<compile_context>
chip_gen: v7x
topology: tpu7x:2x2x1
jax: 0.10.0
libtpu: 0.0.40
codegen_flags: <defaults>
</compile_context>

<pallas_src>
import functools
import math

import jax
import jax.numpy as jnp
import numpy as np
from jax.experimental import pallas as pl
from jax.experimental.pallas import tpu as pltpu

HIDDEN = 128
L_XYZ = 10
L_DIR = 4
DIM_XYZ = 3 * (2 * L_XYZ + 1)          # 63 real xyz-encoding features
DIM_DIR = 3 * (2 * L_DIR + 1)          # 27 real dir-encoding features

ENC_ROWS = 96                          # merged encoding rows
N_ID = 8                               # rows 0..7: x,y,z,dx,dy,dz,0,0
XYZ_SIN0 = N_ID                        # xyz sin/cos rows 8..67
DIR_SIN0 = N_ID + 6 * L_XYZ            # dir sin/cos rows 68..91
W1CD_ROWS = 136                        # fc1 (128) + fc_color dir part (3) + pad (5)
FD_ROWS = 136                          # fc_feature (128) + fc_density (1) + pad (7)
HEAD_PAD = 8                           # output rows: rgb(3) + sigma(1) + pad(4)

# f32 bias/phase slab row offsets (all multiples of 8 -> sublane-aligned views)
_B1, _B2, _B3, _BFD, _BC, _PH, _BSLAB = 0, 136, 264, 392, 528, 536, 624


# --------------------- merged positional-encoding tables --------------------
def _build_pe_tables():
    """Merged feature-major PE tables.

    F     : (96, 8) f32; F @ [x;y;z;dx;dy;dz;0;0] gives freq*coord per row.
    phase : (88, 1) f32; phase for rows 8..95 (0 = sin row, pi/2 = cos row).

    Row layout (identity rows form one aligned 8-row group at the top):
      0..7   : x, y, z, dx, dy, dz, 0, 0
      8..67  : xyz [sin(2^k v) x,y,z ; cos(2^k v) x,y,z], k = 0..9
      68..91 : dir  same pattern, k = 0..3
      92..95 : zero pad
    """
    F = np.zeros((ENC_ROWS, 8), np.float32)
    phase = np.zeros((ENC_ROWS - N_ID, 1), np.float32)
    for c in range(6):
        F[c, c] = 1.0

    def fill(row0, num_freqs, coord_off):
        r = row0
        for k in range(num_freqs):
            f = float(2.0 ** k)
            for ph in (0.0, math.pi / 2.0):          # sin rows, then cos rows
                for c in range(3):
                    F[r, coord_off + c] = f
                    phase[r - N_ID, 0] = ph
                    r += 1
        return r

    assert fill(XYZ_SIN0, L_XYZ, 0) == DIR_SIN0
    assert fill(DIR_SIN0, L_DIR, 3) == DIR_SIN0 + 6 * L_DIR
    return F, phase


_F_NP, _PHASE_NP = _build_pe_tables()


# ----------------------------- Pallas kernel --------------------------------
def _fastnerf_kernel(xd_ref, f_ref, b_ref, w1_ref, w2_ref, w3_ref,
                     wfd_ref, wch_ref, out_ref):
    f32, bf16 = jnp.float32, jnp.bfloat16

    xd = xd_ref[...]                                            # (8, tm) f32

    # --- fused positional encoding: one K=8 MXU stream for xyz + dirs ------
    # Kept in f32: the sin argument needs full precision at high frequencies.
    t = jnp.dot(f_ref[...], xd, preferred_element_type=f32)     # (96, tm)
    phase = b_ref[_PH:_BSLAB, :]                                # (88, 1)
    enc = jnp.concatenate(
        [t[0:N_ID, :],                                          # identity rows
         jnp.sin(t[N_ID:, :] + phase)],                         # sin/cos rows
        axis=0).astype(bf16)                                    # (96, tm) bf16

    # --- fc1 fused with the dir part of fc_color (block-diagonal weight) ---
    pre1 = (jnp.dot(w1_ref[...], enc, preferred_element_type=f32)
            + b_ref[_B1:_B2, :])                                # (136, tm) f32
    h = jnp.maximum(pre1[0:HIDDEN, :], 0.0).astype(bf16)        # relu(fc1(..))
    dir_logit = pre1[HIDDEN:W1CD_ROWS, :]                       # NO relu here

    h = jnp.maximum(jnp.dot(w2_ref[...], h, preferred_element_type=f32)
                    + b_ref[_B2:_B3, :], 0.0).astype(bf16)      # (128, tm)
    h = jnp.maximum(jnp.dot(w3_ref[...], h, preferred_element_type=f32)
                    + b_ref[_B3:_BFD, :], 0.0).astype(bf16)     # (128, tm)

    # --- fused fc_feature (rows 0..127) + fc_density (row 128) head --------
    fd = jnp.maximum(jnp.dot(wfd_ref[...], h, preferred_element_type=f32)
                     + b_ref[_BFD:_BC, :], 0.0)                 # (136, tm) f32
    h_feat = fd[0:HIDDEN, :].astype(bf16)

    # --- color head: Wc_h @ h_feat + (Wc_d @ dir_enc) + bc ------------------
    logits = (jnp.dot(wch_ref[...], h_feat, preferred_element_type=f32)
              + dir_logit + b_ref[_BC:_PH, :])                  # (8, tm) f32
    out_ref[...] = jax.nn.sigmoid(logits).astype(out_ref.dtype)
    out_ref[3:4, :] = fd[HIDDEN:HIDDEN + 1, :].astype(out_ref.dtype)  # sigma


# ----------------------------- parameter packing ----------------------------
def init_params(key):
    """Synthetic parameters, same shapes/layout as the torch module
    (nn.Linear: weight (out, in), bias (out,))."""
    ks = jax.random.split(key, 6)

    def lin(k, fan_in, fan_out):
        bound = 1.0 / math.sqrt(fan_in)
        kw, kb = jax.random.split(k)
        w = jax.random.uniform(kw, (fan_out, fan_in), jnp.float32, -bound, bound)
        b = jax.random.uniform(kb, (fan_out,), jnp.float32, -bound, bound)
        return w, b

    p = {}
    p["w1"], p["b1"] = lin(ks[0], DIM_XYZ, HIDDEN)
    p["w2"], p["b2"] = lin(ks[1], HIDDEN, HIDDEN)
    p["w3"], p["b3"] = lin(ks[2], HIDDEN, HIDDEN)
    p["wd"], p["bd"] = lin(ks[3], HIDDEN, 1)
    p["wf"], p["bf"] = lin(ks[4], HIDDEN, HIDDEN)
    p["wc"], p["bc"] = lin(ks[5], HIDDEN + DIM_DIR, 3)
    return p


def _pack_consts(p):
    """Pad / fuse torch-layout params into the kernel's constant operands."""
    bf16, f32 = jnp.bfloat16, jnp.float32

    # Block-diagonal fc1 | fc_color-dir weight over the merged 96-row encoding.
    w1cd = jnp.zeros((W1CD_ROWS, ENC_ROWS), f32)
    w1cd = w1cd.at[0:HIDDEN, 0:3].set(p["w1"][:, 0:3])                # id xyz
    w1cd = w1cd.at[0:HIDDEN, XYZ_SIN0:DIR_SIN0].set(p["w1"][:, 3:DIM_XYZ])
    w1cd = w1cd.at[HIDDEN:HIDDEN + 3, 3:6].set(p["wc"][:, HIDDEN:HIDDEN + 3])
    w1cd = w1cd.at[HIDDEN:HIDDEN + 3, DIR_SIN0:DIR_SIN0 + 24].set(
        p["wc"][:, HIDDEN + 3:HIDDEN + DIM_DIR])

    # fc_feature (rows 0..127) + fc_density (row 128) fused head.
    wfd = jnp.zeros((FD_ROWS, HIDDEN), f32)
    wfd = wfd.at[0:HIDDEN].set(p["wf"]).at[HIDDEN:HIDDEN + 1].set(p["wd"])

    # fc_color h_feat part, padded to 8 output rows.
    wch = jnp.zeros((HEAD_PAD, HIDDEN), f32).at[0:3].set(p["wc"][:, 0:HIDDEN])

    # Single f32 bias + phase slab (all row offsets multiples of 8).
    bslab = jnp.zeros((_BSLAB, 1), f32)
    bslab = bslab.at[_B1:_B1 + HIDDEN, 0].set(p["b1"])
    bslab = bslab.at[_B2:_B2 + HIDDEN, 0].set(p["b2"])
    bslab = bslab.at[_B3:_B3 + HIDDEN, 0].set(p["b3"])
    bslab = bslab.at[_BFD:_BFD + HIDDEN, 0].set(p["bf"])
    bslab = bslab.at[_BFD + HIDDEN, 0].set(p["bd"][0])
    bslab = bslab.at[_BC:_BC + 3, 0].set(p["bc"])
    bslab = bslab.at[_PH:_BSLAB, 0].set(jnp.asarray(_PHASE_NP[:, 0]))

    return [jnp.asarray(_F_NP), bslab, w1cd.astype(bf16),
            p["w2"].astype(bf16), p["w3"].astype(bf16),
            wfd.astype(bf16), wch.astype(bf16)]


# ----------------------------- wrapper ---------------------------------------
@functools.partial(jax.jit, static_argnames=("tm",))
def fastnerf_forward(x, view_dirs, params, tm=4096):
    """x: (N, 3), view_dirs: (N, 3) -> (rgb (N, 3), sigma (N,)).

    tm = points per tile along the lane axis (multiple of 128). Sweep
    2048-8192 for large N; it is clamped so the grid has >= 2 tiles whenever
    possible (keeps both v7x TensorCores busy and avoids padded dead work).
    """
    assert tm % 128 == 0, "tm must be a multiple of 128 (lane width)"
    N = x.shape[0]
    half = (((N + 1) // 2) + 127) // 128 * 128
    tm = max(128, min(tm, half))
    n_pad = pl.cdiv(N, tm) * tm

    # Points along lanes: rows 0..2 = xyz, rows 3..5 = dirs, rows 6..7 = pad.
    # Single fused transpose/concat/pad pass (no zeros + scatter writes).
    xd = jnp.pad(jnp.concatenate([x.T, view_dirs.T], axis=0),
                 ((0, 2), (0, n_pad - N)))

    consts = _pack_consts(params)

    tile = pl.BlockSpec((8, tm), lambda i: (0, i))
    const_specs = [pl.BlockSpec(c.shape, lambda i: (0, 0)) for c in consts]

    out = pl.pallas_call(
        _fastnerf_kernel,
        out_shape=jax.ShapeDtypeStruct((8, n_pad), jnp.float32),
        grid_spec=pltpu.PrefetchScalarGridSpec(
            num_scalar_prefetch=0,
            grid=(n_pad // tm,),
            in_specs=[tile] + const_specs,
            out_specs=tile,
        ),
        compiler_params=pltpu.CompilerParams(
            dimension_semantics=("parallel",),
            # Peak live VMEM ~2 KB/point: 32 MiB covers tm up to 8192 and is
            # safe on v5e (16 MiB default scoped) and v7x (64 MiB physical).
            vmem_limit_bytes=32 * 1024 * 1024),
    )(xd, *consts)

    rgb = out[0:3, :N].T          # (N, 3)
    sigma = out[3, :N]            # (N,)
    return rgb, sigma


# ----------------------------- reference ------------------------------------
def positional_encoding(v, num_freqs, include_input=True):
    outs = [v] if include_input else []
    for k in range(num_freqs):
        f = 2.0 ** k
        outs.append(jnp.sin(v * f))
        outs.append(jnp.cos(v * f))
    return jnp.concatenate(outs, axis=-1)


def fastnerf_reference(x, view_dirs, p):
    x_enc = positional_encoding(x, L_XYZ)
    d_enc = positional_encoding(view_dirs, L_DIR)
    relu = lambda v: jnp.maximum(v, 0.0)
    h = relu(x_enc @ p["w1"].T + p["b1"])
    h = relu(h @ p["w2"].T + p["b2"])
    h = relu(h @ p["w3"].T + p["b3"])
    sigma = relu(h @ p["wd"].T + p["bd"])
    h_feat = relu(h @ p["wf"].T + p["bf"])
    logits = jnp.concatenate([h_feat, d_enc], axis=-1) @ p["wc"].T + p["bc"]
    rgb = jax.nn.sigmoid(logits)
    return rgb, sigma.squeeze(-1)


if __name__ == "__main__":
    key = jax.random.PRNGKey(0)
    kx, kd, kp = jax.random.split(key, 3)

    N = 1000  # non-multiple of 128: exercises padding and a 2-tile grid
    x = jax.random.normal(kx, (N, 3), jnp.float32)
    view_dirs = jax.random.normal(kd, (N, 3), jnp.float32)
    view_dirs = view_dirs / jnp.linalg.norm(view_dirs, axis=-1, keepdims=True)

    params = init_params(kp)

    rgb, sigma = fastnerf_forward(x, view_dirs, params)
    jax.block_until_ready((rgb, sigma))

    rgb_ref, sigma_ref = fastnerf_reference(x, view_dirs, params)
    assert rgb.shape == (N, 3) and sigma.shape == (N,)
    # bf16 matmul inputs with f32 accumulation -> relaxed tolerance vs f32 ref.
    assert jnp.allclose(rgb, rgb_ref, atol=5e-2, rtol=1e-1), \
        float(jnp.max(jnp.abs(rgb - rgb_ref)))
    assert jnp.allclose(sigma, sigma_ref, atol=5e-2, rtol=1e-1), \
        float(jnp.max(jnp.abs(sigma - sigma_ref)))

    # TODO(synk): view_dirs=None branch (rgb = sigmoid(fc_feature(h))) is not
    # fused; only the standard view-dependent path runs in the kernel.
    print("KERNEL_OK")
</pallas_src>

<mosaic_0001>
module attributes {stable_mosaic.version = 11 : i64} {
  func.func @_fastnerf_kernel(%arg0: i32, %arg1: memref<8x512xf32, #tpu.memory_space<vmem>>, %arg2: memref<96x8xf32, #tpu.memory_space<vmem>>, %arg3: memref<624x1xf32, #tpu.memory_space<vmem>>, %arg4: memref<136x96xbf16, #tpu.memory_space<vmem>>, %arg5: memref<128x128xbf16, #tpu.memory_space<vmem>>, %arg6: memref<128x128xbf16, #tpu.memory_space<vmem>>, %arg7: memref<136x128xbf16, #tpu.memory_space<vmem>>, %arg8: memref<8x128xbf16, #tpu.memory_space<vmem>>, %arg9: memref<8x512xf32, #tpu.memory_space<vmem>>) attributes {dimension_semantics = [#tpu.dimension_semantics<parallel>], iteration_bounds = array<i64: 2>, scalar_prefetch = 0 : i64, scratch_operands = 0 : i64, tpu.core_type = #tpu.core_type<tc>, window_params = [{transform_indices = @transform_0, window_bounds = array<i64: 8, 512>}, {pipeline_mode = #tpu.pipeline_mode<synchronous>, transform_indices = @transform_1, window_bounds = array<i64: 96, 8>}, {pipeline_mode = #tpu.pipeline_mode<synchronous>, transform_indices = @transform_2, window_bounds = array<i64: 624, 1>}, {pipeline_mode = #tpu.pipeline_mode<synchronous>, transform_indices = @transform_3, window_bounds = array<i64: 136, 96>}, {pipeline_mode = #tpu.pipeline_mode<synchronous>, transform_indices = @transform_4, window_bounds = array<i64: 128, 128>}, {pipeline_mode = #tpu.pipeline_mode<synchronous>, transform_indices = @transform_5, window_bounds = array<i64: 128, 128>}, {pipeline_mode = #tpu.pipeline_mode<synchronous>, transform_indices = @transform_6, window_bounds = array<i64: 136, 128>}, {pipeline_mode = #tpu.pipeline_mode<synchronous>, transform_indices = @transform_7, window_bounds = array<i64: 8, 128>}, {transform_indices = @transform_8, window_bounds = array<i64: 8, 512>}]} {
    %c0 = arith.constant 0 : index
    %c0_0 = arith.constant 0 : index
    %0 = vector.load %arg1[%c0, %c0_0] : memref<8x512xf32, #tpu.memory_space<vmem>>, vector<8x512xf32>
    %c0_1 = arith.constant 0 : index
    %c0_2 = arith.constant 0 : index
    %1 = vector.load %arg2[%c0_1, %c0_2] : memref<96x8xf32, #tpu.memory_space<vmem>>, vector<96x8xf32>
    %cst = arith.constant dense<0.000000e+00> : vector<96x512xf32>
    %2 = tpu.matmul %1, %0, %cst {dimension_numbers = #tpu.dot_dimension_numbers<[1], [0], [0], [1], [0, 0, 1, 1], [], []>} : vector<96x8xf32>, vector<8x512xf32>, vector<96x512xf32> -> vector<96x512xf32>
    %c536 = arith.constant 536 : index
    %c0_3 = arith.constant 0 : index
    %3 = vector.load %arg3[%c536, %c0_3] : memref<624x1xf32, #tpu.memory_space<vmem>>, vector<88x1xf32>
    %4 = vector.extract_strided_slice %2 {offsets = [0, 0], sizes = [8, 512], strides = [1, 1]} : vector<96x512xf32> to vector<8x512xf32>
    %5 = vector.extract_strided_slice %2 {offsets = [8, 0], sizes = [88, 512], strides = [1, 1]} : vector<96x512xf32> to vector<88x512xf32>
    %6 = vector.broadcast %3 : vector<88x1xf32> to vector<88x512xf32>
    %7 = arith.addf %5, %6 : vector<88x512xf32>
    %8 = math.sin %7 : vector<88x512xf32>
    %9 = tpu.concatenate %4, %8 in 0 : vector<8x512xf32>, vector<88x512xf32> -> vector<96x512xf32>
    %10 = arith.truncf %9 : vector<96x512xf32> to vector<96x512xbf16>
    %c0_4 = arith.constant 0 : index
    %c0_5 = arith.constant 0 : index
    %11 = vector.load %arg4[%c0_4, %c0_5] : memref<136x96xbf16, #tpu.memory_space<vmem>>, vector<136x96xbf16>
    %cst_6 = arith.constant dense<0.000000e+00> : vector<136x512xf32>
    %12 = tpu.matmul %11, %10, %cst_6 {dimension_numbers = #tpu.dot_dimension_numbers<[1], [0], [0], [1], [0, 0, 1, 1], [], []>} : vector<136x96xbf16>, vector<96x512xbf16>, vector<136x512xf32> -> vector<136x512xf32>
    %c0_7 = arith.constant 0 : index
    %c0_8 = arith.constant 0 : index
    %13 = vector.load %arg3[%c0_7, %c0_8] : memref<624x1xf32, #tpu.memory_space<vmem>>, vector<136x1xf32>
    %14 = vector.broadcast %13 : vector<136x1xf32> to vector<136x512xf32>
    %15 = arith.addf %12, %14 : vector<136x512xf32>
    %16 = vector.extract_strided_slice %15 {offsets = [0, 0], sizes = [128, 512], strides = [1, 1]} : vector<136x512xf32> to vector<128x512xf32>
    %cst_9 = arith.constant 0.000000e+00 : f32
    %17 = vector.broadcast %cst_9 : f32 to vector<128x512xf32>
    %18 = arith.maximumf %16, %17 : vector<128x512xf32>
    %19 = arith.truncf %18 : vector<128x512xf32> to vector<128x512xbf16>
    %20 = vector.extract_strided_slice %15 {offsets = [128, 0], sizes = [8, 512], strides = [1, 1]} : vector<136x512xf32> to vector<8x512xf32>
    %c0_10 = arith.constant 0 : index
    %c0_11 = arith.constant 0 : index
    %21 = vector.load %arg5[%c0_10, %c0_11] : memref<128x128xbf16, #tpu.memory_space<vmem>>, vector<128x128xbf16>
    %cst_12 = arith.constant dense<0.000000e+00> : vector<128x512xf32>
    %22 = tpu.matmul %21, %19, %cst_12 {dimension_numbers = #tpu.dot_dimension_numbers<[1], [0], [0], [1], [0, 0, 1, 1], [], []>} : vector<128x128xbf16>, vector<128x512xbf16>, vector<128x512xf32> -> vector<128x512xf32>
    %c136 = arith.constant 136 : index
    %c0_13 = arith.constant 0 : index
    %23 = vector.load %arg3[%c136, %c0_13] : memref<624x1xf32, #tpu.memory_space<vmem>>, vector<128x1xf32>
    %24 = vector.broadcast %23 : vector<128x1xf32> to vector<128x512xf32>
    %25 = arith.addf %22, %24 : vector<128x512xf32>
    %cst_14 = arith.constant 0.000000e+00 : f32
    %26 = vector.broadcast %cst_14 : f32 to vector<128x512xf32>
    %27 = arith.maximumf %25, %26 : vector<128x512xf32>
    %28 = arith.truncf %27 : vector<128x512xf32> to vector<128x512xbf16>
    %c0_15 = arith.constant 0 : index
    %c0_16 = arith.constant 0 : index
    %29 = vector.load %arg6[%c0_15, %c0_16] : memref<128x128xbf16, #tpu.memory_space<vmem>>, vector<128x128xbf16>
    %cst_17 = arith.constant dense<0.000000e+00> : vector<128x512xf32>
    %30 = tpu.matmul %29, %28, %cst_17 {dimension_numbers = #tpu.dot_dimension_numbers<[1], [0], [0], [1], [0, 0, 1, 1], [], []>} : vector<128x128xbf16>, vector<128x512xbf16>, vector<128x512xf32> -> vector<128x512xf32>
    %c264 = arith.constant 264 : index
    %c0_18 = arith.constant 0 : index
    %31 = vector.load %arg3[%c264, %c0_18] : memref<624x1xf32, #tpu.memory_space<vmem>>, vector<128x1xf32>
    %32 = vector.broadcast %31 : vector<128x1xf32> to vector<128x512xf32>
    %33 = arith.addf %30, %32 : vector<128x512xf32>
    %cst_19 = arith.constant 0.000000e+00 : f32
    %34 = vector.broadcast %cst_19 : f32 to vector<128x512xf32>
    %35 = arith.maximumf %33, %34 : vector<128x512xf32>
    %36 = arith.truncf %35 : vector<128x512xf32> to vector<128x512xbf16>
    %c0_20 = arith.constant 0 : index
    %c0_21 = arith.constant 0 : index
    %37 = vector.load %arg7[%c0_20, %c0_21] : memref<136x128xbf16, #tpu.memory_space<vmem>>, vector<136x128xbf16>
    %cst_22 = arith.constant dense<0.000000e+00> : vector<136x512xf32>
    %38 = tpu.matmul %37, %36, %cst_22 {dimension_numbers = #tpu.dot_dimension_numbers<[1], [0], [0], [1], [0, 0, 1, 1], [], []>} : vector<136x128xbf16>, vector<128x512xbf16>, vector<136x512xf32> -> vector<136x512xf32>
    %c392 = arith.constant 392 : index
    %c0_23 = arith.constant 0 : index
    %39 = vector.load %arg3[%c392, %c0_23] : memref<624x1xf32, #tpu.memory_space<vmem>>, vector<136x1xf32>
    %40 = vector.broadcast %39 : vector<136x1xf32> to vector<136x512xf32>
    %41 = arith.addf %38, %40 : vector<136x512xf32>
    %cst_24 = arith.constant 0.000000e+00 : f32
    %42 = vector.broadcast %cst_24 : f32 to vector<136x512xf32>
    %43 = arith.maximumf %41, %42 : vector<136x512xf32>
    %44 = vector.extract_strided_slice %43 {offsets = [0, 0], sizes = [128, 512], strides = [1, 1]} : vector<136x512xf32> to vector<128x512xf32>
    %45 = arith.truncf %44 : vector<128x512xf32> to vector<128x512xbf16>
    %c0_25 = arith.constant 0 : index
    %c0_26 = arith.constant 0 : index
    %46 = vector.load %arg8[%c0_25, %c0_26] : memref<8x128xbf16, #tpu.memory_space<vmem>>, vector<8x128xbf16>
    %cst_27 = arith.constant dense<0.000000e+00> : vector<8x512xf32>
    %47 = tpu.matmul %46, %45, %cst_27 {dimension_numbers = #tpu.dot_dimension_numbers<[1], [0], [0], [1], [0, 0, 1, 1], [], []>} : vector<8x128xbf16>, vector<128x512xbf16>, vector<8x512xf32> -> vector<8x512xf32>
    %48 = arith.addf %47, %20 : vector<8x512xf32>
    %c528 = arith.constant 528 : index
    %c0_28 = arith.constant 0 : index
    %49 = vector.load %arg3[%c528, %c0_28] : memref<624x1xf32, #tpu.memory_space<vmem>>, vector<8x1xf32>
    %50 = vector.broadcast %49 : vector<8x1xf32> to vector<8x512xf32>
    %51 = arith.addf %48, %50 : vector<8x512xf32>
    %52 = arith.negf %51 : vector<8x512xf32>
    %53 = math.exp %52 : vector<8x512xf32>
    %cst_29 = arith.constant 1.000000e+00 : f32
    %54 = vector.broadcast %cst_29 : f32 to vector<8x512xf32>
    %55 = arith.addf %54, %53 : vector<8x512xf32>
    %56 = arith.divf %54, %55 : vector<8x512xf32>
    %c0_30 = arith.constant 0 : index
    %c0_31 = arith.constant 0 : index
    %57 = vector.load %arg9[%c0_30, %c0_31] : memref<8x512xf32, #tpu.memory_space<vmem>>, vector<8x512xf32>
    tpu.vector_store %arg9[%c0_30, %c0_31], %56 {strides = array<i32>} : memref<8x512xf32, #tpu.memory_space<vmem>>, vector<8x512xf32>,
    %58 = vector.extract_strided_slice %43 {offsets = [128, 0], sizes = [1, 512], strides = [1, 1]} : vector<136x512xf32> to vector<1x512xf32>
    %c3 = arith.constant 3 : index
    %c0_32 = arith.constant 0 : index
    %59 = vector.load %arg9[%c3, %c0_32] : memref<8x512xf32, #tpu.memory_space<vmem>>, vector<1x512xf32>
    tpu.vector_store %arg9[%c3, %c0_32], %58 {strides = array<i32>} : memref<8x512xf32, #tpu.memory_space<vmem>>, vector<1x512xf32>,
    return
  }
  func.func @transform_0(%arg0: i32) -> (i32, i32) {
    %c0_i32 = arith.constant 0 : i32
    %c0_i32_0 = arith.constant 0 : i32
    return %c0_i32, %arg0 : i32, i32
  }
  func.func @transform_1(%arg0: i32) -> (i32, i32) {
    %c0_i32 = arith.constant 0 : i32
    %c0_i32_0 = arith.constant 0 : i32
    %c0_i32_1 = arith.constant 0 : i32
    return %c0_i32, %c0_i32_0 : i32, i32
  }
  func.func @transform_2(%arg0: i32) -> (i32, i32) {
    %c0_i32 = arith.constant 0 : i32
    %c0_i32_0 = arith.constant 0 : i32
    %c0_i32_1 = arith.constant 0 : i32
    return %c0_i32, %c0_i32_0 : i32, i32
  }
  func.func @transform_3(%arg0: i32) -> (i32, i32) {
    %c0_i32 = arith.constant 0 : i32
    %c0_i32_0 = arith.constant 0 : i32
    %c0_i32_1 = arith.constant 0 : i32
    return %c0_i32, %c0_i32_0 : i32, i32
  }
  func.func @transform_4(%arg0: i32) -> (i32, i32) {
    %c0_i32 = arith.constant 0 : i32
    %c0_i32_0 = arith.constant 0 : i32
    %c0_i32_1 = arith.constant 0 : i32
    return %c0_i32, %c0_i32_0 : i32, i32
  }
  func.func @transform_5(%arg0: i32) -> (i32, i32) {
    %c0_i32 = arith.constant 0 : i32
    %c0_i32_0 = arith.constant 0 : i32
    %c0_i32_1 = arith.constant 0 : i32
    return %c0_i32, %c0_i32_0 : i32, i32
  }
  func.func @transform_6(%arg0: i32) -> (i32, i32) {
    %c0_i32 = arith.constant 0 : i32
    %c0_i32_0 = arith.constant 0 : i32
    %c0_i32_1 = arith.constant 0 : i32
    return %c0_i32, %c0_i32_0 : i32, i32
  }
  func.func @transform_7(%arg0: i32) -> (i32, i32) {
    %c0_i32 = arith.constant 0 : i32
    %c0_i32_0 = arith.constant 0 : i32
    %c0_i32_1 = arith.constant 0 : i32
    return %c0_i32, %c0_i32_0 : i32, i32
  }
  func.func @transform_8(%arg0: i32) -> (i32, i32) {
    %c0_i32 = arith.constant 0 : i32
    %c0_i32_0 = arith.constant 0 : i32
    return %c0_i32, %arg0 : i32, i32
  }
}

</mosaic_0001>

<bundles_post_ra>
// kernel: fastnerf_forward.1
= control target key start
LH: loop header
LB: loop body
LE: loop exit
PB: predicated region body
PF: predicated region fallthrough
CT: control target
= control target key end

     0   :  { %s8316_s27 = smov 0   ;;  %s13509_s0 = inlined_call_operand.vmem [shape: f32[8,1024], index: 0, kind: input, shape index: {}]   ;;  %s13510_s1 = inlined_call_operand.vmem [shape: f32[96,8], index: 1, kind: input, shape index: {}]   ;;  %s13511_s2 = inlined_call_operand.vmem [shape: f32[624,1], index: 2, kind: input, shape index: {}]   ;;  %s13512_s3 = inlined_call_operand.vmem [shape: bf16[136,96], index: 3, kind: input, shape index: {}]   ;;  %s13513_s4 = inlined_call_operand.vmem [shape: bf16[128,128], index: 4, kind: input, shape index: {}]   ;;  %s13514_s5 = inlined_call_operand.vmem [shape: bf16[128,128], index: 5, kind: input, shape index: {}]   ;;  %s13515_s6 = inlined_call_operand.vmem [shape: bf16[136,128], index: 6, kind: input, shape index: {}]   ;;  %s13516_s7 = inlined_call_operand.vmem [shape: bf16[8,128], index: 7, kind: input, shape index: {}]   ;;  %s13517_s8 = inlined_call_operand.vmem [shape: f32[8,1024], index: 8, kind: output, shape index: {}]  }
   0x1 LB: > { %s7565_s28 = sadd.s32 4294967295, %s8260_s27   ;;  %p7569_p0 = scmp.ge.s32.totalorder %s8260_s27, 1  ;;  %s8260_s27 = sphi %s8316_s27, %s18_s27  }
   0x2   : > { %p263_p1 = scmp.lt.s32.totalorder %s8260_s27, 3 }
   0x4   : > { %p264_p2 = pnand %p7569_p0, %p263_p1 }
   0x6   : > { %267 = sbr.rel (%p264_p2) target bundleno = 2747 (0xabb), region = 52 }
   0xd   : > { %v639_v0 = vld [vmem:[%s13511_s2 + $0x228] sm:$0xff]  ;;  %v637_v1 = vld [vmem:[%s13511_s2 + $0x218] sm:$0xff]  ;;  %s7570_s11 = sshll.u32 %s7565_s28, 2  ;;  %v13518_v2 = vmov 0   ;;  %v640_v3 = vld [vmem:[%s13511_s2 + $0x230] sm:$0xff]  ;;  %v8263_v5 = vmov 0.0  }
   0xe   : > { %8027 = vset.pattern.permute.xlu1 %v13518_v2  ;;  %8026 = vset.pattern.permute.xlu0 %v13518_v2  ;;  %p298_p3 = scmp.lt.s32.totalorder %s7570_s11, 7  ;;  %v638_v4 = vld [vmem:[%s13511_s2 + $0x220] sm:$0xff]  ;;  %v641_v7 = vld [vmem:[%s13511_s2 + $0x238] sm:$0xff]  ;;  %vm326_vm0 = vcmask 64512   ;;  %v644_v13 = vld [vmem:[%s13511_s2 + $0x250] sm:$0xff] }
   0xf   : > { %660 = vperm.xlu1 %8027, %v639_v0   ;;  %650 = vperm.xlu0 %8026, %v637_v1   ;;  %v642_v6 = vld [vmem:[%s13511_s2 + $0x240] sm:$0xff]  ;;  %v643_v14 = vld [vmem:[%s13511_s2 + $0x248] sm:$0xff]  ;;  %v645_v17 = vld [vmem:[%s13511_s2 + $0x258] sm:$0xff] }
  0x10   : > { %s14358_s11 = smov (!%p298_p3, %s7570_s11), 7  ;;  %427 = vmatprep.mubr.f32.mxu0 %v8263_v5  ;;  %564 = vmatprep.mubr.f32.mxu1 %v8263_v5  ;;  %v314_v12 = vld [vmem:[%s13510_s1] sm:$0xff]  ;;  %v315_v15 = vld [vmem:[%s13510_s1 + $0x8] sm:$0xff]  ;;  %v316_v18 = vld [vmem:[%s13510_s1 + $0x10] sm:$0xff] }
  0x11   : > { %s7571_s16 = sshll.u32 %s14358_s11, 3  ;;  %v646_v16 = vld [vmem:[%s13511_s2 + $0x260] sm:$0xff]  ;;  %v647_v20 = vld [vmem:[%s13511_s2 + $0x268] sm:$0xff]  ;;  %v317_v21 = vld [vmem:[%s13510_s1 + $0x18] sm:$0xff] }
  0x12   : > { %s301_s19 = scalar_lea.vmem %s13509_s0, %s7571_s16  ;;  %v5364_v19 = vld [vmem:[%s13511_s2] sm:$0xff]  ;;  %v5366_v22 = vld [vmem:[%s13511_s2 + $0x10] sm:$0xff]  ;;  %v5365_v23 = vld [vmem:[%s13511_s2 + $0x8] sm:$0xff]  ;;  %s307_s17 = scalar_lea.vmem %s13517_s8, %s7571_s16 }
  0x13   : > { %665 = vperm.xlu1 %8027, %v640_v3   ;;  %655 = vperm.xlu0 %8026, %v638_v4   ;;  %v311_v8 = vld [vmem:[%s301_s19 + $0x8] sm:$0xff]  ;;  %v313_v9 = vld [vmem:[%s301_s19 + $0x18] sm:$0xff]  ;;  %v310_v10 = vld [vmem:[%s301_s19] sm:$0xff] }
  0x14   : > { %363 = vmatprep.subr.mxu0 %v311_v8  ;;  %500 = vmatprep.subr.mxu1 %v313_v9  ;;  %v312_v11 = vld [vmem:[%s301_s19 + $0x10] sm:$0xff]  ;;  %v318_v24 = vld [vmem:[%s13510_s1 + $0x20] sm:$0xff]  ;;  %v5367_v26 = vld [vmem:[%s13511_s2 + $0x18] sm:$0xff] }
  0x15   : > { %364 = vmatpush1.msra.mxu0 %v310_v10  ;;  %501 = vmatpush1.msra.mxu1 %v312_v11  ;;  %v5368_v25 = vld [vmem:[%s13511_s2 + $0x20] sm:$0xff]  ;;  %v319_v27 = vld [vmem:[%s13510_s1 + $0x28] sm:$0xff]  ;;  %v5370_v28 = vld [vmem:[%s13511_s2 + $0x30] sm:$0xff] }
  0x16   : > { %7574 = vmatmul.mubr.msk.f32.vlgmr.msra.gmra.mrb[0].mxu0 %vm326_vm0, %v314_v12  ;;  %7586 = vmatmul.mubr.msk.f32.vlgmr.msra.gmra.mrb[0].mxu1 %vm326_vm0, %v314_v12  ;;  %v5369_v29 = vld [vmem:[%s13511_s2 + $0x28] sm:$0xff]  ;;  %v320_v30 = vld [vmem:[%s13510_s1 + $0x30] sm:$0xff]  ;;  %v5372_v31 = vld [vmem:[%s13511_s2 + $0x40] sm:$0xff] }
  0x17   : > { %675 = vperm.xlu1 %8027, %v642_v6   ;;  %670 = vperm.xlu0 %8026, %v641_v7   ;;  %v5371_v32 = vld [vmem:[%s13511_s2 + $0x38] sm:$0xff]  ;;  %v5374_v34 = vld [vmem:[%s13511_s2 + $0x50] sm:$0xff]  ;;  %v5373_v35 = vld [vmem:[%s13511_s2 + $0x48] sm:$0xff] }
  0x18   : > { %433 = vmatprep.mubr.f32.mxu0 %v8263_v5  ;;  %570 = vmatprep.mubr.f32.mxu1 %v8263_v5  ;;  %v321_v33 = vld [vmem:[%s13510_s1 + $0x38] sm:$0xff]  ;;  %v322_v36 = vld [vmem:[%s13510_s1 + $0x40] sm:$0xff]  ;;  %v323_v39 = vld [vmem:[%s13510_s1 + $0x48] sm:$0xff] }
  0x19   : > { %v5376_v37 = vld [vmem:[%s13511_s2 + $0x60] sm:$0xff]  ;;  %v5375_v38 = vld [vmem:[%s13511_s2 + $0x58] sm:$0xff]  ;;  %v5378_v40 = vld [vmem:[%s13511_s2 + $0x70] sm:$0xff] }
  0x1a   : > { %7575 = vmatmul.mubr.msk.f32.gmra.mrb[2].mxu0 %vm326_vm0, %v315_v15  ;;  %7587 = vmatmul.mubr.msk.f32.gmra.mrb[2].mxu1 %vm326_vm0, %v315_v15  ;;  %v5377_v41 = vld [vmem:[%s13511_s2 + $0x68] sm:$0xff]  ;;  %v324_v42 = vld [vmem:[%s13510_s1 + $0x50] sm:$0xff]  ;;  %v5379_v44 = vld [vmem:[%s13511_s2 + $0x78] sm:$0xff] }
  0x1b   : > { %685 = vperm.xlu1 %8027, %v644_v13   ;;  %680 = vperm.xlu0 %8026, %v643_v14   ;;  %v5891_v43 = vld [vmem:[%s13511_s2 + $0x88] sm:$0xff]  ;;  %v325_v45 = vld [vmem:[%s13510_s1 + $0x58] sm:$0xff]  ;;  %v5892_v47 = vld [vmem:[%s13511_s2 + $0x90] sm:$0xff] }
  0x1c   : > { %439 = vmatprep.mubr.f32.mxu0 %v8263_v5  ;;  %576 = vmatprep.mubr.f32.mxu1 %v8263_v5  ;;  %v5893_v46 = vld [vmem:[%s13511_s2 + $0x98] sm:$0xff]  ;;  %v5895_v48 = vld [vmem:[%s13511_s2 + $0xa8] sm:$0xff]  ;;  %v5894_v49 = vld [vmem:[%s13511_s2 + $0xa0] sm:$0xff] }
  0x1d   : > { %v5897_v50 = vld [vmem:[%s13511_s2 + $0xb8] sm:$0xff]  ;;  %v5896_v51 = vld [vmem:[%s13511_s2 + $0xb0] sm:$0xff]  ;;  %v5899_v52 = vld [vmem:[%s13511_s2 + $0xc8] sm:$0xff] }
  0x1e   : > { %7576 = vmatmul.mubr.msk.f32.gmra.mrb[4].mxu0 %vm326_vm0, %v316_v18  ;;  %7588 = vmatmul.mubr.msk.f32.gmra.mrb[4].mxu1 %vm326_vm0, %v316_v18  ;;  %v5898_v53 = vld [vmem:[%s13511_s2 + $0xc0] sm:$0xff]  ;;  %v5901_v54 = vld [vmem:[%s13511_s2 + $0xd8] sm:$0xff]  ;;  %v5900_v55 = vld [vmem:[%s13511_s2 + $0xd0] sm:$0xff] }
  0x1f   : > { %695 = vperm.xlu1 %8027, %v646_v16   ;;  %690 = vperm.xlu0 %8026, %v645_v17   ;;  %v5903_v56 = vld [vmem:[%s13511_s2 + $0xe8] sm:$0xff]  ;;  %v5902_v57 = vld [vmem:[%s13511_s2 + $0xe0] sm:$0xff]  ;;  %v5905_v58 = vld [vmem:[%s13511_s2 + $0xf8] sm:$0xff] }
  0x20   : > { %445 = vmatprep.mubr.f32.mxu0 %v8263_v5  ;;  %582 = vmatprep.mubr.f32.mxu1 %v8263_v5  ;;  %v5904_v59 = vld [vmem:[%s13511_s2 + $0xf0] sm:$0xff]  ;;  %v6373_v60 = vld [vmem:[%s13511_s2 + $0x108] sm:$0xff]  ;;  %v5906_v61 = vld [vmem:[%s13511_s2 + $0x100] sm:$0xff] }
  0x21   : > { %v6375_v62 = vld [vmem:[%s13511_s2 + $0x118] sm:$0xff]  ;;  %v6374_v63 = vld [vmem:[%s13511_s2 + $0x110] sm:$0xff]  ;;  %v6377_v0 = vld [vmem:[%s13511_s2 + $0x128] sm:$0xff] }
  0x22   : > { %7577 = vmatmul.mubr.msk.f32.gmra.mrb[6].mxu0 %vm326_vm0, %v317_v21  ;;  %7589 = vmatmul.mubr.msk.f32.gmra.mrb[6].mxu1 %vm326_vm0, %v317_v21  ;;  %v6376_v1 = vld [vmem:[%s13511_s2 + $0x120] sm:$0xff]  ;;  %v6379_v3 = vld [vmem:[%s13511_s2 + $0x138] sm:$0xff]  ;;  %v6378_v4 = vld [vmem:[%s13511_s2 + $0x130] sm:$0xff] }
  0x23   : > { %5383 = vperm.xlu1 %8027, %v5364_v19   ;;  %700 = vperm.xlu0 %8026, %v647_v20   ;;  %v6380_v6 = vld [vmem:[%s13511_s2 + $0x140] sm:$0xff]  ;;  %v6383_v7 = vld [vmem:[%s13511_s2 + $0x158] sm:$0xff]  ;;  %v6382_v8 = vld [vmem:[%s13511_s2 + $0x150] sm:$0xff] }
  0x24   : > { %451 = vmatprep.mubr.f32.mxu0 %v8263_v5  ;;  %588 = vmatprep.mubr.f32.mxu1 %v8263_v5  ;;  %v6385_v9 = vld [vmem:[%s13511_s2 + $0x168] sm:$0xff]  ;;  %v6384_v10 = vld [vmem:[%s13511_s2 + $0x160] sm:$0xff]  ;;  %v6387_v11 = vld [vmem:[%s13511_s2 + $0x178] sm:$0xff] }
  0x25   : > { %v6386_v12 = vld [vmem:[%s13511_s2 + $0x170] sm:$0xff]  ;;  %v6856_v13 = vld [vmem:[%s13511_s2 + $0x188] sm:$0xff]  ;;  %v6388_v14 = vld [vmem:[%s13511_s2 + $0x180] sm:$0xff] }
  0x26   : > { %7578 = vmatmul.mubr.msk.f32.gmra.mrb[8].mxu0 %vm326_vm0, %v318_v24  ;;  %7590 = vmatmul.mubr.msk.f32.gmra.mrb[8].mxu1 %vm326_vm0, %v318_v24  ;;  %v6858_v15 = vld [vmem:[%s13511_s2 + $0x198] sm:$0xff]  ;;  %v6857_v16 = vld [vmem:[%s13511_s2 + $0x190] sm:$0xff]  ;;  %v6860_v17 = vld [vmem:[%s13511_s2 + $0x1a8] sm:$0xff] }
  0x27   : > { %5393 = vperm.xlu1 %8027, %v5366_v22   ;;  %5388 = vperm.xlu0 %8026, %v5365_v23   ;;  %v6859_v18 = vld [vmem:[%s13511_s2 + $0x1a0] sm:$0xff]  ;;  %v6862_v19 = vld [vmem:[%s13511_s2 + $0x1b8] sm:$0xff]  ;;  %v6861_v20 = vld [vmem:[%s13511_s2 + $0x1b0] sm:$0xff] }
  0x28   : > { %457 = vmatprep.mubr.f32.mxu0 %v8263_v5  ;;  %594 = vmatprep.mubr.f32.mxu1 %v8263_v5  ;;  %v6864_v21 = vld [vmem:[%s13511_s2 + $0x1c8] sm:$0xff]  ;;  %v6863_v22 = vld [vmem:[%s13511_s2 + $0x1c0] sm:$0xff]  ;;  %v6866_v23 = vld [vmem:[%s13511_s2 + $0x1d8] sm:$0xff] }
  0x29   : > { %v6865_v24 = vld [vmem:[%s13511_s2 + $0x1d0] sm:$0xff] }
  0x2a   : > { %7579 = vmatmul.mubr.msk.f32.gmra.mrb[10].mxu0 %vm326_vm0, %v319_v27  ;;  %7591 = vmatmul.mubr.msk.f32.gmra.mrb[10].mxu1 %vm326_vm0, %v319_v27  ;;  %v6870_v27 = vld [vmem:[%s13511_s2 + $0x1f8] sm:$0xff] }
  0x2b   : > { %5403 = vperm.xlu1 %8027, %v5368_v25   ;;  %5398 = vperm.xlu0 %8026, %v5367_v26   ;;  %v6868_v25 = vld [vmem:[%s13511_s2 + $0x1e8] sm:$0xff]  ;;  %v6867_v26 = vld [vmem:[%s13511_s2 + $0x1e0] sm:$0xff] }
  0x2c   : > { %463 = vmatprep.mubr.f32.mxu0 %v8263_v5  ;;  %600 = vmatprep.mubr.f32.mxu1 %v8263_v5 }
  0x2e   : > { %7580 = vmatmul.mubr.msk.f32.gmra.mrb[12].mxu0 %vm326_vm0, %v320_v30  ;;  %7592 = vmatmul.mubr.msk.f32.gmra.mrb[12].mxu1 %vm326_vm0, %v320_v30  ;;  %v6871_v30 = vld [vmem:[%s13511_s2 + $0x200] sm:$0xff] }
  0x2f   : > { %5413 = vperm.xlu1 %8027, %v5370_v28   ;;  %5408 = vperm.xlu0 %8026, %v5369_v29   ;;  %v6869_v28 = vld [vmem:[%s13511_s2 + $0x1f0] sm:$0xff]  ;;  %v5380_v29 = vld [vmem:[%s13511_s2 + $0x80] sm:$0xff] }
  0x30   : > { %469 = vmatprep.mubr.f32.mxu0 %v8263_v5  ;;  %606 = vmatprep.mubr.f32.mxu1 %v8263_v5 }
  0x32   : > { %7581 = vmatmul.mubr.msk.f32.gmra.mrb[14].mxu0 %vm326_vm0, %v321_v33  ;;  %7593 = vmatmul.mubr.msk.f32.gmra.mrb[14].mxu1 %vm326_vm0, %v321_v33 }
  0x33   : > { %5423 = vperm.xlu1 %8027, %v5372_v31   ;;  %5418 = vperm.xlu0 %8026, %v5371_v32   ;;  %v6872_v31 = vld [vmem:[%s13511_s2 + $0x208] sm:$0xff]  ;;  %v7435_v32 = vld [vmem:[%s13511_s2 + $0x210] sm:$0xff] }
  0x34   : > { %475 = vmatprep.mubr.f32.mxu0 %v8263_v5  ;;  %612 = vmatprep.mubr.f32.mxu1 %v8263_v5 }
  0x36   : > { %7582 = vmatmul.mubr.msk.f32.gmra.mrb[16].mxu0 %vm326_vm0, %v322_v36  ;;  %7594 = vmatmul.mubr.msk.f32.gmra.mrb[16].mxu1 %vm326_vm0, %v322_v36 }
  0x37   : > { %5433 = vperm.xlu1 %8027, %v5374_v34   ;;  %5428 = vperm.xlu0 %8026, %v5373_v35  }
  0x38   : > { %481 = vmatprep.mubr.f32.mxu0 %v8263_v5  ;;  %618 = vmatprep.mubr.f32.mxu1 %v8263_v5 }
  0x3a   : > { %7583 = vmatmul.mubr.msk.f32.gmra.mrb[18].mxu0 %vm326_vm0, %v323_v39  ;;  %7595 = vmatmul.mubr.msk.f32.gmra.mrb[18].mxu1 %vm326_vm0, %v323_v39 }
  0x3b   : > { %5443 = vperm.xlu1 %8027, %v5376_v37   ;;  %5438 = vperm.xlu0 %8026, %v5375_v38  }
  0x3c   : > { %487 = vmatprep.mubr.f32.mxu0 %v8263_v5  ;;  %624 = vmatprep.mubr.f32.mxu1 %v8263_v5 }
  0x3e   : > { %7584 = vmatmul.mubr.msk.f32.gmra.mrb[20].mxu0 %vm326_vm0, %v324_v42  ;;  %7596 = vmatmul.mubr.msk.f32.gmra.mrb[20].mxu1 %vm326_vm0, %v324_v42 }
  0x3f   : > { %5453 = vperm.xlu1 %8027, %v5378_v40   ;;  %5448 = vperm.xlu0 %8026, %v5377_v41  }
  0x40   : > { %493 = vmatprep.mubr.f32.mxu0 %v8263_v5  ;;  %630 = vmatprep.mubr.f32.mxu1 %v8263_v5  ;;  %v6381_v5 = vld [vmem:[%s13511_s2 + $0x148] sm:$0xff] }
  0x42   : > { %7585 = vmatmul.mubr.msk.f32.gmra.mrb[22].mxu0 %vm326_vm0, %v325_v45  ;;  %7597 = vmatmul.mubr.msk.f32.gmra.mrb[22].mxu1 %vm326_vm0, %v325_v45 }
  0x43   : > { %5909 = vperm.xlu1 %8027, %v5891_v43   ;;  %5458 = vperm.xlu0 %8026, %v5379_v44  }
  0x44   : > { %5569 = vmatprep.mubr.bf16.mxu0 %v13518_v2  ;;  %5690 = vmatprep.mubr.bf16.mxu1 %v13518_v2 }
  0x47   : > { %5919 = vperm.xlu1 %8027, %v5893_v46   ;;  %5914 = vperm.xlu0 %8026, %v5892_v47  }
  0x4b   : > { %5929 = vperm.xlu1 %8027, %v5895_v48   ;;  %5924 = vperm.xlu0 %8026, %v5894_v49  }
  0x4f   : > { %5939 = vperm.xlu1 %8027, %v5897_v50   ;;  %5934 = vperm.xlu0 %8026, %v5896_v51  }
  0x53   : > { %5949 = vperm.xlu1 %8027, %v5899_v52   ;;  %5944 = vperm.xlu0 %8026, %v5898_v53  }
  0x57   : > { %5959 = vperm.xlu1 %8027, %v5901_v54   ;;  %5954 = vperm.xlu0 %8026, %v5900_v55  }
  0x5b   : > { %5969 = vperm.xlu1 %8027, %v5903_v56   ;;  %5964 = vperm.xlu0 %8026, %v5902_v57  }
  0x5f   : > { %5979 = vperm.xlu1 %8027, %v5905_v58   ;;  %5974 = vperm.xlu0 %8026, %v5904_v59  }
  0x63   : > { %6391 = vperm.xlu1 %8027, %v6373_v60   ;;  %5984 = vperm.xlu0 %8026, %v5906_v61  }
  0x67   : > { %6401 = vperm.xlu1 %8027, %v6375_v62   ;;  %6396 = vperm.xlu0 %8026, %v6374_v63  }
  0x6b   : > { %6411 = vperm.xlu1 %8027, %v6377_v0   ;;  %6406 = vperm.xlu0 %8026, %v6376_v1  }
  0x6f   : > { %6421 = vperm.xlu1 %8027, %v6379_v3   ;;  %6416 = vperm.xlu0 %8026, %v6378_v4   ;;  %v13530_v3 = vmov 683565275  }
  0x73   : > { %6431 = vperm.xlu1 %8027, %v6381_v5   ;;  %6426 = vperm.xlu0 %8026, %v6380_v6   ;;  %v13526_v5 = vmov 2475754826  }
  0x77   : > { %6441 = vperm.xlu1 %8027, %v6383_v7   ;;  %6436 = vperm.xlu0 %8026, %v6382_v8  }
  0x7b   : > { %6451 = vperm.xlu1 %8027, %v6385_v9   ;;  %6446 = vperm.xlu0 %8026, %v6384_v10   ;;  %v13524_v9 = vmov 2131351028  }
  0x7f   : > { %6461 = vperm.xlu1 %8027, %v6387_v11   ;;  %6456 = vperm.xlu0 %8026, %v6386_v12   ;;  %v13528_v12 = vmov 2102212464  }
  0x83   : > { %6875 = vperm.xlu1 %8027, %v6856_v13   ;;  %6466 = vperm.xlu0 %8026, %v6388_v14  }
  0x87   : > { %6885 = vperm.xlu1 %8027, %v6858_v15   ;;  %6880 = vperm.xlu0 %8026, %v6857_v16   ;;  %v13546_v16 = vmov 920167782  }
  0x8b   : > { %6895 = vperm.xlu1 %8027, %v6860_v17   ;;  %6890 = vperm.xlu0 %8026, %v6859_v18  }
  0x8e   : > { %v8662_v37 = vpop.permute.xlu0 %650 }
  0x8f   : > { %6905 = vperm.xlu1 %8027, %v6862_v19   ;;  %6900 = vperm.xlu0 %8026, %v6861_v20   ;;  %v13532_v19 = vmov 1326507024  }
  0x93   : > { %6915 = vperm.xlu1 %8027, %v6864_v21   ;;  %6910 = vperm.xlu0 %8026, %v6863_v22  }
  0x97   : > { %6925 = vperm.xlu1 %8027, %v6866_v23   ;;  %6920 = vperm.xlu0 %8026, %v6865_v24  }
  0x9b   : > { %6935 = vperm.xlu1 %8027, %v6868_v25   ;;  %6930 = vperm.xlu0 %8026, %v6867_v26  }
  0x9f   : > { %6945 = vperm.xlu1 %8027, %v6870_v27   ;;  %6940 = vperm.xlu0 %8026, %v6869_v28  }
  0xa3   : > { %5463 = vperm.xlu1 %8027, %v5380_v29   ;;  %6950 = vperm.xlu0 %8026, %v6871_v30  }
  0xa7   : > { %6955 = vperm.xlu1 %8027, %v6872_v31   ;;  %7438 = vperm.xlu0 %8026, %v7435_v32  }
  0xe9   : > { %v8654_v33 = vpop.f32.mrb[0].mxu0  ;;  %v8656_v34 = vpop.f32.mrb[0].mxu1 }
  0xea   : > { %13771 = vst [vmem:[#allocation2_spill] sm:$0xff] %v8654_v33  ;;  %13772 = vst [vmem:[#allocation3_spill] sm:$0xff] %v8656_v34  ;;  %v8658_v35 = vpop.f32.mrb[1].mxu0  ;;  %v8660_v36 = vpop.f32.mrb[1].mxu1 }
  0xeb   : > { %13773 = vst [vmem:[#allocation4_spill] sm:$0xff] %v8658_v35  ;;  %13774 = vst [vmem:[#allocation5_spill] sm:$0xff] %v8660_v36 }
  0xed   : > { %v435_v38 = vpop.f32.mrb[2].mxu0  ;;  %v572_v39 = vpop.f32.mrb[2].mxu1 }
  0xee   : > { %v8665_v40 = vadd.f32 %v8662_v37, %v435_v38  ;;  %v8668_v41 = vadd.f32 %v8662_v37, %v572_v39  ;;  %v437_v42 = vpop.f32.mrb[3].mxu0  ;;  %v8670_v43 = vpop.f32.mrb[3].mxu1 }
  0xef   : > { %v8677_v50 = vadd.f32 %v8662_v37, %v437_v42 }
  0xf0   : > { %13775 = vst [vmem:[#allocation6_spill] sm:$0xff] %v8665_v40  ;;  %13776 = vst [vmem:[#allocation7_spill] sm:$0xff] %v8668_v41  ;;  %v750_v44 = vand.u32 2139095040, %v8665_v40  ;;  %v958_v45 = vand.u32 2139095040, %v8668_v41  ;;  %v747_v57 = vand.u32 2147483647, %v8665_v40 }
  0xf1   : > { %v8674_v46 = vpop.f32.mrb[4].mxu0  ;;  %13777 = vst [vmem:[#allocation8_spill] sm:$0xff] %v8677_v50  ;;  %v8679_v51 = vpop.f32.mrb[4].mxu1  ;;  %v854_v58 = vand.u32 2139095040, %v8677_v50  ;;  %v13523_v29 = vand.u32 2147483647, %v8668_v41 }
  0xf2   : > { %v751_v47 = vshrl.u32 %v750_v44, 23  ;;  %v959_v48 = vshrl.u32 %v958_v45, 23  ;;  %v8681_v54 = vpop.f32.mrb[5].mxu0  ;;  %v8683_v55 = vpop.f32.mrb[5].mxu1  ;;  %v754_v62 = vand.u32 8388607, %v747_v57 }
  0xf3   : > { %v855_v0 = vshrl.u32 %v854_v58, 23 }
  0xf4   : > { %v7598_v49 = vadd.s32 4294967169, %v751_v47  ;;  %v7606_v52 = vadd.s32 4294967169, %v959_v48  ;;  %v755_v21 = vor.u32 8388608, %v754_v62 }
  0xf5   : > { %v8702_v14 = vpop.f32.mrb[6].mxu0  ;;  %v7602_v27 = vadd.s32 4294967169, %v855_v0 }
  0xf6   : > { %v757_v53 = vadd.s32 1, %v7598_v49  ;;  %v965_v56 = vadd.s32 1, %v7606_v52  ;;  %v8729_v44 = vshll.u32 %v755_v21, 8 }
  0xf7   : > { %v861_v49 = vadd.s32 1, %v7602_v27 }
  0xf8   : > { %vm758_vm1 = vcmp.gt.s32.totalorder %v757_v53, 0  ;;  %vm966_vm2 = vcmp.gt.s32.totalorder %v965_v56, 0 }
  0xf9   : > { %v759_v59 = vsel %vm758_vm1, %v757_v53, 0  ;;  %v967_v61 = vsel %vm966_vm2, %v965_v56, 0  ;;  %vm862_vm7 = vcmp.gt.s32.totalorder %v861_v49, 0 }
  0xfa   : > { %v761_v60 = vand.u32 31, %v759_v59  ;;  %v8691_v1 = vshrl.u32 %v759_v59, 5  ;;  %v969_v7 = vand.u32 31, %v967_v61  ;;  %v8733_v47 = vshrl.u32 %v967_v61, 5 }
  0xfb   : > { %v863_v27 = vsel %vm862_vm7, %v861_v49, 0  ;;  %v8805_v49 = vpop.f32.mrb[6].mxu1 }
  0xfc   : > { %v8689_v63 = vsub.s32 32, %v761_v60  ;;  %v764_v4 = vshll.u32 %v13530_v3, %v761_v60  ;;  %v767_v6 = vshll.u32 %v13526_v5, %v761_v60  ;;  %v770_v11 = vshll.u32 %v13524_v9, %v761_v60 }
  0xfd   : > { %v773_v15 = vshll.u32 %v13528_v12, %v761_v60  ;;  %v776_v18 = vshll.u32 %v13546_v16, %v761_v60  ;;  %vm779_vm3 = vcmp.lt.s32.totalorder %v8691_v1, 1  ;;  %vm782_vm4 = vcmp.lt.s32.totalorder %v8691_v1, 4 }
  0xfe   : > { %v765_v8 = vshrl.u32 %v13526_v5, %v8689_v63  ;;  %v768_v10 = vshrl.u32 %v13524_v9, %v8689_v63  ;;  %v771_v13 = vshrl.u32 %v13528_v12, %v8689_v63  ;;  %v774_v17 = vshrl.u32 %v13546_v16, %v8689_v63 }
  0xff   : > { %v777_v20 = vshrl.u32 %v13532_v19, %v8689_v63  ;;  %v8715_v30 = vsub.s32 32, %v969_v7  ;;  %vm781_vm5 = vcmp.lt.s32.totalorder %v8691_v1, 3  ;;  %vm780_vm6 = vcmp.lt.s32.totalorder %v8691_v1, 2 }
 0x100   : > { %v766_v22 = vor.u32 %v765_v8, %v764_v4  ;;  %v769_v23 = vor.u32 %v768_v10, %v767_v6  ;;  %v772_v24 = vor.u32 %v771_v13, %v770_v11  ;;  %v775_v25 = vor.u32 %v774_v17, %v773_v15 }
 0x101   : > { %v778_v26 = vor.u32 %v777_v20, %v776_v18  ;;  %v972_v48 = vshll.u32 %v13530_v3, %v969_v7  ;;  %v973_v53 = vshrl.u32 %v13526_v5, %v8715_v30  ;;  %v975_v56 = vshll.u32 %v13526_v5, %v969_v7 }
 0x102   : > { %v787_v28 = vsel %vm779_vm3, %v766_v22, %v769_v23  ;;  %v788_v31 = vsel %vm782_vm4, %v775_v25, 920167782  ;;  %v791_v32 = vsel %vm779_vm3, %v769_v23, %v772_v24  ;;  %v976_v58 = vshrl.u32 %v13524_v9, %v8715_v30 }
 0x103   : > { %v792_v38 = vsel %vm782_vm4, %v778_v26, 1326507024  ;;  %v789_v39 = vsel %vm781_vm5, %v772_v24, %v788_v31  ;;  %v978_v61 = vshll.u32 %v13524_v9, %v969_v7  ;;  %v979_v62 = vshrl.u32 %v13528_v12, %v8715_v30 }
 0x104   : > { %v793_v42 = vsel %vm781_vm5, %v775_v25, %v792_v38  ;;  %v790_v45 = vsel %vm780_vm6, %v787_v28, %v789_v39  ;;  %v981_v0 = vshll.u32 %v13528_v12, %v969_v7  ;;  %v982_v4 = vshrl.u32 %v13546_v16, %v8715_v30 }
 0x105   : > { %v794_v52 = vsel %vm780_vm6, %v791_v32, %v793_v42  ;;  %v8744_v59 = vmul.u32.u64.low %v8729_v44, %v790_v45  ;;  %v8745_v60 = vmul.u32.u64.high %v8729_v44, %v790_v45, %v8744_v59  ;;  %v984_v6 = vshll.u32 %v13546_v16, %v969_v7 }
 0x106   : > { %v985_v8 = vshrl.u32 %v13532_v19, %v8715_v30  ;;  %v8758_v10 = vmul.u32.u64.low %v8729_v44, %v794_v52  ;;  %v8759_v11 = vmul.u32.u64.high %v8729_v44, %v794_v52, %v8758_v10  ;;  %v962_v13 = vand.u32 8388607, %v13523_v29 }
 0x107   : > { %v8765_v15 = vadd.f32 %v8662_v37, %v8670_v43  ;;  %v784_v17 = vsel %vm782_vm4, %v772_v24, 2102212464  ;;  %v8769_v18 = vor.u32 %v973_v53, %v972_v48  ;;  %v983_v7 = vor.u32 %v982_v4, %v981_v0 }
 0x108   : > { %v8771_v20 = vor.u32 %v976_v58, %v975_v56  ;;  %v980_v21 = vor.u32 %v979_v62, %v978_v61  ;;  %v986_v25 = vor.u32 %v985_v8, %v984_v6  ;;  %vm990_vm8 = vcmp.lt.s32.totalorder %v8733_v47, 4 }
 0x109   : > { %13778 = vst [vmem:[#allocation9_spill] sm:$0xff] %v8765_v15  ;;  %v763_v26 = vshrl.u32 %v13530_v3, %v8689_v63  ;;  %v996_v37 = vsel %vm990_vm8, %v983_v7, 920167782  ;;  %v13522_v24 = vand.u32 2147483647, %v8677_v50  ;;  %v785_v31 = vsel %vm781_vm5, %v769_v23, %v784_v17 }
 0x10a   : > { %v1000_v43 = vsel %vm990_vm8, %v986_v25, 1326507024  ;;  %vm987_vm9 = vcmp.lt.s32.totalorder %v8733_v47, 1  ;;  %vm989_vm10 = vcmp.lt.s32.totalorder %v8733_v47, 3  ;;  %v963_v63 = vor.u32 8388608, %v962_v13 }
 0x10b   : > { %v783_v28 = vsel %vm779_vm3, %v763_v26, %v766_v22  ;;  %v995_v32 = vsel %vm987_vm9, %v8769_v18, %v8771_v20  ;;  %v997_v38 = vsel %vm989_vm10, %v980_v21, %v996_v37  ;;  %v1062_v39 = vand.u32 2139095040, %v8765_v15 }
 0x10c   : > { %v805_v22 = vadd.s32 1, %v8745_v60  ;;  %v999_v23 = vsel %vm987_vm9, %v8771_v20, %v980_v21  ;;  %v1001_v42 = vsel %vm989_vm10, %v983_v7, %v1000_v43  ;;  %v865_v45 = vand.u32 31, %v863_v27 }
 0x10d   : > { %v786_v48 = vsel %vm780_vm6, %v783_v28, %v785_v31  ;;  %vm804_vm11 = vc.u32 %v8759_v11, %v8744_v59  ;;  %vm988_vm12 = vcmp.lt.s32.totalorder %v8733_v47, 2  ;;  %v1003_v58 = vshll.u32 %v963_v63, 8 }
 0x10e   : > { %v998_v52 = vsel %vm988_vm12, %v995_v32, %v997_v38  ;;  %v8809_v53 = vsub.s32 32, %v865_v45  ;;  %v1002_v56 = vsel %vm988_vm12, %v999_v23, %v1001_v42  ;;  %v858_v1 = vand.u32 8388607, %v13522_v24 }
 0x10f   : > { %v1063_v61 = vshrl.u32 %v1062_v39, 23  ;;  %v802_v62 = vmul.u32 %v8729_v44, %v786_v48  ;;  %v806_v0 = vsel %vm804_vm11, %v805_v22, %v8745_v60  ;;  %v971_v4 = vshrl.u32 %v13530_v3, %v8715_v30 }
 0x110   : > { %v992_v6 = vsel %vm990_vm8, %v980_v21, 2102212464  ;;  %v8821_v8 = vmul.u32.u64.low %v1003_v58, %v998_v52  ;;  %v8822_v10 = vmul.u32.u64.high %v1003_v58, %v998_v52, %v8821_v8  ;;  %v8825_v13 = vshrl.u32 %v863_v27, 5 }
 0x111   : > { %v869_v17 = vshrl.u32 %v13526_v5, %v8809_v53  ;;  %v8829_v7 = vmul.u32.u64.low %v1003_v58, %v1002_v56  ;;  %v8830_v25 = vmul.u32.u64.high %v1003_v58, %v1002_v56, %v8829_v7  ;;  %v872_v44 = vshrl.u32 %v13524_v9, %v8809_v53 }
 0x112   : > { %v875_v30 = vshrl.u32 %v13528_v12, %v8809_v53  ;;  %v807_v60 = vadd.s32 %v806_v0, %v802_v62  ;;  %v868_v21 = vshll.u32 %v13530_v3, %v865_v45  ;;  %v877_v26 = vshll.u32 %v13528_v12, %v865_v45 }
 0x113   : > { %v878_v37 = vshrl.u32 %v13546_v16, %v8809_v53  ;;  %v871_v43 = vshll.u32 %v13526_v5, %v865_v45  ;;  %v874_v27 = vshll.u32 %v13524_v9, %v865_v45  ;;  %v880_v28 = vshll.u32 %v13546_v16, %v865_v45 }
 0x114   : > { %v881_v31 = vshrl.u32 %v13532_v19, %v8809_v53  ;;  %v870_v63 = vor.u32 %v869_v17, %v868_v21  ;;  %v7610_v38 = vadd.s32 4294967169, %v1063_v61  ;;  %vm886_vm13 = vcmp.lt.s32.totalorder %v8825_v13, 4 }
 0x115   : > { %v879_v32 = vor.u32 %v878_v37, %v877_v26  ;;  %v873_v39 = vor.u32 %v872_v44, %v871_v43  ;;  %v876_v22 = vor.u32 %v875_v30, %v874_v27  ;;  %v808_v42 = vadd.s32 536870912, %v807_v60 }
 0x116   : > { %v882_v23 = vor.u32 %v881_v31, %v880_v28  ;;  %v991_v48 = vsel %vm987_vm9, %v971_v4, %v8769_v18  ;;  %v993_v45 = vsel %vm989_vm10, %v8771_v20, %v992_v6  ;;  %v859_v56 = vor.u32 8388608, %v858_v1 }
 0x117   : > { %v892_v52 = vsel %vm886_vm13, %v879_v32, 920167782  ;;  %v1013_v61 = vadd.s32 1, %v8822_v10  ;;  %vm883_vm14 = vcmp.lt.s32.totalorder %v8825_v13, 1  ;;  %vm885_vm15 = vcmp.lt.s32.totalorder %v8825_v13, 3 }
 0x118   : > { %v896_v62 = vsel %vm886_vm13, %v882_v23, 1326507024  ;;  %v994_v18 = vsel %vm988_vm12, %v991_v48, %v993_v45  ;;  %vm1012_vm0 = vc.u32 %v8830_v25, %v8821_v8  ;;  %v891_v20 = vsel %vm883_vm14, %v870_v63, %v873_v39 }
 0x119   : > { %v893_v1 = vsel %vm885_vm15, %v876_v22, %v892_v52  ;;  %v8867_v0 = vshrl.u32 %v808_v42, 30  ;;  %v895_v4 = vsel %vm883_vm14, %v873_v39, %v876_v22  ;;  %v897_v6 = vsel %vm885_vm15, %v879_v32, %v896_v62  ;;  %v8884_v32 = vpop.f32.mrb[7].mxu0 }
 0x11a   : > { %v1069_v17 = vadd.s32 1, %v7610_v38  ;;  %vm884_vm1 = vcmp.lt.s32.totalorder %v8825_v13, 2  ;;  %v1014_v47 = vsel %vm1012_vm0, %v1013_v61, %v8822_v10  ;;  %v1010_v44 = vmul.u32 %v1003_v58, %v994_v18 }
 0x11b   : > { %v894_v7 = vsel %vm884_vm1, %v891_v20, %v893_v1  ;;  %v898_v30 = vsel %vm884_vm1, %v895_v4, %v897_v6  ;;  %v899_v21 = vshll.u32 %v859_v56, 8  ;;  %v810_v37 = vshll.u32 %v8867_v0, 30 }
 0x11c   : > { %vm1070_vm2 = vcmp.gt.s32.totalorder %v1069_v17, 0  ;;  %v1015_v43 = vadd.s32 %v1014_v47, %v1010_v44  ;;  %v13521_v58 = vand.u32 2147483647, %v8765_v15  ;;  %v888_v45 = vsel %vm886_vm13, %v876_v22, 2102212464 }
 0x11d   : > { %v1071_v26 = vsel %vm1070_vm2, %v1069_v17, 0  ;;  %v8880_v27 = vmul.u32.u64.low %v899_v21, %v894_v7  ;;  %v8881_v28 = vmul.u32.u64.high %v899_v21, %v894_v7, %v8880_v27  ;;  %v8892_v42 = vsub.s32 %v807_v60, %v810_v37 }
 0x11e   : > { %v1073_v31 = vand.u32 31, %v1071_v26  ;;  %v8886_v10 = vmul.u32.u64.low %v899_v21, %v898_v30  ;;  %v8887_v38 = vmul.u32.u64.high %v899_v21, %v898_v30, %v8886_v10  ;;  %v1016_v48 = vadd.s32 536870912, %v1015_v43 }
 0x11f   : > { %v867_v52 = vshrl.u32 %v13530_v3, %v8809_v53  ;;  %v1066_v56 = vand.u32 8388607, %v13521_v58  ;;  %v813_v62 = vsub.s32 0, %v8892_v42  ;;  %v889_v60 = vsel %vm885_vm15, %v873_v39, %v888_v45  ;;  %v8929_v45 = vpop.permute.xlu0 %655 }
 0x120   : > { %v8890_v23 = vsub.s32 32, %v1073_v31  ;;  %v8909_v20 = vshrl.u32 %v1016_v48, 30  ;;  %v909_v53 = vadd.s32 1, %v8881_v28  ;;  %v1076_v1 = vshll.u32 %v13530_v3, %v1073_v31 }
 0x121   : > { %v887_v18 = vsel %vm883_vm14, %v867_v52, %v870_v63  ;;  %vm908_vm3 = vc.u32 %v8887_v38, %v8880_v27  ;;  %v1079_v63 = vshll.u32 %v13526_v5, %v1073_v31  ;;  %v1085_v6 = vshll.u32 %v13528_v12, %v1073_v31 }
 0x122   : > { %v1077_v61 = vshrl.u32 %v13526_v5, %v8890_v23  ;;  %v1080_v22 = vshrl.u32 %v13524_v9, %v8890_v23  ;;  %v1083_v4 = vshrl.u32 %v13528_v12, %v8890_v23  ;;  %v1086_v39 = vshrl.u32 %v13546_v16, %v8890_v23 }
 0x123   : > { %v890_v17 = vsel %vm884_vm1, %v887_v18, %v889_v60  ;;  %v8923_v47 = vshrl.u32 %v1071_v26, 5  ;;  %v1082_v44 = vshll.u32 %v13524_v9, %v1073_v31  ;;  %v1088_v10 = vshll.u32 %v13546_v16, %v1073_v31 }
 0x124   : > { %v1078_v7 = vor.u32 %v1077_v61, %v1076_v1  ;;  %v1081_v30 = vor.u32 %v1080_v22, %v1079_v63  ;;  %v1087_v37 = vor.u32 %v1086_v39, %v1085_v6  ;;  %v1089_v48 = vshrl.u32 %v13532_v19, %v8890_v23 }
 0x125   : > { %v910_v52 = vsel %vm908_vm3, %v909_v53, %v8881_v28  ;;  %v1084_v2 = vor.u32 %v1083_v4, %v1082_v44  ;;  %v7599_v13 = vmin.u32 %v813_v62, %v8892_v42  ;;  %v906_v18 = vmul.u32 %v899_v21, %v890_v17 }
 0x126   : > { %v1090_v26 = vor.u32 %v1089_v48, %v1088_v10  ;;  %v8935_v61 = vadd.f32 %v8929_v45, %v8674_v46  ;;  %v1018_v60 = vshll.u32 %v8909_v20, 30  ;;  %v1067_v22 = vor.u32 8388608, %v1066_v56 }
 0x127   : > { %vm1091_vm4 = vcmp.lt.s32.totalorder %v8923_v47, 1  ;;  %vm1094_vm5 = vcmp.lt.s32.totalorder %v8923_v47, 4  ;;  %v911_v31 = vadd.s32 %v910_v52, %v906_v18  ;;  %vm1093_vm6 = vcmp.lt.s32.totalorder %v8923_v47, 3 }
 0x128   : > { %13779 = vst [vmem:[#allocation10_spill] sm:$0xff] %v8935_v61  ;;  %v1099_v28 = vsel %vm1091_vm4, %v1078_v7, %v1081_v30  ;;  %v1100_v21 = vsel %vm1094_vm5, %v1087_v37, 920167782  ;;  %vm1092_vm7 = vcmp.lt.s32.totalorder %v8923_v47, 2  ;;  %v1103_v62 = vsel %vm1091_vm4, %v1081_v30, %v1084_v2 }
 0x129   : > { %v1101_v46 = vsel %vm1093_vm6, %v1084_v2, %v1100_v21  ;;  %v1104_v53 = vsel %vm1094_vm5, %v1090_v26, 1326507024  ;;  %v1166_v1 = vand.u32 2139095040, %v8935_v61  ;;  %v815_v4 = vclz %v7599_v13 }
 0x12a   : > { %v1102_v56 = vsel %vm1092_vm7, %v1099_v28, %v1101_v46  ;;  %v8955_v63 = vsub.s32 %v1015_v43, %v1018_v60  ;;  %v1105_v6 = vsel %vm1093_vm6, %v1087_v37, %v1104_v53  ;;  %v1107_v39 = vshll.u32 %v1067_v22, 8  ;;  %v8975_v46 = vpop.f32.mrb[7].mxu1 }
 0x12b   : > { %v912_v17 = vadd.s32 536870912, %v911_v31  ;;  %v1106_v44 = vsel %vm1092_vm7, %v1103_v62, %v1105_v6  ;;  %v1167_v26 = vshrl.u32 %v1166_v1, 23  ;;  %v7600_v28 = vadd.s32 4294967294, %v815_v4  ;;  %13781 = vst [vmem:[#allocation12_spill] sm:$0xff] %v8975_v46 }
 0x12c   : > { %v8961_v10 = vmul.u32.u64.low %v1107_v39, %v1102_v56  ;;  %v8962_v48 = vmul.u32.u64.high %v1107_v39, %v1102_v56, %v8961_v10  ;;  %v8965_v52 = vmul.u32.u64.low %v1107_v39, %v1106_v44  ;;  %v8966_v18 = vmul.u32.u64.high %v1107_v39, %v1106_v44, %v8965_v52 }
 0x12d   : > { %v1021_v43 = vsub.s32 0, %v8955_v63  ;;  %v8969_v13 = vshrl.u32 %v912_v17, 30  ;;  %v7614_v60 = vadd.s32 4294967169, %v1167_v26  ;;  %v1075_v37 = vshrl.u32 %v13530_v3, %v8890_v23 }
 0x12e   : > { %v1096_v22 = vsel %vm1094_vm5, %v1084_v2, 2102212464  ;;  %vm7601_vm8 = vcmp.lt.s32.totalorder %v7600_v28, 0  ;;  %v13520_v1 = vand.u32 2147483647, %v8935_v61  ;;  %v1117_v4 = vadd.s32 1, %v8962_v48 }
 0x12f   : > { %13780 = vst [vmem:[#allocation11_spill] sm:$0xff] %v8969_v13  ;;  %v1173_v21 = vadd.s32 1, %v7614_v60  ;;  %v7607_v56 = vmin.u32 %v1021_v43, %v8955_v63  ;;  %v914_v62 = vshll.u32 %v8969_v13, 30  ;;  %v1095_v53 = vsel %vm1091_vm4, %v1075_v37, %v1078_v7 }
 0x130   : > { %v1097_v23 = vsel %vm1093_vm6, %v1081_v30, %v1096_v22  ;;  %v8987_v6 = vadd.f32 %v8929_v45, %v8679_v51  ;;  %vm1116_vm10 = vc.u32 %v8966_v18, %v8961_v10  ;;  %v8993_v7 = vadd.s32 %v8744_v59, %v8759_v11 }
 0x131   : > { %vm1174_vm9 = vcmp.gt.s32.totalorder %v1173_v21, 0  ;;  %v8995_v44 = vsel %vm7601_vm8, 0, %v7600_v28  ;;  %v1023_v52 = vclz %v7607_v56  ;;  %v8997_v26 = vsub.s32 %v911_v31, %v914_v62 }
 0x132   : > { %v1175_v2 = vsel %vm1174_vm9, %v1173_v21, 0  ;;  %13782 = vst [vmem:[#allocation13_spill] sm:$0xff] %v8987_v6  ;;  %v1098_v30 = vsel %vm1092_vm7, %v1095_v53, %v1097_v23  ;;  %v1118_v51 = vsel %vm1116_vm10, %v1117_v4, %v8962_v48  ;;  %v1170_v60 = vand.u32 8388607, %v13520_v1 }
 0x133   : > { %v1177_v17 = vand.u32 31, %v1175_v2  ;;  %v1374_v22 = vand.u32 2139095040, %v8987_v6  ;;  %v9010_v47 = vshrl.u32 %v1175_v2, 5  ;;  %vm749_vm11 = vcmp.lt.s32.totalorder %v8665_v40, 0 }
 0x134   : > { %v917_v1 = vsub.s32 0, %v8997_v26  ;;  %v1114_v58 = vmul.u32 %v1107_v39, %v1098_v30  ;;  %v833_v29 = vsub.s32 4, %v8867_v0  ;;  %vm9032_vm15 = vcmp.le.f32.partialorder %v747_v57, 0.7853982 }
 0x135   : > { %v1178_v43 = vsub.s32 32, %v1177_v17  ;;  %v1180_v37 = vshll.u32 %v13530_v3, %v1177_v17  ;;  %v1183_v11 = vshll.u32 %v13526_v5, %v1177_v17  ;;  %v1186_v21 = vshll.u32 %v13524_v9, %v1177_v17 }
 0x136   : > { %v1189_v48 = vshll.u32 %v13528_v12, %v1177_v17  ;;  %v1192_v23 = vshll.u32 %v13546_v16, %v1177_v17  ;;  %v9020_v3 = vadd.s32 %v1118_v51, %v1114_v58  ;;  %vm1195_vm12 = vcmp.lt.s32.totalorder %v9010_v47, 1 }
 0x137   : > { %v1181_v59 = vshrl.u32 %v13526_v5, %v1178_v43  ;;  %v1184_v31 = vshrl.u32 %v13524_v9, %v1178_v43  ;;  %v1187_v28 = vshrl.u32 %v13528_v12, %v1178_v43  ;;  %v1190_v56 = vshrl.u32 %v13546_v16, %v1178_v43 }
 0x138   : > { %v1193_v4 = vshrl.u32 %v13532_v19, %v1178_v43  ;;  %v7608_v9 = vadd.s32 4294967294, %v1023_v52  ;;  %v1171_v5 = vor.u32 8388608, %v1170_v60  ;;  %vm1198_vm13 = vcmp.lt.s32.totalorder %v9010_v47, 4 }
 0x139   : > { %v1182_v62 = vor.u32 %v1181_v59, %v1180_v37  ;;  %v1185_v53 = vor.u32 %v1184_v31, %v1183_v11  ;;  %v1188_v24 = vor.u32 %v1187_v28, %v1186_v21  ;;  %v1191_v2 = vor.u32 %v1190_v56, %v1189_v48 }
 0x13a   : > { %v1194_v12 = vor.u32 %v1193_v4, %v1192_v23  ;;  %v1375_v17 = vshrl.u32 %v1374_v22, 23  ;;  %v823_v37 = vsub.s32 4294967266, %v8995_v44  ;;  %vm1197_vm14 = vcmp.lt.s32.totalorder %v9010_v47, 3 }
 0x13b   : > { %v1203_v39 = vsel %vm1195_vm12, %v1182_v62, %v1185_v53  ;;  %v1204_v30 = vsel %vm1198_vm13, %v1191_v2, 920167782  ;;  %v7603_v52 = vmin.u32 %v917_v1, %v8997_v26  ;;  %vm1196_vm0 = vcmp.lt.s32.totalorder %v9010_v47, 2 }
 0x13c   : > { %v1205_v51 = vsel %vm1197_vm14, %v1188_v24, %v1204_v30  ;;  %v1207_v60 = vsel %vm1195_vm12, %v1185_v53, %v1188_v24  ;;  %vm957_vm1 = vcmp.lt.s32.totalorder %v8668_v41, 0  ;;  %vm7609_vm2 = vcmp.lt.s32.totalorder %v7608_v9, 0 }
 0x13d   : > { %v1206_v22 = vsel %vm1196_vm0, %v1203_v39, %v1205_v51  ;;  %v1208_v57 = vsel %vm1198_vm13, %v1194_v12, 1326507024  ;;  %v1211_v59 = vshll.u32 %v1171_v5, 8  ;;  %v819_v1 = vsub.s32 32, %v8995_v44 }
 0x13e   : > { %v1120_v11 = vadd.s32 536870912, %v9020_v3  ;;  %v1209_v31 = vsel %vm1197_vm14, %v1191_v2, %v1208_v57  ;;  %v7622_v28 = vadd.s32 4294967169, %v1375_v17  ;;  %v824_v21 = vadd.s32 127, %v823_v37 }
 0x13f   : > { %v1210_v48 = vsel %vm1196_vm0, %v1207_v60, %v1209_v31  ;;  %v9053_v56 = vmul.u32.u64.low %v1211_v59, %v1206_v22  ;;  %v9054_v23 = vmul.u32.u64.high %v1211_v59, %v1206_v22, %v9053_v56  ;;  %v9057_v4 = vsel %vm7609_vm2, 0, %v7608_v9 }
 0x140   : > { %v919_v12 = vclz %v7603_v52  ;;  %v9059_v5 = vmul.u32.u64.low %v1211_v59, %v1210_v48  ;;  %v9060_v39 = vmul.u32.u64.high %v1211_v59, %v1210_v48, %v9059_v5  ;;  %v9065_v30 = vsel %vm749_vm11, %v833_v29, %v8867_v0 }
 0x141   : > { %v1011_v2 = vadd.s32 %v8821_v8, %v8830_v25  ;;  %v1200_v17 = vsel %vm1198_vm13, %v1188_v24, 2102212464  ;;  %v1381_v37 = vadd.s32 1, %v7622_v28  ;;  %v821_v51 = vshrl.u32 %v8993_v7, %v819_v1 }
 0x142   : > { %v1041_v9 = vsub.s32 4, %v8909_v20  ;;  %v9073_v52 = vshrl.u32 %v1120_v11, 30  ;;  %v13786_v60 = vmov 683565275   ;;  %v825_v57 = vshll.u32 %v824_v21, 23 }
 0x143   : > { %v1179_v22 = vshrl.u32 %v13786_v60, %v1178_v43  ;;  %v1027_v31 = vsub.s32 32, %v9057_v4  ;;  %v1031_v29 = vsub.s32 4294967266, %v9057_v4  ;;  %vm1382_vm3 = vcmp.gt.s32.totalorder %v1381_v37, 0 }
 0x144   : > { %13785 = vst [vmem:[#allocation14_spill] sm:$0xff] %v9073_v52  ;;  %v7604_v0 = vadd.s32 4294967294, %v919_v12  ;;  %v1201_v24 = vsel %vm1197_vm14, %v1185_v53, %v1200_v17  ;;  %v9084_v25 = vadd.f32 %v8929_v45, %v8681_v54  ;;  %v820_v7 = vshll.u32 %v8892_v42, %v8995_v44  ;;  %v9101_v42 = vpop.f32.mrb[8].mxu0 }
 0x145   : > { %v1199_v8 = vsel %vm1195_vm12, %v1179_v22, %v1182_v62  ;;  %v1221_v1 = vadd.s32 1, %v9054_v23  ;;  %v1383_v11 = vsel %vm1382_vm3, %v1381_v37, 0  ;;  %v9095_v62 = vsel %vm957_vm1, %v1041_v9, %v8909_v20  ;;  %13788 = vst [vmem:[#allocation16_spill] sm:$0xff] %v9101_v42 }
 0x146   : > { %13787 = vst [vmem:[#allocation15_spill] sm:$0xff] %v9084_v25  ;;  %v1122_v53 = vshll.u32 %v9073_v52, 30  ;;  %vm1220_vm4 = vc.u32 %v9060_v39, %v9053_v56  ;;  %v13534_v54 = vand.u32 2147483647, %v8987_v6  ;;  %v822_v44 = vor.u32 %v821_v51, %v820_v7 }
 0x147   : > { %v826_v28 = vor.u32 4788187, %v825_v57  ;;  %v1202_v21 = vsel %vm1196_vm0, %v1199_v8, %v1201_v24  ;;  %v1385_v48 = vand.u32 31, %v1383_v11  ;;  %v1029_v12 = vshrl.u32 %v1011_v2, %v1027_v31 }
 0x148   : > { %v1032_v5 = vadd.s32 127, %v1031_v29  ;;  %vm7605_vm5 = vcmp.lt.s32.totalorder %v7604_v0, 0  ;;  %v1270_v20 = vand.u32 2139095040, %v9084_v25  ;;  %v1222_v17 = vsel %vm1220_vm4, %v1221_v1, %v9054_v23 }
 0x149   : > { %v1386_v37 = vsub.s32 32, %v1385_v48  ;;  %v1388_v9 = vshll.u32 %v13786_v60, %v1385_v48  ;;  %v13789_v22 = vmov 2475754826   ;;  %v9110_v19 = vsub.s32 %v9020_v3, %v1122_v53 }
 0x14a   : > { %v1391_v43 = vshll.u32 %v13789_v22, %v1385_v48  ;;  %v1218_v51 = vmul.u32 %v1211_v59, %v1202_v21  ;;  %v1378_v47 = vand.u32 8388607, %v13534_v54  ;;  %v13790_v57 = vmov 2102212464  }
 0x14b   : > { %v1397_v2 = vshll.u32 %v13790_v57, %v1385_v48  ;;  %v1389_v31 = vshrl.u32 %v13789_v22, %v1386_v37  ;;  %v13791_v29 = vmov 2131351028   ;;  %v1395_v24 = vshrl.u32 %v13790_v57, %v1386_v37 }
 0x14c   : > { %v1392_v8 = vshrl.u32 %v13791_v29, %v1386_v37  ;;  %v1394_v23 = vshll.u32 %v13791_v29, %v1385_v48  ;;  %v9119_v7 = vadd.s32 %v1222_v17, %v1218_v51  ;;  %v9121_v1 = vshrl.u32 %v1383_v11, 5 }
 0x14d   : > { %v1398_v3 = vshrl.u32 %v13546_v16, %v1386_v37  ;;  %v1400_v59 = vshll.u32 %v13546_v16, %v1385_v48  ;;  %v1390_v53 = vor.u32 %v1389_v31, %v1388_v9  ;;  %v13792_v54 = vmov 1326507024  }
 0x14e   : > { %v1393_v21 = vor.u32 %v1392_v8, %v1391_v43  ;;  %v1401_v34 = vshrl.u32 %v13792_v54, %v1386_v37  ;;  %v1271_v33 = vshrl.u32 %v1270_v20, 23  ;;  %v827_v36 = vand.u32 2147483647, %v826_v28 }
 0x14f   : > { %v829_v35 = vcvt.s32.f32 %v822_v44  ;;  %v1033_v52 = vshll.u32 %v1032_v5, 23  ;;  %v1399_v13 = vor.u32 %v1398_v3, %v1397_v2  ;;  %v1028_v42 = vshll.u32 %v8955_v63, %v9057_v4 }
 0x150   : > { %v9129_v17 = vsel %vm7605_vm5, 0, %v7604_v0  ;;  %v1379_v11 = vor.u32 8388608, %v1378_v47  ;;  %v1396_v51 = vor.u32 %v1395_v24, %v1394_v23  ;;  %v1125_v46 = vsub.s32 0, %v9110_v19  ;;  %v9155_v47 = vpop.f32.mrb[8].mxu1 }
 0x151   : > { %v1224_v48 = vadd.s32 536870912, %v9119_v7  ;;  %v1402_v43 = vor.u32 %v1401_v34, %v1400_v59  ;;  %vm1403_vm6 = vcmp.lt.s32.totalorder %v9121_v1, 1  ;;  %v1030_v20 = vor.u32 %v1029_v12, %v1028_v42  ;;  %13793 = vst [vmem:[#allocation17_spill] sm:$0xff] %v9155_v47 }
 0x152   : > { %vm1406_vm7 = vcmp.lt.s32.totalorder %v9121_v1, 4  ;;  %v1411_v44 = vsel %vm1403_vm6, %v1390_v53, %v1393_v21  ;;  %v7618_v28 = vadd.s32 4294967169, %v1271_v33  ;;  %v1034_v63 = vor.u32 4788187, %v1033_v52 }
 0x153   : > { %v927_v4 = vsub.s32 4294967266, %v9129_v17  ;;  %vm1405_vm8 = vcmp.lt.s32.totalorder %v9121_v1, 3  ;;  %v1412_v0 = vsel %vm1406_vm7, %v1399_v13, 920167782  ;;  %vm1404_vm9 = vcmp.lt.s32.totalorder %v9121_v1, 2 }
 0x154   : > { %v1413_v34 = vsel %vm1405_vm8, %v1396_v51, %v1412_v0  ;;  %v1415_v42 = vsel %vm1403_vm6, %v1393_v21, %v1396_v51  ;;  %v9146_v12 = vshll.u32 %v1379_v11, 8  ;;  %v7611_v33 = vmin.u32 %v1125_v46, %v9110_v19 }
 0x155   : > { %v9149_v52 = vshrl.u32 %v1224_v48, 30  ;;  %v1414_v5 = vsel %vm1404_vm9, %v1411_v44, %v1413_v34  ;;  %v1416_v9 = vsel %vm1406_vm7, %v1402_v43, 1326507024  ;;  %v1277_v23 = vadd.s32 1, %v7618_v28 }
 0x156   : > { %v1417_v2 = vsel %vm1405_vm8, %v1399_v13, %v1416_v9  ;;  %v9160_v31 = vmul.u32.u64.low %v9146_v12, %v1414_v5  ;;  %v9161_v8 = vmul.u32.u64.high %v9146_v12, %v1414_v5, %v9160_v31  ;;  %v830_v46 = vmul.f32 %v829_v35, %v827_v36 }
 0x157   : > { %v1035_v24 = vand.u32 2147483647, %v1034_v63  ;;  %v1037_v3 = vcvt.s32.f32 %v1030_v20  ;;  %v1418_v59 = vsel %vm1404_vm9, %v1415_v42, %v1417_v2  ;;  %v1387_v11 = vshrl.u32 %v13786_v60, %v1386_v37 }
 0x158   : > { %v9168_v48 = vmul.u32.u64.low %v9146_v12, %v1418_v59  ;;  %v9169_v43 = vmul.u32.u64.high %v9146_v12, %v1418_v59, %v9168_v48  ;;  %vm1278_vm10 = vcmp.gt.s32.totalorder %v1277_v23, 0  ;;  %v923_v13 = vsub.s32 32, %v9129_v17 }
 0x159   : > { %v928_v44 = vadd.s32 127, %v927_v4  ;;  %v1408_v0 = vsel %vm1406_vm7, %v1396_v51, 2102212464  ;;  %v1279_v28 = vsel %vm1278_vm10, %v1277_v23, 0  ;;  %v907_v35 = vadd.s32 %v8880_v27, %v8887_v38 }
 0x15a   : > { %v1127_v36 = vclz %v7611_v33  ;;  %v1226_v20 = vshll.u32 %v9149_v52, 30  ;;  %v1281_v63 = vand.u32 31, %v1279_v28  ;;  %v831_v37 = vxor.u32 2147483648, %v830_v46 }
 0x15b   : > { %v9177_v34 = vmul.f32 %v1037_v3, %v1035_v24  ;;  %v13540_v42 = vand.u32 2147483647, %v9084_v25  ;;  %v9182_v5 = vadd.f32 %v8929_v45, %v8683_v55  ;;  %v1407_v51 = vsel %vm1403_vm6, %v1387_v11, %v1390_v53 }
 0x15c   : > { %v1409_v4 = vsel %vm1405_vm8, %v1393_v21, %v1408_v0  ;;  %v1429_v27 = vadd.s32 1, %v9161_v8  ;;  %v9189_v38 = vsub.s32 32, %v1281_v63  ;;  %v924_v33 = vshll.u32 %v8997_v26, %v9129_v17 }
 0x15d   : > { %13794 = vst [vmem:[#allocation18_spill] sm:$0xff] %v9182_v5  ;;  %v925_v9 = vshrl.u32 %v907_v35, %v923_v13  ;;  %v929_v2 = vshll.u32 %v928_v44, 23  ;;  %vm1428_vm12 = vc.u32 %v9169_v43, %v9160_v31  ;;  %v7612_v55 = vadd.s32 4294967294, %v1127_v36 }
 0x15e   : > { %v9196_v45 = vsub.s32 %v9119_v7, %v1226_v20  ;;  %v1285_v53 = vshrl.u32 %v13789_v22, %v9189_v38  ;;  %v1288_v21 = vshrl.u32 %v13791_v29, %v9189_v38  ;;  %v1410_v23 = vsel %vm1404_vm9, %v1407_v51, %v1409_v4 }
 0x15f   : > { %v1284_v26 = vshll.u32 %v13786_v60, %v1281_v63  ;;  %v1287_v17 = vshll.u32 %v13789_v22, %v1281_v63  ;;  %v1291_v24 = vshrl.u32 %v13790_v57, %v9189_v38  ;;  %v1430_v3 = vsel %vm1428_vm12, %v1429_v27, %v9161_v8 }
 0x160   : > { %v1274_v7 = vand.u32 8388607, %v13540_v42  ;;  %v9211_v59 = vshrl.u32 %v1279_v28, 5  ;;  %v1290_v11 = vshll.u32 %v13791_v29, %v1281_v63  ;;  %v1293_v13 = vshll.u32 %v13790_v57, %v1281_v63 }
 0x161   : > { %v9214_v48 = vor.u32 %v1285_v53, %v1284_v26  ;;  %v9216_v1 = vor.u32 %v1288_v21, %v1287_v17  ;;  %v1294_v44 = vshrl.u32 %v13546_v16, %v9189_v38  ;;  %v926_v0 = vor.u32 %v925_v9, %v924_v33 }
 0x162   : > { %v1229_v35 = vsub.s32 0, %v9196_v45  ;;  %v1426_v8 = vmul.u32 %v9146_v12, %v1410_v23  ;;  %v1297_v28 = vshrl.u32 %v13792_v54, %v9189_v38  ;;  %v1292_v36 = vor.u32 %v1291_v24, %v1290_v11 }
 0x163   : > { %v1295_v20 = vor.u32 %v1294_v44, %v1293_v13  ;;  %v1296_v51 = vshll.u32 %v13546_v16, %v1281_v63  ;;  %v1478_v4 = vand.u32 2139095040, %v9182_v5  ;;  %v930_v27 = vor.u32 4788187, %v929_v2 }
 0x164   : > { %vm7613_vm13 = vcmp.lt.s32.totalorder %v7612_v55, 0  ;;  %v9227_v53 = vadd.s32 %v1430_v3, %v1426_v8  ;;  %vm1299_vm14 = vcmp.lt.s32.totalorder %v9211_v59, 1  ;;  %v1275_v33 = vor.u32 8388608, %v1274_v7 }
 0x165   : > { %v1298_v9 = vor.u32 %v1297_v28, %v1296_v51  ;;  %vm1302_vm0 = vcmp.lt.s32.totalorder %v9211_v59, 4  ;;  %v1307_v12 = vsel %vm1299_vm14, %v9214_v48, %v9216_v1  ;;  %v832_v63 = vsel %vm749_vm11, %v831_v37, %v830_v46 }
 0x166   : > { %v13795_v21 = vand.u32 2147483647, %v8668_v41  ;;  %v7615_v23 = vmin.u32 %v1229_v35, %v9196_v45  ;;  %vm1301_vm3 = vcmp.lt.s32.totalorder %v9211_v59, 3  ;;  %v1308_v26 = vsel %vm1302_vm0, %v1295_v20, 920167782 }
 0x167   : > { %v1130_v17 = vsel %vm7613_vm13, 0, %v7612_v55  ;;  %vm1300_vm4 = vcmp.lt.s32.totalorder %v9211_v59, 2  ;;  %v1309_v24 = vsel %vm1301_vm3, %v1292_v36, %v1308_v26  ;;  %v1479_v46 = vshrl.u32 %v1478_v4, 23 }
 0x168   : > { %vm9239_vm2 = vcmp.le.f32.partialorder %v13795_v21, 0.7853982  ;;  %v1039_v37 = vxor.u32 2147483648, %v9177_v34  ;;  %v1432_v3 = vadd.s32 536870912, %v9227_v53  ;;  %v1310_v7 = vsel %vm1300_vm4, %v1307_v12, %v1309_v24  ;;  %v9278_v24 = vpop.f32.mrb[9].mxu0 }
 0x169   : > { %v1311_v11 = vsel %vm1299_vm14, %v9216_v1, %v1292_v36  ;;  %v931_v13 = vand.u32 2147483647, %v930_v27  ;;  %v933_v44 = vcvt.s32.f32 %v926_v0  ;;  %v1312_v55 = vsel %vm1302_vm0, %v1298_v9, 1326507024  ;;  %13798 = vst [vmem:[#allocation19_spill] sm:$0xff] %v9278_v24 }
 0x16a   : > { %v9259_v35 = vshll.u32 %v1275_v33, 8  ;;  %v1131_v8 = vsub.s32 32, %v1130_v17  ;;  %v1135_v28 = vsub.s32 4294967266, %v1130_v17  ;;  %v1231_v51 = vclz %v7615_v23 }
 0x16b   : > { %v1313_v4 = vsel %vm1301_vm3, %v1295_v20, %v1312_v55  ;;  %v7626_v0 = vadd.s32 4294967169, %v1479_v46  ;;  %v1115_v27 = vadd.s32 %v8961_v10, %v8966_v18  ;;  %v9272_v33 = vshrl.u32 %v1432_v3, 30 }
 0x16c   : > { %v1314_v12 = vsel %vm1300_vm4, %v1311_v11, %v1313_v4  ;;  %v9266_v21 = vmul.u32.u64.low %v9259_v35, %v1310_v7  ;;  %v9267_v26 = vmul.u32.u64.high %v9259_v35, %v1310_v7, %v9266_v21  ;;  %v9283_v20 = vsel %vm9032_vm15, %v8665_v40, %v832_v63 }
 0x16d   : > { %v9275_v9 = vmul.u32.u64.low %v9259_v35, %v1314_v12  ;;  %v9276_v23 = vmul.u32.u64.high %v9259_v35, %v1314_v12, %v9275_v9  ;;  %v1040_v46 = vsel %vm957_vm1, %v1039_v37, %v9177_v34  ;;  %v9288_v7 = vmul.f32 %v933_v44, %v931_v13 }
 0x16e   : > { %v1485_v10 = vadd.s32 1, %v7626_v0  ;;  %v1133_v18 = vshrl.u32 %v1115_v27, %v1131_v8  ;;  %v1136_v3 = vadd.s32 127, %v1135_v28  ;;  %v7616_v11 = vadd.s32 4294967294, %v1231_v51  ;;  %v9312_v28 = vpop.permute.xlu1 %660 }
 0x16f   : > { %v1304_v55 = vsel %vm1302_vm0, %v1292_v36, 2102212464  ;;  %v1283_v63 = vshrl.u32 %v13786_v60, %v9189_v38  ;;  %v13539_v12 = vand.u32 2147483647, %v9182_v5  ;;  %8062 = vcosq.f32 %v9283_v20 }
 0x170   : > { %vm1486_vm11 = vcmp.gt.s32.totalorder %v1485_v10, 0  ;;  %v1132_v34 = vshll.u32 %v9110_v19, %v1130_v17  ;;  %v1434_v37 = vshll.u32 %v9272_v33, 30  ;;  %v9304_v36 = vsel %vm9239_vm2, %v8668_v41, %v1040_v46 }
 0x171   : > { %v1487_v13 = vsel %vm1486_vm11, %v1485_v10, 0  ;;  %v1303_v44 = vsel %vm1299_vm14, %v1283_v63, %v9214_v48  ;;  %v1305_v38 = vsel %vm1301_vm3, %v9216_v1, %v1304_v55  ;;  %v935_v19 = vxor.u32 2147483648, %v9288_v7 }
 0x172   : > { %v1489_v8 = vand.u32 31, %v1487_v13  ;;  %v1134_v17 = vor.u32 %v1133_v18, %v1132_v34  ;;  %v1137_v51 = vshll.u32 %v1136_v3, 23  ;;  %vm7617_vm1 = vcmp.lt.s32.totalorder %v7616_v11, 0 }
 0x173   : > { %v1325_v0 = vadd.s32 1, %v9267_v26  ;;  %v1482_v27 = vand.u32 8388607, %v13539_v12  ;;  %v9322_v48 = vadd.f32 %v9312_v28, %v8702_v14  ;;  %v9325_v1 = vsub.s32 %v9227_v53, %v1434_v37 }
 0x174   : > { %v9318_v9 = vsub.s32 32, %v1489_v8  ;;  %v1306_v46 = vsel %vm1300_vm4, %v1303_v44, %v1305_v38  ;;  %vm1324_vm5 = vc.u32 %v9276_v23, %v9266_v21  ;;  %v1492_v10 = vshll.u32 %v13786_v60, %v1489_v8 }
 0x175   : > { %13799 = vst [vmem:[#allocation20_spill] sm:$0xff] %v9322_v48  ;;  %v1495_v3 = vshll.u32 %v13789_v22, %v1489_v8  ;;  %v9339_v55 = vshrl.u32 %v1487_v13, 5  ;;  %v1498_v59 = vshll.u32 %v13791_v29, %v1489_v8  ;;  %v1501_v63 = vshll.u32 %v13790_v57, %v1489_v8 }
 0x176   : > { %v1493_v18 = vshrl.u32 %v13789_v22, %v9318_v9  ;;  %v1496_v14 = vshrl.u32 %v13791_v29, %v9318_v9  ;;  %v1499_v53 = vshrl.u32 %v13790_v57, %v9318_v9  ;;  %v1502_v34 = vshrl.u32 %v13546_v16, %v9318_v9 }
 0x177   : > { %vm13630_vm6 = vcmp.lt.s32.totalorder %v8677_v50, 0  ;;  %v1138_v37 = vor.u32 4788187, %v1137_v51  ;;  %v1326_v44 = vsel %vm1324_vm5, %v1325_v0, %v9267_v26  ;;  %v9348_v42 = vsel %vm7617_vm1, 0, %v7616_v11 }
 0x178   : > { %v1494_v38 = vor.u32 %v1493_v18, %v1492_v10  ;;  %v1497_v12 = vor.u32 %v1496_v14, %v1495_v3  ;;  %v1322_v13 = vmul.u32 %v9259_v35, %v1306_v46  ;;  %v1500_v4 = vor.u32 %v1499_v53, %v1498_v59 }
 0x179   : > { %v1503_v41 = vor.u32 %v1502_v34, %v1501_v63  ;;  %v1437_v40 = vsub.s32 0, %v9325_v1  ;;  %v1483_v24 = vor.u32 8388608, %v1482_v27  ;;  %v1504_v47 = vshll.u32 %v13546_v16, %v1489_v8  ;;  %v9355_v51 = vpop.eup %8062 }
 0x17a   : > { %v1505_v5 = vshrl.u32 %v13792_v54, %v9318_v9  ;;  %13800 = vst [vmem:[#allocation21_spill] sm:$0xff] %v9355_v51  ;;  %v9357_v26 = vadd.s32 %v1326_v44, %v1322_v13  ;;  %vm1507_vm7 = vcmp.lt.s32.totalorder %v9339_v55, 1  ;;  %vm1510_vm8 = vcmp.lt.s32.totalorder %v9339_v55, 4 }
 0x17b   : > { %v1582_v35 = vand.u32 2139095040, %v9322_v48  ;;  %v13801_v11 = vand.u32 2147483647, %v8677_v50  ;;  %v13802_v0 = vmov 0  ;;  %vm1509_vm10 = vcmp.lt.s32.totalorder %v9339_v55, 3 }
 0x17c   : > { %v1506_v8 = vor.u32 %v1505_v5, %v1504_v47  ;;  %v1515_v27 = vsel %vm1507_vm7, %v1494_v38, %v1497_v12  ;;  %v1516_v46 = vsel %vm1510_vm8, %v1503_v41, 920167782  ;;  %v1139_v10 = vand.u32 2147483647, %v1138_v37 }
 0x17d   : > { %vm9364_vm9 = vcmp.le.f32.partialorder %v13801_v11, 0.7853982  ;;  %v1141_v18 = vcvt.s32.f32 %v1134_v17  ;;  %vm1508_vm12 = vcmp.lt.s32.totalorder %v9339_v55, 2  ;;  %v1517_v3 = vsel %vm1509_vm10, %v1500_v4, %v1516_v46 }
 0x17e   : > { %v13803_v0 = vsel %vm9364_vm9, 4294967295, %v13802_v0  ;;  %v1518_v14 = vsel %vm1508_vm12, %v1515_v27, %v1517_v3  ;;  %v1519_v47 = vsel %vm1507_vm7, %v1497_v12, %v1500_v4  ;;  %v1520_v5 = vsel %vm1510_vm8, %v1506_v8, 1326507024 }
 0x17f   : > { %13804 = vst [vmem:[#allocation22_spill] sm:$0xff] %v13803_v0  ;;  %v1523_v53 = vshll.u32 %v1483_v24, 8  ;;  %v1239_v59 = vsub.s32 4294967266, %v9348_v42  ;;  %v7623_v63 = vmin.u32 %v1437_v40, %v9325_v1  ;;  %v1328_v17 = vadd.s32 536870912, %v9357_v26 }
 0x180   : > { %v1521_v34 = vsel %vm1509_vm10, %v1503_v41, %v1520_v5  ;;  %v1583_v11 = vshrl.u32 %v1582_v35, 23  ;;  %8064 = vsinq.f32 %v9283_v20  ;;  %v936_v24 = vsel %vm13630_vm6, %v935_v19, %v9288_v7 }
 0x181   : > { %v1522_v37 = vsel %vm1508_vm12, %v1519_v47, %v1521_v34  ;;  %v9389_v44 = vmul.u32.u64.low %v1523_v53, %v1518_v14  ;;  %v9390_v13 = vmul.u32.u64.high %v1523_v53, %v1518_v14, %v9389_v44  ;;  %vm13629_vm13 = vcmp.lt.s32.totalorder %v8765_v15, 0  ;;  %v9425_v47 = vpop.f32.mrb[9].mxu1 }
 0x182   : > { %v9398_v40 = vmul.u32.u64.low %v1523_v53, %v1522_v37  ;;  %v9399_v8 = vmul.u32.u64.high %v1523_v53, %v1522_v37, %v9398_v40  ;;  %v1142_v41 = vmul.f32 %v1141_v18, %v1139_v10  ;;  %v1235_v27 = vsub.s32 32, %v9348_v42 }
 0x183   : > { %v1512_v46 = vsel %vm1510_vm8, %v1500_v4, 2102212464  ;;  %v7630_v3 = vadd.s32 4294967169, %v1583_v11  ;;  %8066 = vcosq.f32 %v9304_v36  ;;  %v1240_v35 = vadd.s32 127, %v1239_v59 }
 0x184   : > { %v1491_v20 = vshrl.u32 %v13786_v60, %v9318_v9  ;;  %v9409_v7 = vadd.f32 %v9312_v28, %v8805_v49  ;;  %v1219_v19 = vadd.s32 %v9053_v56, %v9060_v39  ;;  %v1439_v10 = vclz %v7623_v63 }
 0x185   : > { %v9413_v18 = vshrl.u32 %v1328_v17, 30  ;;  %v1589_v14 = vadd.s32 1, %v7630_v3  ;;  %8068 = vsinq.f32 %v9304_v36  ;;  %v9419_v4 = vsel %vm9364_vm9, %v8677_v50, %v936_v24 }
 0x186   : > { %13805 = vst [vmem:[#allocation23_spill] sm:$0xff] %v9409_v7  ;;  %v1511_v9 = vsel %vm1507_vm7, %v1491_v20, %v1494_v38  ;;  %v1513_v49 = vsel %vm1509_vm10, %v1497_v12, %v1512_v46  ;;  %v1143_v56 = vxor.u32 2147483648, %v1142_v41  ;;  %v1237_v39 = vshrl.u32 %v1219_v19, %v1235_v27 }
 0x187   : > { %13806 = vst [vmem:[#allocation24_spill] sm:$0xff] %v9413_v18  ;;  %v1533_v5 = vadd.s32 1, %v9390_v13  ;;  %vm1590_vm14 = vcmp.gt.s32.totalorder %v1589_v14, 0  ;;  %v1241_v59 = vshll.u32 %v1240_v35, 23  ;;  %vm1532_vm0 = vc.u32 %v9399_v8, %v9389_v44 }
 0x188   : > { %v13545_v36 = vand.u32 2147483647, %v9322_v48  ;;  %v1790_v63 = vand.u32 2139095040, %v9409_v7  ;;  %v7624_v17 = vadd.s32 4294967294, %v1439_v10  ;;  %v1330_v38 = vshll.u32 %v9413_v18, 30 }
 0x189   : > { %v1514_v12 = vsel %vm1508_vm12, %v1511_v9, %v1513_v49  ;;  %v1591_v34 = vsel %vm1590_vm14, %v1589_v14, 0  ;;  %v13807_v37 = vsel %vm9032_vm15, 0, %v9065_v30  ;;  %v13809_v24 = vsel %vm9239_vm2, 0, %v9095_v62 }
 0x18a   : > { %v9439_v11 = vadd.s32 3, %v13807_v37  ;;  %v9445_v40 = vadd.s32 3, %v13809_v24  ;;  %8070 = vcosq.f32 %v9419_v4  ;;  %v1236_v27 = vshll.u32 %v9196_v45, %v9348_v42  ;;  %v9456_v3 = vpop.eup %8064 }
 0x18b   : > { %v9452_v55 = vsel %vm13629_vm13, %v1143_v56, %v1142_v41  ;;  %v1534_v30 = vsel %vm1532_vm0, %v1533_v5, %v9390_v13  ;;  %v1593_v46 = vand.u32 31, %v1591_v34  ;;  %13811 = vst [vmem:[#allocation27_spill] sm:$0xff] %v9456_v3  ;;  %v9460_v62 = vor.u32 4788187, %v1241_v59 }
 0x18c   : > { %13808 = vst [vmem:[#allocation25_spill] sm:$0xff] %v9439_v11  ;;  %13810 = vst [vmem:[#allocation26_spill] sm:$0xff] %v9445_v40  ;;  %v9458_v2 = vor.u32 %v1237_v39, %v1236_v27  ;;  %v1530_v35 = vmul.u32 %v1523_v53, %v1514_v12  ;;  %v1791_v20 = vshrl.u32 %v1790_v63, 23  ;;  %vm7625_vm15 = vcmp.lt.s32.totalorder %v7624_v17, 0 }
 0x18d   : > { %v9463_v42 = vsub.s32 %v9357_v26, %v1330_v38  ;;  %v1586_v45 = vand.u32 8388607, %v13545_v36  ;;  %v1594_v41 = vsub.s32 32, %v1593_v46  ;;  %v9467_v19 = vpop.eup %8066  ;;  %v1592_v10 = vshrl.u32 %v1591_v34, 5 }
 0x18e   : > { %13812 = vst [vmem:[#allocation28_spill] sm:$0xff] %v9467_v19  ;;  %v9469_v13 = vadd.s32 %v1534_v30, %v1530_v35  ;;  %v1596_v14 = vshll.u32 %v13786_v60, %v1593_v46  ;;  %v1599_v9 = vshll.u32 %v13789_v22, %v1593_v46  ;;  %v1602_v26 = vshll.u32 %v13791_v29, %v1593_v46 }
 0x18f   : > { %v1597_v53 = vshrl.u32 %v13789_v22, %v1594_v41  ;;  %v1600_v49 = vshrl.u32 %v13791_v29, %v1594_v41  ;;  %v1603_v56 = vshrl.u32 %v13790_v57, %v1594_v41  ;;  %v9477_v39 = vpop.eup %8068  ;;  %v1605_v5 = vshll.u32 %v13790_v57, %v1593_v46 }
 0x190   : > { %13813 = vst [vmem:[#allocation29_spill] sm:$0xff] %v9477_v39  ;;  %v1606_v59 = vshrl.u32 %v13546_v16, %v1594_v41  ;;  %v1608_v63 = vshll.u32 %v13546_v16, %v1593_v46  ;;  %v7638_v38 = vadd.s32 4294967169, %v1791_v20  ;;  %v1609_v24 = vshrl.u32 %v13792_v54, %v1594_v41 }
 0x191   : > { %v1598_v12 = vor.u32 %v1597_v53, %v1596_v14  ;;  %v1601_v34 = vor.u32 %v1600_v49, %v1599_v9  ;;  %v1604_v37 = vor.u32 %v1603_v56, %v1602_v26  ;;  %v13814_v27 = vand.u32 2147483647, %v8765_v15 }
 0x192   : > { %v13815_v30 = vmov 0  ;;  %vm1165_vm3 = vcmp.lt.s32.totalorder %v8935_v61, 0  ;;  %v1243_v35 = vand.u32 2147483647, %v9460_v62  ;;  %v9492_v36 = vsel %vm7625_vm15, 0, %v7624_v17 }
 0x193   : > { %vm9485_vm2 = vcmp.le.f32.partialorder %v13814_v27, 0.7853982  ;;  %v1536_v46 = vadd.s32 536870912, %v9469_v13  ;;  %v1607_v20 = vor.u32 %v1606_v59, %v1605_v5  ;;  %v1333_v14 = vsub.s32 0, %v9463_v42 }
 0x194   : > { %v13816_v30 = vsel %vm9485_vm2, 4294967295, %v13815_v30  ;;  %v1587_v9 = vor.u32 8388608, %v1586_v45  ;;  %v1610_v53 = vor.u32 %v1609_v24, %v1608_v63  ;;  %vm1611_vm4 = vcmp.lt.s32.totalorder %v1592_v10, 1  ;;  %v9496_v49 = vpop.eup %8070 }
 0x195   : > { %13817 = vst [vmem:[#allocation30_spill] sm:$0xff] %v13816_v30  ;;  %13818 = vst [vmem:[#allocation31_spill] sm:$0xff] %v9496_v49  ;;  %vm1613_vm11 = vcmp.lt.s32.totalorder %v1592_v10, 3  ;;  %vm1614_vm1 = vcmp.lt.s32.totalorder %v1592_v10, 4  ;;  %v1619_v26 = vsel %vm1611_vm4, %v1598_v12, %v1601_v34  ;;  %v1797_v56 = vadd.s32 1, %v7638_v38 }
 0x196   : > { %v1616_v27 = vsel %vm1614_vm1, %v1604_v37, 2102212464  ;;  %v1620_v62 = vsel %vm1614_vm1, %v1607_v20, 920167782  ;;  %v1623_v17 = vsel %vm1611_vm4, %v1601_v34, %v1604_v37  ;;  %v1624_v16 = vsel %vm1614_vm1, %v1610_v53, 1326507024 }
 0x197   : > { %v9500_v58 = vshrl.u32 %v1536_v46, 30  ;;  %v1595_v5 = vshrl.u32 %v13786_v60, %v1594_v41  ;;  %vm1612_vm5 = vcmp.lt.s32.totalorder %v1592_v10, 2  ;;  %v1621_v45 = vsel %vm1613_vm11, %v1604_v37, %v1620_v62 }
 0x198   : > { %v1447_v59 = vsub.s32 4294967266, %v9492_v36  ;;  %v1622_v63 = vsel %vm1612_vm5, %v1619_v26, %v1621_v45  ;;  %v1625_v24 = vsel %vm1613_vm11, %v1607_v20, %v1624_v16  ;;  %v1627_v18 = vshll.u32 %v1587_v9, 8 }
 0x199   : > { %13819 = vst [vmem:[#allocation32_spill] sm:$0xff] %v9500_v58  ;;  %v1615_v38 = vsel %vm1611_vm4, %v1595_v5, %v1598_v12  ;;  %v1617_v19 = vsel %vm1613_vm11, %v1601_v34, %v1616_v27  ;;  %v1626_v53 = vsel %vm1612_vm5, %v1623_v17, %v1625_v24  ;;  %vm1798_vm7 = vcmp.gt.s32.totalorder %v1797_v56, 0 }
 0x19a   : > { %v7619_v46 = vmin.u32 %v1333_v14, %v9463_v42  ;;  %v9511_v41 = vmul.u32.u64.low %v1627_v18, %v1626_v53  ;;  %v9512_v39 = vmul.u32.u64.high %v1627_v18, %v1626_v53, %v9511_v41  ;;  %v1799_v37 = vsel %vm1798_vm7, %v1797_v56, 0 }
 0x19b   : > { %v1245_v62 = vcvt.s32.f32 %v9458_v2  ;;  %v1538_v26 = vshll.u32 %v9500_v58, 30  ;;  %v9516_v45 = vmul.u32.u64.low %v1627_v18, %v1622_v63  ;;  %v9517_v16 = vmul.u32.u64.high %v1627_v18, %v1622_v63, %v9516_v45 }
 0x19c   : > { %v9524_v12 = vsel %vm9485_vm2, %v8765_v15, %v9452_v55  ;;  %v13820_v34 = vsub.s32 4, %v9149_v52  ;;  %v1618_v2 = vsel %vm1612_vm5, %v1615_v38, %v1617_v19  ;;  %v1801_v14 = vand.u32 31, %v1799_v37 }
 0x19d   : > { %v9534_v9 = vmul.f32 %v1245_v62, %v1243_v35  ;;  %v1427_v56 = vadd.s32 %v9160_v31, %v9169_v43  ;;  %v1443_v27 = vsub.s32 32, %v9492_v36  ;;  %v1448_v17 = vadd.s32 127, %v1447_v59 }
 0x19e   : > { %v9531_v20 = vsel %vm1165_vm3, %v13820_v34, %v9149_v52  ;;  %v1335_v55 = vclz %v7619_v46  ;;  %vm1636_vm8 = vc.u32 %v9512_v39, %v9516_v45  ;;  %v13556_v5 = vand.u32 2147483647, %v9409_v7  ;;  %v9542_v52 = vpop.f32.mrb[10].mxu0 }
 0x19f   : > { %v1802_v63 = vsub.s32 32, %v1801_v14  ;;  %v9545_v19 = vsub.s32 %v9469_v13, %v1538_v26  ;;  %v1634_v10 = vmul.u32 %v1627_v18, %v1618_v2  ;;  %v1637_v35 = vadd.s32 1, %v9517_v16 }
 0x1a0   : > { %v1804_v31 = vshll.u32 %v13786_v60, %v1801_v14  ;;  %v1807_v59 = vshll.u32 %v13789_v22, %v1801_v14  ;;  %v1810_v38 = vshll.u32 %v13791_v29, %v1801_v14  ;;  %v1445_v53 = vshrl.u32 %v1427_v56, %v1443_v27 }
 0x1a1   : > { %v1805_v43 = vshrl.u32 %v13789_v22, %v1802_v63  ;;  %v1808_v24 = vshrl.u32 %v13791_v29, %v1802_v63  ;;  %v1449_v46 = vshll.u32 %v1448_v17, 23  ;;  %v1638_v41 = vsel %vm1636_vm8, %v1637_v35, %v9517_v16 }
 0x1a2   : > { %v1811_v13 = vshrl.u32 %v13790_v57, %v1802_v63  ;;  %v7620_v62 = vadd.s32 4294967294, %v1335_v55  ;;  %v1639_v18 = vadd.s32 %v1638_v41, %v1634_v10  ;;  %v9555_v26 = vshrl.u32 %v1799_v37, 5 }
 0x1a3   : > { %v1813_v34 = vshll.u32 %v13790_v57, %v1801_v14  ;;  %v1541_v2 = vsub.s32 0, %v9545_v19  ;;  %v1794_v58 = vand.u32 8388607, %v13556_v5  ;;  %v1806_v40 = vor.u32 %v1805_v43, %v1804_v31 }
 0x1a4   : > { %v13821_v51 = vmov 920167782   ;;  %v1809_v56 = vor.u32 %v1808_v24, %v1807_v59  ;;  %v1812_v27 = vor.u32 %v1811_v13, %v1810_v38  ;;  %v1817_v17 = vshrl.u32 %v13792_v54, %v1802_v63 }
 0x1a5   : > { %v1814_v3 = vshrl.u32 %v13821_v51, %v1802_v63  ;;  %v1816_v16 = vshll.u32 %v13821_v51, %v1801_v14  ;;  %v1444_v37 = vshll.u32 %v9325_v1, %v9492_v36  ;;  %v1640_v55 = vadd.s32 536870912, %v1639_v18 }
 0x1a6   : > { %v9568_v35 = vadd.f32 %v9312_v28, %v8884_v32  ;;  %v1450_v41 = vor.u32 4788187, %v1449_v46  ;;  %vm7621_vm10 = vcmp.lt.s32.totalorder %v7620_v62, 0  ;;  %vm1822_vm12 = vcmp.lt.s32.totalorder %v9555_v26, 4 }
 0x1a7   : > { %v1815_v10 = vor.u32 %v1814_v3, %v1813_v34  ;;  %v1818_v31 = vor.u32 %v1817_v17, %v1816_v16  ;;  %v13823_v43 = vand.u32 2147483647, %v8935_v61  ;;  %v1795_v59 = vor.u32 8388608, %v1794_v58 }
 0x1a8   : > { %13822 = vst [vmem:[#allocation33_spill] sm:$0xff] %v9568_v35  ;;  %vm1819_vm0 = vcmp.lt.s32.totalorder %v9555_v26, 1  ;;  %vm1821_vm15 = vcmp.lt.s32.totalorder %v9555_v26, 3  ;;  %v1446_v1 = vor.u32 %v1445_v53, %v1444_v37  ;;  %v7627_v36 = vmin.u32 %v1541_v2, %v9545_v19 }
 0x1a9   : > { %vm9573_vm14 = vcmp.le.f32.partialorder %v13823_v43, 0.7853982  ;;  %v1828_v32 = vsel %vm1822_vm12, %v1815_v10, 920167782  ;;  %v1827_v3 = vsel %vm1819_vm0, %v1806_v40, %v1809_v56  ;;  %v9586_v38 = vsel %vm7621_vm10, 0, %v7620_v62 }
 0x1aa   : > { %v1829_v24 = vsel %vm1821_vm15, %v1812_v27, %v1828_v32  ;;  %v9588_v46 = vshrl.u32 %v1640_v55, 30  ;;  %v1831_v58 = vsel %vm1819_vm0, %v1809_v56, %v1812_v27  ;;  %v1832_v13 = vsel %vm1822_vm12, %v1818_v31, 1326507024 }
 0x1ab   : > { %v1247_v53 = vxor.u32 2147483648, %v9534_v9  ;;  %v1451_v34 = vand.u32 2147483647, %v1450_v41  ;;  %vm1820_vm4 = vcmp.lt.s32.totalorder %v9555_v26, 2  ;;  %v1833_v2 = vsel %vm1821_vm15, %v1815_v10, %v1832_v13 }
 0x1ac   : > { %v1830_v62 = vsel %vm1820_vm4, %v1827_v3, %v1829_v24  ;;  %v1834_v16 = vsel %vm1820_vm4, %v1831_v58, %v1833_v2  ;;  %v1835_v17 = vshll.u32 %v1795_v59, 8  ;;  %v1686_v37 = vand.u32 2139095040, %v9568_v35 }
 0x1ad   : > { %v1453_v55 = vcvt.s32.f32 %v1446_v1  ;;  %v1343_v31 = vsub.s32 4294967266, %v9586_v38  ;;  %v1543_v43 = vclz %v7627_v36  ;;  %v1803_v41 = vshrl.u32 %v13786_v60, %v1802_v63  ;;  %v9618_v36 = vpop.f32.mrb[10].mxu1 }
 0x1ae   : > { %v1642_v32 = vshll.u32 %v9588_v46, 30  ;;  %v9606_v5 = vmul.u32.u64.low %v1835_v17, %v1834_v16  ;;  %v9607_v11 = vmul.u32.u64.high %v1835_v17, %v1834_v16, %v9606_v5  ;;  %v1687_v10 = vshrl.u32 %v1686_v37, 23  ;;  %13826 = vst [vmem:[#allocation34_spill] sm:$0xff] %v9618_v36  ;;  %v9715_v36 = vpop.permute.xlu1 %665 }
 0x1af   : > { %v1454_v13 = vmul.f32 %v1453_v55, %v1451_v34  ;;  %v1824_v3 = vsel %vm1822_vm12, %v1812_v27, 2102212464  ;;  %v9611_v24 = vmul.u32.u64.low %v1835_v17, %v1830_v62  ;;  %v9612_v59 = vmul.u32.u64.high %v1835_v17, %v1830_v62, %v9611_v24 }
 0x1b0   : > { %8072 = vsinq.f32 %v9419_v4  ;;  %vm1373_vm11 = vcmp.lt.s32.totalorder %v8987_v6, 0  ;;  %v1457_v63 = vsub.s32 4, %v9272_v33  ;;  %v7634_v1 = vadd.s32 4294967169, %v1687_v10 }
 0x1b1   : > { %8074 = vcosq.f32 %v9524_v12  ;;  %v1344_v27 = vadd.s32 127, %v1343_v31  ;;  %v7628_v58 = vadd.s32 4294967294, %v1543_v43  ;;  %v9624_v34 = vsub.s32 %v1639_v18, %v1642_v32 }
 0x1b2   : > { %v1823_v4 = vsel %vm1819_vm0, %v1803_v41, %v1806_v40  ;;  %v1825_v2 = vsel %vm1821_vm15, %v1809_v56, %v1824_v3  ;;  %v1693_v62 = vadd.s32 1, %v7634_v1  ;;  %8076 = vsinq.f32 %v9524_v12 }
 0x1b3   : > { %v1248_v16 = vsel %vm1165_vm3, %v1247_v53, %v9534_v9  ;;  %v1455_v37 = vxor.u32 2147483648, %v1454_v13  ;;  %v1845_v55 = vadd.s32 1, %v9612_v59  ;;  %v9638_v18 = vsel %vm1373_vm11, %v1457_v63, %v9272_v33 }
 0x1b4   : > { %vm1844_vm1 = vc.u32 %v9607_v11, %v9611_v24  ;;  %v13557_v40 = vand.u32 2147483647, %v9568_v35  ;;  %vm1694_vm5 = vcmp.gt.s32.totalorder %v1693_v62, 0  ;;  %v1339_v12 = vsub.s32 32, %v9586_v38 }
 0x1b5   : > { %v1345_v56 = vshll.u32 %v1344_v27, 23  ;;  %v1826_v9 = vsel %vm1820_vm4, %v1823_v4, %v1825_v2  ;;  %v1695_v53 = vsel %vm1694_vm5, %v1693_v62, 0  ;;  %v9649_v31 = vsel %vm9573_vm14, %v8935_v61, %v1248_v16  ;;  %v13827_v62 = vld [vmem:[#allocation12_spill] sm:$0xff] }
 0x1b6   : > { %vm7629_vm3 = vcmp.lt.s32.totalorder %v7628_v58, 0  ;;  %v1645_v33 = vsub.s32 0, %v9624_v34  ;;  %v1697_v43 = vand.u32 31, %v1695_v53  ;;  %v9654_v41 = vsel %vm1373_vm11, %v1455_v37, %v1454_v13 }
 0x1b7   : > { %v1323_v32 = vadd.s32 %v9266_v21, %v9276_v23  ;;  %v1531_v26 = vadd.s32 %v9389_v44, %v9399_v8  ;;  %v1846_v10 = vsel %vm1844_vm1, %v1845_v55, %v9612_v59  ;;  %v1340_v3 = vshll.u32 %v9463_v42, %v9586_v38 }
 0x1b8   : > { %v1842_v63 = vmul.u32 %v1835_v17, %v1826_v9  ;;  %v1690_v1 = vand.u32 8388607, %v13557_v40  ;;  %v1698_v27 = vsub.s32 32, %v1697_v43  ;;  %v9665_v2 = vor.u32 4788187, %v1345_v56 }
 0x1b9   : > { %v1341_v4 = vshrl.u32 %v1323_v32, %v1339_v12  ;;  %v9667_v13 = vsel %vm7629_vm3, 0, %v7628_v58  ;;  %v9671_v21 = vadd.f32 %v9312_v28, %v13827_v62  ;;  %v7631_v44 = vmin.u32 %v1645_v33, %v9624_v34 }
 0x1ba   : > { %v9673_v23 = vpop.eup %8072  ;;  %v9676_v8 = vadd.s32 %v1846_v10, %v1842_v63  ;;  %v1701_v42 = vshrl.u32 %v13789_v22, %v1698_v27  ;;  %v1704_v38 = vshrl.u32 %v13791_v29, %v1698_v27  ;;  %v1700_v59 = vshll.u32 %v13786_v60, %v1697_v43 }
 0x1bb   : > { %13828 = vst [vmem:[#allocation12_spill] sm:$0xff] %v9671_v21  ;;  %13829 = vst [vmem:[#allocation35_spill] sm:$0xff] %v9673_v23  ;;  %v9680_v17 = vpop.eup %8074  ;;  %v1703_v58 = vshll.u32 %v13789_v22, %v1697_v43  ;;  %v1707_v16 = vshrl.u32 %v13790_v57, %v1698_v27  ;;  %v1710_v28 = vshrl.u32 %v13821_v51, %v1698_v27  ;;  %v1691_v37 = vor.u32 8388608, %v1690_v1 }
 0x1bc   : > { %13830 = vst [vmem:[#allocation36_spill] sm:$0xff] %v9680_v17  ;;  %v1696_v55 = vshrl.u32 %v1695_v53, 5  ;;  %v1706_v12 = vshll.u32 %v13791_v29, %v1697_v43  ;;  %v1709_v56 = vshll.u32 %v13790_v57, %v1697_v43  ;;  %v9688_v9 = vpop.eup %8076  ;;  %v1342_v33 = vor.u32 %v1341_v4, %v1340_v3 }
 0x1bd   : > { %13831 = vst [vmem:[#allocation37_spill] sm:$0xff] %v9688_v9  ;;  %v1702_v32 = vor.u32 %v1701_v42, %v1700_v59  ;;  %v1705_v10 = vor.u32 %v1704_v38, %v1703_v58  ;;  %v1894_v63 = vand.u32 2139095040, %v9671_v21  ;;  %v13832_v62 = vand.u32 2147483647, %v8987_v6 }
 0x1be   : > { %v1708_v5 = vor.u32 %v1707_v16, %v1706_v12  ;;  %v1711_v1 = vor.u32 %v1710_v28, %v1709_v56  ;;  %v1712_v53 = vshll.u32 %v13821_v51, %v1697_v43  ;;  %v1713_v61 = vshrl.u32 %v13792_v54, %v1698_v27 }
 0x1bf   : > { %vm9693_vm7 = vcmp.le.f32.partialorder %v13832_v62, 0.7853982  ;;  %v1347_v17 = vand.u32 2147483647, %v9665_v2  ;;  %v1547_v3 = vsub.s32 32, %v9667_v13  ;;  %v1551_v4 = vsub.s32 4294967266, %v9667_v13 }
 0x1c0   : > { %v1848_v42 = vadd.s32 536870912, %v9676_v8  ;;  %v1647_v38 = vclz %v7631_v44  ;;  %v1714_v59 = vor.u32 %v1713_v61, %v1712_v53  ;;  %vm1715_vm8 = vcmp.lt.s32.totalorder %v1696_v55, 1 }
 0x1c1   : > { %v1731_v58 = vshll.u32 %v1691_v37, 8  ;;  %v1699_v62 = vshrl.u32 %v13786_v60, %v1698_v27  ;;  %vm1718_vm10 = vcmp.lt.s32.totalorder %v1696_v55, 4  ;;  %v1723_v16 = vsel %vm1715_vm8, %v1702_v32, %v1705_v10 }
 0x1c2   : > { %v1895_v28 = vshrl.u32 %v1894_v63, 23  ;;  %vm1717_vm12 = vcmp.lt.s32.totalorder %v1696_v55, 3  ;;  %v1720_v43 = vsel %vm1718_vm10, %v1708_v5, 2102212464  ;;  %v1724_v12 = vsel %vm1718_vm10, %v1711_v1, 920167782 }
 0x1c3   : > { %v1727_v56 = vsel %vm1715_vm8, %v1705_v10, %v1708_v5  ;;  %v9704_v2 = vshrl.u32 %v1848_v42, 30  ;;  %vm1716_vm0 = vcmp.lt.s32.totalorder %v1696_v55, 2  ;;  %v1725_v9 = vsel %vm1717_vm12, %v1708_v5, %v1724_v12 }
 0x1c4   : > { %v1728_v30 = vsel %vm1718_vm10, %v1714_v59, 1326507024  ;;  %v1549_v15 = vshrl.u32 %v1531_v26, %v1547_v3  ;;  %v1719_v49 = vsel %vm1715_vm8, %v1699_v62, %v1702_v32  ;;  %v1726_v61 = vsel %vm1716_vm0, %v1723_v16, %v1725_v9  ;;  %v9721_v32 = vpop.f32.mrb[11].mxu0 }
 0x1c5   : > { %v1729_v44 = vsel %vm1717_vm12, %v1711_v1, %v1728_v30  ;;  %v1721_v37 = vsel %vm1717_vm12, %v1705_v10, %v1720_v43  ;;  %v9708_v53 = vmul.u32.u64.low %v1731_v58, %v1726_v61  ;;  %v9709_v23 = vmul.u32.u64.high %v1731_v58, %v1726_v61, %v9708_v53 }
 0x1c6   : > { %v1730_v27 = vsel %vm1716_vm0, %v1727_v56, %v1729_v44  ;;  %v1552_v63 = vadd.s32 127, %v1551_v4  ;;  %v7632_v0 = vadd.s32 4294967294, %v1647_v38  ;;  %v1460_v5 = vsel %vm9693_vm7, 0, %v9638_v18 }
 0x1c7   : > { %v9712_v50 = vmul.u32.u64.low %v1731_v58, %v1730_v27  ;;  %v9713_v42 = vmul.u32.u64.high %v1731_v58, %v1730_v27, %v9712_v50  ;;  %v1349_v26 = vcvt.s32.f32 %v1342_v33  ;;  %v1850_v30 = vshll.u32 %v9704_v2, 30 }
 0x1c8   : > { %v7642_v9 = vadd.s32 4294967169, %v1895_v28  ;;  %v1548_v10 = vshll.u32 %v9545_v19, %v9667_v13  ;;  %v1722_v1 = vsel %vm1716_vm0, %v1719_v49, %v1721_v37  ;;  %v13569_v3 = vand.u32 2147483647, %v9671_v21  ;;  %v13835_v50 = vld [vmem:[#allocation16_spill] sm:$0xff] }
 0x1c9   : > { %v9729_v4 = vadd.f32 %v9715_v36, %v13835_v50  ;;  %8078 = vcosq.f32 %v9649_v31  ;;  %v9736_v18 = vsel %vm9693_vm7, %v8987_v6, %v9654_v41  ;;  %v1741_v33 = vadd.s32 1, %v9709_v23 }
 0x1ca   : > { %v1901_v38 = vadd.s32 1, %v7642_v9  ;;  %v9739_v19 = vmul.f32 %v1349_v26, %v1347_v17  ;;  %v9741_v49 = vor.u32 %v1549_v15, %v1548_v10  ;;  %v1553_v13 = vshll.u32 %v1552_v63, 23 }
 0x1cb   : > { %13836 = vst [vmem:[#allocation16_spill] sm:$0xff] %v9729_v4  ;;  %vm7633_vm15 = vcmp.lt.s32.totalorder %v7632_v0, 0  ;;  %v9744_v55 = vsub.s32 %v9676_v8, %v1850_v30  ;;  %v1738_v59 = vmul.u32 %v1731_v58, %v1722_v1  ;;  %vm1740_vm4 = vc.u32 %v9713_v42, %v9708_v53 }
 0x1cc   : > { %vm1902_vm11 = vcmp.gt.s32.totalorder %v1901_v38, 0  ;;  %v1742_v40 = vsel %vm1740_vm4, %v1741_v33, %v9709_v23  ;;  %v1898_v41 = vand.u32 8388607, %v13569_v3  ;;  %v1998_v17 = vand.u32 2139095040, %v9729_v4 }
 0x1cd   : > { %v1903_v62 = vsel %vm1902_vm11, %v1901_v38, 0  ;;  %8080 = vsinq.f32 %v9649_v31  ;;  %v13837_v15 = vsel %vm9573_vm14, 0, %v9531_v20  ;;  %v9759_v58 = vadd.s32 %v1742_v40, %v1738_v59 }
 0x1ce   : > { %v9757_v8 = vadd.s32 3, %v13837_v15  ;;  %v1905_v16 = vand.u32 31, %v1903_v62  ;;  %8082 = vcosq.f32 %v9736_v18  ;;  %v9762_v23 = vadd.s32 3, %v1460_v5 }
 0x1cf   : > { %v1351_v28 = vxor.u32 2147483648, %v9739_v19  ;;  %v1554_v43 = vor.u32 4788187, %v1553_v13  ;;  %v1557_v12 = vcvt.s32.f32 %v9741_v49  ;;  %v9767_v31 = vsel %vm7633_vm15, 0, %v7632_v0 }
 0x1d0   : > { %13838 = vst [vmem:[#allocation38_spill] sm:$0xff] %v9757_v8  ;;  %13839 = vst [vmem:[#allocation39_spill] sm:$0xff] %v9762_v23  ;;  %v1853_v14 = vsub.s32 0, %v9744_v55  ;;  %v1906_v20 = vsub.s32 32, %v1905_v16  ;;  %v1744_v56 = vadd.s32 536870912, %v9759_v58  ;;  %v1899_v61 = vor.u32 8388608, %v1898_v41 }
 0x1d1   : > { %v1904_v44 = vshrl.u32 %v1903_v62, 5  ;;  %v1999_v37 = vshrl.u32 %v1998_v17, 23  ;;  %v1908_v27 = vshll.u32 %v13786_v60, %v1905_v16  ;;  %v1911_v5 = vshll.u32 %v13789_v22, %v1905_v16 }
 0x1d2   : > { %v1909_v63 = vshrl.u32 %v13789_v22, %v1906_v20  ;;  %v1912_v26 = vshrl.u32 %v13791_v29, %v1906_v20  ;;  %vm13614_vm14 = vcmp.lt.s32.totalorder %v9084_v25, 0  ;;  %v1914_v0 = vshll.u32 %v13791_v29, %v1905_v16 }
 0x1d3   : > { %v1915_v30 = vshrl.u32 %v13790_v57, %v1906_v20  ;;  %v1917_v9 = vshll.u32 %v13790_v57, %v1905_v16  ;;  %v1918_v10 = vshrl.u32 %v13821_v51, %v1906_v20  ;;  %v9780_v1 = vpop.eup %8078  ;;  %v1920_v38 = vshll.u32 %v13821_v51, %v1905_v16 }
 0x1d4   : > { %13840 = vst [vmem:[#allocation40_spill] sm:$0xff] %v9780_v1  ;;  %v1910_v50 = vor.u32 %v1909_v63, %v1908_v27  ;;  %v1913_v33 = vor.u32 %v1912_v26, %v1911_v5  ;;  %v1921_v49 = vshrl.u32 %v13792_v54, %v1906_v20  ;;  %v1555_v13 = vand.u32 2147483647, %v1554_v43 }
 0x1d5   : > { %v1655_v59 = vsub.s32 4294967266, %v9767_v31  ;;  %v1916_v40 = vor.u32 %v1915_v30, %v1914_v0  ;;  %v1919_v41 = vor.u32 %v1918_v10, %v1917_v9  ;;  %v13841_v62 = vand.u32 2147483647, %v9084_v25 }
 0x1d6   : > { %v13842_v17 = vmov 0  ;;  %v7639_v15 = vmin.u32 %v1853_v14, %v9744_v55  ;;  %v9792_v3 = vshrl.u32 %v1744_v56, 30  ;;  %v1922_v27 = vor.u32 %v1921_v49, %v1920_v38 }
 0x1d7   : > { %vm9787_vm1 = vcmp.le.f32.partialorder %v13841_v62, 0.7853982  ;;  %vm1923_vm5 = vcmp.lt.s32.totalorder %v1904_v44, 1  ;;  %vm1926_vm3 = vcmp.lt.s32.totalorder %v1904_v44, 4  ;;  %v1939_v43 = vshll.u32 %v1899_v61, 8  ;;  %v9795_v5 = vpop.eup %8080  ;;  %v13848_v62 = vld [vmem:[#allocation18_spill] sm:$0xff] }
 0x1d8   : > { %v13843_v17 = vsel %vm9787_vm1, 4294967295, %v13842_v17  ;;  %13845 = vst [vmem:[#allocation42_spill] sm:$0xff] %v9792_v3  ;;  %v1931_v16 = vsel %vm1923_vm5, %v1910_v50, %v1913_v33  ;;  %v7646_v63 = vadd.s32 4294967169, %v1999_v37  ;;  %13846 = vst [vmem:[#allocation43_spill] sm:$0xff] %v9795_v5  ;;  %v1907_v26 = vshrl.u32 %v13786_v60, %v1906_v20  ;;  %v9798_v9 = vpop.eup %8082 }
 0x1d9   : > { %13844 = vst [vmem:[#allocation41_spill] sm:$0xff] %v13843_v17  ;;  %vm1925_vm7 = vcmp.lt.s32.totalorder %v1904_v44, 3  ;;  %v1928_v0 = vsel %vm1926_vm3, %v1916_v40, 2102212464  ;;  %v1932_v30 = vsel %vm1926_vm3, %v1919_v41, 920167782  ;;  %v1935_v56 = vsel %vm1923_vm5, %v1913_v33, %v1916_v40 }
 0x1da   : > { %13847 = vst [vmem:[#allocation44_spill] sm:$0xff] %v9798_v9  ;;  %vm1924_vm8 = vcmp.lt.s32.totalorder %v1904_v44, 2  ;;  %v1933_v14 = vsel %vm1925_vm7, %v1916_v40, %v1932_v30  ;;  %v1936_v10 = vsel %vm1926_vm3, %v1922_v27, 1326507024  ;;  %v1855_v38 = vclz %v7639_v15  ;;  %v9810_v30 = vpop.f32.mrb[11].mxu1  ;;  %v13850_v44 = vld [vmem:[#allocation17_spill] sm:$0xff] }
 0x1db   : > { %v1746_v49 = vshll.u32 %v9792_v3, 30  ;;  %v1927_v61 = vsel %vm1923_vm5, %v1907_v26, %v1910_v50  ;;  %v1934_v37 = vsel %vm1924_vm8, %v1931_v16, %v1933_v14  ;;  %vm13597_vm10 = vcmp.lt.s32.totalorder %v13848_v62, 0  ;;  %13849 = vst [vmem:[#allocation45_spill] sm:$0xff] %v9810_v30 }
 0x1dc   : > { %vm1581_vm12 = vcmp.lt.s32.totalorder %v9322_v48, 0  ;;  %v1929_v20 = vsel %vm1925_vm7, %v1913_v33, %v1928_v0  ;;  %v1937_v6 = vsel %vm1925_vm7, %v1919_v41, %v1936_v10  ;;  %v1352_v40 = vsel %vm13614_vm14, %v1351_v28, %v9739_v19 }
 0x1dd   : > { %v9806_v23 = vmul.u32.u64.low %v1939_v43, %v1934_v37  ;;  %v9807_v9 = vmul.u32.u64.high %v1939_v43, %v1934_v37, %v9806_v23  ;;  %v1558_v15 = vmul.f32 %v1557_v12, %v1555_v13  ;;  %v1651_v50 = vsub.s32 32, %v9767_v31 }
 0x1de   : > { %v1938_v27 = vsel %vm1924_vm8, %v1935_v56, %v1937_v6  ;;  %v1656_v16 = vadd.s32 127, %v1655_v59  ;;  %v2005_v33 = vadd.s32 1, %v7646_v63  ;;  %v1635_v41 = vadd.s32 %v9516_v45, %v9512_v39 }
 0x1df   : > { %v9817_v26 = vmul.u32.u64.low %v1939_v43, %v1938_v27  ;;  %v9818_v14 = vmul.u32.u64.high %v1939_v43, %v1938_v27, %v9817_v26  ;;  %v9823_v0 = vsub.s32 %v9759_v58, %v1746_v49  ;;  %v1930_v10 = vsel %vm1924_vm8, %v1927_v61, %v1929_v20 }
 0x1e0   : > { %v13572_v19 = vand.u32 2147483647, %v9729_v4  ;;  %v9830_v28 = vsel %vm9787_vm1, %v9084_v25, %v1352_v40  ;;  %v7640_v6 = vadd.s32 4294967294, %v1855_v38  ;;  %v1949_v12 = vadd.s32 1, %v9807_v9 }
 0x1e1   : > { %vm2006_vm0 = vcmp.gt.s32.totalorder %v2005_v33, 0  ;;  %v1559_v13 = vxor.u32 2147483648, %v1558_v15  ;;  %v1653_v59 = vshrl.u32 %v1635_v41, %v1651_v50  ;;  %v1665_v39 = vsub.s32 4, %v9588_v46 }
 0x1e2   : > { %v2007_v45 = vsel %vm2006_vm0, %v2005_v33, 0  ;;  %v1657_v58 = vshll.u32 %v1656_v16, 23  ;;  %v1946_v63 = vmul.u32 %v1939_v43, %v1930_v10  ;;  %vm1948_vm15 = vc.u32 %v9818_v14, %v9806_v23 }
 0x1e3   : > { %v9838_v56 = vadd.f32 %v9715_v36, %v13850_v44  ;;  %v1652_v38 = vshll.u32 %v9624_v34, %v9767_v31  ;;  %v1749_v49 = vsub.s32 0, %v9823_v0  ;;  %v1950_v61 = vsel %vm1948_vm15, %v1949_v12, %v9807_v9 }
 0x1e4   : > { %v2002_v37 = vand.u32 8388607, %v13572_v19  ;;  %8084 = vsinq.f32 %v9736_v18  ;;  %vm7641_vm4 = vcmp.lt.s32.totalorder %v7640_v6, 0  ;;  %v9847_v43 = vadd.s32 %v1950_v61, %v1946_v63 }
 0x1e5   : > { %13851 = vst [vmem:[#allocation17_spill] sm:$0xff] %v9838_v56  ;;  %v2009_v20 = vand.u32 31, %v2007_v45  ;;  %8086 = vcosq.f32 %v9830_v28  ;;  %v9852_v40 = vsel %vm13597_vm10, %v1559_v13, %v1558_v15  ;;  %v9854_v34 = vor.u32 %v1653_v59, %v1652_v38 }
 0x1e6   : > { %v9859_v31 = vsel %vm1581_vm12, %v1665_v39, %v9588_v46  ;;  %v9861_v9 = vor.u32 4788187, %v1657_v58  ;;  %v9863_v18 = vshrl.u32 %v2007_v45, 5  ;;  %v2206_v27 = vand.u32 2139095040, %v9838_v56 }
 0x1e7   : > { %v2010_v50 = vsub.s32 32, %v2009_v20  ;;  %v9866_v16 = vsel %vm7641_vm4, 0, %v7640_v6  ;;  %v7635_v26 = vmin.u32 %v1749_v49, %v9823_v0  ;;  %v1952_v15 = vadd.s32 536870912, %v9847_v43 }
 0x1e8   : > { %v2003_v33 = vor.u32 8388608, %v2002_v37  ;;  %v2012_v41 = vshll.u32 %v13786_v60, %v2009_v20  ;;  %v2015_v46 = vshll.u32 %v13789_v22, %v2009_v20  ;;  %v2018_v13 = vshll.u32 %v13791_v29, %v2009_v20 }
 0x1e9   : > { %v2013_v10 = vshrl.u32 %v13789_v22, %v2010_v50  ;;  %v2016_v12 = vshrl.u32 %v13791_v29, %v2010_v50  ;;  %v2019_v59 = vshrl.u32 %v13790_v57, %v2010_v50  ;;  %v2021_v6 = vshll.u32 %v13790_v57, %v2009_v20 }
 0x1ea   : > { %v2022_v39 = vshrl.u32 %v13821_v51, %v2010_v50  ;;  %vm2027_vm11 = vcmp.lt.s32.totalorder %v9863_v18, 1  ;;  %v2207_v63 = vshrl.u32 %v2206_v27, 23  ;;  %v13852_v44 = vand.u32 2147483647, %v13848_v62 }
 0x1eb   : > { %v2014_v45 = vor.u32 %v2013_v10, %v2012_v41  ;;  %v2017_v58 = vor.u32 %v2016_v12, %v2015_v46  ;;  %v13853_v38 = vmov 0  ;;  %v2020_v49 = vor.u32 %v2019_v59, %v2018_v13 }
 0x1ec   : > { %vm9881_vm5 = vcmp.le.f32.partialorder %v13852_v44, 0.7853982  ;;  %v2023_v61 = vor.u32 %v2022_v39, %v2021_v6  ;;  %v2024_v37 = vshll.u32 %v13821_v51, %v2009_v20  ;;  %v2025_v19 = vshrl.u32 %v13792_v54, %v2010_v50 }
 0x1ed   : > { %v13854_v38 = vsel %vm9881_vm5, 4294967295, %v13853_v38  ;;  %v1863_v1 = vsub.s32 4294967266, %v9866_v16  ;;  %v1751_v5 = vclz %v7635_v26  ;;  %vm2030_vm3 = vcmp.lt.s32.totalorder %v9863_v18, 4 }
 0x1ee   : > { %13855 = vst [vmem:[#allocation46_spill] sm:$0xff] %v13854_v38  ;;  %v2035_v27 = vsel %vm2027_vm11, %v2014_v45, %v2017_v58  ;;  %v13856_v41 = vand.u32 2147483647, %v9322_v48  ;;  %v9897_v46 = vshrl.u32 %v1952_v15, 30  ;;  %v2026_v12 = vor.u32 %v2025_v19, %v2024_v37  ;;  %v9900_v13 = vpop.eup %8084 }
 0x1ef   : > { %vm2029_vm8 = vcmp.lt.s32.totalorder %v9863_v18, 3  ;;  %v2036_v20 = vsel %vm2030_vm3, %v2023_v61, 920167782  ;;  %13860 = vst [vmem:[#allocation48_spill] sm:$0xff] %v9900_v13  ;;  %vm2028_vm0 = vcmp.lt.s32.totalorder %v9863_v18, 2  ;;  %v2039_v59 = vsel %vm2027_vm11, %v2017_v58, %v2020_v49  ;;  %v9907_v39 = vpop.eup %8086 }
 0x1f0   : > { %vm9893_vm7 = vcmp.le.f32.partialorder %v13856_v41, 0.7853982  ;;  %13859 = vst [vmem:[#allocation47_spill] sm:$0xff] %v9897_v46  ;;  %v2037_v26 = vsel %vm2029_vm8, %v2020_v49, %v2036_v20  ;;  %v2043_v6 = vshll.u32 %v2003_v33, 8  ;;  %13861 = vst [vmem:[#allocation49_spill] sm:$0xff] %v9907_v39  ;;  %v7654_v37 = vadd.s32 4294967169, %v2207_v63 }
 0x1f1   : > { %v2032_v44 = vsel %vm2030_vm3, %v2020_v49, 2102212464  ;;  %v2038_v19 = vsel %vm2028_vm0, %v2035_v27, %v2037_v26  ;;  %v2040_v15 = vsel %vm2030_vm3, %v2026_v12, 1326507024  ;;  %v2011_v41 = vshrl.u32 %v13786_v60, %v2010_v50 }
 0x1f2   : > { %v2041_v13 = vsel %vm2029_vm8, %v2023_v61, %v2040_v15  ;;  %v9914_v8 = vmul.u32.u64.low %v2043_v6, %v2038_v19  ;;  %v9915_v17 = vmul.u32.u64.high %v2043_v6, %v2038_v19, %v9914_v8  ;;  %v1659_v20 = vand.u32 2147483647, %v9861_v9 }
 0x1f3   : > { %v1859_v33 = vsub.s32 32, %v9866_v16  ;;  %v1954_v49 = vshll.u32 %v9897_v46, 30  ;;  %v2042_v27 = vsel %vm2028_vm0, %v2039_v59, %v2041_v13  ;;  %v2031_v63 = vsel %vm2027_vm11, %v2011_v41, %v2014_v45 }
 0x1f4   : > { %v2033_v50 = vsel %vm2029_vm8, %v2017_v58, %v2032_v44  ;;  %v9927_v61 = vmul.u32.u64.low %v2043_v6, %v2042_v27  ;;  %v9928_v12 = vmul.u32.u64.high %v2043_v6, %v2042_v27, %v9927_v61  ;;  %v1661_v26 = vcvt.s32.f32 %v9854_v34  ;;  %v9955_v44 = vpop.f32.mrb[12].mxu0 }
 0x1f5   : > { %v1843_v9 = vadd.s32 %v9611_v24, %v9607_v11  ;;  %v7636_v19 = vadd.s32 4294967294, %v1751_v5  ;;  %v2213_v15 = vadd.s32 1, %v7654_v37  ;;  %8088 = vsinq.f32 %v9830_v28  ;;  %13862 = vst [vmem:[#allocation50_spill] sm:$0xff] %v9955_v44 }
 0x1f6   : > { %v9938_v45 = vsel %vm9881_vm5, %v13848_v62, %v9852_v40  ;;  %v1864_v13 = vadd.s32 127, %v1863_v1  ;;  %v2053_v58 = vadd.s32 1, %v9915_v17  ;;  %v1662_v59 = vmul.f32 %v1661_v26, %v1659_v20 }
 0x1f7   : > { %vm1789_vm15 = vcmp.lt.s32.totalorder %v9409_v7, 0  ;;  %v1861_v34 = vshrl.u32 %v1843_v9, %v1859_v33  ;;  %v2034_v11 = vsel %vm2028_vm0, %v2031_v63, %v2033_v50  ;;  %vm2214_vm4 = vcmp.gt.s32.totalorder %v2213_v15, 0 }
 0x1f8   : > { %v9948_v5 = vsub.s32 %v9847_v43, %v1954_v49  ;;  %vm2052_vm11 = vc.u32 %v9928_v12, %v9914_v8  ;;  %v2215_v1 = vsel %vm2214_vm4, %v2213_v15, 0  ;;  %v1860_v28 = vshll.u32 %v9744_v55, %v9866_v16 }
 0x1f9   : > { %vm7637_vm3 = vcmp.lt.s32.totalorder %v7636_v19, 0  ;;  %v2054_v40 = vsel %vm2052_vm11, %v2053_v58, %v9915_v17  ;;  %v2217_v18 = vand.u32 31, %v2215_v1  ;;  %8090 = vcosq.f32 %v9938_v45 }
 0x1fa   : > { %v1865_v37 = vshll.u32 %v1864_v13, 23  ;;  %v1873_v41 = vsub.s32 4, %v9704_v2  ;;  %v2050_v43 = vmul.u32 %v2043_v6, %v2034_v11  ;;  %v1663_v20 = vxor.u32 2147483648, %v1662_v59 }
 0x1fb   : > { %v1862_v33 = vor.u32 %v1861_v34, %v1860_v28  ;;  %v13581_v49 = vand.u32 2147483647, %v9838_v56  ;;  %v2218_v27 = vsub.s32 32, %v2217_v18  ;;  %v9960_v63 = vsel %vm7637_vm3, 0, %v7636_v19  ;;  %v13863_v28 = vld [vmem:[#allocation19_spill] sm:$0xff] }
 0x1fc   : > { %v1957_v55 = vsub.s32 0, %v9948_v5  ;;  %v9963_v16 = vadd.s32 %v2054_v40, %v2050_v43  ;;  %v2220_v17 = vshll.u32 %v13786_v60, %v2217_v18  ;;  %v2223_v61 = vshll.u32 %v13789_v22, %v2217_v18 }
 0x1fd   : > { %v2221_v50 = vshrl.u32 %v13789_v22, %v2218_v27  ;;  %v2224_v26 = vshrl.u32 %v13791_v29, %v2218_v27  ;;  %v2229_v6 = vshll.u32 %v13790_v57, %v2217_v18  ;;  %v1866_v9 = vor.u32 4788187, %v1865_v37 }
 0x1fe   : > { %v2226_v15 = vshll.u32 %v13791_v29, %v2217_v18  ;;  %v2227_v19 = vshrl.u32 %v13790_v57, %v2218_v27  ;;  %v2230_v13 = vshrl.u32 %v13821_v51, %v2218_v27  ;;  %v1759_v58 = vsub.s32 4294967266, %v9960_v63 }
 0x1ff   : > { %v2210_v34 = vand.u32 8388607, %v13581_v49  ;;  %v2232_v11 = vshll.u32 %v13821_v51, %v2217_v18  ;;  %v9979_v40 = vadd.f32 %v9715_v36, %v13863_v28  ;;  %v9981_v43 = vpop.eup %8088  ;;  %v9986_v37 = vsel %vm1789_vm15, %v1873_v41, %v9704_v2 }
 0x200   : > { %13864 = vst [vmem:[#allocation19_spill] sm:$0xff] %v9981_v43  ;;  %v7643_v24 = vmin.u32 %v1957_v55, %v9948_v5  ;;  %v2056_v46 = vadd.s32 536870912, %v9963_v16  ;;  %v2216_v38 = vshrl.u32 %v2215_v1, 5  ;;  %v2222_v62 = vor.u32 %v2221_v50, %v2220_v17 }
 0x201   : > { %v2225_v49 = vor.u32 %v2224_v26, %v2223_v61  ;;  %v2231_v39 = vor.u32 %v2230_v13, %v2229_v6  ;;  %v2233_v18 = vshrl.u32 %v13792_v54, %v2218_v27  ;;  %v1664_v28 = vsel %vm1581_vm12, %v1663_v20, %v1662_v59 }
 0x202   : > { %v1867_v3 = vand.u32 2147483647, %v1866_v9  ;;  %v1869_v43 = vcvt.s32.f32 %v1862_v33  ;;  %v2228_v25 = vor.u32 %v2227_v19, %v2226_v15  ;;  %v1760_v44 = vadd.s32 127, %v1759_v58 }
 0x203   : > { %v2211_v30 = vor.u32 8388608, %v2210_v34  ;;  %v2234_v2 = vor.u32 %v2233_v18, %v2232_v11  ;;  %v2102_v41 = vand.u32 2139095040, %v9979_v40  ;;  %v9994_v55 = vpop.eup %8090  ;;  %v13866_v1 = vand.u32 2147483647, %v9409_v7 }
 0x204   : > { %13865 = vst [vmem:[#allocation51_spill] sm:$0xff] %v9994_v55  ;;  %v10002_v50 = vshrl.u32 %v2056_v46, 30  ;;  %v2219_v59 = vshrl.u32 %v13786_v60, %v2218_v27  ;;  %vm2235_vm12 = vcmp.lt.s32.totalorder %v2216_v38, 1  ;;  %vm2238_vm0 = vcmp.lt.s32.totalorder %v2216_v38, 4 }
 0x205   : > { %vm9998_vm8 = vcmp.le.f32.partialorder %v13866_v1, 0.7853982  ;;  %v1959_v20 = vclz %v7643_v24  ;;  %vm2237_vm4 = vcmp.lt.s32.totalorder %v2216_v38, 3  ;;  %v2243_v33 = vsel %vm2235_vm12, %v2222_v62, %v2225_v49 }
 0x206   : > { %v2244_v61 = vsel %vm2238_vm0, %v2231_v39, 920167782  ;;  %vm2236_vm11 = vcmp.lt.s32.totalorder %v2216_v38, 2  ;;  %v2240_v26 = vsel %vm2238_vm0, %v2228_v25, 2102212464  ;;  %v2247_v9 = vsel %vm2235_vm12, %v2225_v49, %v2228_v25 }
 0x207   : > { %v2245_v6 = vsel %vm2237_vm4, %v2228_v25, %v2244_v61  ;;  %v2248_v19 = vsel %vm2238_vm0, %v2234_v2, 1326507024  ;;  %v2251_v13 = vshll.u32 %v2211_v30, 8  ;;  %v2103_v46 = vshrl.u32 %v2102_v41, 23  ;;  %v10019_v30 = vpop.f32.mrb[12].mxu1 }
 0x208   : > { %v2246_v15 = vsel %vm2236_vm11, %v2243_v33, %v2245_v6  ;;  %v1870_v58 = vmul.f32 %v1869_v43, %v1867_v3  ;;  %v2058_v27 = vshll.u32 %v10002_v50, 30  ;;  %v2239_v34 = vsel %vm2235_vm12, %v2219_v59, %v2222_v62 }
 0x209   : > { %v2249_v24 = vsel %vm2237_vm4, %v2231_v39, %v2248_v19  ;;  %v2241_v11 = vsel %vm2237_vm4, %v2225_v49, %v2240_v26  ;;  %v10011_v1 = vmul.u32.u64.low %v2251_v13, %v2246_v15  ;;  %v10012_v55 = vmul.u32.u64.high %v2251_v13, %v2246_v15, %v10011_v1 }
 0x20a   : > { %v2250_v18 = vsel %vm2236_vm11, %v2247_v9, %v2249_v24  ;;  %v1755_v25 = vsub.s32 32, %v9960_v63  ;;  %v7644_v61 = vadd.s32 4294967294, %v1959_v20  ;;  %8092 = vsinq.f32 %v9938_v45 }
 0x20b   : > { %v10016_v33 = vmul.u32.u64.low %v2251_v13, %v2250_v18  ;;  %v10017_v2 = vmul.u32.u64.high %v2251_v13, %v2250_v18, %v10016_v33  ;;  %v13869_v3 = vsel %vm9893_vm7, 0, %v9859_v31  ;;  %v1761_v39 = vshll.u32 %v1760_v44, 23 }
 0x20c   : > { %v10026_v62 = vadd.s32 3, %v13869_v3  ;;  %v7650_v49 = vadd.s32 4294967169, %v2103_v46  ;;  %v1739_v43 = vadd.s32 %v9708_v53, %v9713_v42  ;;  %v10031_v41 = vsub.s32 %v9963_v16, %v2058_v27 }
 0x20d   : > { %v2242_v59 = vsel %vm2236_vm11, %v2239_v34, %v2241_v11  ;;  %v10036_v20 = vadd.f32 %v9715_v36, %v9425_v47  ;;  %v10041_v31 = vsel %vm9893_vm7, %v9322_v48, %v1664_v28  ;;  %v1876_v45 = vsel %vm9998_vm8, 0, %v9986_v37 }
 0x20e   : > { %13870 = vst [vmem:[#allocation52_spill] sm:$0xff] %v10026_v62  ;;  %v2261_v53 = vadd.s32 1, %v10012_v55  ;;  %v2109_v42 = vadd.s32 1, %v7650_v49  ;;  %v1871_v44 = vxor.u32 2147483648, %v1870_v58  ;;  %v1757_v16 = vshrl.u32 %v1739_v43, %v1755_v25 }
 0x20f   : > { %13871 = vst [vmem:[#allocation53_spill] sm:$0xff] %v10036_v20  ;;  %vm7645_vm3 = vcmp.lt.s32.totalorder %v7644_v61, 0  ;;  %v13589_v38 = vand.u32 2147483647, %v9979_v40  ;;  %v1762_v26 = vor.u32 4788187, %v1761_v39  ;;  %v2258_v47 = vmul.u32 %v2251_v13, %v2242_v59 }
 0x210   : > { %vm2260_vm12 = vc.u32 %v10017_v2, %v10011_v1  ;;  %vm2110_vm0 = vcmp.gt.s32.totalorder %v2109_v42, 0  ;;  %v1756_v36 = vshll.u32 %v9823_v0, %v9960_v63  ;;  %v2061_v10 = vsub.s32 0, %v10031_v41 }
 0x211   : > { %v2262_v37 = vsel %vm2260_vm12, %v2261_v53, %v10012_v55  ;;  %v2111_v28 = vsel %vm2110_vm0, %v2109_v42, 0  ;;  %v10054_v6 = vadd.s32 3, %v1876_v45  ;;  %v10056_v9 = vsel %vm7645_vm3, 0, %v7644_v61 }
 0x212   : > { %v10058_v15 = vadd.s32 %v2262_v37, %v2258_v47  ;;  %v2113_v19 = vand.u32 31, %v2111_v28  ;;  %8094 = vcosq.f32 %v10041_v31  ;;  %v10063_v13 = vsel %vm1789_vm15, %v1871_v44, %v1870_v58 }
 0x213   : > { %13872 = vst [vmem:[#allocation54_spill] sm:$0xff] %v10054_v6  ;;  %v1758_v46 = vor.u32 %v1757_v16, %v1756_v36  ;;  %v1947_v0 = vadd.s32 %v9806_v23, %v9818_v14  ;;  %v1763_v63 = vand.u32 2147483647, %v1762_v26  ;;  %v2106_v55 = vand.u32 8388607, %v13589_v38 }
 0x214   : > { %v2114_v27 = vsub.s32 32, %v2113_v19  ;;  %v2310_v34 = vand.u32 2139095040, %v10036_v20  ;;  %v1963_v24 = vsub.s32 32, %v10056_v9  ;;  %v1967_v11 = vsub.s32 4294967266, %v10056_v9  ;;  %v10074_v25 = vpop.eup %8092 }
 0x215   : > { %v7647_v18 = vmin.u32 %v2061_v10, %v10031_v41  ;;  %v2264_v58 = vadd.s32 536870912, %v10058_v15  ;;  %13873 = vst [vmem:[#allocation55_spill] sm:$0xff] %v10074_v25  ;;  %v2116_v61 = vshll.u32 %v13786_v60, %v2113_v19  ;;  %v2119_v14 = vshll.u32 %v13789_v22, %v2113_v19 }
 0x216   : > { %v2117_v23 = vshrl.u32 %v13789_v22, %v2114_v27  ;;  %v2120_v33 = vshrl.u32 %v13791_v29, %v2114_v27  ;;  %v2122_v3 = vshll.u32 %v13791_v29, %v2113_v19  ;;  %v2123_v39 = vshrl.u32 %v13790_v57, %v2114_v27 }
 0x217   : > { %v2125_v49 = vshll.u32 %v13790_v57, %v2113_v19  ;;  %v2126_v43 = vshrl.u32 %v13821_v51, %v2114_v27  ;;  %v1765_v59 = vcvt.s32.f32 %v1758_v46  ;;  %v2112_v45 = vshrl.u32 %v2111_v28, 5 }
 0x218   : > { %v2118_v53 = vor.u32 %v2117_v23, %v2116_v61  ;;  %v2311_v42 = vshrl.u32 %v2310_v34, 23  ;;  %v2121_v44 = vor.u32 %v2120_v33, %v2119_v14  ;;  %v2124_v16 = vor.u32 %v2123_v39, %v2122_v3 }
 0x219   : > { %v2127_v26 = vor.u32 %v2126_v43, %v2125_v49  ;;  %v2129_v47 = vshrl.u32 %v13792_v54, %v2114_v27  ;;  %v1766_v36 = vmul.f32 %v1765_v59, %v1763_v63  ;;  %v1964_v10 = vshll.u32 %v9948_v5, %v10056_v9 }
 0x21a   : > { %v10087_v37 = vshrl.u32 %v2264_v58, 30  ;;  %v2128_v38 = vshll.u32 %v13821_v51, %v2113_v19  ;;  %v1965_v6 = vshrl.u32 %v1947_v0, %v1963_v24  ;;  %v1968_v48 = vadd.s32 127, %v1967_v11 }
 0x21b   : > { %v2063_v62 = vclz %v7647_v18  ;;  %v2107_v46 = vor.u32 8388608, %v2106_v55  ;;  %vm2131_vm7 = vcmp.lt.s32.totalorder %v2112_v45, 1  ;;  %vm2134_vm15 = vcmp.lt.s32.totalorder %v2112_v45, 4 }
 0x21c   : > { %v2130_v28 = vor.u32 %v2129_v47, %v2128_v38  ;;  %v7658_v34 = vadd.s32 4294967169, %v2311_v42  ;;  %v10090_v61 = vpop.eup %8094  ;;  %vm13603_vm4 = vcmp.lt.s32.totalorder %v9568_v35, 0  ;;  %vm2133_vm11 = vcmp.lt.s32.totalorder %v2112_v45, 3 }
 0x21d   : > { %13874 = vst [vmem:[#allocation56_spill] sm:$0xff] %v10090_v61  ;;  %v2136_v63 = vsel %vm2134_vm15, %v2124_v16, 2102212464  ;;  %v2139_v5 = vsel %vm2131_vm7, %v2118_v53, %v2121_v44  ;;  %v2140_v9 = vsel %vm2134_vm15, %v2127_v26, 920167782  ;;  %v2266_v19 = vshll.u32 %v10087_v37, 30 }
 0x21e   : > { %v2115_v0 = vshrl.u32 %v13786_v60, %v2114_v27  ;;  %vm2132_vm3 = vcmp.lt.s32.totalorder %v2112_v45, 2  ;;  %v2141_v38 = vsel %vm2133_vm11, %v2124_v16, %v2140_v9  ;;  %v7648_v55 = vadd.s32 4294967294, %v2063_v62 }
 0x21f   : > { %v2142_v24 = vsel %vm2132_vm3, %v2139_v5, %v2141_v38  ;;  %v2143_v11 = vsel %vm2131_vm7, %v2121_v44, %v2124_v16  ;;  %v2147_v18 = vshll.u32 %v2107_v46, 8  ;;  %v1969_v58 = vshll.u32 %v1968_v48, 23  ;;  %v10122_v46 = vpop.f32.mrb[13].mxu0 }
 0x220   : > { %v2135_v23 = vsel %vm2131_vm7, %v2115_v0, %v2118_v53  ;;  %v2137_v14 = vsel %vm2133_vm11, %v2121_v44, %v2136_v63  ;;  %v2144_v33 = vsel %vm2134_vm15, %v2130_v28, 1326507024  ;;  %v2317_v49 = vadd.s32 1, %v7658_v34  ;;  %v10132_v28 = vpop.permute.xlu0 %670 }
 0x221   : > { %v2145_v3 = vsel %vm2133_vm11, %v2127_v26, %v2144_v33  ;;  %v10105_v39 = vmul.u32.u64.low %v2147_v18, %v2142_v24  ;;  %v10106_v27 = vmul.u32.u64.high %v2147_v18, %v2142_v24, %v10105_v39  ;;  %v1767_v62 = vxor.u32 2147483648, %v1766_v36 }
 0x222   : > { %v10109_v43 = vor.u32 %v1965_v6, %v1964_v10  ;;  %v10112_v59 = vsub.s32 %v10058_v15, %v2266_v19  ;;  %v2146_v48 = vsel %vm2132_vm3, %v2143_v11, %v2145_v3  ;;  %vm7649_vm12 = vcmp.lt.s32.totalorder %v7648_v55, 0 }
 0x223   : > { %v10115_v53 = vmul.u32.u64.low %v2147_v18, %v2146_v48  ;;  %v10116_v42 = vmul.u32.u64.high %v2147_v18, %v2146_v48, %v10115_v53  ;;  %vm2318_vm0 = vcmp.gt.s32.totalorder %v2317_v49, 0  ;;  %v10118_v44 = vor.u32 4788187, %v1969_v58 }
 0x224   : > { %v2138_v16 = vsel %vm2132_vm3, %v2135_v23, %v2137_v14  ;;  %v13591_v26 = vand.u32 2147483647, %v10036_v20  ;;  %v2319_v47 = vsel %vm2318_vm0, %v2317_v49, 0  ;;  %8096 = vsinq.f32 %v10041_v31 }
 0x225   : > { %v10129_v6 = vsel %vm9998_vm8, %v9409_v7, %v10063_v13  ;;  %v2157_v15 = vadd.s32 1, %v10106_v27  ;;  %v2321_v10 = vand.u32 31, %v2319_v47  ;;  %v10136_v45 = vsel %vm13603_vm4, %v1767_v62, %v1766_v36 }
 0x226   : > { %v10140_v63 = vsel %vm7649_vm12, 0, %v7648_v55  ;;  %v2269_v31 = vsub.s32 0, %v10112_v59  ;;  %v2154_v5 = vmul.u32 %v2147_v18, %v2138_v16  ;;  %vm2156_vm8 = vc.u32 %v10116_v42, %v10105_v39 }
 0x227   : > { %v2322_v17 = vsub.s32 32, %v2321_v10  ;;  %v10147_v13 = vadd.f32 %v10132_v28, %v9542_v52  ;;  %v2158_v19 = vsel %vm2156_vm8, %v2157_v15, %v10106_v27  ;;  %v2314_v0 = vand.u32 8388607, %v13591_v26 }
 0x228   : > { %v2071_v38 = vsub.s32 4294967266, %v10140_v63  ;;  %v2159_v55 = vadd.s32 %v2158_v19, %v2154_v5  ;;  %v7655_v18 = vmin.u32 %v2269_v31, %v10112_v59  ;;  %v2324_v52 = vshll.u32 %v13786_v60, %v2321_v10 }
 0x229   : > { %13875 = vst [vmem:[#allocation57_spill] sm:$0xff] %v10147_v13  ;;  %v2325_v24 = vshrl.u32 %v13789_v22, %v2322_v17  ;;  %v2328_v11 = vshrl.u32 %v13791_v29, %v2322_v17  ;;  %v2327_v58 = vshll.u32 %v13789_v22, %v2321_v10  ;;  %v2331_v23 = vshrl.u32 %v13790_v57, %v2322_v17 }
 0x22a   : > { %v2160_v14 = vadd.s32 536870912, %v2159_v55  ;;  %v2320_v33 = vshrl.u32 %v2319_v47, 5  ;;  %v2330_v3 = vshll.u32 %v13791_v29, %v2321_v10  ;;  %v2414_v27 = vand.u32 2139095040, %v10147_v13 }
 0x22b   : > { %v2326_v49 = vor.u32 %v2325_v24, %v2324_v52  ;;  %v2329_v62 = vor.u32 %v2328_v11, %v2327_v58  ;;  %v2333_v48 = vshll.u32 %v13790_v57, %v2321_v10  ;;  %v2334_v53 = vshrl.u32 %v13821_v51, %v2322_v17 }
 0x22c   : > { %v2315_v16 = vor.u32 8388608, %v2314_v0  ;;  %v2332_v15 = vor.u32 %v2331_v23, %v2330_v3  ;;  %v2336_v31 = vshll.u32 %v13821_v51, %v2321_v10  ;;  %v2337_v5 = vshrl.u32 %v13792_v54, %v2322_v17 }
 0x22d   : > { %v13876_v19 = vand.u32 2147483647, %v9568_v35  ;;  %v13877_v47 = vmov 0  ;;  %vm1997_vm15 = vcmp.lt.s32.totalorder %v9729_v4, 0  ;;  %v2067_v24 = vsub.s32 32, %v10140_v63 }
 0x22e   : > { %v2072_v11 = vadd.s32 127, %v2071_v38  ;;  %v10175_v52 = vshrl.u32 %v2160_v14, 30  ;;  %v2335_v58 = vor.u32 %v2334_v53, %v2333_v48  ;;  %v10177_v0 = vpop.eup %8096  ;;  %v2271_v23 = vclz %v7655_v18 }
 0x22f   : > { %vm10169_vm7 = vcmp.le.f32.partialorder %v13876_v19, 0.7853982  ;;  %13881 = vst [vmem:[#allocation60_spill] sm:$0xff] %v10177_v0  ;;  %v2338_v10 = vor.u32 %v2337_v5, %v2336_v31  ;;  %vm2339_vm11 = vcmp.lt.s32.totalorder %v2320_v33, 1  ;;  %vm2342_vm3 = vcmp.lt.s32.totalorder %v2320_v33, 4  ;;  %v10202_v0 = vpop.f32.mrb[13].mxu1 }
 0x230   : > { %v13878_v47 = vsel %vm10169_vm7, 4294967295, %v13877_v47  ;;  %13880 = vst [vmem:[#allocation59_spill] sm:$0xff] %v10175_v52  ;;  %vm2341_vm12 = vcmp.lt.s32.totalorder %v2320_v33, 3  ;;  %v2347_v3 = vsel %vm2339_vm11, %v2326_v49, %v2329_v62  ;;  %v2348_v19 = vsel %vm2342_vm3, %v2335_v58, 920167782 }
 0x231   : > { %13879 = vst [vmem:[#allocation58_spill] sm:$0xff] %v13878_v47  ;;  %v2415_v26 = vshrl.u32 %v2414_v27, 23  ;;  %vm2340_vm0 = vcmp.lt.s32.totalorder %v2320_v33, 2  ;;  %v2349_v36 = vsel %vm2341_vm12, %v2332_v15, %v2348_v19  ;;  %v2351_v34 = vsel %vm2339_vm11, %v2329_v62, %v2332_v15 }
 0x232   : > { %v2355_v38 = vshll.u32 %v2315_v16, 8  ;;  %v2162_v14 = vshll.u32 %v10175_v52, 30  ;;  %v2344_v48 = vsel %vm2342_vm3, %v2332_v15, 2102212464  ;;  %v2350_v53 = vsel %vm2340_vm0, %v2347_v3, %v2349_v36 }
 0x233   : > { %v2352_v18 = vsel %vm2342_vm3, %v2338_v10, 1326507024  ;;  %v13882_v31 = vand.u32 2147483647, %v9729_v4  ;;  %v2323_v27 = vshrl.u32 %v13786_v60, %v2322_v17  ;;  %v2073_v16 = vshll.u32 %v2072_v11, 23 }
 0x234   : > { %v2353_v9 = vsel %vm2341_vm12, %v2335_v58, %v2352_v18  ;;  %v10192_v19 = vmul.u32.u64.low %v2355_v38, %v2350_v53  ;;  %v10193_v7 = vmul.u32.u64.high %v2355_v38, %v2350_v53, %v10192_v19  ;;  %v7656_v52 = vadd.s32 4294967294, %v2271_v23  ;;  %v13888_v18 = vld [vmem:[#allocation34_spill] sm:$0xff] }
 0x235   : > { %vm10186_vm8 = vcmp.le.f32.partialorder %v13882_v31, 0.7853982  ;;  %v2354_v15 = vsel %vm2340_vm0, %v2351_v34, %v2353_v9  ;;  %v7662_v36 = vadd.s32 4294967169, %v2415_v26  ;;  %v2343_v10 = vsel %vm2339_vm11, %v2323_v27, %v2326_v49 }
 0x236   : > { %v2345_v3 = vsel %vm2341_vm12, %v2329_v62, %v2344_v48  ;;  %v10199_v31 = vmul.u32.u64.low %v2355_v38, %v2354_v15  ;;  %v10200_v61 = vmul.u32.u64.high %v2355_v38, %v2354_v15, %v10199_v31  ;;  %8098 = vcosq.f32 %v10129_v6 }
 0x237   : > { %v2051_v17 = vadd.s32 %v9914_v8, %v9928_v12  ;;  %v10207_v58 = vsub.s32 %v2159_v55, %v2162_v14  ;;  %v2421_v11 = vadd.s32 1, %v7662_v36  ;;  %v10213_v26 = vsel %vm10169_vm7, %v9568_v35, %v10136_v45 }
 0x238   : > { %v13885_v34 = vand.u32 2147483647, %v10118_v44  ;;  %v13886_v9 = vcvt.s32.f32 %v10109_v43  ;;  %v13887_v62 = vsub.s32 4, %v10002_v50  ;;  %v2365_v12 = vadd.s32 1, %v10193_v7 }
 0x239   : > { %v2069_v55 = vshrl.u32 %v2051_v17, %v2067_v24  ;;  %vm7657_vm11 = vcmp.lt.s32.totalorder %v7656_v52, 0  ;;  %v2346_v23 = vsel %vm2340_vm0, %v2343_v10, %v2345_v3  ;;  %vm2422_vm3 = vcmp.gt.s32.totalorder %v2421_v11, 0 }
 0x23a   : > { %v1974_v49 = vmul.f32 %v13886_v9, %v13885_v34  ;;  %v10224_v8 = vsel %vm1997_vm15, %v13887_v62, %v10002_v50  ;;  %v2074_v45 = vor.u32 4788187, %v2073_v16  ;;  %vm2364_vm12 = vc.u32 %v10200_v61, %v10192_v19 }
 0x23b   : > { %v13598_v43 = vand.u32 2147483647, %v10147_v13  ;;  %v2423_v44 = vsel %vm2422_vm3, %v2421_v11, 0  ;;  %8100 = vsinq.f32 %v10129_v6  ;;  %vm13602_vm10 = vcmp.lt.s32.totalorder %v9671_v21, 0 }
 0x23c   : > { %v2165_v50 = vsub.s32 0, %v10207_v58  ;;  %v2366_v14 = vsel %vm2364_vm12, %v2365_v12, %v10193_v7  ;;  %v2425_v24 = vand.u32 31, %v2423_v44  ;;  %v2068_v33 = vshll.u32 %v10031_v41, %v10140_v63 }
 0x23d   : > { %v10237_v48 = vsel %vm7657_vm11, 0, %v7656_v52  ;;  %v2362_v53 = vmul.u32 %v2355_v38, %v2346_v23  ;;  %v10241_v27 = vadd.f32 %v10132_v28, %v13888_v18  ;;  %8102 = vcosq.f32 %v10213_v26 }
 0x23e   : > { %v1975_v6 = vxor.u32 2147483648, %v1974_v49  ;;  %v2426_v15 = vsub.s32 32, %v2425_v24  ;;  %v2070_v7 = vor.u32 %v2069_v55, %v2068_v33  ;;  %v2075_v36 = vand.u32 2147483647, %v2074_v45 }
 0x23f   : > { %13889 = vst [vmem:[#allocation34_spill] sm:$0xff] %v10241_v27  ;;  %v10247_v10 = vadd.s32 %v2366_v14, %v2362_v53  ;;  %v2418_v41 = vand.u32 8388607, %v13598_v43  ;;  %v2279_v63 = vsub.s32 4294967266, %v10237_v48  ;;  %v7651_v52 = vmin.u32 %v2165_v50, %v10207_v58 }
 0x240   : > { %v2429_v38 = vshrl.u32 %v13789_v22, %v2426_v15  ;;  %v2432_v3 = vshrl.u32 %v13791_v29, %v2426_v15  ;;  %v2428_v31 = vshll.u32 %v13786_v60, %v2425_v24  ;;  %v2431_v17 = vshll.u32 %v13789_v22, %v2425_v24  ;;  %v10259_v9 = vpop.eup %8098 }
 0x241   : > { %v2435_v11 = vshrl.u32 %v13790_v57, %v2426_v15  ;;  %v2622_v34 = vand.u32 2139095040, %v10241_v27  ;;  %13890 = vst [vmem:[#allocation61_spill] sm:$0xff] %v10259_v9  ;;  %v2424_v62 = vshrl.u32 %v2423_v44, 5  ;;  %v2434_v12 = vshll.u32 %v13791_v29, %v2425_v24 }
 0x242   : > { %v2437_v55 = vshll.u32 %v13790_v57, %v2425_v24  ;;  %v2438_v23 = vshrl.u32 %v13821_v51, %v2426_v15  ;;  %v2077_v45 = vcvt.s32.f32 %v2070_v7  ;;  %v2368_v50 = vadd.s32 536870912, %v10247_v10 }
 0x243   : > { %v2430_v14 = vor.u32 %v2429_v38, %v2428_v31  ;;  %v2433_v33 = vor.u32 %v2432_v3, %v2431_v17  ;;  %v2436_v53 = vor.u32 %v2435_v11, %v2434_v12  ;;  %v2440_v43 = vshll.u32 %v13821_v51, %v2425_v24 }
 0x244   : > { %v2439_v18 = vor.u32 %v2438_v23, %v2437_v55  ;;  %v2441_v16 = vshrl.u32 %v13792_v54, %v2426_v15  ;;  %v13891_v9 = vand.u32 2147483647, %v9671_v21  ;;  %v13892_v44 = vmov 0 }
 0x245   : > { %v1976_v25 = vsel %vm13602_vm10, %v1975_v6, %v1974_v49  ;;  %v10275_v7 = vmul.f32 %v2077_v45, %v2075_v36  ;;  %v2280_v47 = vadd.s32 127, %v2279_v63  ;;  %v2167_v38 = vclz %v7651_v52  ;;  %v10277_v3 = vpop.eup %8100 }
 0x246   : > { %vm10269_vm0 = vcmp.le.f32.partialorder %v13891_v9, 0.7853982  ;;  %13895 = vst [vmem:[#allocation63_spill] sm:$0xff] %v10277_v3  ;;  %v2419_v31 = vor.u32 8388608, %v2418_v41  ;;  %v2442_v17 = vor.u32 %v2441_v16, %v2440_v43  ;;  %vm2443_vm11 = vcmp.lt.s32.totalorder %v2424_v62, 1 }
 0x247   : > { %v13893_v44 = vsel %vm10269_vm0, 4294967295, %v13892_v44  ;;  %v2623_v24 = vshrl.u32 %v2622_v34, 23  ;;  %v10279_v11 = vshrl.u32 %v2368_v50, 30  ;;  %vm2445_vm3 = vcmp.lt.s32.totalorder %v2424_v62, 3  ;;  %v10282_v12 = vpop.eup %8102 }
 0x248   : > { %13894 = vst [vmem:[#allocation62_spill] sm:$0xff] %v13893_v44  ;;  %vm2446_vm12 = vcmp.lt.s32.totalorder %v2424_v62, 4  ;;  %v2451_v9 = vsel %vm2443_vm11, %v2430_v14, %v2433_v33  ;;  %13897 = vst [vmem:[#allocation65_spill] sm:$0xff] %v10282_v12  ;;  %v2455_v6 = vsel %vm2443_vm11, %v2433_v33, %v2436_v53  ;;  %vm2205_vm10 = vcmp.lt.s32.totalorder %v9838_v56, 0 }
 0x249   : > { %13896 = vst [vmem:[#allocation64_spill] sm:$0xff] %v10279_v11  ;;  %v2448_v55 = vsel %vm2446_vm12, %v2436_v53, 2102212464  ;;  %v2452_v49 = vsel %vm2446_vm12, %v2439_v18, 920167782  ;;  %v7652_v63 = vadd.s32 4294967294, %v2167_v38  ;;  %v2427_v43 = vshrl.u32 %v13786_v60, %v2426_v15 }
 0x24a   : > { %v2456_v36 = vsel %vm2446_vm12, %v2442_v17, 1326507024  ;;  %vm2444_vm4 = vcmp.lt.s32.totalorder %v2424_v62, 2  ;;  %v2453_v16 = vsel %vm2445_vm3, %v2436_v53, %v2452_v49  ;;  %v2459_v34 = vshll.u32 %v2419_v31, 8 }
 0x24b   : > { %v2454_v41 = vsel %vm2444_vm4, %v2451_v9, %v2453_v16  ;;  %v2457_v52 = vsel %vm2445_vm3, %v2439_v18, %v2456_v36  ;;  %v7670_v23 = vadd.s32 4294967169, %v2623_v24  ;;  %v2370_v45 = vshll.u32 %v10279_v11, 30 }
 0x24c   : > { %v2447_v50 = vsel %vm2443_vm11, %v2427_v43, %v2430_v14  ;;  %v2449_v17 = vsel %vm2445_vm3, %v2433_v33, %v2448_v55  ;;  %v2458_v3 = vsel %vm2444_vm4, %v2455_v6, %v2457_v52  ;;  %v2275_v53 = vsub.s32 32, %v10237_v48 }
 0x24d   : > { %v10294_v38 = vmul.u32.u64.low %v2459_v34, %v2458_v3  ;;  %v10295_v12 = vmul.u32.u64.high %v2459_v34, %v2458_v3, %v10294_v38  ;;  %v10297_v15 = vmul.u32.u64.low %v2459_v34, %v2454_v41  ;;  %v10298_v35 = vmul.u32.u64.high %v2459_v34, %v2454_v41, %v10297_v15  ;;  %v10343_v41 = vpop.f32.mrb[14].mxu0 }
 0x24e   : > { %v2281_v18 = vshll.u32 %v2280_v47, 23  ;;  %vm7653_vm12 = vcmp.lt.s32.totalorder %v7652_v63, 0  ;;  %v2629_v31 = vadd.s32 1, %v7670_v23  ;;  %8104 = vsinq.f32 %v10213_v26 }
 0x24f   : > { %v10306_v14 = vsel %vm10269_vm0, %v9671_v21, %v1976_v25  ;;  %v13898_v33 = vsel %vm10186_vm8, 0, %v10224_v8  ;;  %v2289_v24 = vsub.s32 4, %v10087_v37  ;;  %v2259_v47 = vadd.s32 %v10011_v1, %v10017_v2 }
 0x250   : > { %v10312_v3 = vadd.s32 3, %v13898_v33  ;;  %v10318_v9 = vsub.s32 %v10247_v10, %v2370_v45  ;;  %v2450_v26 = vsel %vm2444_vm4, %v2447_v50, %v2449_v17  ;;  %vm2630_vm11 = vcmp.gt.s32.totalorder %v2629_v31, 0 }
 0x251   : > { %v2079_v25 = vxor.u32 2147483648, %v10275_v7  ;;  %v10322_v55 = vsel %vm7653_vm12, 0, %v7652_v63  ;;  %vm2468_vm3 = vc.u32 %v10295_v12, %v10297_v15  ;;  %v10328_v8 = vadd.f32 %v10132_v28, %v9721_v32 }
 0x252   : > { %13899 = vst [vmem:[#allocation66_spill] sm:$0xff] %v10312_v3  ;;  %v2277_v49 = vshrl.u32 %v2259_v47, %v2275_v53  ;;  %v2282_v6 = vor.u32 4788187, %v2281_v18  ;;  %v2469_v1 = vadd.s32 1, %v10298_v35  ;;  %v13608_v2 = vand.u32 2147483647, %v10241_v27 }
 0x253   : > { %8106 = vcosq.f32 %v10306_v14  ;;  %v10336_v10 = vsel %vm2205_vm10, %v2289_v24, %v10087_v37  ;;  %v2466_v62 = vmul.u32 %v2459_v34, %v2450_v26  ;;  %v2631_v36 = vsel %vm2630_vm11, %v2629_v31, 0 }
 0x254   : > { %v2276_v63 = vshll.u32 %v10112_v59, %v10237_v48  ;;  %v2175_v32 = vsub.s32 4294967266, %v10322_v55  ;;  %v2373_v43 = vsub.s32 0, %v10318_v9  ;;  %v2470_v16 = vsel %vm2468_vm3, %v2469_v1, %v10298_v35 }
 0x255   : > { %v10348_v52 = vsel %vm1997_vm15, %v2079_v25, %v10275_v7  ;;  %v2471_v37 = vadd.s32 %v2470_v16, %v2466_v62  ;;  %v2633_v23 = vand.u32 31, %v2631_v36  ;;  %v2518_v34 = vand.u32 2139095040, %v10328_v8 }
 0x256   : > { %v2278_v45 = vor.u32 %v2277_v49, %v2276_v63  ;;  %v2283_v50 = vand.u32 2147483647, %v2282_v6  ;;  %v2155_v59 = vadd.s32 %v10105_v39, %v10116_v42  ;;  %v2626_v48 = vand.u32 8388607, %v13608_v2 }
 0x257   : > { %v2472_v35 = vadd.s32 536870912, %v2471_v37  ;;  %v2634_v17 = vsub.s32 32, %v2633_v23  ;;  %v2636_v38 = vshll.u32 %v13786_v60, %v2633_v23  ;;  %v2639_v53 = vshll.u32 %v13789_v22, %v2633_v23 }
 0x258   : > { %v2171_v7 = vsub.s32 32, %v10322_v55  ;;  %v2176_v18 = vadd.s32 127, %v2175_v32  ;;  %v7659_v31 = vmin.u32 %v2373_v43, %v10318_v9  ;;  %v2645_v33 = vshll.u32 %v13790_v57, %v2633_v23  ;;  %v10360_v24 = vpop.eup %8104 }
 0x259   : > { %13900 = vst [vmem:[#allocation67_spill] sm:$0xff] %v10360_v24  ;;  %v2637_v39 = vshrl.u32 %v13789_v22, %v2634_v17  ;;  %v2640_v42 = vshrl.u32 %v13791_v29, %v2634_v17  ;;  %v2642_v47 = vshll.u32 %v13791_v29, %v2633_v23  ;;  %v2519_v26 = vshrl.u32 %v2518_v34, 23  ;;  %v10485_v34 = vpop.permute.xlu1 %675 }
 0x25a   : > { %v2632_v25 = vshrl.u32 %v2631_v36, 5  ;;  %v2643_v49 = vshrl.u32 %v13790_v57, %v2634_v17  ;;  %v2646_v6 = vshrl.u32 %v13821_v51, %v2634_v17  ;;  %v2648_v1 = vshll.u32 %v13821_v51, %v2633_v23 }
 0x25b   : > { %v2285_v62 = vcvt.s32.f32 %v2278_v45  ;;  %v10368_v63 = vshrl.u32 %v2472_v35, 30  ;;  %v2638_v32 = vor.u32 %v2637_v39, %v2636_v38  ;;  %v2641_v43 = vor.u32 %v2640_v42, %v2639_v53 }
 0x25c   : > { %v2173_v16 = vshrl.u32 %v2155_v59, %v2171_v7  ;;  %v2177_v2 = vshll.u32 %v2176_v18, 23  ;;  %v2647_v3 = vor.u32 %v2646_v6, %v2645_v33  ;;  %v2649_v11 = vshrl.u32 %v13792_v54, %v2634_v17 }
 0x25d   : > { %v10371_v44 = vpop.eup %8106  ;;  %v13902_v36 = vand.u32 2147483647, %v9838_v56  ;;  %v2286_v21 = vmul.f32 %v2285_v62, %v2283_v50  ;;  %v2172_v23 = vshll.u32 %v10207_v58, %v10322_v55  ;;  %v2375_v45 = vclz %v7659_v31 }
 0x25e   : > { %13901 = vst [vmem:[#allocation68_spill] sm:$0xff] %v10371_v44  ;;  %v2644_v35 = vor.u32 %v2643_v49, %v2642_v47  ;;  %v2627_v38 = vor.u32 8388608, %v2626_v48  ;;  %v2650_v59 = vor.u32 %v2649_v11, %v2648_v1  ;;  %vm2651_vm15 = vcmp.lt.s32.totalorder %v2632_v25, 1 }
 0x25f   : > { %vm10375_vm4 = vcmp.le.f32.partialorder %v13902_v36, 0.7853982  ;;  %v7666_v53 = vadd.s32 4294967169, %v2519_v26  ;;  %v2474_v7 = vshll.u32 %v10368_v63, 30  ;;  %v2635_v18 = vshrl.u32 %v13786_v60, %v2634_v17 }
 0x260   : > { %vm2654_vm12 = vcmp.lt.s32.totalorder %v2632_v25, 4  ;;  %v2659_v33 = vsel %vm2651_vm15, %v2638_v32, %v2641_v43  ;;  %v2174_v39 = vor.u32 %v2173_v16, %v2172_v23  ;;  %v2178_v42 = vor.u32 4788187, %v2177_v2 }
 0x261   : > { %vm2653_vm11 = vcmp.lt.s32.totalorder %v2632_v25, 3  ;;  %v2660_v50 = vsel %vm2654_vm12, %v2647_v3, 920167782  ;;  %vm2652_vm3 = vcmp.lt.s32.totalorder %v2632_v25, 2  ;;  %v2656_v6 = vsel %vm2654_vm12, %v2644_v35, 2102212464 }
 0x262   : > { %v2661_v58 = vsel %vm2653_vm11, %v2644_v35, %v2660_v50  ;;  %v2663_v55 = vsel %vm2651_vm15, %v2641_v43, %v2644_v35  ;;  %v7660_v48 = vadd.s32 4294967294, %v2375_v45  ;;  %v2664_v31 = vsel %vm2654_vm12, %v2650_v59, 1326507024 }
 0x263   : > { %v2662_v11 = vsel %vm2652_vm3, %v2659_v33, %v2661_v58  ;;  %v2667_v47 = vshll.u32 %v2627_v38, 8  ;;  %v10386_v26 = vsub.s32 %v2471_v37, %v2474_v7  ;;  %v2655_v17 = vsel %vm2651_vm15, %v2635_v18, %v2638_v32  ;;  %v10406_v38 = vpop.f32.mrb[14].mxu1 }
 0x264   : > { %v2665_v49 = vsel %vm2653_vm11, %v2647_v3, %v2664_v31  ;;  %v2525_v1 = vadd.s32 1, %v7666_v53  ;;  %v2657_v62 = vsel %vm2653_vm11, %v2641_v43, %v2656_v6  ;;  %v2287_v23 = vxor.u32 2147483648, %v2286_v21 }
 0x265   : > { %v2666_v2 = vsel %vm2652_vm3, %v2663_v55, %v2665_v49  ;;  %v10390_v16 = vmul.u32.u64.low %v2667_v47, %v2662_v11  ;;  %v10391_v36 = vmul.u32.u64.high %v2667_v47, %v2662_v11, %v10390_v16  ;;  %v10401_v37 = vsel %vm10186_vm8, %v9729_v4, %v10348_v52 }
 0x266   : > { %v10394_v35 = vmul.u32.u64.low %v2667_v47, %v2666_v2  ;;  %v10395_v45 = vmul.u32.u64.high %v2667_v47, %v2666_v2, %v10394_v35  ;;  %vm2526_vm14 = vcmp.gt.s32.totalorder %v2525_v1, 0  ;;  %v2292_v3 = vsel %vm10375_vm4, 0, %v10336_v10 }
 0x267   : > { %v2179_v32 = vand.u32 2147483647, %v2178_v42  ;;  %v2527_v43 = vsel %vm2526_vm14, %v2525_v1, 0  ;;  %8108 = vsinq.f32 %v10306_v14  ;;  %v2658_v59 = vsel %vm2652_vm3, %v2655_v17, %v2657_v62 }
 0x268   : > { %v13615_v53 = vand.u32 2147483647, %v10328_v8  ;;  %v2529_v7 = vand.u32 31, %v2527_v43  ;;  %v2181_v18 = vcvt.s32.f32 %v2174_v39  ;;  %vm7661_vm15 = vcmp.lt.s32.totalorder %v7660_v48, 0 }
 0x269   : > { %v2477_v5 = vsub.s32 0, %v10386_v26  ;;  %v2677_v52 = vadd.s32 1, %v10391_v36  ;;  %8110 = vcosq.f32 %v10401_v37  ;;  %v2288_v10 = vsel %vm2205_vm10, %v2287_v23, %v2286_v21  ;;  %v13906_v21 = vld [vmem:[#allocation45_spill] sm:$0xff] }
 0x26a   : > { %v10416_v33 = vadd.s32 3, %v2292_v3  ;;  %v2363_v14 = vadd.s32 %v10192_v19, %v10200_v61  ;;  %v10420_v25 = vmul.f32 %v2181_v18, %v2179_v32  ;;  %v2674_v42 = vmul.u32 %v2667_v47, %v2658_v59 }
 0x26b   : > { %vm2676_vm14 = vc.u32 %v10395_v45, %v10390_v16  ;;  %v2530_v39 = vsub.s32 32, %v2529_v7  ;;  %v10424_v50 = vsel %vm7661_vm15, 0, %v7660_v48  ;;  %v2522_v58 = vand.u32 8388607, %v13615_v53 }
 0x26c   : > { %13905 = vst [vmem:[#allocation69_spill] sm:$0xff] %v10416_v33  ;;  %v2678_v6 = vsel %vm2676_vm14, %v2677_v52, %v10391_v36  ;;  %v10431_v55 = vadd.f32 %v10132_v28, %v13906_v21  ;;  %v7663_v61 = vmin.u32 %v2477_v5, %v10386_v26  ;;  %v2532_v47 = vshll.u32 %v13786_v60, %v2529_v7 }
 0x26d   : > { %v2679_v19 = vadd.s32 %v2678_v6, %v2674_v42  ;;  %v2533_v11 = vshrl.u32 %v13789_v22, %v2530_v39  ;;  %v2536_v31 = vshrl.u32 %v13791_v29, %v2530_v39  ;;  %v2535_v48 = vshll.u32 %v13789_v22, %v2529_v7 }
 0x26e   : > { %13907 = vst [vmem:[#allocation45_spill] sm:$0xff] %v10431_v55  ;;  %v2538_v17 = vshll.u32 %v13791_v29, %v2529_v7  ;;  %v2539_v49 = vshrl.u32 %v13790_v57, %v2530_v39  ;;  %v2528_v62 = vshrl.u32 %v2527_v43, 5  ;;  %v2541_v28 = vshll.u32 %v13790_v57, %v2529_v7 }
 0x26f   : > { %v2680_v1 = vadd.s32 536870912, %v2679_v19  ;;  %v2542_v2 = vshrl.u32 %v13821_v51, %v2530_v39  ;;  %v2379_v36 = vsub.s32 32, %v10424_v50  ;;  %v2534_v23 = vor.u32 %v2533_v11, %v2532_v47 }
 0x270   : > { %v2537_v35 = vor.u32 %v2536_v31, %v2535_v48  ;;  %v2540_v3 = vor.u32 %v2539_v49, %v2538_v17  ;;  %v2544_v18 = vshll.u32 %v13821_v51, %v2529_v7  ;;  %v2545_v5 = vshrl.u32 %v13792_v54, %v2530_v39 }
 0x271   : > { %v10443_v32 = vshrl.u32 %v2680_v1, 30  ;;  %v2543_v59 = vor.u32 %v2542_v2, %v2541_v28  ;;  %v10447_v52 = vpop.eup %8108  ;;  %v2383_v43 = vsub.s32 4294967266, %v10424_v50  ;;  %v2479_v42 = vclz %v7663_v61 }
 0x272   : > { %13908 = vst [vmem:[#allocation70_spill] sm:$0xff] %v10447_v52  ;;  %v2523_v6 = vor.u32 8388608, %v2522_v58  ;;  %v2726_v21 = vand.u32 2139095040, %v10431_v55  ;;  %v2546_v11 = vor.u32 %v2545_v5, %v2544_v18  ;;  %vm2547_vm10 = vcmp.lt.s32.totalorder %v2528_v62, 1 }
 0x273   : > { %v2682_v53 = vshll.u32 %v10443_v32, 30  ;;  %vm2550_vm8 = vcmp.lt.s32.totalorder %v2528_v62, 4  ;;  %v10452_v31 = vpop.eup %8110  ;;  %v2531_v47 = vshrl.u32 %v13786_v60, %v2530_v39  ;;  %vm2549_vm12 = vcmp.lt.s32.totalorder %v2528_v62, 3 }
 0x274   : > { %13909 = vst [vmem:[#allocation71_spill] sm:$0xff] %v10452_v31  ;;  %v2555_v7 = vsel %vm2547_vm10, %v2534_v23, %v2537_v35  ;;  %v2556_v48 = vsel %vm2550_vm8, %v2543_v59, 920167782  ;;  %vm2548_vm11 = vcmp.lt.s32.totalorder %v2528_v62, 2  ;;  %v2552_v58 = vsel %vm2550_vm8, %v2540_v3, 2102212464 }
 0x275   : > { %v10457_v17 = vsub.s32 %v2679_v19, %v2682_v53  ;;  %v2557_v61 = vsel %vm2549_vm12, %v2540_v3, %v2556_v48  ;;  %v7664_v49 = vadd.s32 4294967294, %v2479_v42  ;;  %v2563_v28 = vshll.u32 %v2523_v6, 8 }
 0x276   : > { %v2558_v1 = vsel %vm2548_vm11, %v2555_v7, %v2557_v61  ;;  %v2727_v2 = vshrl.u32 %v2726_v21, 23  ;;  %vm13628_vm3 = vcmp.lt.s32.totalorder %v9979_v40, 0  ;;  %v2551_v18 = vsel %vm2547_vm10, %v2531_v47, %v2534_v23 }
 0x277   : > { %v2685_v39 = vsub.s32 0, %v10457_v17  ;;  %v2559_v5 = vsel %vm2547_vm10, %v2537_v35, %v2540_v3  ;;  %v2560_v53 = vsel %vm2550_vm8, %v2546_v11, 1326507024  ;;  %v2553_v19 = vsel %vm2549_vm12, %v2537_v35, %v2552_v58 }
 0x278   : > { %v2561_v33 = vsel %vm2549_vm12, %v2543_v59, %v2560_v53  ;;  %v10469_v48 = vmul.u32.u64.low %v2563_v28, %v2558_v1  ;;  %v10470_v42 = vmul.u32.u64.high %v2563_v28, %v2558_v1, %v10469_v48  ;;  %v2291_v6 = vsel %vm10375_vm4, %v9838_v56, %v2288_v10 }
 0x279   : > { %v2381_v21 = vshrl.u32 %v2363_v14, %v2379_v36  ;;  %v2384_v7 = vadd.s32 127, %v2383_v43  ;;  %v2562_v23 = vsel %vm2548_vm11, %v2559_v5, %v2561_v33  ;;  %v2380_v3 = vshll.u32 %v10318_v9, %v10424_v50  ;;  %v10490_v14 = vpop.f32.mrb[15].mxu0  ;;  %v13910_v43 = vld [vmem:[#allocation50_spill] sm:$0xff] }
 0x27a   : > { %v10479_v11 = vmul.u32.u64.low %v2563_v28, %v2562_v23  ;;  %v10480_v47 = vmul.u32.u64.high %v2563_v28, %v2562_v23, %v10479_v11  ;;  %v7674_v35 = vadd.s32 4294967169, %v2727_v2  ;;  %vm7665_vm15 = vcmp.lt.s32.totalorder %v7664_v49, 0 }
 0x27b   : > { %v7671_v59 = vmin.u32 %v2685_v39, %v10457_v17  ;;  %v2554_v58 = vsel %vm2548_vm11, %v2551_v18, %v2553_v19  ;;  %v13616_v61 = vand.u32 2147483647, %v10431_v55  ;;  %8112 = vsinq.f32 %v10401_v37 }
 0x27c   : > { %v2183_v10 = vxor.u32 2147483648, %v10420_v25  ;;  %v2573_v33 = vadd.s32 1, %v10470_v42  ;;  %v2733_v9 = vadd.s32 1, %v7674_v35  ;;  %8114 = vcosq.f32 %v2291_v6 }
 0x27d   : > { %v10492_v50 = vor.u32 %v2381_v21, %v2380_v3  ;;  %v2385_v36 = vshll.u32 %v2384_v7, 23  ;;  %v10496_v62 = vadd.f32 %v10485_v34, %v13910_v43  ;;  %v10498_v1 = vsel %vm7665_vm15, 0, %v7664_v49 }
 0x27e   : > { %v2570_v2 = vmul.u32 %v2563_v28, %v2554_v58  ;;  %vm2572_vm4 = vc.u32 %v10480_v47, %v10469_v48  ;;  %vm2734_vm14 = vcmp.gt.s32.totalorder %v2733_v9, 0  ;;  %v2687_v37 = vclz %v7671_v59 }
 0x27f   : > { %13911 = vst [vmem:[#allocation50_spill] sm:$0xff] %v10496_v62  ;;  %v2574_v39 = vsel %vm2572_vm4, %v2573_v33, %v10470_v42  ;;  %v2730_v18 = vand.u32 8388607, %v13616_v61  ;;  %v2735_v5 = vsel %vm2734_vm14, %v2733_v9, 0  ;;  %8116 = vsinq.f32 %v2291_v6 }
 0x280   : > { %v10508_v53 = vsel %vm13628_vm3, %v2183_v10, %v10420_v25  ;;  %v2575_v49 = vadd.s32 %v2574_v39, %v2570_v2  ;;  %v2737_v19 = vand.u32 31, %v2735_v5  ;;  %v10510_v28 = vor.u32 4788187, %v2385_v36 }
 0x281   : > { %v2467_v7 = vadd.s32 %v10297_v15, %v10295_v12  ;;  %v2483_v42 = vsub.s32 32, %v10498_v1  ;;  %v2487_v23 = vsub.s32 4294967266, %v10498_v1  ;;  %v2830_v11 = vand.u32 2139095040, %v10496_v62 }
 0x282   : > { %v2576_v3 = vadd.s32 536870912, %v2575_v49  ;;  %v2738_v6 = vsub.s32 32, %v2737_v19  ;;  %v7672_v35 = vadd.s32 4294967294, %v2687_v37  ;;  %v2731_v25 = vor.u32 8388608, %v2730_v18 }
 0x283   : > { %v2736_v59 = vshrl.u32 %v2735_v5, 5  ;;  %v2740_v58 = vshll.u32 %v13786_v60, %v2737_v19  ;;  %v2743_v9 = vshll.u32 %v13789_v22, %v2737_v19  ;;  %v2746_v15 = vshll.u32 %v13791_v29, %v2737_v19 }
 0x284   : > { %v10519_v10 = vshrl.u32 %v2576_v3, 30  ;;  %v2741_v33 = vshrl.u32 %v13789_v22, %v2738_v6  ;;  %v2744_v12 = vshrl.u32 %v13791_v29, %v2738_v6  ;;  %v2747_v36 = vshrl.u32 %v13790_v57, %v2738_v6 }
 0x285   : > { %v2749_v43 = vshll.u32 %v13790_v57, %v2737_v19  ;;  %v2750_v2 = vshrl.u32 %v13821_v51, %v2738_v6  ;;  %v10528_v37 = vpop.eup %8112  ;;  %v2831_v3 = vshrl.u32 %v2830_v11, 23  ;;  %v2387_v21 = vand.u32 2147483647, %v10510_v28 }
 0x286   : > { %13912 = vst [vmem:[#allocation72_spill] sm:$0xff] %v10519_v10  ;;  %13913 = vst [vmem:[#allocation73_spill] sm:$0xff] %v10528_v37  ;;  %v2578_v39 = vshll.u32 %v10519_v10, 30  ;;  %v2742_v18 = vor.u32 %v2741_v33, %v2740_v58  ;;  %v2745_v5 = vor.u32 %v2744_v12, %v2743_v9  ;;  %v10531_v61 = vpop.eup %8114  ;;  %v2485_v56 = vshrl.u32 %v2467_v7, %v2483_v42 }
 0x287   : > { %13914 = vst [vmem:[#allocation74_spill] sm:$0xff] %v10531_v61  ;;  %v2748_v4 = vor.u32 %v2747_v36, %v2746_v15  ;;  %v2751_v31 = vor.u32 %v2750_v2, %v2749_v43  ;;  %v13915_v44 = vand.u32 2147483647, %v9979_v40  ;;  %v13916_v52 = vmov 0 }
 0x288   : > { %v2488_v24 = vadd.s32 127, %v2487_v23  ;;  %v10540_v37 = vsub.s32 %v2575_v49, %v2578_v39  ;;  %v2752_v58 = vshll.u32 %v13821_v51, %v2737_v19  ;;  %v2753_v11 = vshrl.u32 %v13792_v54, %v2738_v6 }
 0x289   : > { %vm10536_vm10 = vcmp.le.f32.partialorder %v13915_v44, 0.7853982  ;;  %vm7673_vm8 = vcmp.lt.s32.totalorder %v7672_v35, 0  ;;  %vm2755_vm12 = vcmp.lt.s32.totalorder %v2736_v59, 1  ;;  %vm2758_vm11 = vcmp.lt.s32.totalorder %v2736_v59, 4  ;;  %v10544_v7 = vpop.eup %8116 }
 0x28a   : > { %v13917_v52 = vsel %vm10536_vm10, 4294967295, %v13916_v52  ;;  %v2771_v28 = vshll.u32 %v2731_v25, 8  ;;  %13919 = vst [vmem:[#allocation76_spill] sm:$0xff] %v10544_v7  ;;  %v2754_v42 = vor.u32 %v2753_v11, %v2752_v58  ;;  %v2760_v33 = vsel %vm2758_vm11, %v2748_v4, 2102212464 }
 0x28b   : > { %13918 = vst [vmem:[#allocation75_spill] sm:$0xff] %v13917_v52  ;;  %v2763_v44 = vsel %vm2755_vm12, %v2742_v18, %v2745_v5  ;;  %v7678_v9 = vadd.s32 4294967169, %v2831_v3  ;;  %v2739_v12 = vshrl.u32 %v13786_v60, %v2738_v6  ;;  %vm2757_vm15 = vcmp.lt.s32.totalorder %v2736_v59, 3 }
 0x28c   : > { %v2764_v49 = vsel %vm2758_vm11, %v2751_v31, 920167782  ;;  %v2767_v23 = vsel %vm2755_vm12, %v2745_v5, %v2748_v4  ;;  %v2581_v19 = vsub.s32 0, %v10540_v37  ;;  %vm2756_vm4 = vcmp.lt.s32.totalorder %v2736_v59, 2 }
 0x28d   : > { %v2765_v15 = vsel %vm2757_vm15, %v2748_v4, %v2764_v49  ;;  %v2768_v36 = vsel %vm2758_vm11, %v2754_v42, 1326507024  ;;  %vm13631_vm14 = vcmp.lt.s32.totalorder %v10147_v13, 0  ;;  %v2759_v25 = vsel %vm2755_vm12, %v2739_v12, %v2742_v18 }
 0x28e   : > { %v2761_v43 = vsel %vm2757_vm15, %v2745_v5, %v2760_v33  ;;  %v2766_v2 = vsel %vm2756_vm4, %v2763_v44, %v2765_v15  ;;  %v2769_v39 = vsel %vm2757_vm15, %v2751_v31, %v2768_v36  ;;  %v2489_v58 = vshll.u32 %v2488_v24, 23 }
 0x28f   : > { %v2770_v3 = vsel %vm2756_vm4, %v2767_v23, %v2769_v39  ;;  %v10552_v11 = vmul.u32.u64.low %v2771_v28, %v2766_v2  ;;  %v10553_v6 = vmul.u32.u64.high %v2771_v28, %v2766_v2, %v10552_v11  ;;  %v2484_v61 = vshll.u32 %v10386_v26, %v10498_v1 }
 0x290   : > { %v10559_v7 = vsel %vm7673_vm8, 0, %v7672_v35  ;;  %v10561_v4 = vmul.u32.u64.low %v2771_v28, %v2770_v3  ;;  %v10562_v42 = vmul.u32.u64.high %v2771_v28, %v2770_v3, %v10561_v4  ;;  %v7667_v59 = vmin.u32 %v2581_v19, %v10540_v37 }
 0x291   : > { %v2762_v18 = vsel %vm2756_vm4, %v2759_v25, %v2761_v43  ;;  %v13627_v31 = vand.u32 2147483647, %v10496_v62  ;;  %v2837_v24 = vadd.s32 1, %v7678_v9  ;;  %v2187_v5 = vsel %vm10536_vm10, %v9979_v40, %v10508_v53 }
 0x292   : > { %v13920_v33 = vcvt.s32.f32 %v10492_v50  ;;  %v10574_v1 = vor.u32 %v2485_v56, %v2484_v61  ;;  %v2497_v35 = vsub.s32 4, %v10368_v63  ;;  %v10577_v44 = vor.u32 4788187, %v2489_v58 }
 0x293   : > { %v2691_v12 = vsub.s32 32, %v10559_v7  ;;  %v2781_v49 = vadd.s32 1, %v10553_v6  ;;  %vm2838_vm8 = vcmp.gt.s32.totalorder %v2837_v24, 0  ;;  %v2695_v9 = vsub.s32 4294967266, %v10559_v7 }
 0x294   : > { %v10572_v26 = vmul.f32 %v13920_v33, %v2387_v21  ;;  %v2778_v23 = vmul.u32 %v2771_v28, %v2762_v18  ;;  %vm2780_vm12 = vc.u32 %v10562_v42, %v10552_v11  ;;  %v2839_v50 = vsel %vm2838_vm8, %v2837_v24, 0  ;;  %v10587_v21 = vpop.f32.mrb[15].mxu1 }
 0x295   : > { %8118 = vcosq.f32 %v2187_v5  ;;  %v2583_v53 = vclz %v7667_v59  ;;  %v2782_v56 = vsel %vm2780_vm12, %v2781_v49, %v10553_v6  ;;  %v2834_v61 = vand.u32 8388607, %v13627_v31 }
 0x296   : > { %8120 = vsinq.f32 %v2187_v5  ;;  %v2675_v19 = vadd.s32 %v10390_v16, %v10395_v45  ;;  %v2783_v15 = vadd.s32 %v2782_v56, %v2778_v23  ;;  %v2841_v36 = vand.u32 31, %v2839_v50 }
 0x297   : > { %v2391_v28 = vxor.u32 2147483648, %v10572_v26  ;;  %v2491_v25 = vand.u32 2147483647, %v10577_v44  ;;  %v2493_v43 = vcvt.s32.f32 %v10574_v1  ;;  %v10597_v2 = vsel %vm13631_vm14, %v2497_v35, %v10368_v63 }
 0x298   : > { %v10599_v39 = vshrl.u32 %v2675_v19, %v2691_v12  ;;  %v2696_v58 = vadd.s32 127, %v2695_v9  ;;  %v2784_v3 = vadd.s32 536870912, %v2783_v15  ;;  %v2842_v6 = vsub.s32 32, %v2841_v36 }
 0x299   : > { %v7668_v4 = vadd.s32 4294967294, %v2583_v53  ;;  %v2835_v16 = vor.u32 8388608, %v2834_v61  ;;  %v2840_v45 = vshrl.u32 %v2839_v50, 5  ;;  %v2844_v59 = vshll.u32 %v13786_v60, %v2841_v36 }
 0x29a   : > { %v10602_v18 = vshrl.u32 %v2784_v3, 30  ;;  %v2845_v24 = vshrl.u32 %v13789_v22, %v2842_v6  ;;  %v2847_v5 = vshll.u32 %v13789_v22, %v2841_v36  ;;  %v2848_v33 = vshrl.u32 %v13791_v29, %v2842_v6 }
 0x29b   : > { %vm13645_vm11 = vcmp.lt.s32.totalorder %v10036_v20, 0  ;;  %v2850_v63 = vshll.u32 %v13791_v29, %v2841_v36  ;;  %v2851_v1 = vshrl.u32 %v13790_v57, %v2842_v6  ;;  %v2853_v35 = vshll.u32 %v13790_v57, %v2841_v36 }
 0x29c   : > { %13921 = vst [vmem:[#allocation77_spill] sm:$0xff] %v10602_v18  ;;  %v2854_v44 = vshrl.u32 %v13821_v51, %v2842_v6  ;;  %v2786_v12 = vshll.u32 %v10602_v18, 30  ;;  %v2846_v49 = vor.u32 %v2845_v24, %v2844_v59  ;;  %v2849_v9 = vor.u32 %v2848_v33, %v2847_v5 }
 0x29d   : > { %v10615_v23 = vadd.f32 %v10485_v34, %v10019_v30  ;;  %v2852_v50 = vor.u32 %v2851_v1, %v2850_v63  ;;  %v2856_v56 = vshll.u32 %v13821_v51, %v2841_v36  ;;  %v2857_v61 = vshrl.u32 %v13792_v54, %v2842_v6 }
 0x29e   : > { %v2855_v53 = vor.u32 %v2854_v44, %v2853_v35  ;;  %v13923_v19 = vand.u32 2147483647, %v10036_v20  ;;  %v13924_v3 = vmov 0  ;;  %v13927_v31 = vand.u32 2147483647, %v10147_v13 }
 0x29f   : > { %13922 = vst [vmem:[#allocation78_spill] sm:$0xff] %v10615_v23  ;;  %v2697_v30 = vshll.u32 %v2696_v58, 23  ;;  %vm7669_vm8 = vcmp.lt.s32.totalorder %v7668_v4, 0  ;;  %v10631_v24 = vsub.s32 %v2783_v15, %v2786_v12  ;;  %v2875_v5 = vshll.u32 %v2835_v16, 8  ;;  %v10633_v36 = vpop.eup %8118 }
 0x2a0   : > { %vm10621_vm15 = vcmp.le.f32.partialorder %v13923_v19, 0.7853982  ;;  %vm10627_vm4 = vcmp.le.f32.partialorder %v13927_v31, 0.7853982  ;;  %13930 = vst [vmem:[#allocation80_spill] sm:$0xff] %v10633_v36  ;;  %v2843_v33 = vshrl.u32 %v13786_v60, %v2842_v6  ;;  %v2858_v63 = vor.u32 %v2857_v61, %v2856_v56  ;;  %v10637_v1 = vpop.eup %8120 }
 0x2a1   : > { %v13925_v3 = vsel %vm10621_vm15, 4294967295, %v13924_v3  ;;  %vm2859_vm3 = vcmp.lt.s32.totalorder %v2840_v45, 1  ;;  %vm2862_vm13 = vcmp.lt.s32.totalorder %v2840_v45, 4  ;;  %13931 = vst [vmem:[#allocation81_spill] sm:$0xff] %v10637_v1  ;;  %vm2861_vm6 = vcmp.lt.s32.totalorder %v2840_v45, 3 }
 0x2a2   : > { %13926 = vst [vmem:[#allocation79_spill] sm:$0xff] %v13925_v3  ;;  %v2864_v31 = vsel %vm2862_vm13, %v2852_v50, 2102212464  ;;  %v2867_v35 = vsel %vm2859_vm3, %v2846_v49, %v2849_v9  ;;  %v2868_v44 = vsel %vm2862_vm13, %v2855_v53, 920167782  ;;  %vm2860_vm14 = vcmp.lt.s32.totalorder %v2840_v45, 2 }
 0x2a3   : > { %v2869_v58 = vsel %vm2861_vm6, %v2852_v50, %v2868_v44  ;;  %v2871_v15 = vsel %vm2859_vm3, %v2849_v9, %v2852_v50  ;;  %v3038_v16 = vand.u32 2139095040, %v10615_v23  ;;  %v2789_v12 = vsub.s32 0, %v10631_v24 }
 0x2a4   : > { %v2863_v19 = vsel %vm2859_vm3, %v2843_v33, %v2846_v49  ;;  %v2870_v18 = vsel %vm2860_vm14, %v2867_v35, %v2869_v58  ;;  %v2872_v6 = vsel %vm2862_vm13, %v2858_v63, 1326507024  ;;  %v13932_v56 = vand.u32 2147483647, %v10241_v27 }
 0x2a5   : > { %v2865_v36 = vsel %vm2861_vm6, %v2849_v9, %v2864_v31  ;;  %v2873_v1 = vsel %vm2861_vm6, %v2855_v53, %v2872_v6  ;;  %v10648_v10 = vmul.u32.u64.low %v2875_v5, %v2870_v18  ;;  %v10649_v52 = vmul.u32.u64.high %v2875_v5, %v2870_v18, %v10648_v10 }
 0x2a6   : > { %vm10644_vm12 = vcmp.le.f32.partialorder %v13932_v56, 0.7853982  ;;  %v2392_v50 = vsel %vm13645_vm11, %v2391_v28, %v10572_v26  ;;  %v2494_v49 = vmul.f32 %v2493_v43, %v2491_v25  ;;  %v2705_v33 = vsub.s32 4, %v10443_v32  ;;  %v10685_v56 = vpop.f32.mrb[16].mxu0 }
 0x2a7   : > { %v2874_v63 = vsel %vm2860_vm14, %v2871_v15, %v2873_v1  ;;  %v2692_v35 = vshll.u32 %v10457_v17, %v10559_v7  ;;  %v2698_v44 = vor.u32 4788187, %v2697_v30  ;;  %v2586_v18 = vsel %vm7669_vm8, 0, %v7668_v4 }
 0x2a8   : > { %v10659_v58 = vmul.u32.u64.low %v2875_v5, %v2874_v63  ;;  %v10660_v9 = vmul.u32.u64.high %v2875_v5, %v2874_v63, %v10659_v58  ;;  %v7675_v53 = vmin.u32 %v2789_v12, %v10631_v24  ;;  %v2866_v31 = vsel %vm2860_vm14, %v2863_v19, %v2865_v36 }
 0x2a9   : > { %v3039_v6 = vshrl.u32 %v3038_v16, 23  ;;  %v2395_v26 = vsel %vm10621_vm15, %v10036_v20, %v2392_v50  ;;  %v2500_v28 = vsel %vm10627_vm4, 0, %v10597_v2  ;;  %v2694_v17 = vor.u32 %v10599_v39, %v2692_v35 }
 0x2aa   : > { %v2885_v7 = vadd.s32 1, %v10649_v52  ;;  %v2495_v25 = vxor.u32 2147483648, %v2494_v49  ;;  %vm13935_vm6 = vcmp.lt.s32.totalorder %v10241_v27, 0  ;;  %v10678_v45 = vadd.f32 %v10485_v34, %v10122_v46 }
 0x2ab   : > { %v2706_v43 = vsel %vm13935_vm6, %v2705_v33, %v10443_v32  ;;  %v7686_v4 = vadd.s32 4294967169, %v3039_v6  ;;  %v2699_v30 = vand.u32 2147483647, %v2698_v44  ;;  %v2587_v36 = vsub.s32 32, %v2586_v18 }
 0x2ac   : > { %13936 = vst [vmem:[#allocation82_spill] sm:$0xff] %v10678_v45  ;;  %v2882_v1 = vmul.u32 %v2875_v5, %v2866_v31  ;;  %vm2884_vm13 = vc.u32 %v10660_v9, %v10648_v10  ;;  %8122 = vcosq.f32 %v2395_v26  ;;  %v2571_v2 = vadd.s32 %v10469_v48, %v10480_v47 }
 0x2ad   : > { %v2791_v39 = vclz %v7675_v53  ;;  %v2886_v15 = vsel %vm2884_vm13, %v2885_v7, %v10649_v52  ;;  %v2701_v16 = vcvt.s32.f32 %v2694_v17  ;;  %v2591_v32 = vsub.s32 4294967266, %v2586_v18 }
 0x2ae   : > { %v2887_v12 = vadd.s32 %v2886_v15, %v2882_v1  ;;  %v3045_v19 = vadd.s32 1, %v7686_v4  ;;  %vm13937_vm3 = vcmp.lt.s32.totalorder %v10147_v13, 0  ;;  %v2708_v5 = vsel %vm10644_vm12, 0, %v2706_v43 }
 0x2af   : > { %v2496_v46 = vsel %vm13937_vm3, %v2495_v25, %v2494_v49  ;;  %v13639_v50 = vand.u32 2147483647, %v10615_v23  ;;  %v2934_v33 = vand.u32 2139095040, %v10678_v45  ;;  %v10693_v48 = vmul.f32 %v2701_v16, %v2699_v30 }
 0x2b0   : > { %v2589_v47 = vshrl.u32 %v2571_v2, %v2587_v36  ;;  %v2888_v52 = vadd.s32 536870912, %v2887_v12  ;;  %vm3046_vm14 = vcmp.gt.s32.totalorder %v3045_v19, 0  ;;  %8124 = vsinq.f32 %v2395_v26 }
 0x2b1   : > { %v10695_v63 = vadd.s32 3, %v2500_v28  ;;  %v7676_v35 = vadd.s32 4294967294, %v2791_v39  ;;  %v3047_v44 = vsel %vm3046_vm14, %v3045_v19, 0  ;;  %v2588_v58 = vshll.u32 %v10540_v37, %v2586_v18 }
 0x2b2   : > { %v2592_v49 = vadd.s32 127, %v2591_v32  ;;  %v10698_v53 = vshrl.u32 %v2888_v52, 30  ;;  %v3049_v31 = vand.u32 31, %v3047_v44  ;;  %v10703_v6 = vsel %vm10627_vm4, %v10147_v13, %v2496_v46 }
 0x2b3   : > { %13938 = vst [vmem:[#allocation83_spill] sm:$0xff] %v10695_v63  ;;  %v10705_v17 = vadd.s32 3, %v2708_v5  ;;  %v3042_v26 = vand.u32 8388607, %v13639_v50  ;;  %v2935_v28 = vshrl.u32 %v2934_v33, 23  ;;  %v10710_v25 = vor.u32 %v2589_v47, %v2588_v58 }
 0x2b4   : > { %v2890_v37 = vshll.u32 %v10698_v53, 30  ;;  %v3050_v18 = vsub.s32 32, %v3049_v31  ;;  %vm7677_vm8 = vcmp.lt.s32.totalorder %v7676_v35, 0  ;;  %v3052_v43 = vshll.u32 %v13786_v60, %v3049_v31 }
 0x2b5   : > { %13939 = vst [vmem:[#allocation84_spill] sm:$0xff] %v10705_v17  ;;  %v3055_v59 = vshll.u32 %v13789_v22, %v3049_v31  ;;  %v3058_v4 = vshll.u32 %v13791_v29, %v3049_v31  ;;  %v2593_v30 = vshll.u32 %v2592_v49, 23  ;;  %v3061_v2 = vshll.u32 %v13790_v57, %v3049_v31 }
 0x2b6   : > { %v10716_v36 = vsub.s32 %v2887_v12, %v2890_v37  ;;  %v3053_v1 = vshrl.u32 %v13789_v22, %v3050_v18  ;;  %v10720_v39 = vpop.eup %8122  ;;  %v3043_v15 = vor.u32 8388608, %v3042_v26  ;;  %v3056_v16 = vshrl.u32 %v13791_v29, %v3050_v18 }
 0x2b7   : > { %13940 = vst [vmem:[#allocation85_spill] sm:$0xff] %v10720_v39  ;;  %v3059_v32 = vshrl.u32 %v13790_v57, %v3050_v18  ;;  %v7682_v19 = vadd.s32 4294967169, %v2935_v28  ;;  %v10724_v46 = vsel %vm7677_vm8, 0, %v7676_v35  ;;  %v3048_v33 = vshrl.u32 %v3047_v44, 5 }
 0x2b8   : > { %v2893_v5 = vsub.s32 0, %v10716_v36  ;;  %v3062_v12 = vshrl.u32 %v13821_v51, %v3050_v18  ;;  %v3054_v47 = vor.u32 %v3053_v1, %v3052_v43  ;;  %v3057_v52 = vor.u32 %v3056_v16, %v3055_v59 }
 0x2b9   : > { %v3060_v58 = vor.u32 %v3059_v32, %v3058_v4  ;;  %v3064_v49 = vshll.u32 %v13821_v51, %v3049_v31  ;;  %v3051_v26 = vshrl.u32 %v13786_v60, %v3050_v18  ;;  %v3065_v7 = vshrl.u32 %v13792_v54, %v3050_v18  ;;  %v10735_v18 = vpop.f32.mrb[16].mxu1 }
 0x2ba   : > { %v7679_v37 = vmin.u32 %v2893_v5, %v10716_v36  ;;  %v3063_v50 = vor.u32 %v3062_v12, %v3061_v2  ;;  %v10732_v28 = vpop.eup %8124  ;;  %v2594_v35 = vor.u32 4788187, %v2593_v30  ;;  %v2799_v13 = vsub.s32 4294967266, %v10724_v46 }
 0x2bb   : > { %13941 = vst [vmem:[#allocation86_spill] sm:$0xff] %v10732_v28  ;;  %v3083_v44 = vshll.u32 %v3043_v15, 8  ;;  %v2941_v17 = vadd.s32 1, %v7682_v19  ;;  %v3066_v43 = vor.u32 %v3065_v7, %v3064_v49  ;;  %vm3067_vm4 = vcmp.lt.s32.totalorder %v3048_v33, 1 }
 0x2bc   : > { %v2895_v63 = vclz %v7679_v37  ;;  %vm3070_vm6 = vcmp.lt.s32.totalorder %v3048_v33, 4  ;;  %vm3069_vm13 = vcmp.lt.s32.totalorder %v3048_v33, 3  ;;  %v3075_v59 = vsel %vm3067_vm4, %v3054_v47, %v3057_v52 }
 0x2bd   : > { %v3072_v31 = vsel %vm3070_vm6, %v3060_v58, 2102212464  ;;  %v3076_v4 = vsel %vm3070_vm6, %v3063_v50, 920167782  ;;  %vm3068_vm3 = vcmp.lt.s32.totalorder %v3048_v33, 2  ;;  %v3071_v2 = vsel %vm3067_vm4, %v3051_v26, %v3054_v47 }
 0x2be   : > { %v7680_v1 = vadd.s32 4294967294, %v2895_v63  ;;  %v3077_v16 = vsel %vm3069_vm13, %v3060_v58, %v3076_v4  ;;  %v3073_v32 = vsel %vm3069_vm13, %v3057_v52, %v3072_v31  ;;  %v3079_v5 = vsel %vm3067_vm4, %v3057_v52, %v3060_v58 }
 0x2bf   : > { %v3078_v30 = vsel %vm3068_vm3, %v3075_v59, %v3077_v16  ;;  %v3080_v15 = vsel %vm3070_vm6, %v3066_v43, 1326507024  ;;  %v10744_v49 = vadd.f32 %v10485_v34, %v10202_v0  ;;  %v2595_v63 = vand.u32 2147483647, %v2594_v35 }
 0x2c0   : > { %v3081_v19 = vsel %vm3069_vm13, %v3063_v50, %v3080_v15  ;;  %v10738_v12 = vmul.u32.u64.low %v3083_v44, %v3078_v30  ;;  %v10739_v7 = vmul.u32.u64.high %v3083_v44, %v3078_v30, %v10738_v12  ;;  %v13641_v37 = vand.u32 2147483647, %v10678_v45 }
 0x2c1   : > { %13942 = vst [vmem:[#allocation87_spill] sm:$0xff] %v10744_v49  ;;  %v3082_v47 = vsel %vm3068_vm3, %v3079_v5, %v3081_v19  ;;  %vm2942_vm14 = vcmp.gt.s32.totalorder %v2941_v17, 0  ;;  %v2597_v26 = vcvt.s32.f32 %v10710_v25  ;;  %v2800_v31 = vadd.s32 127, %v2799_v13 }
 0x2c2   : > { %v3074_v52 = vsel %vm3068_vm3, %v3071_v2, %v3073_v32  ;;  %v2943_v50 = vsel %vm2942_vm14, %v2941_v17, 0  ;;  %vm7681_vm8 = vcmp.lt.s32.totalorder %v7680_v1, 0  ;;  %8126 = vcosq.f32 %v10703_v6 }
 0x2c3   : > { %v10750_v58 = vmul.u32.u64.low %v3083_v44, %v3082_v47  ;;  %v10751_v43 = vmul.u32.u64.high %v3083_v44, %v3082_v47, %v10750_v58  ;;  %v2945_v59 = vand.u32 31, %v2943_v50  ;;  %v13943_v0 = vxor.u32 2147483648, %v10693_v48 }
 0x2c4   : > { %vm13944_vm4 = vcmp.lt.s32.totalorder %v10241_v27, 0  ;;  %v2779_v13 = vadd.s32 %v10552_v11, %v10562_v42  ;;  %v3093_v25 = vadd.s32 1, %v10739_v7  ;;  %v10764_v17 = vmul.f32 %v2597_v26, %v2595_v63 }
 0x2c5   : > { %v10759_v34 = vsel %vm13944_vm4, %v13943_v0, %v10693_v48  ;;  %v2938_v33 = vand.u32 8388607, %v13641_v37  ;;  %v2946_v35 = vsub.s32 32, %v2945_v59  ;;  %v2801_v2 = vshll.u32 %v2800_v31, 23 }
 0x2c6   : > { %v10769_v16 = vsel %vm7681_vm8, 0, %v7680_v1  ;;  %v3090_v32 = vmul.u32 %v3083_v44, %v3074_v52  ;;  %v3142_v48 = vand.u32 2139095040, %v10744_v49  ;;  %vm3092_vm6 = vc.u32 %v10751_v43, %v10738_v12 }
 0x2c7   : > { %v10774_v11 = vshrl.u32 %v2943_v50, 5  ;;  %v2948_v42 = vshll.u32 %v13786_v60, %v2945_v59  ;;  %v2949_v30 = vshrl.u32 %v13789_v22, %v2946_v35  ;;  %v3094_v5 = vsel %vm3092_vm6, %v3093_v25, %v10739_v7 }
 0x2c8   : > { %v2951_v15 = vshll.u32 %v13789_v22, %v2945_v59  ;;  %v2952_v19 = vshrl.u32 %v13791_v29, %v2946_v35  ;;  %v2954_v1 = vshll.u32 %v13791_v29, %v2945_v59  ;;  %v3095_v44 = vadd.s32 %v3094_v5, %v3090_v32 }
 0x2c9   : > { %v2955_v63 = vshrl.u32 %v13790_v57, %v2946_v35  ;;  %v2957_v47 = vshll.u32 %v13790_v57, %v2945_v59  ;;  %v2958_v26 = vshrl.u32 %v13821_v51, %v2946_v35  ;;  %v2950_v31 = vor.u32 %v2949_v30, %v2948_v42 }
 0x2ca   : > { %v2953_v52 = vor.u32 %v2952_v19, %v2951_v15  ;;  %v2960_v50 = vshll.u32 %v13821_v51, %v2945_v59  ;;  %v2961_v58 = vshrl.u32 %v13792_v54, %v2946_v35  ;;  %v2903_v7 = vsub.s32 4294967266, %v10769_v16 }
 0x2cb   : > { %v3096_v0 = vadd.s32 536870912, %v3095_v44  ;;  %v2956_v25 = vor.u32 %v2955_v63, %v2954_v1  ;;  %v2959_v37 = vor.u32 %v2958_v26, %v2957_v47  ;;  %v2795_v4 = vsub.s32 32, %v10724_v46 }
 0x2cc   : > { %v2796_v32 = vshll.u32 %v10631_v24, %v10724_v46  ;;  %v2939_v5 = vor.u32 8388608, %v2938_v33  ;;  %v2962_v39 = vor.u32 %v2961_v58, %v2960_v50  ;;  %v2802_v3 = vor.u32 4788187, %v2801_v2  ;;  %v10795_v59 = vpop.eup %8126 }
 0x2cd   : > { %v10791_v28 = vshrl.u32 %v3096_v0, 30  ;;  %vm2963_vm13 = vcmp.lt.s32.totalorder %v10774_v11, 1  ;;  %vm2966_vm3 = vcmp.lt.s32.totalorder %v10774_v11, 4  ;;  %13945 = vst [vmem:[#allocation88_spill] sm:$0xff] %v10795_v59  ;;  %vm2965_vm14 = vcmp.lt.s32.totalorder %v10774_v11, 3 }
 0x2ce   : > { %v2971_v42 = vsel %vm2963_vm13, %v2950_v31, %v2953_v52  ;;  %v2972_v30 = vsel %vm2966_vm3, %v2959_v37, 920167782  ;;  %v3143_v15 = vshrl.u32 %v3142_v48, 23  ;;  %v2904_v19 = vadd.s32 127, %v2903_v7 }
 0x2cf   : > { %v3098_v24 = vshll.u32 %v10791_v28, 30  ;;  %v2973_v46 = vsel %vm2965_vm14, %v2956_v25, %v2972_v30  ;;  %v2975_v33 = vsel %vm2963_vm13, %v2953_v52, %v2956_v25  ;;  %v2797_v2 = vshrl.u32 %v2779_v13, %v2795_v4 }
 0x2d0   : > { %vm2964_vm8 = vcmp.lt.s32.totalorder %v10774_v11, 2  ;;  %v2968_v1 = vsel %vm2966_vm3, %v2956_v25, 2102212464  ;;  %v2976_v63 = vsel %vm2966_vm3, %v2962_v39, 1326507024  ;;  %vm13646_vm4 = vcmp.lt.s32.totalorder %v10328_v8, 0 }
 0x2d1   : > { %v10807_v47 = vsub.s32 %v3095_v44, %v3098_v24  ;;  %v2947_v48 = vshrl.u32 %v13786_v60, %v2946_v35  ;;  %v2974_v26 = vsel %vm2964_vm8, %v2971_v42, %v2973_v46  ;;  %v2977_v50 = vsel %vm2965_vm14, %v2959_v37, %v2976_v63  ;;  %v10846_v63 = vpop.f32.mrb[17].mxu0 }
 0x2d2   : > { %v2899_v58 = vsub.s32 32, %v10769_v16  ;;  %v2978_v13 = vsel %vm2964_vm8, %v2975_v33, %v2977_v50  ;;  %v2979_v4 = vshll.u32 %v2939_v5, 8  ;;  %v7690_v7 = vadd.s32 4294967169, %v3143_v15 }
 0x2d3   : > { %v2905_v39 = vshll.u32 %v2904_v19, 23  ;;  %v3101_v0 = vsub.s32 0, %v10807_v47  ;;  %v2967_v44 = vsel %vm2963_vm13, %v2947_v48, %v2950_v31  ;;  %v2969_v35 = vsel %vm2965_vm14, %v2953_v52, %v2968_v1 }
 0x2d4   : > { %v10822_v25 = vmul.u32.u64.low %v2979_v4, %v2978_v13  ;;  %v10823_v42 = vmul.u32.u64.high %v2979_v4, %v2978_v13, %v10822_v25  ;;  %v10825_v37 = vmul.u32.u64.low %v2979_v4, %v2974_v26  ;;  %v10826_v30 = vmul.u32.u64.high %v2979_v4, %v2974_v26, %v10825_v37  ;;  %v10858_v13 = vpop.permute.xlu0 %680 }
 0x2d5   : > { %v2798_v24 = vor.u32 %v2797_v2, %v2796_v32  ;;  %v2883_v5 = vadd.s32 %v10648_v10, %v10660_v9  ;;  %v7687_v15 = vmin.u32 %v3101_v0, %v10807_v47  ;;  %v3149_v19 = vadd.s32 1, %v7690_v7 }
 0x2d6   : > { %v10836_v31 = vsel %vm10644_vm12, %v10241_v27, %v10759_v34  ;;  %v2599_v52 = vxor.u32 2147483648, %v10764_v17  ;;  %v2803_v46 = vand.u32 2147483647, %v2802_v3  ;;  %v2970_v33 = vsel %vm2964_vm8, %v2967_v44, %v2969_v35 }
 0x2d7   : > { %v2901_v1 = vshrl.u32 %v2883_v5, %v2899_v58  ;;  %v2906_v32 = vor.u32 4788187, %v2905_v39  ;;  %v3103_v2 = vclz %v7687_v15  ;;  %vm3150_vm6 = vcmp.gt.s32.totalorder %v3149_v19, 0 }
 0x2d8   : > { %vm2988_vm13 = vc.u32 %v10823_v42, %v10825_v37  ;;  %v2989_v10 = vadd.s32 1, %v10826_v30  ;;  %v13946_v9 = vand.u32 2147483647, %v10744_v49  ;;  %v3151_v34 = vsel %vm3150_vm6, %v3149_v19, 0 }
 0x2d9   : > { %8128 = vsinq.f32 %v10703_v6  ;;  %v2805_v3 = vcvt.s32.f32 %v2798_v24  ;;  %v2986_v11 = vmul.u32 %v2979_v4, %v2970_v33  ;;  %v3153_v48 = vand.u32 31, %v3151_v34 }
 0x2da   : > { %v3146_v61 = vand.u32 8388607, %v13946_v9  ;;  %8130 = vcosq.f32 %v10836_v31  ;;  %v10853_v26 = vsel %vm13646_vm4, %v2599_v52, %v10764_v17  ;;  %v2900_v50 = vshll.u32 %v10716_v36, %v10769_v16 }
 0x2db   : > { %v2990_v58 = vsel %vm2988_vm13, %v2989_v10, %v10826_v30  ;;  %v10860_v7 = vmul.f32 %v2805_v3, %v2803_v46  ;;  %v7688_v6 = vadd.s32 4294967294, %v3103_v2  ;;  %v3154_v4 = vsub.s32 32, %v3153_v48 }
 0x2dc   : > { %v2991_v39 = vadd.s32 %v2990_v58, %v2986_v11  ;;  %v2902_v0 = vor.u32 %v2901_v1, %v2900_v50  ;;  %v2907_v44 = vand.u32 2147483647, %v2906_v32  ;;  %v3147_v35 = vor.u32 8388608, %v3146_v61 }
 0x2dd   : > { %v10864_v25 = vadd.f32 %v10858_v13, %v10343_v41  ;;  %v3152_v24 = vshrl.u32 %v3151_v34, 5  ;;  %v3156_v36 = vshll.u32 %v13786_v60, %v3153_v48  ;;  %v3159_v16 = vshll.u32 %v13789_v22, %v3153_v48 }
 0x2de   : > { %v2992_v17 = vadd.s32 536870912, %v2991_v39  ;;  %v3157_v30 = vshrl.u32 %v13789_v22, %v3154_v4  ;;  %v3160_v5 = vshrl.u32 %v13791_v29, %v3154_v4  ;;  %v3162_v15 = vshll.u32 %v13791_v29, %v3153_v48 }
 0x2df   : > { %13947 = vst [vmem:[#allocation89_spill] sm:$0xff] %v10864_v25  ;;  %v3163_v19 = vshrl.u32 %v13790_v57, %v3154_v4  ;;  %vm7689_vm12 = vcmp.lt.s32.totalorder %v7688_v6, 0  ;;  %v3165_v41 = vshll.u32 %v13790_v57, %v3153_v48  ;;  %v3166_v46 = vshrl.u32 %v13821_v51, %v3154_v4 }
 0x2e0   : > { %v10872_v52 = vshrl.u32 %v2992_v17, 30  ;;  %v13949_v33 = vand.u32 2147483647, %v10328_v8  ;;  %v13950_v1 = vmov 0  ;;  %v2909_v32 = vcvt.s32.f32 %v2902_v0 }
 0x2e1   : > { %v3158_v2 = vor.u32 %v3157_v30, %v3156_v36  ;;  %v3161_v10 = vor.u32 %v3160_v5, %v3159_v16  ;;  %v3164_v9 = vor.u32 %v3163_v19, %v3162_v15  ;;  %vm13656_vm14 = vcmp.lt.s32.totalorder %v10431_v55, 0 }
 0x2e2   : > { %13948 = vst [vmem:[#allocation90_spill] sm:$0xff] %v10872_v52  ;;  %vm10878_vm3 = vcmp.le.f32.partialorder %v13949_v33, 0.7853982  ;;  %v2807_v61 = vxor.u32 2147483648, %v10860_v7  ;;  %v2913_v34 = vsub.s32 4, %v10698_v53  ;;  %v2994_v3 = vshll.u32 %v10872_v52, 30 }
 0x2e3   : > { %v13951_v1 = vsel %vm10878_vm3, 4294967295, %v13950_v1  ;;  %v3167_v11 = vor.u32 %v3166_v46, %v3165_v41  ;;  %v2910_v50 = vmul.f32 %v2909_v32, %v2907_v44  ;;  %v10888_v58 = vsel %vm7689_vm12, 0, %v7688_v6  ;;  %v10892_v36 = vpop.eup %8128 }
 0x2e4   : > { %13952 = vst [vmem:[#allocation91_spill] sm:$0xff] %v13951_v1  ;;  %v3168_v0 = vshll.u32 %v13821_v51, %v3153_v48  ;;  %v3169_v17 = vshrl.u32 %v13792_v54, %v3154_v4  ;;  %13953 = vst [vmem:[#allocation92_spill] sm:$0xff] %v10892_v36  ;;  %vm3171_vm6 = vcmp.lt.s32.totalorder %v3152_v24, 1  ;;  %vm3174_vm13 = vcmp.lt.s32.totalorder %v3152_v24, 4  ;;  %v10895_v5 = vpop.eup %8130 }
 0x2e5   : > { %v3187_v16 = vshll.u32 %v3147_v35, 8  ;;  %v3246_v30 = vand.u32 2139095040, %v10864_v25  ;;  %13954 = vst [vmem:[#allocation93_spill] sm:$0xff] %v10895_v5  ;;  %v10897_v15 = vsub.s32 %v2991_v39, %v2994_v3  ;;  %v3176_v44 = vsel %vm3174_vm13, %v3164_v9, 2102212464 }
 0x2e6   : > { %v3170_v19 = vor.u32 %v3169_v17, %v3168_v0  ;;  %v3179_v6 = vsel %vm3171_vm6, %v3158_v2, %v3161_v10  ;;  %v13955_v48 = vand.u32 2147483647, %v10431_v55  ;;  %v13956_v41 = vmov 0 }
 0x2e7   : > { %v13959_v46 = vand.u32 2147483647, %v10496_v62  ;;  %v3111_v39 = vsub.s32 4294967266, %v10888_v58  ;;  %v3155_v33 = vshrl.u32 %v13786_v60, %v3154_v4  ;;  %vm3173_vm4 = vcmp.lt.s32.totalorder %v3152_v24, 3 }
 0x2e8   : > { %vm10903_vm12 = vcmp.le.f32.partialorder %v13955_v48, 0.7853982  ;;  %v3180_v32 = vsel %vm3174_vm13, %v3167_v11, 920167782  ;;  %vm3172_vm8 = vcmp.lt.s32.totalorder %v3152_v24, 2  ;;  %v3183_v0 = vsel %vm3171_vm6, %v3161_v10, %v3164_v9 }
 0x2e9   : > { %v13957_v41 = vsel %vm10903_vm12, 4294967295, %v13956_v41  ;;  %vm10909_vm11 = vcmp.le.f32.partialorder %v13959_v46, 0.7853982  ;;  %v3181_v3 = vsel %vm3173_vm4, %v3164_v9, %v3180_v32  ;;  %v3184_v17 = vsel %vm3174_vm13, %v3170_v19, 1326507024  ;;  %v10934_v19 = vpop.f32.mrb[17].mxu1 }
 0x2ea   : > { %13958 = vst [vmem:[#allocation94_spill] sm:$0xff] %v13957_v41  ;;  %v3175_v48 = vsel %vm3171_vm6, %v3155_v33, %v3158_v2  ;;  %v3177_v27 = vsel %vm3173_vm4, %v3161_v10, %v3176_v44  ;;  %v3182_v46 = vsel %vm3172_vm8, %v3179_v6, %v3181_v3  ;;  %v3185_v52 = vsel %vm3173_vm4, %v3167_v11, %v3184_v17 }
 0x2eb   : > { %v2997_v5 = vsub.s32 0, %v10897_v15  ;;  %v3186_v59 = vsel %vm3172_vm8, %v3183_v0, %v3185_v52  ;;  %v10922_v4 = vmul.u32.u64.low %v3187_v16, %v3182_v46  ;;  %v10923_v36 = vmul.u32.u64.high %v3187_v16, %v3182_v46, %v10922_v4 }
 0x2ec   : > { %8132 = vsinq.f32 %v10836_v31  ;;  %v2603_v9 = vsel %vm10878_vm3, %v10328_v8, %v10853_v26  ;;  %v10931_v2 = vmul.u32.u64.low %v3187_v16, %v3186_v59  ;;  %v10932_v10 = vmul.u32.u64.high %v3187_v16, %v3186_v59, %v10931_v2 }
 0x2ed   : > { %v2808_v52 = vsel %vm13656_vm14, %v2807_v61, %v10860_v7  ;;  %vm13962_vm4 = vcmp.lt.s32.totalorder %v10496_v62, 0  ;;  %v3178_v31 = vsel %vm3172_vm8, %v3175_v48, %v3177_v27  ;;  %v3247_v44 = vshrl.u32 %v3246_v30, 23 }
 0x2ee   : > { %v2914_v11 = vsel %vm13962_vm4, %v2913_v34, %v10698_v53  ;;  %v2911_v6 = vxor.u32 2147483648, %v2910_v50  ;;  %v3107_v33 = vsub.s32 32, %v10888_v58  ;;  %v3112_v26 = vadd.s32 127, %v3111_v39  ;;  %vm13964_vm6 = vmmov %vm13962_vm4 }
 0x2ef   : > { %v10946_v59 = vadd.f32 %v10858_v13, %v10406_v38  ;;  %v7683_v32 = vmin.u32 %v2997_v5, %v10897_v15  ;;  %v3197_v3 = vadd.s32 1, %v10923_v36  ;;  %v13653_v7 = vand.u32 2147483647, %v10864_v25 }
 0x2f0   : > { %v7694_v61 = vadd.s32 4294967169, %v3247_v44  ;;  %8134 = vcosq.f32 %v2603_v9  ;;  %v3091_v27 = vadd.s32 %v10738_v12, %v10751_v43  ;;  %v3194_v53 = vmul.u32 %v3187_v16, %v3178_v31 }
 0x2f1   : > { %13963 = vst [vmem:[#allocation95_spill] sm:$0xff] %v10946_v59  ;;  %vm3196_vm8 = vc.u32 %v10932_v10, %v10922_v4  ;;  %v10958_v38 = vsel %vm10903_vm12, %v10431_v55, %v2808_v52  ;;  %v2916_v24 = vsel %vm10909_vm11, 0, %v2914_v11  ;;  %v2912_v5 = vsel %vm13964_vm6, %v2911_v6, %v2910_v50 }
 0x2f2   : > { %v3198_v34 = vsel %vm3196_vm8, %v3197_v3, %v10923_v36  ;;  %v3253_v30 = vadd.s32 1, %v7694_v61  ;;  %v3109_v39 = vshrl.u32 %v3091_v27, %v3107_v33  ;;  %v3113_v12 = vshll.u32 %v3112_v26, 23 }
 0x2f3   : > { %v3199_v43 = vadd.s32 %v3198_v34, %v3194_v53  ;;  %vm13657_vm13 = vcmp.lt.s32.totalorder %v10615_v23, 0  ;;  %v2999_v16 = vclz %v7683_v32  ;;  %v3250_v0 = vand.u32 8388607, %v13653_v7 }
 0x2f4   : > { %vm3254_vm4 = vcmp.gt.s32.totalorder %v3253_v30, 0  ;;  %v3454_v17 = vand.u32 2139095040, %v10946_v59  ;;  %8136 = vsinq.f32 %v2603_v9  ;;  %v3108_v36 = vshll.u32 %v10807_v47, %v10888_v58 }
 0x2f5   : > { %v3200_v48 = vadd.s32 536870912, %v3199_v43  ;;  %v3255_v46 = vsel %vm3254_vm4, %v3253_v30, 0  ;;  %8138 = vcosq.f32 %v10958_v38  ;;  %v10972_v50 = vadd.s32 3, %v2916_v24 }
 0x2f6   : > { %v3121_v2 = vsub.s32 4, %v10791_v28  ;;  %v3257_v52 = vand.u32 31, %v3255_v46  ;;  %v10975_v11 = vpop.eup %8132  ;;  %v10980_v31 = vsel %vm10909_vm11, %v10496_v62, %v2912_v5  ;;  %v10982_v9 = vor.u32 %v3109_v39, %v3108_v36 }
 0x2f7   : > { %13965 = vst [vmem:[#allocation96_spill] sm:$0xff] %v10972_v50  ;;  %13966 = vst [vmem:[#allocation97_spill] sm:$0xff] %v10975_v11  ;;  %v10984_v44 = vor.u32 4788187, %v3113_v12  ;;  %v10986_v47 = vshrl.u32 %v3200_v48, 30  ;;  %v7684_v58 = vadd.s32 4294967294, %v2999_v16  ;;  %8140 = vsinq.f32 %v10958_v38 }
 0x2f8   : > { %v3251_v6 = vor.u32 8388608, %v3250_v0  ;;  %v3258_v33 = vsub.s32 32, %v3257_v52  ;;  %v3455_v26 = vshrl.u32 %v3454_v17, 23  ;;  %v3256_v3 = vshrl.u32 %v3255_v46, 5 }
 0x2f9   : > { %13967 = vst [vmem:[#allocation98_spill] sm:$0xff] %v10986_v47  ;;  %v3202_v32 = vshll.u32 %v10986_v47, 30  ;;  %v3260_v61 = vshll.u32 %v13786_v60, %v3257_v52  ;;  %v3263_v27 = vshll.u32 %v13789_v22, %v3257_v52  ;;  %v3266_v24 = vshll.u32 %v13791_v29, %v3257_v52 }
 0x2fa   : > { %v3261_v35 = vshrl.u32 %v13789_v22, %v3258_v33  ;;  %v3264_v53 = vshrl.u32 %v13791_v29, %v3258_v33  ;;  %v3267_v34 = vshrl.u32 %v13790_v57, %v3258_v33  ;;  %v10995_v30 = vpop.eup %8134  ;;  %v3269_v39 = vshll.u32 %v13790_v57, %v3257_v52 }
 0x2fb   : > { %13968 = vst [vmem:[#allocation99_spill] sm:$0xff] %v10995_v30  ;;  %v10997_v5 = vsub.s32 %v3199_v43, %v3202_v32  ;;  %v3270_v12 = vshrl.u32 %v13821_v51, %v3258_v33  ;;  %v3272_v16 = vshll.u32 %v13821_v51, %v3257_v52  ;;  %v3273_v48 = vshrl.u32 %v13792_v54, %v3258_v33 }
 0x2fc   : > { %v3262_v0 = vor.u32 %v3261_v35, %v3260_v61  ;;  %v3265_v17 = vor.u32 %v3264_v53, %v3263_v27  ;;  %v3268_v36 = vor.u32 %v3267_v34, %v3266_v24  ;;  %v3117_v46 = vcvt.s32.f32 %v10982_v9 }
 0x2fd   : > { %v11007_v7 = vsel %vm13657_vm13, %v3121_v2, %v10791_v28  ;;  %v3205_v43 = vsub.s32 0, %v10997_v5  ;;  %v3271_v32 = vor.u32 %v3270_v12, %v3269_v39  ;;  %v13969_v62 = vand.u32 2147483647, %v10615_v23 }
 0x2fe   : > { %v3115_v52 = vand.u32 2147483647, %v10984_v44  ;;  %vm7685_vm8 = vcmp.lt.s32.totalorder %v7684_v58, 0  ;;  %v3274_v61 = vor.u32 %v3273_v48, %v3272_v16  ;;  %v3291_v27 = vshll.u32 %v3251_v6, 8  ;;  %v11017_v9 = vpop.eup %8136 }
 0x2ff   : > { %vm11012_vm11 = vcmp.le.f32.partialorder %v13969_v62, 0.7853982  ;;  %v7691_v35 = vmin.u32 %v3205_v43, %v10997_v5  ;;  %vm3275_vm6 = vcmp.lt.s32.totalorder %v3256_v3, 1  ;;  %vm3278_vm4 = vcmp.lt.s32.totalorder %v3256_v3, 4  ;;  %v11020_v2 = vpop.eup %8138 }
 0x300   : > { %v7702_v28 = vadd.s32 4294967169, %v3455_v26  ;;  %13972 = vst [vmem:[#allocation100_spill] sm:$0xff] %v11020_v2  ;;  %vm3277_vm14 = vcmp.lt.s32.totalorder %v3256_v3, 3  ;;  %v3280_v53 = vsel %vm3278_vm4, %v3268_v36, 2102212464  ;;  %v3283_v62 = vsel %vm3275_vm6, %v3262_v0, %v3265_v17 }
 0x301   : > { %v3284_v24 = vsel %vm3278_vm4, %v3271_v32, 920167782  ;;  %v3259_v34 = vshrl.u32 %v13786_v60, %v3258_v33  ;;  %vm3276_vm13 = vcmp.lt.s32.totalorder %v3256_v3, 2  ;;  %v3287_v6 = vsel %vm3275_vm6, %v3265_v17, %v3268_v36 }
 0x302   : > { %v3285_v44 = vsel %vm3277_vm14, %v3268_v36, %v3284_v24  ;;  %v11026_v39 = vsel %vm7685_vm8, 0, %v7684_v58  ;;  %v3207_v12 = vclz %v7691_v35  ;;  %v3288_v26 = vsel %vm3278_vm4, %v3274_v61, 1326507024 }
 0x303   : > { %v3286_v16 = vsel %vm3276_vm13, %v3283_v62, %v3285_v44  ;;  %v3279_v48 = vsel %vm3275_vm6, %v3259_v34, %v3262_v0  ;;  %v3281_v43 = vsel %vm3277_vm14, %v3265_v17, %v3280_v53  ;;  %v3289_v47 = vsel %vm3277_vm14, %v3271_v32, %v3288_v26 }
 0x304   : > { %v3461_v11 = vadd.s32 1, %v7702_v28  ;;  %v3290_v2 = vsel %vm3276_vm13, %v3287_v6, %v3289_v47  ;;  %v11031_v41 = vmul.u32.u64.low %v3291_v27, %v3286_v16  ;;  %v11032_v33 = vmul.u32.u64.high %v3291_v27, %v3286_v16, %v11031_v41 }
 0x305   : > { %v13663_v36 = vand.u32 2147483647, %v10946_v59  ;;  %v3007_v58 = vsub.s32 4294967266, %v11026_v39  ;;  %v11037_v24 = vmul.u32.u64.low %v3291_v27, %v3290_v2  ;;  %v11038_v35 = vmul.u32.u64.high %v3291_v27, %v3290_v2, %v11037_v24 }
 0x306   : > { %vm3462_vm8 = vcmp.gt.s32.totalorder %v3461_v11, 0  ;;  %v7692_v0 = vadd.s32 4294967294, %v3207_v12  ;;  %v3282_v17 = vsel %vm3276_vm13, %v3279_v48, %v3281_v43  ;;  %8142 = vcosq.f32 %v10980_v31 }
 0x307   : > { %v3463_v32 = vsel %vm3462_vm8, %v3461_v11, 0  ;;  %v11043_v47 = vmul.f32 %v3117_v46, %v3115_v52  ;;  %v3003_v28 = vsub.s32 32, %v11026_v39  ;;  %v3301_v2 = vadd.s32 1, %v11032_v33 }
 0x308   : > { %v3458_v53 = vand.u32 8388607, %v13663_v36  ;;  %v3465_v38 = vand.u32 31, %v3463_v32  ;;  %v11054_v3 = vadd.f32 %v10858_v13, %v10490_v14  ;;  %v2987_v11 = vadd.s32 %v10825_v37, %v10823_v42  ;;  %v11068_v37 = vpop.f32.mrb[18].mxu0 }
 0x309   : > { %v3008_v46 = vadd.s32 127, %v3007_v58  ;;  %v3298_v52 = vmul.u32 %v3291_v27, %v3282_v17  ;;  %vm3300_vm14 = vc.u32 %v11038_v35, %v11031_v41  ;;  %vm7693_vm13 = vcmp.lt.s32.totalorder %v7692_v0, 0 }
 0x30a   : > { %13973 = vst [vmem:[#allocation101_spill] sm:$0xff] %v11054_v3  ;;  %v3302_v62 = vsel %vm3300_vm14, %v3301_v2, %v11032_v33  ;;  %v3466_v34 = vsub.s32 32, %v3465_v38  ;;  %v11063_v44 = vadd.f32 %v10858_v13, %v10587_v21  ;;  %v3004_v14 = vshll.u32 %v10897_v15, %v11026_v39 }
 0x30b   : > { %v3005_v12 = vshrl.u32 %v2987_v11, %v3003_v28  ;;  %v3303_v42 = vadd.s32 %v3302_v62, %v3298_v52  ;;  %v3459_v27 = vor.u32 8388608, %v3458_v53  ;;  %v3009_v43 = vshll.u32 %v3008_v46, 23 }
 0x30c   : > { %13974 = vst [vmem:[#allocation102_spill] sm:$0xff] %v11063_v44  ;;  %v3469_v16 = vshrl.u32 %v13789_v22, %v3466_v34  ;;  %v3472_v26 = vshrl.u32 %v13791_v29, %v3466_v34  ;;  %v3475_v48 = vshrl.u32 %v13790_v57, %v3466_v34  ;;  %v11073_v33 = vsel %vm7693_vm13, 0, %v7692_v0  ;;  %v11084_v0 = vpop.eup %8140 }
 0x30d   : > { %v3304_v21 = vadd.s32 536870912, %v3303_v42  ;;  %v3468_v13 = vshll.u32 %v13786_v60, %v3465_v38  ;;  %v3471_v58 = vshll.u32 %v13789_v22, %v3465_v38  ;;  %v3474_v15 = vshll.u32 %v13791_v29, %v3465_v38  ;;  %13975 = vst [vmem:[#allocation103_spill] sm:$0xff] %v11084_v0 }
 0x30e   : > { %v3477_v39 = vshll.u32 %v13790_v57, %v3465_v38  ;;  %v3478_v24 = vshrl.u32 %v13821_v51, %v3466_v34  ;;  %v3464_v28 = vshrl.u32 %v3463_v32, 5  ;;  %v3480_v2 = vshll.u32 %v13821_v51, %v3465_v38 }
 0x30f   : > { %v11080_v17 = vshrl.u32 %v3304_v21, 30  ;;  %v3481_v53 = vshrl.u32 %v13792_v54, %v3466_v34  ;;  %v3470_v11 = vor.u32 %v3469_v16, %v3468_v13  ;;  %v3473_v46 = vor.u32 %v3472_v26, %v3471_v58 }
 0x310   : > { %v3476_v52 = vor.u32 %v3475_v48, %v3474_v15  ;;  %v3479_v62 = vor.u32 %v3478_v24, %v3477_v39  ;;  %v11086_v36 = vpop.eup %8142  ;;  %v3006_v61 = vor.u32 %v3005_v12, %v3004_v14  ;;  %v3010_v20 = vor.u32 4788187, %v3009_v43 }
 0x311   : > { %13976 = vst [vmem:[#allocation104_spill] sm:$0xff] %v11086_v36  ;;  %v3306_v6 = vshll.u32 %v11080_v17, 30  ;;  %v3482_v55 = vor.u32 %v3481_v53, %v3480_v2  ;;  %v3211_v32 = vsub.s32 32, %v11073_v33  ;;  %v3215_v38 = vsub.s32 4294967266, %v11073_v33 }
 0x312   : > { %v3499_v30 = vshll.u32 %v3459_v27, 8  ;;  %vm3483_vm6 = vcmp.lt.s32.totalorder %v3464_v28, 1  ;;  %vm3486_vm4 = vcmp.lt.s32.totalorder %v3464_v28, 4  ;;  %v3350_v16 = vand.u32 2139095040, %v11054_v3 }
 0x313   : > { %v11092_v1 = vsub.s32 %v3303_v42, %v3306_v6  ;;  %v3491_v26 = vsel %vm3483_vm6, %v3470_v11, %v3473_v46  ;;  %v3492_v14 = vsel %vm3486_vm4, %v3479_v62, 920167782  ;;  %v3495_v12 = vsel %vm3483_vm6, %v3473_v46, %v3476_v52 }
 0x314   : > { %v3496_v48 = vsel %vm3486_vm4, %v3482_v55, 1326507024  ;;  %v3467_v43 = vshrl.u32 %v13786_v60, %v3466_v34  ;;  %vm3485_vm8 = vcmp.lt.s32.totalorder %v3464_v28, 3  ;;  %v3488_v58 = vsel %vm3486_vm4, %v3476_v52, 2102212464  ;;  %v11106_v34 = vpop.f32.mrb[18].mxu1 }
 0x315   : > { %v3309_v13 = vsub.s32 0, %v11092_v1  ;;  %v3216_v15 = vadd.s32 127, %v3215_v38  ;;  %vm3484_vm14 = vcmp.lt.s32.totalorder %v3464_v28, 2  ;;  %v3493_v6 = vsel %vm3485_vm8, %v3476_v52, %v3492_v14 }
 0x316   : > { %v3497_v42 = vsel %vm3485_vm8, %v3479_v62, %v3496_v48  ;;  %v3487_v39 = vsel %vm3483_vm6, %v3467_v43, %v3470_v11  ;;  %v3494_v24 = vsel %vm3484_vm14, %v3491_v26, %v3493_v6  ;;  %v3489_v53 = vsel %vm3485_vm8, %v3473_v46, %v3488_v58 }
 0x317   : > { %v7695_v27 = vmin.u32 %v3309_v13, %v11092_v1  ;;  %v3498_v2 = vsel %vm3484_vm14, %v3495_v12, %v3497_v42  ;;  %v3351_v36 = vshrl.u32 %v3350_v16, 23  ;;  %v3195_v38 = vadd.s32 %v10922_v4, %v10932_v10 }
 0x318   : > { %v11103_v55 = vmul.u32.u64.low %v3499_v30, %v3498_v2  ;;  %v11104_v21 = vmul.u32.u64.high %v3499_v30, %v3498_v2, %v11103_v55  ;;  %v11110_v62 = vmul.u32.u64.low %v3499_v30, %v3494_v24  ;;  %v11111_v14 = vmul.u32.u64.high %v3499_v30, %v3494_v24, %v11110_v62 }
 0x319   : > { %v3311_v52 = vclz %v7695_v27  ;;  %8144 = vsinq.f32 %v10980_v31  ;;  %v13977_v11 = vxor.u32 2147483648, %v11043_v47  ;;  %vm13978_vm13 = vcmp.lt.s32.totalorder %v10615_v23, 0 }
 0x31a   : > { %v3011_v26 = vand.u32 2147483647, %v3010_v20  ;;  %v7698_v16 = vadd.s32 4294967169, %v3351_v36  ;;  %v3213_v12 = vshrl.u32 %v3195_v38, %v3211_v32  ;;  %v3217_v48 = vshll.u32 %v3216_v15, 23 }
 0x31b   : > { %v3120_v46 = vsel %vm13978_vm13, %v13977_v11, %v11043_v47  ;;  %v7696_v13 = vadd.s32 4294967294, %v3311_v52  ;;  %v3490_v4 = vsel %vm3484_vm14, %v3487_v39, %v3489_v53  ;;  %v3013_v10 = vcvt.s32.f32 %v3006_v61  ;;  %v11146_v53 = vpop.permute.xlu1 %685 }
 0x31c   : > { %vm3508_vm6 = vc.u32 %v11104_v21, %v11110_v62  ;;  %v13979_v43 = vand.u32 2147483647, %v11054_v3  ;;  %v3357_v58 = vadd.s32 1, %v7698_v16  ;;  %v3123_v6 = vsel %vm11012_vm11, %v10615_v23, %v3120_v46 }
 0x31d   : > { %v3212_v20 = vshll.u32 %v10997_v5, %v11073_v33  ;;  %v3509_v36 = vadd.s32 1, %v11111_v14  ;;  %v3558_v47 = vand.u32 2139095040, %v11063_v44  ;;  %v11132_v28 = vmul.f32 %v3013_v10, %v3011_v26 }
 0x31e   : > { %v3354_v31 = vand.u32 8388607, %v13979_v43  ;;  %vm7697_vm4 = vcmp.lt.s32.totalorder %v7696_v13, 0  ;;  %v3506_v61 = vmul.u32 %v3499_v30, %v3490_v4  ;;  %vm3358_vm8 = vcmp.gt.s32.totalorder %v3357_v58, 0 }
 0x31f   : > { %v13980_v32 = vsel %vm11012_vm11, 0, %v11007_v7  ;;  %v11140_v42 = vor.u32 %v3213_v12, %v3212_v20  ;;  %v11142_v27 = vor.u32 4788187, %v3217_v48  ;;  %v3510_v5 = vsel %vm3508_vm6, %v3509_v36, %v11111_v14 }
 0x320   : > { %v11138_v15 = vadd.s32 3, %v13980_v32  ;;  %v3511_v33 = vadd.s32 %v3510_v5, %v3506_v61  ;;  %v3355_v39 = vor.u32 8388608, %v3354_v31  ;;  %v3359_v24 = vsel %vm3358_vm8, %v3357_v58, 0 }
 0x321   : > { %v13671_v2 = vand.u32 2147483647, %v11063_v44  ;;  %8146 = vcosq.f32 %v3123_v6  ;;  %v3314_v30 = vsel %vm7697_vm4, 0, %v7696_v13  ;;  %v3361_v50 = vand.u32 31, %v3359_v24 }
 0x322   : > { %13981 = vst [vmem:[#allocation105_spill] sm:$0xff] %v11138_v15  ;;  %v3559_v55 = vshrl.u32 %v3558_v47, 23  ;;  %8148 = vsinq.f32 %v3123_v6  ;;  %v3512_v38 = vadd.s32 536870912, %v3511_v33  ;;  %v11151_v52 = vadd.f32 %v11146_v53, %v10685_v56 }
 0x323   : > { %v3299_v46 = vadd.s32 %v11031_v41, %v11038_v35  ;;  %v3362_v26 = vsub.s32 32, %v3361_v50  ;;  %v11157_v16 = vpop.eup %8144  ;;  %v3315_v12 = vsub.s32 32, %v3314_v30  ;;  %v11161_v13 = vshll.u32 %v3355_v39, 8 }
 0x324   : > { %13982 = vst [vmem:[#allocation106_spill] sm:$0xff] %v11151_v52  ;;  %13983 = vst [vmem:[#allocation107_spill] sm:$0xff] %v11157_v16  ;;  %v11159_v48 = vshrl.u32 %v3512_v38, 30  ;;  %v11165_v4 = vand.u32 8388607, %v13671_v2  ;;  %v3319_v56 = vsub.s32 4294967266, %v3314_v30  ;;  %v3364_v10 = vshll.u32 %v13786_v60, %v3361_v50 }
 0x325   : > { %v3365_v43 = vshrl.u32 %v13789_v22, %v3362_v26  ;;  %v7706_v31 = vadd.s32 4294967169, %v3559_v55  ;;  %v3367_v35 = vshll.u32 %v13789_v22, %v3361_v50  ;;  %v3368_v58 = vshrl.u32 %v13791_v29, %v3362_v26 }
 0x326   : > { %v3514_v41 = vshll.u32 %v11159_v48, 30  ;;  %v3371_v6 = vshrl.u32 %v13790_v57, %v3362_v26  ;;  %v3360_v20 = vshrl.u32 %v3359_v24, 5  ;;  %v3370_v36 = vshll.u32 %v13791_v29, %v3361_v50 }
 0x327   : > { %v3373_v47 = vshll.u32 %v13790_v57, %v3361_v50  ;;  %v3374_v61 = vshrl.u32 %v13821_v51, %v3362_v26  ;;  %v3317_v32 = vshrl.u32 %v3299_v46, %v3315_v12  ;;  %v3366_v39 = vor.u32 %v3365_v43, %v3364_v10 }
 0x328   : > { %v11176_v5 = vsub.s32 %v3511_v33, %v3514_v41  ;;  %v3369_v55 = vor.u32 %v3368_v58, %v3367_v35  ;;  %vm13679_vm11 = vcmp.lt.s32.totalorder %v10678_v45, 0  ;;  %v3372_v38 = vor.u32 %v3371_v6, %v3370_v36 }
 0x329   : > { %v3375_v2 = vor.u32 %v3374_v61, %v3373_v47  ;;  %v3376_v11 = vshll.u32 %v13821_v51, %v3361_v50  ;;  %v3377_v14 = vshrl.u32 %v13792_v54, %v3362_v26  ;;  %v3316_v24 = vshll.u32 %v11092_v1, %v3314_v30 }
 0x32a   : > { %v3517_v7 = vsub.s32 0, %v11176_v5  ;;  %v3563_v23 = vor.u32 8388608, %v11165_v4  ;;  %v3662_v46 = vand.u32 2139095040, %v11151_v52  ;;  %v3320_v12 = vadd.s32 127, %v3319_v56 }
 0x32b   : > { %v11185_v33 = vpop.eup %8146  ;;  %v3378_v10 = vor.u32 %v3377_v14, %v3376_v11  ;;  %vm3379_vm14 = vcmp.lt.s32.totalorder %v3360_v20, 1  ;;  %v3565_v43 = vadd.s32 1, %v7706_v31  ;;  %v11189_v35 = vor.u32 %v3317_v32, %v3316_v24 }
 0x32c   : > { %13984 = vst [vmem:[#allocation108_spill] sm:$0xff] %v11185_v33  ;;  %v11187_v41 = vpop.eup %8148  ;;  %v7703_v50 = vmin.u32 %v3517_v7, %v11176_v5  ;;  %vm3382_vm13 = vcmp.lt.s32.totalorder %v3360_v20, 4  ;;  %v3387_v1 = vsel %vm3379_vm14, %v3366_v39, %v3369_v55  ;;  %v3363_v30 = vshrl.u32 %v13786_v60, %v3362_v26 }
 0x32d   : > { %13985 = vst [vmem:[#allocation109_spill] sm:$0xff] %v11187_v41  ;;  %vm3381_vm6 = vcmp.lt.s32.totalorder %v3360_v20, 3  ;;  %v3384_v4 = vsel %vm3382_vm13, %v3372_v38, 2102212464  ;;  %v3388_v58 = vsel %vm3382_vm13, %v3375_v2, 920167782  ;;  %v3391_v14 = vsel %vm3379_vm14, %v3369_v55, %v3372_v38 }
 0x32e   : > { %v3519_v6 = vclz %v7703_v50  ;;  %vm3380_vm4 = vcmp.lt.s32.totalorder %v3360_v20, 2  ;;  %v3389_v56 = vsel %vm3381_vm6, %v3372_v38, %v3388_v58  ;;  %v3321_v11 = vshll.u32 %v3320_v12, 23  ;;  %v11203_v58 = vpop.f32.mrb[19].mxu0 }
 0x32f   : > { %v3383_v31 = vsel %vm3379_vm14, %v3363_v30, %v3366_v39  ;;  %v3390_v36 = vsel %vm3380_vm4, %v3387_v1, %v3389_v56  ;;  %v3392_v47 = vsel %vm3382_vm13, %v3378_v10, 1326507024  ;;  %v3385_v61 = vsel %vm3381_vm6, %v3369_v55, %v3384_v4 }
 0x330   : > { %v7704_v7 = vadd.s32 4294967294, %v3519_v6  ;;  %v3393_v32 = vsel %vm3381_vm6, %v3375_v2, %v3392_v47  ;;  %vm3566_vm8 = vcmp.gt.s32.totalorder %v3565_v43, 0  ;;  %v13986_v39 = vxor.u32 2147483648, %v11132_v28 }
 0x331   : > { %v3394_v26 = vsel %vm3380_vm4, %v3391_v14, %v3393_v32  ;;  %v11199_v24 = vmul.u32.u64.low %v11161_v13, %v3390_v36  ;;  %v11200_v33 = vmul.u32.u64.high %v11161_v13, %v3390_v36, %v11199_v24  ;;  %v3567_v50 = vsel %vm3566_vm8, %v3565_v43, 0 }
 0x332   : > { %v11210_v38 = vsel %vm13679_vm11, %v13986_v39, %v11132_v28  ;;  %vm7705_vm14 = vcmp.lt.s32.totalorder %v7704_v7, 0  ;;  %v11213_v2 = vmul.u32.u64.low %v11161_v13, %v3394_v26  ;;  %v11214_v55 = vmul.u32.u64.high %v11161_v13, %v3394_v26, %v11213_v2 }
 0x333   : > { %v13987_v12 = vand.u32 2147483647, %v11142_v27  ;;  %v13988_v10 = vcvt.s32.f32 %v11140_v42  ;;  %v3386_v43 = vsel %vm3380_vm4, %v3383_v31, %v3385_v61  ;;  %v3569_v30 = vand.u32 31, %v3567_v50 }
 0x334   : > { %v3322_v6 = vor.u32 4788187, %v3321_v11  ;;  %v3507_v28 = vadd.s32 %v11110_v62, %v11104_v21  ;;  %v11226_v56 = vshll.u32 %v3563_v23, 8  ;;  %v3663_v14 = vshrl.u32 %v3662_v46, 23 }
 0x335   : > { %v11220_v1 = vmul.f32 %v13988_v10, %v13987_v12  ;;  %v3325_v36 = vcvt.s32.f32 %v11189_v35  ;;  %v3522_v47 = vsel %vm7705_vm14, 0, %v7704_v7  ;;  %v3405_v27 = vadd.s32 1, %v11200_v33 }
 0x336   : > { %v3570_v42 = vsub.s32 32, %v3569_v30  ;;  %v3402_v32 = vmul.u32 %v11161_v13, %v3386_v43  ;;  %vm3404_vm13 = vc.u32 %v11214_v55, %v11199_v24  ;;  %v3568_v20 = vshrl.u32 %v3567_v50, 5 }
 0x337   : > { %v3572_v11 = vshll.u32 %v13786_v60, %v3569_v30  ;;  %v3406_v31 = vsel %vm3404_vm13, %v3405_v27, %v11200_v33  ;;  %v3575_v21 = vshll.u32 %v13789_v22, %v3569_v30  ;;  %v3323_v46 = vand.u32 2147483647, %v3322_v6 }
 0x338   : > { %v3573_v23 = vshrl.u32 %v13789_v22, %v3570_v42  ;;  %v3576_v62 = vshrl.u32 %v13791_v29, %v3570_v42  ;;  %v3523_v35 = vsub.s32 32, %v3522_v47  ;;  %v3527_v7 = vsub.s32 4294967266, %v3522_v47 }
 0x339   : > { %v3407_v61 = vadd.s32 %v3406_v31, %v3402_v32  ;;  %v3578_v39 = vshll.u32 %v13791_v29, %v3569_v30  ;;  %v3579_v50 = vshrl.u32 %v13790_v57, %v3570_v42  ;;  %v13989_v2 = vand.u32 2147483647, %v10678_v45 }
 0x33a   : > { %v3574_v26 = vor.u32 %v3573_v23, %v3572_v11  ;;  %v3577_v13 = vor.u32 %v3576_v62, %v3575_v21  ;;  %v13990_v33 = vmov 0  ;;  %v3581_v10 = vshll.u32 %v13790_v57, %v3569_v30 }
 0x33b   : > { %vm11242_vm6 = vcmp.le.f32.partialorder %v13989_v2, 0.7853982  ;;  %v3408_v12 = vadd.s32 536870912, %v3407_v61  ;;  %v3582_v43 = vshrl.u32 %v13821_v51, %v3570_v42  ;;  %v7710_v6 = vadd.s32 4294967169, %v3663_v14 }
 0x33c   : > { %v13991_v33 = vsel %vm11242_vm6, 4294967295, %v13990_v33  ;;  %v3580_v27 = vor.u32 %v3579_v50, %v3578_v39  ;;  %v3584_v32 = vshll.u32 %v13821_v51, %v3569_v30  ;;  %v3585_v11 = vshrl.u32 %v13792_v54, %v3570_v42 }
 0x33d   : > { %13992 = vst [vmem:[#allocation110_spill] sm:$0xff] %v13991_v33  ;;  %vm3587_vm4 = vcmp.lt.s32.totalorder %v3568_v20, 1  ;;  %v3525_v31 = vshrl.u32 %v3507_v28, %v3523_v35  ;;  %v3528_v23 = vadd.s32 127, %v3527_v7  ;;  %v11250_v21 = vshrl.u32 %v3408_v12, 30 }
 0x33e   : > { %v3583_v62 = vor.u32 %v3582_v43, %v3581_v10  ;;  %v3571_v2 = vshrl.u32 %v13786_v60, %v3570_v42  ;;  %v3586_v4 = vor.u32 %v3585_v11, %v3584_v32  ;;  %vm3590_vm8 = vcmp.lt.s32.totalorder %v3568_v20, 4 }
 0x33f   : > { %13993 = vst [vmem:[#allocation111_spill] sm:$0xff] %v11250_v21  ;;  %v3595_v41 = vsel %vm3587_vm4, %v3574_v26, %v3577_v13  ;;  %v3410_v15 = vshll.u32 %v11250_v21, 30  ;;  %vm3589_vm14 = vcmp.lt.s32.totalorder %v3568_v20, 3  ;;  %v3592_v14 = vsel %vm3590_vm8, %v3580_v27, 2102212464 }
 0x340   : > { %v3596_v39 = vsel %vm3590_vm8, %v3583_v62, 920167782  ;;  %vm3588_vm13 = vcmp.lt.s32.totalorder %v3568_v20, 2  ;;  %v3599_v50 = vsel %vm3587_vm4, %v3577_v13, %v3580_v27  ;;  %v3600_v28 = vsel %vm3590_vm8, %v3586_v4, 1326507024 }
 0x341   : > { %v3597_v30 = vsel %vm3589_vm14, %v3580_v27, %v3596_v39  ;;  %v3529_v35 = vshll.u32 %v3528_v23, 23  ;;  %v11256_v7 = vsub.s32 %v3407_v61, %v3410_v15  ;;  %v3591_v12 = vsel %vm3587_vm4, %v3571_v2, %v3574_v26 }
 0x342   : > { %v3598_v42 = vsel %vm3588_vm13, %v3595_v41, %v3597_v30  ;;  %v3593_v10 = vsel %vm3589_vm14, %v3577_v13, %v3592_v14  ;;  %v3601_v43 = vsel %vm3589_vm14, %v3583_v62, %v3600_v28  ;;  %v11265_v16 = vmul.f32 %v3325_v36, %v3323_v46 }
 0x343   : > { %v11261_v32 = vmul.u32.u64.low %v11226_v56, %v3598_v42  ;;  %v11262_v11 = vmul.u32.u64.high %v11226_v56, %v3598_v42, %v11261_v32  ;;  %v3524_v39 = vshll.u32 %v11176_v5, %v3522_v47  ;;  %v3413_v4 = vsub.s32 0, %v11256_v7  ;;  %v11282_v47 = vpop.f32.mrb[19].mxu1 }
 0x344   : > { %v3602_v15 = vsel %vm3588_vm13, %v3599_v50, %v3601_v43  ;;  %v11274_v41 = vsel %vm11242_vm6, %v10678_v45, %v11210_v38  ;;  %v3669_v13 = vadd.s32 1, %v7710_v6  ;;  %v3530_v36 = vor.u32 4788187, %v3529_v35 }
 0x345   : > { %v11277_v61 = vmul.u32.u64.low %v11226_v56, %v3602_v15  ;;  %v11278_v26 = vmul.u32.u64.high %v11226_v56, %v3602_v15, %v11277_v61  ;;  %v3526_v27 = vor.u32 %v3525_v31, %v3524_v39  ;;  %v7699_v46 = vmin.u32 %v3413_v4, %v11256_v7 }
 0x346   : > { %v3594_v5 = vsel %vm3588_vm13, %v3591_v12, %v3593_v10  ;;  %v3613_v62 = vadd.s32 1, %v11262_v11  ;;  %v13994_v38 = vand.u32 2147483647, %v11151_v52  ;;  %vm3670_vm4 = vcmp.gt.s32.totalorder %v3669_v13, 0 }
 0x347   : > { %v3415_v31 = vclz %v7699_v46  ;;  %v3671_v30 = vsel %vm3670_vm4, %v3669_v13, 0  ;;  %v3403_v20 = vadd.s32 %v11199_v24, %v11214_v55  ;;  %v3610_v50 = vmul.u32 %v11226_v56, %v3594_v5 }
 0x348   : > { %v3666_v2 = vand.u32 8388607, %v13994_v38  ;;  %vm3612_vm8 = vc.u32 %v11278_v26, %v11261_v32  ;;  %v3673_v28 = vand.u32 31, %v3671_v30  ;;  %v3531_v35 = vand.u32 2147483647, %v3530_v36 }
 0x349   : > { %v3533_v12 = vcvt.s32.f32 %v3526_v27  ;;  %v7700_v42 = vadd.s32 4294967294, %v3415_v31  ;;  %v3614_v10 = vsel %vm3612_vm8, %v3613_v62, %v11262_v11  ;;  %v11298_v15 = vadd.f32 %v11146_v53, %v10735_v18 }
 0x34a   : > { %v3615_v43 = vadd.s32 %v3614_v10, %v3610_v50  ;;  %v3667_v39 = vor.u32 8388608, %v3666_v2  ;;  %v3674_v4 = vsub.s32 32, %v3673_v28  ;;  %v11300_v24 = vshrl.u32 %v3671_v30, 5 }
 0x34b   : > { %13995 = vst [vmem:[#allocation112_spill] sm:$0xff] %v11298_v15  ;;  %vm7701_vm14 = vcmp.lt.s32.totalorder %v7700_v42, 0  ;;  %v3676_v55 = vshll.u32 %v13786_v60, %v3673_v28  ;;  %v3679_v56 = vshll.u32 %v13789_v22, %v3673_v28  ;;  %v3682_v11 = vshll.u32 %v13791_v29, %v3673_v28 }
 0x34c   : > { %v3418_v61 = vsel %vm7701_vm14, 0, %v7700_v42  ;;  %v3616_v13 = vadd.s32 536870912, %v3615_v43  ;;  %v3677_v27 = vshrl.u32 %v13789_v22, %v3674_v4  ;;  %v3680_v46 = vshrl.u32 %v13791_v29, %v3674_v4 }
 0x34d   : > { %v3423_v36 = vsub.s32 4294967266, %v3418_v61  ;;  %v3685_v5 = vshll.u32 %v13790_v57, %v3673_v28  ;;  %v3688_v18 = vshll.u32 %v13821_v51, %v3673_v28  ;;  %v3419_v62 = vsub.s32 32, %v3418_v61 }
 0x34e   : > { %v11309_v38 = vshrl.u32 %v3616_v13, 30  ;;  %v3683_v2 = vshrl.u32 %v13790_v57, %v3674_v4  ;;  %v3686_v31 = vshrl.u32 %v13821_v51, %v3674_v4  ;;  %v3678_v50 = vor.u32 %v3677_v27, %v3676_v55 }
 0x34f   : > { %v3424_v30 = vadd.s32 127, %v3423_v36  ;;  %v3681_v42 = vor.u32 %v3680_v46, %v3679_v56  ;;  %v3689_v10 = vshrl.u32 %v13792_v54, %v3674_v4  ;;  %v11316_v6 = vmul.f32 %v3533_v12, %v3531_v35 }
 0x350   : > { %13996 = vst [vmem:[#allocation113_spill] sm:$0xff] %v11309_v38  ;;  %v3618_v28 = vshll.u32 %v11309_v38, 30  ;;  %v3684_v23 = vor.u32 %v3683_v2, %v3682_v11  ;;  %v3687_v13 = vor.u32 %v3686_v31, %v3685_v5  ;;  %v3675_v14 = vshrl.u32 %v13786_v60, %v3674_v4 }
 0x351   : > { %v3690_v33 = vor.u32 %v3689_v10, %v3688_v18  ;;  %v3707_v21 = vshll.u32 %v3667_v39, 8  ;;  %v3870_v36 = vand.u32 2139095040, %v11298_v15  ;;  %v3420_v55 = vshll.u32 %v11256_v7, %v3418_v61 }
 0x352   : > { %v3425_v56 = vshll.u32 %v3424_v30, 23  ;;  %v11322_v27 = vsub.s32 %v3615_v43, %v3618_v28  ;;  %vm3691_vm8 = vcmp.lt.s32.totalorder %v11300_v24, 1  ;;  %v13997_v35 = vand.u32 2147483647, %v10744_v49 }
 0x353   : > { %v13998_v12 = vmov 0  ;;  %v3421_v11 = vshrl.u32 %v3403_v20, %v3419_v62  ;;  %vm3693_vm11 = vcmp.lt.s32.totalorder %v11300_v24, 3  ;;  %vm3694_vm4 = vcmp.lt.s32.totalorder %v11300_v24, 4 }
 0x354   : > { %vm11327_vm14 = vcmp.le.f32.partialorder %v13997_v35, 0.7853982  ;;  %v3699_v39 = vsel %vm3691_vm8, %v3678_v50, %v3681_v42  ;;  %v3621_v4 = vsub.s32 0, %v11322_v27  ;;  %v3696_v7 = vsel %vm3694_vm4, %v3684_v23, 2102212464 }
 0x355   : > { %v13999_v12 = vsel %vm11327_vm14, 4294967295, %v13998_v12  ;;  %v3700_v61 = vsel %vm3694_vm4, %v3687_v13, 920167782  ;;  %v3703_v43 = vsel %vm3691_vm8, %v3681_v42, %v3684_v23  ;;  %v14001_v46 = vand.u32 2147483647, %v10864_v25 }
 0x356   : > { %14000 = vst [vmem:[#allocation114_spill] sm:$0xff] %v13999_v12  ;;  %vm3453_vm6 = vcmp.lt.s32.totalorder %v10946_v59, 0  ;;  %vm3692_vm12 = vcmp.lt.s32.totalorder %v11300_v24, 2  ;;  %v3695_v20 = vsel %vm3691_vm8, %v3675_v14, %v3678_v50  ;;  %v3701_v18 = vsel %vm3693_vm11, %v3684_v23, %v3700_v61 }
 0x357   : > { %vm11336_vm13 = vcmp.le.f32.partialorder %v14001_v46, 0.7853982  ;;  %v3704_v62 = vsel %vm3694_vm4, %v3690_v33, 1326507024  ;;  %v3426_v2 = vor.u32 4788187, %v3425_v56  ;;  %v7707_v31 = vmin.u32 %v3621_v4, %v11322_v27 }
 0x358   : > { %v3702_v30 = vsel %vm3692_vm12, %v3699_v39, %v3701_v18  ;;  %v3705_v10 = vsel %vm3693_vm11, %v3687_v13, %v3704_v62  ;;  %v3697_v28 = vsel %vm3693_vm11, %v3681_v42, %v3696_v7  ;;  %v3871_v4 = vshrl.u32 %v3870_v36, 23 }
 0x359   : > { %v3706_v35 = vsel %vm3692_vm12, %v3703_v43, %v3705_v10  ;;  %v11353_v14 = vmul.u32.u64.low %v3707_v21, %v3702_v30  ;;  %v11354_v50 = vmul.u32.u64.high %v3707_v21, %v3702_v30, %v11353_v14  ;;  %v3623_v33 = vclz %v7707_v31 }
 0x35a   : > { %v11357_v23 = vmul.u32.u64.low %v3707_v21, %v3706_v35  ;;  %v11358_v56 = vmul.u32.u64.high %v3707_v21, %v3706_v35, %v11357_v23  ;;  %8150 = vcosq.f32 %v11274_v41  ;;  %v14004_v13 = vxor.u32 2147483648, %v11220_v1 }
 0x35b   : > { %vm14005_vm4 = vcmp.lt.s32.totalorder %v10744_v49, 0  ;;  %v14006_v39 = vsub.s32 4, %v11080_v17  ;;  %vm14007_vm11 = vcmp.lt.s32.totalorder %v10864_v25, 0  ;;  %v14008_v61 = vand.u32 2147483647, %v10946_v59 }
 0x35c   : > { %v3224_v42 = vsel %vm14005_vm4, %v14004_v13, %v11220_v1  ;;  %v3422_v36 = vor.u32 %v3421_v11, %v3420_v55  ;;  %v3537_v46 = vsub.s32 4, %v11159_v48  ;;  %v7708_v18 = vadd.s32 4294967294, %v3623_v33  ;;  %vm14012_vm4 = vmmov %vm14007_vm11 }
 0x35d   : > { %v3330_v7 = vsel %vm14007_vm11, %v14006_v39, %v11080_v17  ;;  %vm11373_vm8 = vcmp.le.f32.partialorder %v14008_v61, 0.7853982  ;;  %v3698_v62 = vsel %vm3692_vm12, %v3695_v20, %v3697_v28  ;;  %v7718_v1 = vadd.s32 4294967169, %v3871_v4  ;;  %v11419_v39 = vpop.f32.mrb[20].mxu0 }
 0x35e   : > { %v14011_v31 = vxor.u32 2147483648, %v11265_v16  ;;  %v3535_v30 = vxor.u32 2147483648, %v11316_v6  ;;  %v3427_v10 = vand.u32 2147483647, %v3426_v2  ;;  %v3717_v35 = vadd.s32 1, %v11354_v50 }
 0x35f   : > { %8152 = vsinq.f32 %v11274_v41  ;;  %v3227_v55 = vsel %vm11327_vm14, %v10744_v49, %v3224_v42  ;;  %vm3716_vm12 = vc.u32 %v11358_v56, %v11353_v14  ;;  %v11395_v24 = vadd.f32 %v11146_v53, %v10846_v63 }
 0x360   : > { %v3328_v17 = vsel %vm14012_vm4, %v14011_v31, %v11265_v16  ;;  %v3429_v11 = vcvt.s32.f32 %v3422_v36  ;;  %v3714_v16 = vmul.u32 %v3707_v21, %v3698_v62  ;;  %v3718_v20 = vsel %vm3716_vm12, %v3717_v35, %v11354_v50 }
 0x361   : > { %v3877_v2 = vadd.s32 1, %v7718_v1  ;;  %v11401_v41 = vsel %vm11336_vm13, %v10864_v25, %v3328_v17  ;;  %v3332_v28 = vsel %vm11336_vm13, 0, %v3330_v7  ;;  %v11408_v33 = vsel %vm3453_vm6, %v3537_v46, %v11159_v48 }
 0x362   : > { %vm7709_vm11 = vcmp.lt.s32.totalorder %v7708_v18, 0  ;;  %v3536_v63 = vsel %vm3453_vm6, %v3535_v30, %v11316_v6  ;;  %v11413_v21 = vmul.f32 %v3429_v11, %v3427_v10  ;;  %v3719_v50 = vadd.s32 %v3718_v20, %v3714_v16 }
 0x363   : > { %vm3878_vm4 = vcmp.gt.s32.totalorder %v3877_v2, 0  ;;  %8154 = vcosq.f32 %v3227_v55  ;;  %v13682_v23 = vand.u32 2147483647, %v11298_v15  ;;  %v3766_v5 = vand.u32 2139095040, %v11395_v24 }
 0x364   : > { %v3879_v4 = vsel %vm3878_vm4, %v3877_v2, 0  ;;  %8156 = vsinq.f32 %v3227_v55  ;;  %v11417_v13 = vsel %vm7709_vm11, 0, %v7708_v18  ;;  %v3720_v48 = vadd.s32 536870912, %v3719_v50  ;;  %v11432_v36 = vpop.eup %8150 }
 0x365   : > { %v3881_v42 = vand.u32 31, %v3879_v4  ;;  %8158 = vcosq.f32 %v11401_v41  ;;  %v11422_v6 = vadd.s32 3, %v3332_v28  ;;  %v11427_v7 = vsel %vm11373_vm8, %v10946_v59, %v3536_v63  ;;  %14014 = vst [vmem:[#allocation116_spill] sm:$0xff] %v11432_v36 }
 0x366   : > { %v3611_v18 = vadd.s32 %v11261_v32, %v11278_v26  ;;  %v11437_v62 = vshrl.u32 %v3720_v48, 30  ;;  %v3627_v31 = vsub.s32 32, %v11417_v13  ;;  %v3874_v17 = vand.u32 8388607, %v13682_v23 }
 0x367   : > { %14013 = vst [vmem:[#allocation115_spill] sm:$0xff] %v11422_v6  ;;  %v3882_v1 = vsub.s32 32, %v3881_v42  ;;  %v3767_v10 = vshrl.u32 %v3766_v5, 23  ;;  %v3884_v55 = vshll.u32 %v13786_v60, %v3881_v42  ;;  %v3887_v16 = vshll.u32 %v13789_v22, %v3881_v42 }
 0x368   : > { %v3722_v35 = vshll.u32 %v11437_v62, 30  ;;  %v3890_v20 = vshll.u32 %v13791_v29, %v3881_v42  ;;  %v3880_v5 = vshrl.u32 %v3879_v4, 5  ;;  %v3893_v48 = vshll.u32 %v13790_v57, %v3881_v42 }
 0x369   : > { %v3885_v11 = vshrl.u32 %v13789_v22, %v3882_v1  ;;  %v11447_v32 = vpop.eup %8152  ;;  %v3888_v26 = vshrl.u32 %v13791_v29, %v3882_v1  ;;  %v3891_v2 = vshrl.u32 %v13790_v57, %v3882_v1  ;;  %v3894_v28 = vshrl.u32 %v13821_v51, %v3882_v1 }
 0x36a   : > { %14015 = vst [vmem:[#allocation117_spill] sm:$0xff] %v11447_v32  ;;  %v11453_v63 = vsub.s32 %v3719_v50, %v3722_v35  ;;  %v11458_v23 = vadd.f32 %v11146_v53, %v10934_v19  ;;  %v3875_v46 = vor.u32 8388608, %v3874_v17  ;;  %v3896_v38 = vshll.u32 %v13821_v51, %v3881_v42 }
 0x36b   : > { %v3886_v61 = vor.u32 %v3885_v11, %v3884_v55  ;;  %v3889_v30 = vor.u32 %v3888_v26, %v3887_v16  ;;  %v3892_v59 = vor.u32 %v3891_v2, %v3890_v20  ;;  %v3895_v6 = vor.u32 %v3894_v28, %v3893_v48 }
 0x36c   : > { %14016 = vst [vmem:[#allocation118_spill] sm:$0xff] %v11458_v23  ;;  %v3725_v25 = vsub.s32 0, %v11453_v63  ;;  %v3897_v12 = vshrl.u32 %v13792_v54, %v3882_v1  ;;  %v3628_v4 = vshll.u32 %v11322_v27, %v11417_v13  ;;  %v3629_v35 = vshrl.u32 %v3611_v18, %v3627_v31 }
 0x36d   : > { %v11463_v50 = vpop.eup %8154  ;;  %v3631_v19 = vsub.s32 4294967266, %v11417_v13  ;;  %v7714_v53 = vadd.s32 4294967169, %v3767_v10  ;;  %vm3899_vm6 = vcmp.lt.s32.totalorder %v3880_v5, 1  ;;  %vm3902_vm13 = vcmp.lt.s32.totalorder %v3880_v5, 4 }
 0x36e   : > { %14017 = vst [vmem:[#allocation119_spill] sm:$0xff] %v11463_v50  ;;  %v11468_v17 = vpop.eup %8156  ;;  %v7711_v55 = vmin.u32 %v3725_v25, %v11453_v63  ;;  %v3898_v11 = vor.u32 %v3897_v12, %v3896_v38  ;;  %vm3901_vm11 = vcmp.lt.s32.totalorder %v3880_v5, 3  ;;  %v3904_v42 = vsel %vm3902_vm13, %v3892_v59, 2102212464 }
 0x36f   : > { %14018 = vst [vmem:[#allocation120_spill] sm:$0xff] %v11468_v17  ;;  %v11471_v16 = vpop.eup %8158  ;;  %v3907_v27 = vsel %vm3899_vm6, %v3886_v61, %v3889_v30  ;;  %v3908_v18 = vsel %vm3902_vm13, %v3895_v6, 920167782  ;;  %v3883_v31 = vshrl.u32 %v13786_v60, %v3882_v1  ;;  %vm3900_vm4 = vcmp.lt.s32.totalorder %v3880_v5, 2 }
 0x370   : > { %14019 = vst [vmem:[#allocation121_spill] sm:$0xff] %v11471_v16  ;;  %v3727_v13 = vclz %v7711_v55  ;;  %v3909_v25 = vsel %vm3901_vm11, %v3892_v59, %v3908_v18  ;;  %v3632_v38 = vadd.s32 127, %v3631_v19  ;;  %v3911_v10 = vsel %vm3899_vm6, %v3889_v30, %v3892_v59  ;;  %v11484_v16 = vpop.f32.mrb[20].mxu1 }
 0x371   : > { %v3910_v12 = vsel %vm3900_vm4, %v3907_v27, %v3909_v25  ;;  %v3915_v26 = vshll.u32 %v3875_v46, 8  ;;  %v3903_v2 = vsel %vm3899_vm6, %v3883_v31, %v3886_v61  ;;  %v3905_v28 = vsel %vm3901_vm11, %v3889_v30, %v3904_v42 }
 0x372   : > { %v7712_v20 = vadd.s32 4294967294, %v3727_v13  ;;  %v3912_v48 = vsel %vm3902_vm13, %v3898_v11, 1326507024  ;;  %v3773_v19 = vadd.s32 1, %v7714_v53  ;;  %v11491_v27 = vor.u32 %v3629_v35, %v3628_v4 }
 0x373   : > { %v3913_v1 = vsel %vm3901_vm11, %v3895_v6, %v3912_v48  ;;  %v11487_v55 = vmul.u32.u64.low %v3915_v26, %v3910_v12  ;;  %v11488_v50 = vmul.u32.u64.high %v3915_v26, %v3910_v12, %v11487_v55  ;;  %v14020_v61 = vand.u32 2147483647, %v11395_v24 }
 0x374   : > { %vm7713_vm12 = vcmp.lt.s32.totalorder %v7712_v20, 0  ;;  %v3914_v59 = vsel %vm3900_vm4, %v3911_v10, %v3913_v1  ;;  %vm3774_vm6 = vcmp.gt.s32.totalorder %v3773_v19, 0  ;;  %v3633_v6 = vshll.u32 %v3632_v38, 23 }
 0x375   : > { %v11496_v46 = vand.u32 8388607, %v14020_v61  ;;  %v11498_v30 = vsel %vm7713_vm12, 0, %v7712_v20  ;;  %v11500_v11 = vmul.u32.u64.low %v3915_v26, %v3914_v59  ;;  %v11501_v42 = vmul.u32.u64.high %v3915_v26, %v3914_v59, %v11500_v11 }
 0x376   : > { %v3735_v18 = vsub.s32 4294967266, %v11498_v30  ;;  %v3906_v53 = vsel %vm3900_vm4, %v3903_v2, %v3905_v28  ;;  %v3775_v4 = vsel %vm3774_vm6, %v3773_v19, 0  ;;  %8160 = vsinq.f32 %v11401_v41 }
 0x377   : > { %v14021_v35 = vsel %vm11373_vm8, 0, %v11408_v33  ;;  %v3925_v31 = vadd.s32 1, %v11488_v50  ;;  %v3777_v25 = vand.u32 31, %v3775_v4  ;;  %8162 = vcosq.f32 %v11427_v7 }
 0x378   : > { %v11510_v13 = vadd.s32 3, %v14021_v35  ;;  %v14023_v38 = vxor.u32 2147483648, %v11413_v21  ;;  %vm14024_vm13 = vcmp.lt.s32.totalorder %v11054_v3, 0  ;;  %v3715_v41 = vadd.s32 %v11353_v14, %v11358_v56 }
 0x379   : > { %v3771_v43 = vor.u32 8388608, %v11496_v46  ;;  %v3736_v33 = vadd.s32 127, %v3735_v18  ;;  %v3922_v12 = vmul.u32 %v3915_v26, %v3906_v53  ;;  %vm3924_vm8 = vc.u32 %v11501_v42, %v11487_v55 }
 0x37a   : > { %14022 = vst [vmem:[#allocation122_spill] sm:$0xff] %v11510_v13  ;;  %v11519_v5 = vsel %vm14024_vm13, %v14023_v38, %v11413_v21  ;;  %v3778_v10 = vsub.s32 32, %v3777_v25  ;;  %v3634_v20 = vor.u32 4788187, %v3633_v6  ;;  %v3637_v2 = vcvt.s32.f32 %v11491_v27 }
 0x37b   : > { %v3926_v28 = vsel %vm3924_vm8, %v3925_v31, %v11488_v50  ;;  %v3731_v26 = vsub.s32 32, %v11498_v30  ;;  %v3780_v19 = vshll.u32 %v13786_v60, %v3777_v25  ;;  %v3783_v59 = vshll.u32 %v13789_v22, %v3777_v25 }
 0x37c   : > { %v3927_v1 = vadd.s32 %v3926_v28, %v3922_v12  ;;  %v3781_v14 = vshrl.u32 %v13789_v22, %v3778_v10  ;;  %v3784_v56 = vshrl.u32 %v13791_v29, %v3778_v10  ;;  %v3787_v61 = vshrl.u32 %v13790_v57, %v3778_v10 }
 0x37d   : > { %v3737_v27 = vshll.u32 %v3736_v33, 23  ;;  %v3776_v50 = vshrl.u32 %v3775_v4, 5  ;;  %v3786_v11 = vshll.u32 %v13791_v29, %v3777_v25  ;;  %v3789_v53 = vshll.u32 %v13790_v57, %v3777_v25 }
 0x37e   : > { %v3928_v46 = vadd.s32 536870912, %v3927_v1  ;;  %v3782_v6 = vor.u32 %v3781_v14, %v3780_v19  ;;  %v3785_v18 = vor.u32 %v3784_v56, %v3783_v59  ;;  %v3790_v35 = vshrl.u32 %v13821_v51, %v3778_v10 }
 0x37f   : > { %v3635_v31 = vand.u32 2147483647, %v3634_v20  ;;  %v3788_v12 = vor.u32 %v3787_v61, %v3786_v11  ;;  %v3793_v28 = vshrl.u32 %v13792_v54, %v3778_v10  ;;  %v3732_v21 = vshll.u32 %v11453_v63, %v11498_v30 }
 0x380   : > { %v11539_v38 = vshrl.u32 %v3928_v46, 30  ;;  %v3733_v33 = vshrl.u32 %v3715_v41, %v3731_v26  ;;  %v3791_v48 = vor.u32 %v3790_v35, %v3789_v53  ;;  %v3792_v4 = vshll.u32 %v13821_v51, %v3777_v25  ;;  %v11545_v13 = vpop.eup %8160 }
 0x381   : > { %14025 = vst [vmem:[#allocation123_spill] sm:$0xff] %v11545_v13  ;;  %v3738_v14 = vor.u32 4788187, %v3737_v27  ;;  %vm3795_vm12 = vcmp.lt.s32.totalorder %v3776_v50, 1  ;;  %vm3798_vm11 = vcmp.lt.s32.totalorder %v3776_v50, 4  ;;  %v11548_v20 = vpop.eup %8162  ;;  %v14028_v59 = vmov 0 }
 0x382   : > { %v3930_v56 = vshll.u32 %v11539_v38, 30  ;;  %14026 = vst [vmem:[#allocation124_spill] sm:$0xff] %v11548_v20  ;;  %v14027_v19 = vand.u32 2147483647, %v11054_v3  ;;  %v3794_v63 = vor.u32 %v3793_v28, %v3792_v4  ;;  %vm3797_vm6 = vcmp.lt.s32.totalorder %v3776_v50, 3 }
 0x383   : > { %v3803_v30 = vsel %vm3795_vm12, %v3782_v6, %v3785_v18  ;;  %v3804_v25 = vsel %vm3798_vm11, %v3791_v48, 920167782  ;;  %vm13691_vm8 = vcmp.lt.s32.totalorder %v3776_v50, 2  ;;  %v3811_v61 = vshll.u32 %v3771_v43, 8  ;;  %v11573_v43 = vpop.permute.xlu0 %690 }
 0x384   : > { %vm11552_vm4 = vcmp.le.f32.partialorder %v14027_v19, 0.7853982  ;;  %v11559_v41 = vsub.s32 %v3927_v1, %v3930_v56  ;;  %v3805_v26 = vsel %vm3797_vm6, %v3788_v12, %v3804_v25  ;;  %v3734_v27 = vor.u32 %v3733_v33, %v3732_v21 }
 0x385   : > { %v14029_v59 = vsel %vm11552_vm4, 4294967295, %v14028_v59  ;;  %v3800_v46 = vsel %vm3798_vm11, %v3788_v12, 2102212464  ;;  %v3806_v11 = vsel %vm13691_vm8, %v3803_v30, %v3805_v26  ;;  %v3974_v53 = vand.u32 2139095040, %v11458_v23 }
 0x386   : > { %14030 = vst [vmem:[#allocation125_spill] sm:$0xff] %v14029_v59  ;;  %v3638_v35 = vmul.f32 %v3637_v2, %v3635_v31  ;;  %v3933_v28 = vsub.s32 0, %v11559_v41  ;;  %v3779_v4 = vshrl.u32 %v13786_v60, %v3778_v10  ;;  %v3807_v19 = vsel %vm3795_vm12, %v3785_v18, %v3788_v12 }
 0x387   : > { %v3739_v1 = vand.u32 2147483647, %v3738_v14  ;;  %v3808_v56 = vsel %vm3798_vm11, %v3794_v63, 1326507024  ;;  %v11569_v20 = vmul.u32.u64.low %v3811_v61, %v3806_v11  ;;  %v11570_v25 = vmul.u32.u64.high %v3811_v61, %v3806_v11, %v11569_v20 }
 0x388   : > { %v7719_v21 = vmin.u32 %v3933_v28, %v11559_v41  ;;  %v3799_v33 = vsel %vm3795_vm12, %v3779_v4, %v3782_v6  ;;  %v3801_v2 = vsel %vm3797_vm6, %v3785_v18, %v3800_v46  ;;  %v3809_v31 = vsel %vm3797_vm6, %v3791_v48, %v3808_v56 }
 0x389   : > { %v14031_v10 = vand.u32 2147483647, %v11151_v52  ;;  %v3741_v14 = vcvt.s32.f32 %v3734_v27  ;;  %vm14034_vm11 = vcmp.lt.s32.totalorder %v3776_v50, 2  ;;  %v3975_v30 = vshrl.u32 %v3974_v53, 23  ;;  %v11597_v27 = vpop.f32.mrb[21].mxu0 }
 0x38a   : > { %v3810_v63 = vsel %vm14034_vm11, %v3807_v19, %v3809_v31  ;;  %v11589_v26 = vadd.f32 %v11573_v43, %v11068_v37  ;;  %8164 = vsinq.f32 %v11427_v7  ;;  %v3935_v6 = vclz %v7719_v21  ;;  %vm14036_vm12 = vmmov %vm14034_vm11 }
 0x38b   : > { %vm11582_vm8 = vcmp.le.f32.partialorder %v14031_v10, 0.7853982  ;;  %v11592_v48 = vmul.u32.u64.low %v3811_v61, %v3810_v63  ;;  %v11593_v18 = vmul.u32.u64.high %v3811_v61, %v3810_v63, %v11592_v48  ;;  %v3742_v46 = vmul.f32 %v3741_v14, %v3739_v1 }
 0x38c   : > { %14035 = vst [vmem:[#allocation126_spill] sm:$0xff] %v11589_v26  ;;  %v3802_v11 = vsel %vm14036_vm12, %v3799_v33, %v3801_v2  ;;  %v3821_v28 = vadd.s32 1, %v11570_v25  ;;  %v7722_v4 = vadd.s32 4294967169, %v3975_v30  ;;  %v3435_v37 = vsel %vm11552_vm4, %v11054_v3, %v11519_v5 }
 0x38d   : > { %v7720_v7 = vadd.s32 4294967294, %v3935_v6  ;;  %v14037_v53 = vand.u32 2147483647, %v11458_v23  ;;  %v3639_v56 = vxor.u32 2147483648, %v3638_v35  ;;  %v14038_v50 = vsub.s32 4, %v11437_v62 }
 0x38e   : > { %vm14039_vm11 = vcmp.lt.s32.totalorder %v11151_v52, 0  ;;  %v3981_v21 = vadd.s32 1, %v7722_v4  ;;  %v4078_v33 = vand.u32 2139095040, %v11589_v26  ;;  %v3953_v5 = vsub.s32 4, %v11539_v38 }
 0x38f   : > { %v3978_v19 = vand.u32 8388607, %v14037_v53  ;;  %v11611_v1 = vsel %vm14039_vm11, %v14038_v50, %v11437_v62  ;;  %vm7721_vm12 = vcmp.lt.s32.totalorder %v7720_v7, 0  ;;  %v3818_v2 = vmul.u32 %v3811_v61, %v3802_v11 }
 0x390   : > { %vm3820_vm6 = vc.u32 %v11593_v18, %v11569_v20  ;;  %v3743_v31 = vxor.u32 2147483648, %v3742_v46  ;;  %v11617_v10 = vsel %vm7721_vm12, 0, %v7720_v7  ;;  %vm3982_vm13 = vcmp.gt.s32.totalorder %v3981_v21, 0 }
 0x391   : > { %v3822_v14 = vsel %vm3820_vm6, %v3821_v28, %v11570_v25  ;;  %8166 = vcosq.f32 %v3435_v37  ;;  %v3979_v62 = vor.u32 8388608, %v3978_v19  ;;  %v13692_v30 = vand.u32 2147483647, %v11589_v26 }
 0x392   : > { %v3823_v63 = vadd.s32 %v3822_v14, %v3818_v2  ;;  %8168 = vsinq.f32 %v3435_v37  ;;  %v3943_v6 = vsub.s32 4294967266, %v11617_v10  ;;  %v3983_v48 = vsel %vm3982_vm13, %v3981_v21, 0 }
 0x393   : > { %v4079_v4 = vshrl.u32 %v4078_v33, 23  ;;  %vm14040_vm11 = vcmp.lt.s32.totalorder %v11063_v44, 0  ;;  %v3923_v25 = vadd.s32 %v11487_v55, %v11501_v42  ;;  %vm14041_vm6 = vcmp.lt.s32.totalorder %v11151_v52, 0 }
 0x394   : > { %v11624_v61 = vsel %vm14040_vm11, %v3639_v56, %v3638_v35  ;;  %v3824_v28 = vadd.s32 536870912, %v3823_v63  ;;  %v11633_v7 = vsel %vm14041_vm6, %v3743_v31, %v3742_v46  ;;  %vm14042_vm13 = vcmp.lt.s32.totalorder %v11298_v15, 0  ;;  %v11644_v19 = vpop.eup %8164 }
 0x395   : > { %v11638_v37 = vsel %vm14042_vm13, %v3953_v5, %v11539_v38  ;;  %v3985_v53 = vand.u32 31, %v3983_v48  ;;  %v11642_v35 = vadd.f32 %v11573_v43, %v11106_v34  ;;  %14044 = vst [vmem:[#allocation128_spill] sm:$0xff] %v11644_v19  ;;  %v3939_v56 = vsub.s32 32, %v11617_v10 }
 0x396   : > { %v11647_v55 = vshrl.u32 %v3824_v28, 30  ;;  %v11649_v42 = vshll.u32 %v3979_v62, 8  ;;  %v11653_v46 = vand.u32 8388607, %v13692_v30  ;;  %v3940_v38 = vshll.u32 %v11559_v41, %v11617_v10 }
 0x397   : > { %14043 = vst [vmem:[#allocation127_spill] sm:$0xff] %v11642_v35  ;;  %v3944_v50 = vadd.s32 127, %v3943_v6  ;;  %v3986_v21 = vsub.s32 32, %v3985_v53  ;;  %v7726_v33 = vadd.s32 4294967169, %v4079_v4  ;;  %v3984_v5 = vshrl.u32 %v3983_v48, 5 }
 0x398   : > { %14045 = vst [vmem:[#allocation129_spill] sm:$0xff] %v11647_v55  ;;  %v3826_v34 = vshll.u32 %v11647_v55, 30  ;;  %v3988_v2 = vshll.u32 %v13786_v60, %v3985_v53  ;;  %v3991_v31 = vshll.u32 %v13789_v22, %v3985_v53  ;;  %v3994_v28 = vshll.u32 %v13791_v29, %v3985_v53 }
 0x399   : > { %v3989_v14 = vshrl.u32 %v13789_v22, %v3986_v21  ;;  %v3992_v62 = vshrl.u32 %v13791_v29, %v3986_v21  ;;  %v3995_v30 = vshrl.u32 %v13790_v57, %v3986_v21  ;;  %v3997_v41 = vshll.u32 %v13790_v57, %v3985_v53 }
 0x39a   : > { %v11664_v11 = vsub.s32 %v3823_v63, %v3826_v34  ;;  %v3998_v10 = vshrl.u32 %v13821_v51, %v3986_v21  ;;  %v4000_v6 = vshll.u32 %v13821_v51, %v3985_v53  ;;  %v4001_v19 = vshrl.u32 %v13792_v54, %v3986_v21 }
 0x39b   : > { %v3990_v48 = vor.u32 %v3989_v14, %v3988_v2  ;;  %v3993_v4 = vor.u32 %v3992_v62, %v3991_v31  ;;  %v3996_v55 = vor.u32 %v3995_v30, %v3994_v28  ;;  %v11670_v13 = vpop.eup %8166  ;;  %v3941_v17 = vshrl.u32 %v3923_v25, %v3939_v56 }
 0x39c   : > { %14046 = vst [vmem:[#allocation130_spill] sm:$0xff] %v11670_v13  ;;  %v3829_v49 = vsub.s32 0, %v11664_v11  ;;  %v3999_v59 = vor.u32 %v3998_v10, %v3997_v41  ;;  %v4085_v36 = vadd.s32 1, %v7726_v33  ;;  %v11673_v63 = vpop.eup %8168  ;;  %v3945_v34 = vshll.u32 %v3944_v50, 23 }
 0x39d   : > { %14047 = vst [vmem:[#allocation131_spill] sm:$0xff] %v11673_v63  ;;  %v3987_v3 = vshrl.u32 %v13786_v60, %v3986_v21  ;;  %v4002_v32 = vor.u32 %v4001_v19, %v4000_v6  ;;  %vm4003_vm12 = vcmp.lt.s32.totalorder %v3984_v5, 1  ;;  %vm4005_vm11 = vcmp.lt.s32.totalorder %v3984_v5, 3 }
 0x39e   : > { %v7715_v53 = vmin.u32 %v3829_v49, %v11664_v11  ;;  %vm4006_vm6 = vcmp.lt.s32.totalorder %v3984_v5, 4  ;;  %v4011_v30 = vsel %vm4003_vm12, %v3990_v48, %v3993_v4  ;;  %v4015_v14 = vsel %vm4003_vm12, %v3993_v4, %v3996_v55 }
 0x39f   : > { %v4008_v2 = vsel %vm4006_vm6, %v3996_v55, 2102212464  ;;  %v4012_v31 = vsel %vm4006_vm6, %v3999_v59, 920167782  ;;  %v4016_v25 = vsel %vm4006_vm6, %v4002_v32, 1326507024  ;;  %v11679_v50 = vor.u32 %v3941_v17, %v3940_v38 }
 0x3a0   : > { %v3831_v56 = vclz %v7715_v53  ;;  %vm4004_vm13 = vcmp.lt.s32.totalorder %v3984_v5, 2  ;;  %v4013_v33 = vsel %vm4005_vm11, %v3996_v55, %v4012_v31  ;;  %v4083_v62 = vor.u32 8388608, %v11653_v46  ;;  %v11697_v38 = vpop.f32.mrb[21].mxu1 }
 0x3a1   : > { %v4007_v21 = vsel %vm4003_vm12, %v3987_v3, %v3990_v48  ;;  %v4014_v19 = vsel %vm4004_vm13, %v4011_v30, %v4013_v33  ;;  %v4017_v49 = vsel %vm4005_vm11, %v3999_v59, %v4016_v25  ;;  %v4009_v41 = vsel %vm4005_vm11, %v3993_v4, %v4008_v2 }
 0x3a2   : > { %v7716_v28 = vadd.s32 4294967294, %v3831_v56  ;;  %v4018_v10 = vsel %vm4004_vm13, %v4015_v14, %v4017_v49  ;;  %vm4086_vm14 = vcmp.gt.s32.totalorder %v4085_v36, 0  ;;  %v11685_v32 = vor.u32 4788187, %v3945_v34 }
 0x3a3   : > { %v11688_v6 = vmul.u32.u64.low %v11649_v42, %v4018_v10  ;;  %v11689_v55 = vmul.u32.u64.high %v11649_v42, %v4018_v10, %v11688_v6  ;;  %v4087_v46 = vsel %vm4086_vm14, %v4085_v36, 0  ;;  %v4010_v4 = vsel %vm4004_vm13, %v4007_v21, %v4009_v41 }
 0x3a4   : > { %vm7717_vm6 = vcmp.lt.s32.totalorder %v7716_v28, 0  ;;  %v11692_v3 = vmul.u32.u64.low %v11649_v42, %v4014_v19  ;;  %v11693_v17 = vmul.u32.u64.high %v11649_v42, %v4014_v19, %v11692_v3  ;;  %v4089_v34 = vand.u32 31, %v4087_v46 }
 0x3a5   : > { %v3834_v48 = vsel %vm7717_vm6, 0, %v7716_v28  ;;  %v4286_v53 = vand.u32 2139095040, %v11642_v35  ;;  %v3949_v30 = vcvt.s32.f32 %v11679_v50  ;;  %v3819_v36 = vadd.s32 %v11569_v20, %v11593_v18 }
 0x3a6   : > { %v3839_v2 = vsub.s32 4294967266, %v3834_v48  ;;  %v11704_v31 = vshll.u32 %v4083_v62, 8  ;;  %v3947_v14 = vand.u32 2147483647, %v11685_v32  ;;  %v3835_v25 = vsub.s32 32, %v3834_v48 }
 0x3a7   : > { %vm4028_vm14 = vc.u32 %v11689_v55, %v11692_v3  ;;  %v4090_v56 = vsub.s32 32, %v4089_v34  ;;  %v4026_v33 = vmul.u32 %v11649_v42, %v4010_v4  ;;  %v4029_v21 = vadd.s32 1, %v11693_v17 }
 0x3a8   : > { %v3840_v5 = vadd.s32 127, %v3839_v2  ;;  %v4088_v19 = vshrl.u32 %v4087_v46, 5  ;;  %v4092_v50 = vshll.u32 %v13786_v60, %v4089_v34  ;;  %v4287_v62 = vshrl.u32 %v4286_v53, 23 }
 0x3a9   : > { %v4093_v20 = vshrl.u32 %v13789_v22, %v4090_v56  ;;  %v4096_v18 = vshrl.u32 %v13791_v29, %v4090_v56  ;;  %v4030_v49 = vsel %vm4028_vm14, %v4029_v21, %v11693_v17  ;;  %v4095_v28 = vshll.u32 %v13789_v22, %v4089_v34 }
 0x3aa   : > { %v4098_v41 = vshll.u32 %v13791_v29, %v4089_v34  ;;  %v4099_v10 = vshrl.u32 %v13790_v57, %v4090_v56  ;;  %v3837_v32 = vshrl.u32 %v3819_v36, %v3835_v25  ;;  %v3841_v42 = vshll.u32 %v3840_v5, 23 }
 0x3ab   : > { %v4031_v6 = vadd.s32 %v4030_v49, %v4026_v33  ;;  %v4094_v4 = vor.u32 %v4093_v20, %v4092_v50  ;;  %v4097_v46 = vor.u32 %v4096_v18, %v4095_v28  ;;  %v4101_v59 = vshll.u32 %v13790_v57, %v4089_v34 }
 0x3ac   : > { %v4100_v2 = vor.u32 %v4099_v10, %v4098_v41  ;;  %v4102_v13 = vshrl.u32 %v13821_v51, %v4090_v56  ;;  %v14048_v53 = vand.u32 2147483647, %v11063_v44  ;;  %v14049_v17 = vmov 0 }
 0x3ad   : > { %v3836_v21 = vshll.u32 %v11664_v11, %v3834_v48  ;;  %v4032_v63 = vadd.s32 536870912, %v4031_v6  ;;  %v4104_v36 = vshll.u32 %v13821_v51, %v4089_v34  ;;  %v4105_v25 = vshrl.u32 %v13792_v54, %v4090_v56 }
 0x3ae   : > { %vm11722_vm12 = vcmp.le.f32.partialorder %v14048_v53, 0.7853982  ;;  %v14052_v5 = vand.u32 2147483647, %v11298_v15  ;;  %v4091_v50 = vshrl.u32 %v13786_v60, %v4090_v56  ;;  %v4103_v20 = vor.u32 %v4102_v13, %v4101_v59 }
 0x3af   : > { %v14050_v17 = vsel %vm11722_vm12, 4294967295, %v14049_v17  ;;  %vm4107_vm13 = vcmp.lt.s32.totalorder %v4088_v19, 1  ;;  %vm4110_vm6 = vcmp.lt.s32.totalorder %v4088_v19, 4  ;;  %v3838_v18 = vor.u32 %v3837_v32, %v3836_v21 }
 0x3b0   : > { %14051 = vst [vmem:[#allocation132_spill] sm:$0xff] %v14050_v17  ;;  %vm11731_vm11 = vcmp.le.f32.partialorder %v14052_v5, 0.7853982  ;;  %v11736_v49 = vshrl.u32 %v4032_v63, 30  ;;  %v4106_v11 = vor.u32 %v4105_v25, %v4104_v36  ;;  %v4112_v48 = vsel %vm4110_vm6, %v4100_v2, 2102212464 }
 0x3b1   : > { %v3842_v34 = vor.u32 4788187, %v3841_v42  ;;  %vm4109_vm14 = vcmp.lt.s32.totalorder %v4088_v19, 3  ;;  %v4115_v28 = vsel %vm4107_vm13, %v4094_v4, %v4097_v46  ;;  %v4116_v41 = vsel %vm4110_vm6, %v4103_v20, 920167782 }
 0x3b2   : > { %14055 = vst [vmem:[#allocation133_spill] sm:$0xff] %v11736_v49  ;;  %v4034_v10 = vshll.u32 %v11736_v49, 30  ;;  %vm4108_vm4 = vcmp.lt.s32.totalorder %v4088_v19, 2  ;;  %v4117_v53 = vsel %vm4109_vm14, %v4100_v2, %v4116_v41  ;;  %v4119_v5 = vsel %vm4107_vm13, %v4097_v46, %v4100_v2 }
 0x3b3   : > { %v4111_v56 = vsel %vm4107_vm13, %v4091_v50, %v4094_v4  ;;  %v4113_v13 = vsel %vm4109_vm14, %v4097_v46, %v4112_v48  ;;  %v4118_v59 = vsel %vm4108_vm4, %v4115_v28, %v4117_v53  ;;  %v4120_v63 = vsel %vm4110_vm6, %v4106_v11, 1326507024 }
 0x3b4   : > { %v11743_v32 = vsub.s32 %v4031_v6, %v4034_v10  ;;  %v4121_v21 = vsel %vm4109_vm14, %v4103_v20, %v4120_v63  ;;  %v11746_v42 = vmul.u32.u64.low %v11704_v31, %v4118_v59  ;;  %v11747_v36 = vmul.u32.u64.high %v11704_v31, %v4118_v59, %v11746_v42 }
 0x3b5   : > { %v3950_v25 = vmul.f32 %v3949_v30, %v3947_v14  ;;  %v3843_v45 = vand.u32 2147483647, %v3842_v34  ;;  %v4122_v49 = vsel %vm4108_vm4, %v4119_v5, %v4121_v21  ;;  %v7734_v41 = vadd.s32 4294967169, %v4287_v62 }
 0x3b6   : > { %v14056_v4 = vsel %vm11582_vm8, 0, %v11611_v1  ;;  %v4037_v6 = vsub.s32 0, %v11743_v32  ;;  %v11759_v2 = vmul.u32.u64.low %v11704_v31, %v4122_v49  ;;  %v11760_v50 = vmul.u32.u64.high %v11704_v31, %v4122_v49, %v11759_v2 }
 0x3b7   : > { %v11755_v46 = vadd.s32 3, %v14056_v4  ;;  %v3643_v30 = vsel %vm11722_vm12, %v11063_v44, %v11624_v61  ;;  %v3845_v14 = vcvt.s32.f32 %v3838_v18  ;;  %v4114_v62 = vsel %vm4108_vm4, %v4111_v56, %v4113_v13  ;;  %v11792_v13 = vpop.f32.mrb[22].mxu0 }
 0x3b8   : > { %v4293_v20 = vadd.s32 1, %v7734_v41  ;;  %v11771_v1 = vsel %vm11582_vm8, %v11151_v52, %v11633_v7  ;;  %v3956_v49 = vsel %vm11731_vm11, 0, %v11638_v37  ;;  %v7723_v11 = vmin.u32 %v4037_v6, %v11743_v32 }
 0x3b9   : > { %14057 = vst [vmem:[#allocation134_spill] sm:$0xff] %v11755_v46  ;;  %v4133_v48 = vadd.s32 1, %v11747_v36  ;;  %v3951_v34 = vxor.u32 2147483648, %v3950_v25  ;;  %v11778_v61 = vmul.f32 %v3845_v14, %v3843_v45  ;;  %v14058_v19 = vand.u32 2147483647, %v11642_v35 }
 0x3ba   : > { %vm4294_vm4 = vcmp.gt.s32.totalorder %v4293_v20, 0  ;;  %v4039_v28 = vclz %v7723_v11  ;;  %v4130_v12 = vmul.u32 %v11704_v31, %v4114_v62  ;;  %vm4132_vm8 = vc.u32 %v11760_v50, %v11746_v42 }
 0x3bb   : > { %v4290_v18 = vand.u32 8388607, %v14058_v19  ;;  %v4295_v7 = vsel %vm4294_vm4, %v4293_v20, 0  ;;  %8170 = vcosq.f32 %v3643_v30  ;;  %v4134_v37 = vsel %vm4132_vm8, %v4133_v48, %v11747_v36 }
 0x3bc   : > { %v4297_v10 = vand.u32 31, %v4295_v7  ;;  %v11788_v53 = vadd.f32 %v11573_v43, %v11203_v58  ;;  %8172 = vsinq.f32 %v3643_v30  ;;  %v11790_v45 = vadd.s32 3, %v3956_v49 }
 0x3bd   : > { %v7724_v5 = vadd.s32 4294967294, %v4039_v28  ;;  %v4135_v56 = vadd.s32 %v4134_v37, %v4130_v12  ;;  %8174 = vcosq.f32 %v11771_v1  ;;  %vm14060_vm13 = vcmp.lt.s32.totalorder %v11298_v15, 0 }
 0x3be   : > { %14059 = vst [vmem:[#allocation135_spill] sm:$0xff] %v11790_v45  ;;  %v11797_v31 = vsel %vm14060_vm13, %v3951_v34, %v3950_v25  ;;  %v4291_v59 = vor.u32 8388608, %v4290_v18  ;;  %v4298_v63 = vsub.s32 32, %v4297_v10  ;;  %v3847_v21 = vxor.u32 2147483648, %v11778_v61 }
 0x3bf   : > { %v4027_v58 = vadd.s32 %v11692_v3, %v11689_v55  ;;  %vm7725_vm6 = vcmp.lt.s32.totalorder %v7724_v5, 0  ;;  %v4136_v36 = vadd.s32 536870912, %v4135_v56  ;;  %v4182_v2 = vand.u32 2139095040, %v11788_v53 }
 0x3c0   : > { %v4042_v41 = vsel %vm7725_vm6, 0, %v7724_v5  ;;  %v4301_v4 = vshrl.u32 %v13789_v22, %v4298_v63  ;;  %v4304_v6 = vshrl.u32 %v13791_v29, %v4298_v63  ;;  %v11807_v25 = vshrl.u32 %v4295_v7, 5 }
 0x3c1   : > { %v4047_v30 = vsub.s32 4294967266, %v4042_v41  ;;  %v11805_v14 = vshrl.u32 %v4136_v36, 30  ;;  %v4300_v62 = vshll.u32 %v13786_v60, %v4297_v10  ;;  %v4303_v20 = vshll.u32 %v13789_v22, %v4297_v10 }
 0x3c2   : > { %v4306_v55 = vshll.u32 %v13791_v29, %v4297_v10  ;;  %v4307_v3 = vshrl.u32 %v13790_v57, %v4298_v63  ;;  %v4310_v49 = vshrl.u32 %v13821_v51, %v4298_v63  ;;  %v4043_v11 = vsub.s32 32, %v4042_v41 }
 0x3c3   : > { %v4048_v48 = vadd.s32 127, %v4047_v30  ;;  %v4138_v34 = vshll.u32 %v11805_v14, 30  ;;  %v4309_v19 = vshll.u32 %v13790_v57, %v4297_v10  ;;  %v4302_v18 = vor.u32 %v4301_v4, %v4300_v62 }
 0x3c4   : > { %v4305_v28 = vor.u32 %v4304_v6, %v4303_v20  ;;  %v4312_v12 = vshll.u32 %v13821_v51, %v4297_v10  ;;  %v4313_v7 = vshrl.u32 %v13792_v54, %v4298_v63  ;;  %v4308_v36 = vor.u32 %v4307_v3, %v4306_v55 }
 0x3c5   : > { %v4049_v37 = vshll.u32 %v4048_v48, 23  ;;  %v11819_v5 = vsub.s32 %v4135_v56, %v4138_v34  ;;  %v4311_v45 = vor.u32 %v4310_v49, %v4309_v19  ;;  %v11821_v52 = vpop.eup %8170  ;;  %v4299_v30 = vshrl.u32 %v13786_v60, %v4298_v63 }
 0x3c6   : > { %v4314_v46 = vor.u32 %v4313_v7, %v4312_v12  ;;  %v4331_v17 = vshll.u32 %v4291_v59, 8  ;;  %v4183_v44 = vshrl.u32 %v4182_v2, 23  ;;  %v11824_v0 = vpop.eup %8172  ;;  %v4044_v4 = vshll.u32 %v11743_v32, %v4042_v41 }
 0x3c7   : > { %v4045_v6 = vshrl.u32 %v4027_v58, %v4043_v11  ;;  %v4141_v10 = vsub.s32 0, %v11819_v5  ;;  %vm4315_vm4 = vcmp.lt.s32.totalorder %v11807_v25, 1  ;;  %v11829_v56 = vpop.eup %8174  ;;  %v14062_v62 = vand.u32 2147483647, %v11395_v24 }
 0x3c8   : > { %14061 = vst [vmem:[#allocation136_spill] sm:$0xff] %v11829_v56  ;;  %v14063_v20 = vmov 0  ;;  %vm4316_vm13 = vcmp.lt.s32.totalorder %v11807_v25, 2  ;;  %vm4317_vm6 = vcmp.lt.s32.totalorder %v11807_v25, 3  ;;  %vm4318_vm14 = vcmp.lt.s32.totalorder %v11807_v25, 4 }
 0x3c9   : > { %vm11833_vm8 = vcmp.le.f32.partialorder %v14062_v62, 0.7853982  ;;  %v4323_v32 = vsel %vm4315_vm4, %v4302_v18, %v4305_v28  ;;  %v4050_v59 = vor.u32 4788187, %v4049_v37  ;;  %v7727_v63 = vmin.u32 %v4141_v10, %v11819_v5 }
 0x3ca   : > { %v14064_v20 = vsel %vm11833_vm8, 4294967295, %v14063_v20  ;;  %v4320_v58 = vsel %vm4318_vm14, %v4308_v36, 2102212464  ;;  %v4324_v41 = vsel %vm4318_vm14, %v4311_v45, 920167782  ;;  %v4327_v55 = vsel %vm4315_vm4, %v4305_v28, %v4308_v36 }
 0x3cb   : > { %v4325_v2 = vsel %vm4317_vm6, %v4308_v36, %v4324_v41  ;;  %v4328_v3 = vsel %vm4318_vm14, %v4314_v46, 1326507024  ;;  %v7730_v49 = vadd.s32 4294967169, %v4183_v44  ;;  %v4046_v11 = vor.u32 %v4045_v6, %v4044_v4 }
 0x3cc   : > { %v4143_v48 = vclz %v7727_v63  ;;  %v4319_v34 = vsel %vm4315_vm4, %v4299_v30, %v4302_v18  ;;  %v4326_v19 = vsel %vm4316_vm13, %v4323_v32, %v4325_v2  ;;  %v4321_v12 = vsel %vm4317_vm6, %v4305_v28, %v4320_v58 }
 0x3cd   : > { %v4329_v7 = vsel %vm4317_vm6, %v4311_v45, %v4328_v3  ;;  %v11855_v37 = vmul.u32.u64.low %v4331_v17, %v4326_v19  ;;  %v11856_v10 = vmul.u32.u64.high %v4331_v17, %v4326_v19, %v11855_v37  ;;  %vm14065_vm14 = vcmp.lt.s32.totalorder %v11395_v24, 0  ;;  %v11868_v45 = vpop.f32.mrb[22].mxu1 }
 0x3ce   : > { %v3848_v44 = vsel %vm14065_vm14, %v3847_v21, %v11778_v61  ;;  %v4051_v46 = vand.u32 2147483647, %v4050_v59  ;;  %v7728_v36 = vadd.s32 4294967294, %v4143_v48  ;;  %v4330_v18 = vsel %vm4316_vm13, %v4327_v55, %v4329_v7 }
 0x3cf   : > { %v11864_v30 = vmul.u32.u64.low %v4331_v17, %v4330_v18  ;;  %v11865_v4 = vmul.u32.u64.high %v4331_v17, %v4330_v18, %v11864_v30  ;;  %v13719_v28 = vand.u32 2147483647, %v11788_v53  ;;  %v4189_v6 = vadd.s32 1, %v7730_v49 }
 0x3d0   : > { %8176 = vsinq.f32 %v11771_v1  ;;  %v4053_v62 = vcvt.s32.f32 %v4046_v11  ;;  %vm7729_vm4 = vcmp.lt.s32.totalorder %v7728_v36, 0  ;;  %v4322_v61 = vsel %vm4316_vm13, %v4319_v34, %v4321_v12 }
 0x3d1   : > { %v3955_v21 = vsel %vm11731_vm11, %v11298_v15, %v11797_v31  ;;  %v4146_v32 = vsel %vm7729_vm4, 0, %v7728_v36  ;;  %v4341_v59 = vadd.s32 1, %v11856_v10  ;;  %vm4190_vm6 = vcmp.gt.s32.totalorder %v4189_v6, 0 }
 0x3d2   : > { %v11881_v63 = vsel %vm11833_vm8, %v11395_v24, %v3848_v44  ;;  %v4054_v1 = vmul.f32 %v4053_v62, %v4051_v46  ;;  %v4151_v58 = vsub.s32 4294967266, %v4146_v32  ;;  %v4161_v41 = vsub.s32 4, %v11805_v14 }
 0x3d3   : > { %v4338_v25 = vmul.u32 %v4331_v17, %v4322_v61  ;;  %vm4340_vm13 = vc.u32 %v11865_v4, %v11855_v37  ;;  %v4186_v33 = vand.u32 8388607, %v13719_v28  ;;  %v4191_v31 = vsel %vm4190_vm6, %v4189_v6, 0 }
 0x3d4   : > { %8178 = vcosq.f32 %v3955_v21  ;;  %vm13720_vm11 = vcmp.lt.s32.totalorder %v11458_v23, 0  ;;  %v4152_v2 = vadd.s32 127, %v4151_v58  ;;  %v4342_v55 = vsel %vm4340_vm13, %v4341_v59, %v11856_v10 }
 0x3d5   : > { %v11892_v3 = vadd.f32 %v11573_v43, %v11282_v47  ;;  %8180 = vsinq.f32 %v3955_v21  ;;  %vm13721_vm14 = vcmp.lt.s32.totalorder %v11589_v26, 0  ;;  %v4343_v17 = vadd.s32 %v4342_v55, %v4338_v25 }
 0x3d6   : > { %v4193_v49 = vand.u32 31, %v4191_v31  ;;  %8182 = vcosq.f32 %v11881_v63  ;;  %v4055_v11 = vxor.u32 2147483648, %v4054_v1  ;;  %v4131_v48 = vadd.s32 %v11746_v42, %v11760_v50 }
 0x3d7   : > { %14066 = vst [vmem:[#allocation137_spill] sm:$0xff] %v11892_v3  ;;  %v11901_v34 = vsel %vm13721_vm14, %v4161_v41, %v11805_v14  ;;  %v4147_v19 = vsub.s32 32, %v4146_v32  ;;  %v4344_v12 = vadd.s32 536870912, %v4343_v17  ;;  %v4187_v47 = vor.u32 8388608, %v4186_v33 }
 0x3d8   : > { %v4194_v43 = vsub.s32 32, %v4193_v49  ;;  %v4153_v7 = vshll.u32 %v4152_v2, 23  ;;  %v11903_v10 = vshrl.u32 %v4191_v31, 5  ;;  %v4196_v44 = vshll.u32 %v13786_v60, %v4193_v49 }
 0x3d9   : > { %v11907_v36 = vshrl.u32 %v4344_v12, 30  ;;  %v4199_v50 = vshll.u32 %v13789_v22, %v4193_v49  ;;  %v4202_v30 = vshll.u32 %v13791_v29, %v4193_v49  ;;  %v4205_v62 = vshll.u32 %v13790_v57, %v4193_v49 }
 0x3da   : > { %v4197_v42 = vshrl.u32 %v13789_v22, %v4194_v43  ;;  %v4200_v14 = vshrl.u32 %v13791_v29, %v4194_v43  ;;  %v11912_v18 = vpop.eup %8176  ;;  %v4203_v6 = vshrl.u32 %v13790_v57, %v4194_v43  ;;  %v4206_v61 = vshrl.u32 %v13821_v51, %v4194_v43 }
 0x3db   : > { %14067 = vst [vmem:[#allocation138_spill] sm:$0xff] %v11912_v18  ;;  %v4149_v21 = vshrl.u32 %v4131_v48, %v4147_v19  ;;  %v4346_v59 = vshll.u32 %v11907_v36, 30  ;;  %v4208_v31 = vshll.u32 %v13821_v51, %v4193_v49  ;;  %v4209_v2 = vshrl.u32 %v13792_v54, %v4194_v43 }
 0x3dc   : > { %v4198_v58 = vor.u32 %v4197_v42, %v4196_v44  ;;  %v4201_v41 = vor.u32 %v4200_v14, %v4199_v50  ;;  %v4204_v25 = vor.u32 %v4203_v6, %v4202_v30  ;;  %v4207_v33 = vor.u32 %v4206_v61, %v4205_v62 }
 0x3dd   : > { %v14068_v55 = vand.u32 2147483647, %v11458_v23  ;;  %v14069_v12 = vmov 0  ;;  %v4056_v28 = vsel %vm13720_vm11, %v4055_v11, %v4054_v1  ;;  %v4148_v48 = vshll.u32 %v11819_v5, %v4146_v32 }
 0x3de   : > { %v11930_v19 = vsub.s32 %v4343_v17, %v4346_v59  ;;  %v11932_v44 = vshll.u32 %v4187_v47, 8  ;;  %v11934_v42 = vpop.eup %8178  ;;  %v4154_v49 = vor.u32 4788187, %v4153_v7  ;;  %v4210_v50 = vor.u32 %v4209_v2, %v4208_v31 }
 0x3df   : > { %vm11923_vm4 = vcmp.le.f32.partialorder %v14068_v55, 0.7853982  ;;  %14072 = vst [vmem:[#allocation140_spill] sm:$0xff] %v11934_v42  ;;  %vm4211_vm6 = vcmp.lt.s32.totalorder %v11903_v10, 1  ;;  %v4390_v14 = vand.u32 2139095040, %v11892_v3  ;;  %v11938_v30 = vpop.eup %8180  ;;  %v4150_v6 = vor.u32 %v4149_v21, %v4148_v48 }
 0x3e0   : > { %v14070_v12 = vsel %vm11923_vm4, 4294967295, %v14069_v12  ;;  %14073 = vst [vmem:[#allocation141_spill] sm:$0xff] %v11938_v30  ;;  %v4349_v62 = vsub.s32 0, %v11930_v19  ;;  %vm4214_vm13 = vcmp.lt.s32.totalorder %v11903_v10, 4  ;;  %v4219_v5 = vsel %vm4211_vm6, %v4198_v58, %v4201_v41  ;;  %v11944_v32 = vpop.eup %8182 }
 0x3e1   : > { %14071 = vst [vmem:[#allocation139_spill] sm:$0xff] %v14070_v12  ;;  %14074 = vst [vmem:[#allocation142_spill] sm:$0xff] %v11944_v32  ;;  %v4195_v1 = vshrl.u32 %v13786_v60, %v4194_v43  ;;  %vm4213_vm11 = vcmp.lt.s32.totalorder %v11903_v10, 3  ;;  %v4216_v17 = vsel %vm4214_vm13, %v4204_v25, 2102212464  ;;  %vm4212_vm14 = vcmp.lt.s32.totalorder %v11903_v10, 2 }
 0x3e2   : > { %v4220_v11 = vsel %vm4214_vm13, %v4207_v33, 920167782  ;;  %v7735_v47 = vmin.u32 %v4349_v62, %v11930_v19  ;;  %v4223_v61 = vsel %vm4211_vm6, %v4201_v41, %v4204_v25  ;;  %v4155_v21 = vand.u32 2147483647, %v4154_v49 }
 0x3e3   : > { %v4221_v7 = vsel %vm4213_vm11, %v4204_v25, %v4220_v11  ;;  %v4215_v59 = vsel %vm4211_vm6, %v4195_v1, %v4198_v58  ;;  %v4224_v43 = vsel %vm4214_vm13, %v4210_v50, 1326507024  ;;  %v4217_v55 = vsel %vm4213_vm11, %v4201_v41, %v4216_v17  ;;  %v11965_v58 = vpop.permute.xlu1 %695 }
 0x3e4   : > { %v4222_v31 = vsel %vm4212_vm14, %v4219_v5, %v4221_v7  ;;  %v4351_v2 = vclz %v7735_v47  ;;  %v4225_v48 = vsel %vm4213_vm11, %v4207_v33, %v4224_v43  ;;  %v4391_v46 = vshrl.u32 %v4390_v14, 23  ;;  %v11982_v7 = vpop.f32.mrb[23].mxu0 }
 0x3e5   : > { %v4226_v62 = vsel %vm4212_vm14, %v4223_v61, %v4225_v48  ;;  %v11959_v11 = vmul.u32.u64.low %v11932_v44, %v4222_v31  ;;  %v11960_v15 = vmul.u32.u64.high %v11932_v44, %v4222_v31, %v11959_v11  ;;  %v14075_v25 = vand.u32 2147483647, %v11892_v3 }
 0x3e6   : > { %v7736_v1 = vadd.s32 4294967294, %v4351_v2  ;;  %v11968_v50 = vmul.u32.u64.low %v11932_v44, %v4226_v62  ;;  %v11969_v5 = vmul.u32.u64.high %v11932_v44, %v4226_v62, %v11968_v50  ;;  %v7738_v41 = vadd.s32 4294967169, %v4391_v46 }
 0x3e7   : > { %v4394_v49 = vand.u32 8388607, %v14075_v25  ;;  %v11974_v33 = vsel %vm11923_vm4, %v11458_v23, %v4056_v28  ;;  %v4157_v14 = vcvt.s32.f32 %v4150_v6  ;;  %v4218_v17 = vsel %vm4212_vm14, %v4215_v59, %v4217_v55 }
 0x3e8   : > { %v11980_v47 = vadd.f32 %v11965_v58, %v11419_v39  ;;  %8184 = vsinq.f32 %v11881_v63  ;;  %v14077_v61 = vand.u32 2147483647, %v11589_v26  ;;  %vm7737_vm6 = vcmp.lt.s32.totalorder %v7736_v1, 0 }
 0x3e9   : > { %v4397_v28 = vadd.s32 1, %v7738_v41  ;;  %v11991_v6 = vmul.f32 %v4157_v14, %v4155_v21  ;;  %v4354_v39 = vsel %vm7737_vm6, 0, %v7736_v1  ;;  %v4237_v59 = vadd.s32 1, %v11960_v15 }
 0x3ea   : > { %14076 = vst [vmem:[#allocation143_spill] sm:$0xff] %v11980_v47  ;;  %vm11987_vm11 = vcmp.le.f32.partialorder %v14077_v61, 0.7853982  ;;  %8186 = vcosq.f32 %v11974_v33  ;;  %v4359_v63 = vsub.s32 4294967266, %v4354_v39  ;;  %v4234_v31 = vmul.u32 %v11932_v44, %v4218_v17 }
 0x3eb   : > { %v4395_v43 = vor.u32 8388608, %v4394_v49  ;;  %v4355_v2 = vsub.s32 32, %v4354_v39  ;;  %vm4236_vm14 = vc.u32 %v11969_v5, %v11959_v11  ;;  %vm4398_vm13 = vcmp.gt.s32.totalorder %v4397_v28, 0 }
 0x3ec   : > { %v4494_v21 = vand.u32 2139095040, %v11980_v47  ;;  %v4339_v55 = vadd.s32 %v11855_v37, %v11865_v4  ;;  %v4360_v48 = vadd.s32 127, %v4359_v63  ;;  %v4238_v62 = vsel %vm4236_vm14, %v4237_v59, %v11960_v15 }
 0x3ed   : > { %v4399_v25 = vsel %vm4398_vm13, %v4397_v28, 0  ;;  %v4239_v44 = vadd.s32 %v4238_v62, %v4234_v31  ;;  %v4356_v41 = vshll.u32 %v11930_v19, %v4354_v39  ;;  %v12008_v14 = vshll.u32 %v4395_v43, 8 }
 0x3ee   : > { %v4401_v49 = vand.u32 31, %v4399_v25  ;;  %v12013_v61 = vadd.f32 %v11965_v58, %v11484_v16  ;;  %v4357_v37 = vshrl.u32 %v4339_v55, %v4355_v2  ;;  %v4495_v28 = vshrl.u32 %v4494_v21, 23 }
 0x3ef   : > { %v4240_v4 = vadd.s32 536870912, %v4239_v44  ;;  %v4361_v59 = vshll.u32 %v4360_v48, 23  ;;  %v4400_v63 = vshrl.u32 %v4399_v25, 5  ;;  %v14083_v18 = vand.u32 2147483647, %v11980_v47 }
 0x3f0   : > { %14080 = vst [vmem:[#allocation144_spill] sm:$0xff] %v12013_v61  ;;  %v4402_v15 = vsub.s32 32, %v4401_v49  ;;  %v4404_v10 = vshll.u32 %v13786_v60, %v4401_v49  ;;  %v4407_v31 = vshll.u32 %v13789_v22, %v4401_v49  ;;  %v4410_v43 = vshll.u32 %v13791_v29, %v4401_v49 }
 0x3f1   : > { %v12017_v62 = vshrl.u32 %v4240_v4, 30  ;;  %v4413_v21 = vshll.u32 %v13790_v57, %v4401_v49  ;;  %v4416_v48 = vshll.u32 %v13821_v51, %v4401_v49  ;;  %v7742_v56 = vadd.s32 4294967169, %v4495_v28 }
 0x3f2   : > { %v4405_v19 = vshrl.u32 %v13789_v22, %v4402_v15  ;;  %v4408_v39 = vshrl.u32 %v13791_v29, %v4402_v15  ;;  %v12022_v16 = vpop.eup %8184  ;;  %v4411_v2 = vshrl.u32 %v13790_v57, %v4402_v15  ;;  %v4414_v55 = vshrl.u32 %v13821_v51, %v4402_v15 }
 0x3f3   : > { %14081 = vst [vmem:[#allocation145_spill] sm:$0xff] %v12022_v16  ;;  %v4242_v25 = vshll.u32 %v12017_v62, 30  ;;  %v4417_v1 = vshrl.u32 %v13792_v54, %v4402_v15  ;;  %v4498_v12 = vand.u32 8388607, %v14083_v18  ;;  %v4362_v23 = vor.u32 4788187, %v4361_v59 }
 0x3f4   : > { %v4406_v4 = vor.u32 %v4405_v19, %v4404_v10  ;;  %v4409_v50 = vor.u32 %v4408_v39, %v4407_v31  ;;  %v12030_v17 = vpop.eup %8186  ;;  %v4412_v42 = vor.u32 %v4411_v2, %v4410_v43  ;;  %v4415_v30 = vor.u32 %v4414_v55, %v4413_v21 }
 0x3f5   : > { %14082 = vst [vmem:[#allocation146_spill] sm:$0xff] %v12030_v17  ;;  %v12035_v32 = vsub.s32 %v4239_v44, %v4242_v25  ;;  %v4418_v49 = vor.u32 %v4417_v1, %v4416_v48  ;;  %vm4419_vm14 = vcmp.lt.s32.totalorder %v4400_v63, 1  ;;  %v4358_v16 = vor.u32 %v4357_v37, %v4356_v41  ;;  %v12046_v48 = vpop.f32.mrb[23].mxu1 }
 0x3f6   : > { %v4403_v10 = vshrl.u32 %v13786_v60, %v4402_v15  ;;  %vm4422_vm13 = vcmp.lt.s32.totalorder %v4400_v63, 4  ;;  %v4427_v31 = vsel %vm4419_vm14, %v4406_v4, %v4409_v50  ;;  %vm4421_vm4 = vcmp.lt.s32.totalorder %v4400_v63, 3 }
 0x3f7   : > { %v4245_v19 = vsub.s32 0, %v12035_v32  ;;  %v4424_v39 = vsel %vm4422_vm13, %v4412_v42, 2102212464  ;;  %v4428_v43 = vsel %vm4422_vm13, %v4415_v30, 920167782  ;;  %vm4420_vm6 = vcmp.lt.s32.totalorder %v4400_v63, 2 }
 0x3f8   : > { %v4429_v28 = vsel %vm4421_vm4, %v4412_v42, %v4428_v43  ;;  %v4431_v2 = vsel %vm4419_vm14, %v4409_v50, %v4412_v42  ;;  %v4432_v21 = vsel %vm4422_vm13, %v4418_v49, 1326507024  ;;  %v4363_v18 = vand.u32 2147483647, %v4362_v23 }
 0x3f9   : > { %v7731_v44 = vmin.u32 %v4245_v19, %v12035_v32  ;;  %v4423_v59 = vsel %vm4419_vm14, %v4403_v10, %v4406_v4  ;;  %v4430_v1 = vsel %vm4420_vm6, %v4427_v31, %v4429_v28  ;;  %v4425_v41 = vsel %vm4421_vm4, %v4409_v50, %v4424_v39 }
 0x3fa   : > { %v4433_v37 = vsel %vm4421_vm4, %v4415_v30, %v4432_v21  ;;  %v12042_v15 = vmul.u32.u64.low %v12008_v14, %v4430_v1  ;;  %v12043_v55 = vmul.u32.u64.high %v12008_v14, %v4430_v1, %v12042_v15  ;;  %8188 = vsinq.f32 %v11974_v33 }
 0x3fb   : > { %v4365_v25 = vcvt.s32.f32 %v4358_v16  ;;  %v4247_v42 = vclz %v7731_v44  ;;  %v4434_v23 = vsel %vm4420_vm6, %v4431_v2, %v4433_v37  ;;  %v14084_v4 = vxor.u32 2147483648, %v11991_v6 }
 0x3fc   : > { %vm14085_vm14 = vcmp.lt.s32.totalorder %v11589_v26, 0  ;;  %v12056_v30 = vmul.u32.u64.low %v12008_v14, %v4434_v23  ;;  %v12057_v49 = vmul.u32.u64.high %v12008_v14, %v4434_v23, %v12056_v30  ;;  %v4501_v10 = vadd.s32 1, %v7742_v56 }
 0x3fd   : > { %v4160_v50 = vsel %vm14085_vm14, %v14084_v4, %v11991_v6  ;;  %v12059_v31 = vmul.f32 %v4365_v25, %v4363_v18  ;;  %v14086_v33 = vsub.s32 4, %v11907_v36  ;;  %vm14087_vm4 = vcmp.lt.s32.totalorder %v11642_v35, 0 }
 0x3fe   : > { %v7732_v19 = vadd.s32 4294967294, %v4247_v42  ;;  %v4426_v39 = vsel %vm4420_vm6, %v4423_v59, %v4425_v41  ;;  %v4445_v43 = vadd.s32 1, %v12043_v55  ;;  %v4499_v6 = vor.u32 8388608, %v4498_v12 }
 0x3ff   : > { %v12066_v16 = vsel %vm14087_vm4, %v14086_v33, %v11907_v36  ;;  %vm4502_vm13 = vcmp.gt.s32.totalorder %v4501_v10, 0  ;;  %v4702_v28 = vand.u32 2139095040, %v12013_v61  ;;  %v12074_v56 = vsel %vm11987_vm11, %v11589_v26, %v4160_v50 }
 0x400   : > { %v4235_v2 = vadd.s32 %v11959_v11, %v11969_v5  ;;  %vm7733_vm14 = vcmp.lt.s32.totalorder %v7732_v19, 0  ;;  %v4503_v36 = vsel %vm4502_vm13, %v4501_v10, 0  ;;  %v4442_v63 = vmul.u32 %v12008_v14, %v4426_v39 }
 0x401   : > { %v4250_v21 = vsel %vm7733_vm14, 0, %v7732_v19  ;;  %vm4444_vm6 = vc.u32 %v12057_v49, %v12042_v15  ;;  %v12081_v12 = vshrl.u32 %v4503_v36, 5  ;;  %v4505_v37 = vand.u32 31, %v4503_v36 }
 0x402   : > { %v4251_v44 = vsub.s32 32, %v4250_v21  ;;  %v4255_v59 = vsub.s32 4294967266, %v4250_v21  ;;  %v4446_v1 = vsel %vm4444_vm6, %v4445_v43, %v12043_v55  ;;  %v12085_v25 = vshll.u32 %v4499_v6, 8 }
 0x403   : > { %v4447_v41 = vadd.s32 %v4446_v1, %v4442_v63  ;;  %v4703_v11 = vshrl.u32 %v4702_v28, 23  ;;  %v4252_v5 = vshll.u32 %v12035_v32, %v4250_v21  ;;  %vm4523_vm4 = vcmp.lt.s32.totalorder %v12081_v12, 1 }
 0x404   : > { %v4253_v42 = vshrl.u32 %v4235_v2, %v4251_v44  ;;  %v4256_v14 = vadd.s32 127, %v4255_v59  ;;  %v4506_v4 = vsub.s32 32, %v4505_v37  ;;  %vm4525_vm14 = vcmp.lt.s32.totalorder %v12081_v12, 3  ;;  %v12091_v50 = vpop.eup %8188 }
 0x405   : > { %v4448_v23 = vadd.s32 536870912, %v4447_v41  ;;  %14088 = vst [vmem:[#allocation147_spill] sm:$0xff] %v12091_v50  ;;  %v4508_v10 = vshll.u32 %v13786_v60, %v4505_v37  ;;  %v4511_v33 = vshll.u32 %v13789_v22, %v4505_v37  ;;  %v14089_v32 = vand.u32 2147483647, %v11642_v35 }
 0x406   : > { %v4254_v55 = vor.u32 %v4253_v42, %v4252_v5  ;;  %v4257_v30 = vshll.u32 %v4256_v14, 23  ;;  %v4509_v43 = vshrl.u32 %v13789_v22, %v4506_v4  ;;  %v4512_v6 = vshrl.u32 %v13791_v29, %v4506_v4 }
 0x407   : > { %vm12097_vm6 = vcmp.le.f32.partialorder %v14089_v32, 0.7853982  ;;  %v12101_v39 = vshrl.u32 %v4448_v23, 30  ;;  %v4514_v28 = vshll.u32 %v13791_v29, %v4505_v37  ;;  %v4515_v36 = vshrl.u32 %v13790_v57, %v4506_v4 }
 0x408   : > { %v4258_v2 = vor.u32 4788187, %v4257_v30  ;;  %v4517_v21 = vshll.u32 %v13790_v57, %v4505_v37  ;;  %v4518_v63 = vshrl.u32 %v13821_v51, %v4506_v4  ;;  %v4510_v59 = vor.u32 %v4509_v43, %v4508_v10 }
 0x409   : > { %14092 = vst [vmem:[#allocation148_spill] sm:$0xff] %v12101_v39  ;;  %v4450_v44 = vshll.u32 %v12101_v39, 30  ;;  %v4513_v1 = vor.u32 %v4512_v6, %v4511_v33  ;;  %vm4526_vm13 = vcmp.lt.s32.totalorder %v12081_v12, 4  ;;  %v4516_v5 = vor.u32 %v4515_v36, %v4514_v28 }
 0x40a   : > { %v4519_v42 = vor.u32 %v4518_v63, %v4517_v21  ;;  %v4520_v14 = vshll.u32 %v13821_v51, %v4505_v37  ;;  %v4521_v23 = vshrl.u32 %v13792_v54, %v4506_v4  ;;  %v4261_v32 = vcvt.s32.f32 %v4254_v55 }
 0x40b   : > { %v12113_v30 = vsub.s32 %v4447_v41, %v4450_v44  ;;  %v4507_v18 = vshrl.u32 %v13786_v60, %v4506_v4  ;;  %v4531_v26 = vsel %vm4523_vm4, %v4510_v59, %v4513_v1  ;;  %v4259_v17 = vand.u32 2147483647, %v4258_v2 }
 0x40c   : > { %v4522_v39 = vor.u32 %v4521_v23, %v4520_v14  ;;  %v4528_v10 = vsel %vm4526_vm13, %v4516_v5, 2102212464  ;;  %v4532_v33 = vsel %vm4526_vm13, %v4519_v42, 920167782  ;;  %v4535_v4 = vsel %vm4523_vm4, %v4513_v1, %v4516_v5 }
 0x40d   : > { %v4453_v37 = vsub.s32 0, %v12113_v30  ;;  %v4527_v55 = vsel %vm4523_vm4, %v4507_v18, %v4510_v59  ;;  %v4533_v41 = vsel %vm4525_vm14, %v4516_v5, %v4532_v33  ;;  %v4529_v43 = vsel %vm4525_vm14, %v4513_v1, %v4528_v10 }
 0x40e   : > { %vm14093_vm8 = vcmp.lt.s32.totalorder %v12081_v12, 2  ;;  %v4536_v28 = vsel %vm4526_vm13, %v4522_v39, 1326507024  ;;  %v7750_v2 = vadd.s32 4294967169, %v4703_v11  ;;  %vm13741_vm12 = vcmp.lt.s32.totalorder %v11788_v53, 0 }
 0x40f   : > { %v4534_v6 = vsel %vm14093_vm8, %v4531_v26, %v4533_v41  ;;  %v7739_v18 = vmin.u32 %v4453_v37, %v12113_v30  ;;  %v4537_v36 = vsel %vm4525_vm14, %v4519_v42, %v4536_v28  ;;  %v4372_v26 = vsel %vm12097_vm6, 0, %v12066_v16  ;;  %vm14098_vm13 = vmmov %vm14093_vm8 }
 0x410   : > { %v12140_v21 = vmul.u32.u64.low %v12085_v25, %v4534_v6  ;;  %v12141_v63 = vmul.u32.u64.high %v12085_v25, %v4534_v6, %v12140_v21  ;;  %v4262_v44 = vmul.f32 %v4261_v32, %v4259_v17  ;;  %v4538_v11 = vsel %vm14093_vm8, %v4535_v4, %v4537_v36 }
 0x411   : > { %v13739_v39 = vand.u32 2147483647, %v12013_v61  ;;  %v14094_v59 = vxor.u32 2147483648, %v12059_v31  ;;  %vm14095_vm4 = vcmp.lt.s32.totalorder %v11642_v35, 0  ;;  %v4455_v5 = vclz %v7739_v18 }
 0x412   : > { %v12156_v42 = vmul.u32.u64.low %v12085_v25, %v4538_v11  ;;  %v12157_v14 = vmul.u32.u64.high %v12085_v25, %v4538_v11, %v12156_v42  ;;  %8190 = vcosq.f32 %v12074_v56  ;;  %v14096_v17 = vsel %vm11987_vm11, 0, %v11901_v34 }
 0x413   : > { %v4368_v1 = vsel %vm14095_vm4, %v14094_v59, %v12059_v31  ;;  %v12164_v16 = vadd.s32 3, %v14096_v17  ;;  %v4530_v23 = vsel %vm14098_vm13, %v4527_v55, %v4529_v43  ;;  %v4709_v32 = vadd.s32 1, %v7750_v2 }
 0x414   : > { %8192 = vsinq.f32 %v12074_v56  ;;  %v12169_v31 = vadd.s32 3, %v4372_v26  ;;  %v7740_v10 = vadd.s32 4294967294, %v4455_v5  ;;  %v4549_v33 = vadd.s32 1, %v12141_v63 }
 0x415   : > { %14097 = vst [vmem:[#allocation149_spill] sm:$0xff] %v12164_v16  ;;  %v12175_v37 = vsel %vm12097_vm6, %v11642_v35, %v4368_v1  ;;  %v4263_v46 = vxor.u32 2147483648, %v4262_v44  ;;  %v4706_v34 = vand.u32 8388607, %v13739_v39  ;;  %vm4710_vm11 = vcmp.gt.s32.totalorder %v4709_v32, 0 }
 0x416   : > { %14099 = vst [vmem:[#allocation150_spill] sm:$0xff] %v12169_v31  ;;  %vm7741_vm14 = vcmp.lt.s32.totalorder %v7740_v10, 0  ;;  %v4546_v12 = vmul.u32 %v12085_v25, %v4530_v23  ;;  %vm4548_vm8 = vc.u32 %v12157_v14, %v12140_v21  ;;  %v4711_v56 = vsel %vm4710_vm11, %v4709_v32, 0 }
 0x417   : > { %v14100_v55 = vand.u32 2147483647, %v11788_v53  ;;  %v14101_v41 = vmov 0  ;;  %v4458_v19 = vsel %vm7741_vm14, 0, %v7740_v10  ;;  %v4550_v4 = vsel %vm4548_vm8, %v4549_v33, %v12141_v63 }
 0x418   : > { %v4713_v43 = vand.u32 31, %v4711_v56  ;;  %v12191_v6 = vadd.f32 %v11965_v58, %v11597_v27  ;;  %v4443_v25 = vadd.s32 %v12042_v15, %v12057_v49  ;;  %v4459_v28 = vsub.s32 32, %v4458_v19 }
 0x419   : > { %vm12184_vm4 = vcmp.le.f32.partialorder %v14100_v55, 0.7853982  ;;  %v4463_v2 = vsub.s32 4294967266, %v4458_v19  ;;  %v4551_v18 = vadd.s32 %v4550_v4, %v4546_v12  ;;  %8194 = vcosq.f32 %v12175_v37 }
 0x41a   : > { %v14102_v41 = vsel %vm12184_vm4, 4294967295, %v14101_v41  ;;  %v4264_v36 = vsel %vm13741_vm12, %v4263_v46, %v4262_v44  ;;  %v4707_v26 = vor.u32 8388608, %v4706_v34  ;;  %v4714_v11 = vsub.s32 32, %v4713_v43 }
 0x41b   : > { %v4460_v63 = vshll.u32 %v12113_v30, %v4458_v19  ;;  %v4461_v59 = vshrl.u32 %v4443_v25, %v4459_v28  ;;  %v4464_v1 = vadd.s32 127, %v4463_v2  ;;  %v4552_v5 = vadd.s32 536870912, %v4551_v18 }
 0x41c   : > { %v4716_v27 = vshll.u32 %v13786_v60, %v4713_v43  ;;  %v4717_v42 = vshrl.u32 %v13789_v22, %v4714_v11  ;;  %v4720_v15 = vshrl.u32 %v13791_v29, %v4714_v11  ;;  %v4723_v49 = vshrl.u32 %v13790_v57, %v4714_v11  ;;  %v12207_v10 = vpop.eup %8190 }
 0x41d   : > { %v4465_v17 = vshll.u32 %v4464_v1, 23  ;;  %v12203_v23 = vshrl.u32 %v4552_v5, 30  ;;  %v4719_v44 = vshll.u32 %v13789_v22, %v4713_v43  ;;  %v4726_v32 = vshrl.u32 %v13821_v51, %v4714_v11  ;;  %14103 = vst [vmem:[#allocation151_spill] sm:$0xff] %v12207_v10 }
 0x41e   : > { %v4462_v30 = vor.u32 %v4461_v59, %v4460_v63  ;;  %v4712_v33 = vshrl.u32 %v4711_v56, 5  ;;  %v4722_v46 = vshll.u32 %v13791_v29, %v4713_v43  ;;  %v4725_v34 = vshll.u32 %v13790_v57, %v4713_v43  ;;  %v12211_v12 = vpop.eup %8192 }
 0x41f   : > { %14104 = vst [vmem:[#allocation152_spill] sm:$0xff] %v12211_v12  ;;  %v4466_v55 = vor.u32 4788187, %v4465_v17  ;;  %v4554_v19 = vshll.u32 %v12203_v23, 30  ;;  %v4718_v4 = vor.u32 %v4717_v42, %v4716_v27  ;;  %v4721_v25 = vor.u32 %v4720_v15, %v4719_v44 }
 0x420   : > { %v4724_v28 = vor.u32 %v4723_v49, %v4722_v46  ;;  %v4727_v2 = vor.u32 %v4726_v32, %v4725_v34  ;;  %v4728_v1 = vshll.u32 %v13821_v51, %v4713_v43  ;;  %v4729_v5 = vshrl.u32 %v13792_v54, %v4714_v11 }
 0x421   : > { %v4267_v56 = vsel %vm12184_vm4, %v11788_v53, %v4264_v36  ;;  %v12219_v63 = vsub.s32 %v4551_v18, %v4554_v19  ;;  %v12221_v59 = vshll.u32 %v4707_v26, 8  ;;  %v4467_v39 = vand.u32 2147483647, %v4466_v55 }
 0x422   : > { %v4715_v27 = vshrl.u32 %v13786_v60, %v4714_v11  ;;  %v4730_v42 = vor.u32 %v4729_v5, %v4728_v1  ;;  %v4598_v15 = vand.u32 2139095040, %v12191_v6  ;;  %v4469_v49 = vcvt.s32.f32 %v4462_v30 }
 0x423   : > { %v4557_v43 = vsub.s32 0, %v12219_v63  ;;  %vm4731_vm6 = vcmp.lt.s32.totalorder %v4712_v33, 1  ;;  %vm4734_vm13 = vcmp.lt.s32.totalorder %v4712_v33, 4  ;;  %v12227_v44 = vpop.eup %8194  ;;  %vm4733_vm11 = vcmp.lt.s32.totalorder %v4712_v33, 3 }
 0x424   : > { %14105 = vst [vmem:[#allocation153_spill] sm:$0xff] %v12227_v44  ;;  %v4736_v18 = vsel %vm4734_vm13, %v4724_v28, 2102212464  ;;  %v4739_v36 = vsel %vm4731_vm6, %v4718_v4, %v4721_v25  ;;  %v4740_v26 = vsel %vm4734_vm13, %v4727_v2, 920167782  ;;  %vm13746_vm14 = vcmp.lt.s32.totalorder %v11892_v3, 0 }
 0x425   : > { %v7743_v32 = vmin.u32 %v4557_v43, %v12219_v63  ;;  %vm4732_vm8 = vcmp.lt.s32.totalorder %v4712_v33, 2  ;;  %v4741_v11 = vsel %vm4733_vm11, %v4724_v28, %v4740_v26  ;;  %v4743_v30 = vsel %vm4731_vm6, %v4721_v25, %v4724_v28 }
 0x426   : > { %v4470_v46 = vmul.f32 %v4469_v49, %v4467_v39  ;;  %v4742_v34 = vsel %vm4732_vm8, %v4739_v36, %v4741_v11  ;;  %v4744_v55 = vsel %vm4734_vm13, %v4730_v42, 1326507024  ;;  %v4599_v19 = vshrl.u32 %v4598_v15, 23 }
 0x427   : > { %v4559_v1 = vclz %v7743_v32  ;;  %v4735_v5 = vsel %vm4731_vm6, %v4715_v27, %v4718_v4  ;;  %v4737_v17 = vsel %vm4733_vm11, %v4721_v25, %v4736_v18  ;;  %v4745_v35 = vsel %vm4733_vm11, %v4727_v2, %v4744_v55 }
 0x428   : > { %8196 = vsinq.f32 %v12175_v37  ;;  %v14106_v43 = vand.u32 2147483647, %v11892_v3  ;;  %v14107_v26 = vmov 0  ;;  %v4746_v39 = vsel %vm4732_vm8, %v4743_v30, %v4745_v35 }
 0x429   : > { %v12247_v28 = vmul.u32.u64.low %v12221_v59, %v4742_v34  ;;  %v12248_v42 = vmul.u32.u64.high %v12221_v59, %v4742_v34, %v12247_v28  ;;  %8198 = vcosq.f32 %v4267_v56  ;;  %v7744_v4 = vadd.s32 4294967294, %v4559_v1 }
 0x42a   : > { %vm12241_vm12 = vcmp.le.f32.partialorder %v14106_v43, 0.7853982  ;;  %v12252_v25 = vmul.u32.u64.low %v12221_v59, %v4746_v39  ;;  %v12253_v2 = vmul.u32.u64.high %v12221_v59, %v4746_v39, %v12252_v25  ;;  %v4471_v37 = vxor.u32 2147483648, %v4470_v46 }
 0x42b   : > { %v14108_v26 = vsel %vm12241_vm12, 4294967295, %v14107_v26  ;;  %v4738_v27 = vsel %vm4732_vm8, %v4735_v5, %v4737_v17  ;;  %v7746_v15 = vadd.s32 4294967169, %v4599_v19  ;;  %v12258_v49 = vadd.f32 %v11965_v58, %v11697_v38 }
 0x42c   : > { %14109 = vst [vmem:[#allocation154_spill] sm:$0xff] %v14108_v26  ;;  %8200 = vsinq.f32 %v4267_v56  ;;  %vm4493_vm6 = vcmp.lt.s32.totalorder %v11980_v47, 0  ;;  %vm7745_vm13 = vcmp.lt.s32.totalorder %v7744_v4, 0  ;;  %v14110_v35 = vand.u32 2147483647, %v12191_v6 }
 0x42d   : > { %v4547_v36 = vadd.s32 %v12140_v21, %v12157_v14  ;;  %v4562_v32 = vsel %vm7745_vm13, 0, %v7744_v4  ;;  %v4757_v33 = vadd.s32 1, %v12248_v42  ;;  %v4605_v17 = vadd.s32 1, %v7746_v15  ;;  %v12275_v21 = vpop.permute.xlu0 %700 }
 0x42e   : > { %v12263_v18 = vand.u32 8388607, %v14110_v35  ;;  %v4563_v11 = vsub.s32 32, %v4562_v32  ;;  %v4567_v30 = vsub.s32 4294967266, %v4562_v32  ;;  %v4577_v38 = vsub.s32 4, %v12203_v23 }
 0x42f   : > { %v4754_v58 = vmul.u32 %v12221_v59, %v4738_v27  ;;  %v4472_v56 = vsel %vm13746_vm14, %v4471_v37, %v4470_v46  ;;  %vm4756_vm11 = vc.u32 %v12253_v2, %v12247_v28  ;;  %vm4606_vm8 = vcmp.gt.s32.totalorder %v4605_v17, 0 }
 0x430   : > { %v4806_v34 = vand.u32 2139095040, %v12258_v49  ;;  %v4565_v14 = vshrl.u32 %v4547_v36, %v4563_v11  ;;  %v4568_v55 = vadd.s32 127, %v4567_v30  ;;  %v4758_v19 = vsel %vm4756_vm11, %v4757_v33, %v12248_v42 }
 0x431   : > { %v4607_v1 = vsel %vm4606_vm8, %v4605_v17, 0  ;;  %v4564_v5 = vshll.u32 %v12219_v63, %v4562_v32  ;;  %v4759_v43 = vadd.s32 %v4758_v19, %v4754_v58  ;;  %v12281_v46 = vadd.f32 %v12275_v21, %v11792_v13 }
 0x432   : > { %v4609_v59 = vand.u32 31, %v4607_v1  ;;  %v12286_v39 = vsel %vm12241_vm12, %v11892_v3, %v4472_v56  ;;  %v4569_v4 = vshll.u32 %v4568_v55, 23  ;;  %v12291_v25 = vsel %vm4493_vm6, %v4577_v38, %v12203_v23  ;;  %v12294_v63 = vpop.eup %8196 }
 0x433   : > { %14111 = vst [vmem:[#allocation155_spill] sm:$0xff] %v12294_v63  ;;  %v4566_v37 = vor.u32 %v4565_v14, %v4564_v5  ;;  %v4760_v27 = vadd.s32 536870912, %v4759_v43  ;;  %v4807_v13 = vshrl.u32 %v4806_v34, 23  ;;  %v12296_v35 = vpop.eup %8198  ;;  %v4608_v32 = vshrl.u32 %v4607_v1, 5 }
 0x434   : > { %v4610_v15 = vsub.s32 32, %v4609_v59  ;;  %v4570_v36 = vor.u32 4788187, %v4569_v4  ;;  %v4612_v33 = vshll.u32 %v13786_v60, %v4609_v59  ;;  %v4615_v17 = vshll.u32 %v13789_v22, %v4609_v59 }
 0x435   : > { %v12300_v11 = vshrl.u32 %v4760_v27, 30  ;;  %v4618_v38 = vshll.u32 %v13791_v29, %v4609_v59  ;;  %v4621_v14 = vshll.u32 %v13790_v57, %v4609_v59  ;;  %v4573_v19 = vcvt.s32.f32 %v4566_v37 }
 0x436   : > { %v4613_v23 = vshrl.u32 %v13789_v22, %v4610_v15  ;;  %v4616_v30 = vshrl.u32 %v13791_v29, %v4610_v15  ;;  %v12305_v58 = vpop.eup %8200  ;;  %v4571_v56 = vand.u32 2147483647, %v4570_v36  ;;  %v4619_v34 = vshrl.u32 %v13790_v57, %v4610_v15 }
 0x437   : > { %v4622_v55 = vshrl.u32 %v13821_v51, %v4610_v15  ;;  %v4762_v1 = vshll.u32 %v12300_v11, 30  ;;  %v4603_v5 = vor.u32 8388608, %v12263_v18  ;;  %v4625_v63 = vshrl.u32 %v13792_v54, %v4610_v15 }
 0x438   : > { %v4614_v4 = vor.u32 %v4613_v23, %v4612_v33  ;;  %v4617_v27 = vor.u32 %v4616_v30, %v4615_v17  ;;  %v4620_v42 = vor.u32 %v4619_v34, %v4618_v38  ;;  %8202 = vcosq.f32 %v12286_v39 }
 0x439   : > { %v4623_v44 = vor.u32 %v4622_v55, %v4621_v14  ;;  %v12314_v36 = vsub.s32 %v4759_v43, %v4762_v1  ;;  %v4624_v31 = vshll.u32 %v13821_v51, %v4609_v59  ;;  %v14112_v10 = vand.u32 2147483647, %v12258_v49 }
 0x43a   : > { %v4574_v37 = vmul.f32 %v4573_v19, %v4571_v56  ;;  %v4611_v16 = vshrl.u32 %v13786_v60, %v4610_v15  ;;  %vm4627_vm13 = vcmp.lt.s32.totalorder %v4608_v32, 1  ;;  %v7754_v18 = vadd.s32 4294967169, %v4807_v13 }
 0x43b   : > { %v4810_v12 = vand.u32 8388607, %v14112_v10  ;;  %v4765_v33 = vsub.s32 0, %v12314_v36  ;;  %v4626_v17 = vor.u32 %v4625_v63, %v4624_v31  ;;  %vm4629_vm11 = vcmp.lt.s32.totalorder %v4608_v32, 3 }
 0x43c   : > { %vm4630_vm8 = vcmp.lt.s32.totalorder %v4608_v32, 4  ;;  %v4631_v23 = vsel %vm4627_vm13, %v4611_v16, %v4614_v4  ;;  %v4635_v43 = vsel %vm4627_vm13, %v4614_v4, %v4617_v27  ;;  %vm4628_vm14 = vcmp.lt.s32.totalorder %v4608_v32, 2 }
 0x43d   : > { %v4632_v30 = vsel %vm4630_vm8, %v4620_v42, 2102212464  ;;  %v4636_v38 = vsel %vm4630_vm8, %v4623_v44, 920167782  ;;  %v7751_v59 = vmin.u32 %v4765_v33, %v12314_v36  ;;  %v4639_v56 = vsel %vm4627_vm13, %v4617_v27, %v4620_v42 }
 0x43e   : > { %v4633_v10 = vsel %vm4629_vm11, %v4617_v27, %v4632_v30  ;;  %v4637_v15 = vsel %vm4629_vm11, %v4620_v42, %v4636_v38  ;;  %v4643_v34 = vshll.u32 %v4603_v5, 8  ;;  %v4811_v31 = vor.u32 8388608, %v4810_v12 }
 0x43f   : > { %v4638_v13 = vsel %vm4628_vm14, %v4635_v43, %v4637_v15  ;;  %v4575_v63 = vxor.u32 2147483648, %v4574_v37  ;;  %v4767_v14 = vclz %v7751_v59  ;;  %v4634_v16 = vsel %vm4628_vm14, %v4631_v23, %v4633_v10 }
 0x440   : > { %v4640_v55 = vsel %vm4630_vm8, %v4626_v17, 1326507024  ;;  %v12330_v1 = vmul.u32.u64.low %v4643_v34, %v4638_v13  ;;  %v12331_v4 = vmul.u32.u64.high %v4643_v34, %v4638_v13, %v12330_v1  ;;  %v4813_v33 = vadd.s32 1, %v7754_v18 }
 0x441   : > { %v4641_v19 = vsel %vm4629_vm11, %v4623_v44, %v4640_v55  ;;  %v4755_v30 = vadd.s32 %v12247_v28, %v12253_v2  ;;  %v7752_v43 = vadd.s32 4294967294, %v4767_v14  ;;  %v13747_v12 = vand.u32 2147483647, %v12281_v46 }
 0x442   : > { %v4642_v42 = vsel %vm4628_vm14, %v4639_v56, %v4641_v19  ;;  %vm4814_vm13 = vcmp.gt.s32.totalorder %v4813_v33, 0  ;;  %v12342_v44 = vpop.eup %8202  ;;  %v12346_v17 = vsel %vm4493_vm6, %v4575_v63, %v4574_v37  ;;  %v4650_v18 = vmul.u32 %v4643_v34, %v4634_v16 }
 0x443   : > { %v12339_v27 = vmul.u32.u64.low %v4643_v34, %v4642_v42  ;;  %v12340_v23 = vmul.u32.u64.high %v4643_v34, %v4642_v42, %v12339_v27  ;;  %14113 = vst [vmem:[#allocation156_spill] sm:$0xff] %v12342_v44  ;;  %vm7753_vm11 = vcmp.lt.s32.totalorder %v7752_v43, 0  ;;  %v4815_v28 = vsel %vm4814_vm13, %v4813_v33, 0 }
 0x444   : > { %v4770_v2 = vsel %vm7753_vm11, 0, %v7752_v43  ;;  %v4653_v32 = vadd.s32 1, %v12331_v4  ;;  %v4817_v38 = vand.u32 31, %v4815_v28  ;;  %v12349_v59 = vshll.u32 %v4811_v31, 8 }
 0x445   : > { %v4771_v10 = vsub.s32 32, %v4770_v2  ;;  %v4775_v15 = vsub.s32 4294967266, %v4770_v2  ;;  %v4910_v13 = vand.u32 2139095040, %v12281_v46  ;;  %v12354_v56 = vand.u32 8388607, %v13747_v12 }
 0x446   : > { %v4772_v37 = vshll.u32 %v12314_v36, %v4770_v2  ;;  %vm4652_vm14 = vc.u32 %v12340_v23, %v12330_v1  ;;  %v4816_v34 = vshrl.u32 %v4815_v28, 5  ;;  %v4818_v63 = vsub.s32 32, %v4817_v38 }
 0x447   : > { %v4773_v14 = vshrl.u32 %v4755_v30, %v4771_v10  ;;  %v4776_v16 = vadd.s32 127, %v4775_v15  ;;  %v4654_v31 = vsel %vm4652_vm14, %v4653_v32, %v12331_v4  ;;  %v4820_v55 = vshll.u32 %v13786_v60, %v4817_v38 }
 0x448   : > { %v4655_v19 = vadd.s32 %v4654_v31, %v4650_v18  ;;  %v4821_v33 = vshrl.u32 %v13789_v22, %v4818_v63  ;;  %v4823_v43 = vshll.u32 %v13789_v22, %v4817_v38  ;;  %v4824_v42 = vshrl.u32 %v13791_v29, %v4818_v63 }
 0x449   : > { %v4774_v27 = vor.u32 %v4773_v14, %v4772_v37  ;;  %v4777_v36 = vshll.u32 %v4776_v16, 23  ;;  %v4826_v2 = vshll.u32 %v13791_v29, %v4817_v38  ;;  %v4827_v28 = vshrl.u32 %v13790_v57, %v4818_v63 }
 0x44a   : > { %v4656_v12 = vadd.s32 536870912, %v4655_v19  ;;  %v4822_v30 = vor.u32 %v4821_v33, %v4820_v55  ;;  %v4825_v10 = vor.u32 %v4824_v42, %v4823_v43  ;;  %v4911_v15 = vshrl.u32 %v4910_v13, 23 }
 0x44b   : > { %v4778_v4 = vor.u32 4788187, %v4777_v36  ;;  %v4828_v32 = vor.u32 %v4827_v28, %v4826_v2  ;;  %v4829_v18 = vshll.u32 %v13790_v57, %v4817_v38  ;;  %v4830_v31 = vshrl.u32 %v13821_v51, %v4818_v63 }
 0x44c   : > { %v14114_v5 = vand.u32 2147483647, %v11980_v47  ;;  %v12374_v37 = vshrl.u32 %v4656_v12, 30  ;;  %v4819_v14 = vshrl.u32 %v13786_v60, %v4818_v63  ;;  %v4832_v16 = vshll.u32 %v13821_v51, %v4817_v38 }
 0x44d   : > { %v4833_v13 = vshrl.u32 %v13792_v54, %v4818_v63  ;;  %v4779_v55 = vand.u32 2147483647, %v4778_v4  ;;  %v4781_v33 = vcvt.s32.f32 %v4774_v27  ;;  %v4831_v43 = vor.u32 %v4830_v31, %v4829_v18 }
 0x44e   : > { %vm12370_vm6 = vcmp.le.f32.partialorder %v14114_v5, 0.7853982  ;;  %14117 = vst [vmem:[#allocation157_spill] sm:$0xff] %v12374_v37  ;;  %vm4835_vm8 = vcmp.lt.s32.totalorder %v4816_v34, 1  ;;  %v4658_v42 = vshll.u32 %v12374_v37, 30  ;;  %vm4837_vm13 = vcmp.lt.s32.totalorder %v4816_v34, 3 }
 0x44f   : > { %v4834_v36 = vor.u32 %v4833_v13, %v4832_v16  ;;  %vm4838_vm11 = vcmp.lt.s32.totalorder %v4816_v34, 4  ;;  %v4782_v5 = vmul.f32 %v4781_v33, %v4779_v55  ;;  %v4843_v28 = vsel %vm4835_vm8, %v4822_v30, %v4825_v10 }
 0x450   : > { %v4840_v2 = vsel %vm4838_vm11, %v4828_v32, 2102212464  ;;  %v4844_v12 = vsel %vm4838_vm11, %v4831_v43, 920167782  ;;  %v12380_v26 = vsub.s32 %v4655_v19, %v4658_v42  ;;  %vm4836_vm14 = vcmp.lt.s32.totalorder %v4816_v34, 2 }
 0x451   : > { %v4845_v38 = vsel %vm4837_vm13, %v4828_v32, %v4844_v12  ;;  %v4847_v3 = vsel %vm4835_vm8, %v4825_v10, %v4828_v32  ;;  %v14118_v63 = vand.u32 2147483647, %v12013_v61  ;;  %v4839_v4 = vsel %vm4835_vm8, %v4819_v14, %v4822_v30 }
 0x452   : > { %v4841_v18 = vsel %vm4837_vm13, %v4825_v10, %v4840_v2  ;;  %v4846_v31 = vsel %vm4836_vm14, %v4843_v28, %v4845_v38  ;;  %v4848_v16 = vsel %vm4838_vm11, %v4834_v36, 1326507024  ;;  %v4661_v13 = vsub.s32 0, %v12380_v26 }
 0x453   : > { %vm12385_vm12 = vcmp.le.f32.partialorder %v14118_v63, 0.7853982  ;;  %v4849_v19 = vsel %vm4837_vm13, %v4831_v43, %v4848_v16  ;;  %v12394_v55 = vmul.u32.u64.low %v12349_v59, %v4846_v31  ;;  %v12395_v33 = vmul.u32.u64.high %v12349_v59, %v4846_v31, %v12394_v55 }
 0x454   : > { %v4783_v32 = vxor.u32 2147483648, %v4782_v5  ;;  %v4850_v42 = vsel %vm4836_vm14, %v4847_v3, %v4849_v19  ;;  %v7758_v12 = vadd.s32 4294967169, %v4911_v15  ;;  %v12401_v30 = vadd.f32 %v12275_v21, %v11868_v45 }
 0x455   : > { %v7747_v10 = vmin.u32 %v4661_v13, %v12380_v26  ;;  %v4842_v14 = vsel %vm4836_vm14, %v4839_v4, %v4841_v18  ;;  %v12406_v36 = vmul.u32.u64.low %v12349_v59, %v4850_v42  ;;  %v12407_v43 = vmul.u32.u64.high %v12349_v59, %v4850_v42, %v12406_v36 }
 0x456   : > { %8204 = vsinq.f32 %v12286_v39  ;;  %vm4701_vm8 = vcmp.lt.s32.totalorder %v12013_v61, 0  ;;  %v4917_v3 = vadd.s32 1, %v7758_v12  ;;  %v12418_v45 = vsel %vm12370_vm6, %v11980_v47, %v12346_v17 }
 0x457   : > { %v14121_v34 = vsub.s32 4, %v12300_v11  ;;  %v4663_v28 = vclz %v7747_v10  ;;  %v4861_v39 = vadd.s32 1, %v12395_v33  ;;  %v4784_v38 = vsel %vm4701_vm8, %v4783_v32, %v4782_v5 }
 0x458   : > { %v4858_v63 = vmul.u32 %v12349_v59, %v4842_v14  ;;  %v4915_v4 = vor.u32 8388608, %v12354_v56  ;;  %vm4918_vm13 = vcmp.gt.s32.totalorder %v4917_v3, 0  ;;  %vm4860_vm11 = vc.u32 %v12407_v43, %v12394_v55 }
 0x459   : > { %v12423_v15 = vsel %vm4701_vm8, %v14121_v34, %v12300_v11  ;;  %v7748_v18 = vadd.s32 4294967294, %v4663_v28  ;;  %v4919_v17 = vsel %vm4918_vm13, %v4917_v3, 0  ;;  %v5118_v31 = vand.u32 2139095040, %v12401_v30 }
 0x45a   : > { %8206 = vcosq.f32 %v12418_v45  ;;  %v4651_v11 = vadd.s32 %v12330_v1, %v12340_v23  ;;  %v4862_v16 = vsel %vm4860_vm11, %v4861_v39, %v12395_v33  ;;  %v4921_v5 = vand.u32 31, %v4919_v17 }
 0x45b   : > { %v12438_v59 = vsel %vm12385_vm12, %v12013_v61, %v4784_v38  ;;  %vm7749_vm14 = vcmp.lt.s32.totalorder %v7748_v18, 0  ;;  %v4863_v56 = vadd.s32 %v4862_v16, %v4858_v63  ;;  %v12441_v32 = vshrl.u32 %v4919_v17, 5 }
 0x45c   : > { %v4666_v19 = vsel %vm7749_vm14, 0, %v7748_v18  ;;  %v4922_v42 = vsub.s32 32, %v4921_v5  ;;  %v12443_v12 = vshll.u32 %v4915_v4, 8  ;;  %v5119_v33 = vshrl.u32 %v5118_v31, 23 }
 0x45d   : > { %v4667_v10 = vsub.s32 32, %v4666_v19  ;;  %v4671_v1 = vsub.s32 4294967266, %v4666_v19  ;;  %v4864_v23 = vadd.s32 536870912, %v4863_v56  ;;  %v4924_v14 = vshll.u32 %v13786_v60, %v4921_v5 }
 0x45e   : > { %v4925_v36 = vshrl.u32 %v13789_v22, %v4922_v42  ;;  %v4927_v3 = vshll.u32 %v13789_v22, %v4921_v5  ;;  %v4928_v34 = vshrl.u32 %v13791_v29, %v4922_v42  ;;  %v4931_v63 = vshrl.u32 %v13790_v57, %v4922_v42 }
 0x45f   : > { %v4669_v28 = vshrl.u32 %v4651_v11, %v4667_v10  ;;  %v4672_v39 = vadd.s32 127, %v4671_v1  ;;  %v12449_v38 = vshrl.u32 %v4864_v23, 30  ;;  %v4668_v18 = vshll.u32 %v12380_v26, %v4666_v19 }
 0x460   : > { %v12452_v4 = vpop.eup %8204  ;;  %v4930_v17 = vshll.u32 %v13791_v29, %v4921_v5  ;;  %v4933_v31 = vshll.u32 %v13790_v57, %v4921_v5  ;;  %v4934_v16 = vshrl.u32 %v13821_v51, %v4922_v42  ;;  %v4926_v61 = vor.u32 %v4925_v36, %v4924_v14 }
 0x461   : > { %14122 = vst [vmem:[#allocation158_spill] sm:$0xff] %v12452_v4  ;;  %v4673_v13 = vshll.u32 %v4672_v39, 23  ;;  %v4866_v2 = vshll.u32 %v12449_v38, 30  ;;  %v4929_v11 = vor.u32 %v4928_v34, %v4927_v3  ;;  %v4936_v23 = vshll.u32 %v13821_v51, %v4921_v5 }
 0x462   : > { %v4932_v10 = vor.u32 %v4931_v63, %v4930_v17  ;;  %v4935_v1 = vor.u32 %v4934_v16, %v4933_v31  ;;  %v4937_v47 = vshrl.u32 %v13792_v54, %v4922_v42  ;;  %v4670_v37 = vor.u32 %v4669_v28, %v4668_v18 }
 0x463   : > { %v4674_v4 = vor.u32 4788187, %v4673_v13  ;;  %v12461_v26 = vsub.s32 %v4863_v56, %v4866_v2  ;;  %v12465_v19 = vadd.f32 %v12275_v21, %v11982_v7  ;;  %v4923_v39 = vshrl.u32 %v13786_v60, %v4922_v42 }
 0x464   : > { %v12467_v50 = vpop.eup %8206  ;;  %v4938_v14 = vor.u32 %v4937_v47, %v4936_v23  ;;  %vm4939_vm8 = vcmp.lt.s32.totalorder %v12441_v32, 1  ;;  %vm4941_vm13 = vcmp.lt.s32.totalorder %v12441_v32, 3  ;;  %vm4942_vm11 = vcmp.lt.s32.totalorder %v12441_v32, 4 }
 0x465   : > { %14123 = vst [vmem:[#allocation159_spill] sm:$0xff] %v12467_v50  ;;  %v4675_v5 = vand.u32 2147483647, %v4674_v4  ;;  %v4869_v36 = vsub.s32 0, %v12461_v26  ;;  %v4947_v2 = vsel %vm4939_vm8, %v4926_v61, %v4929_v11  ;;  %v4944_v56 = vsel %vm4942_vm11, %v4932_v10, 2102212464 }
 0x466   : > { %v4948_v13 = vsel %vm4942_vm11, %v4935_v1, 920167782  ;;  %v4951_v3 = vsel %vm4939_vm8, %v4929_v11, %v4932_v10  ;;  %v4952_v7 = vsel %vm4942_vm11, %v4938_v14, 1326507024  ;;  %v4677_v34 = vcvt.s32.f32 %v4670_v37 }
 0x467   : > { %v7755_v28 = vmin.u32 %v4869_v36, %v12461_v26  ;;  %vm4940_vm14 = vcmp.lt.s32.totalorder %v12441_v32, 2  ;;  %v4949_v47 = vsel %vm4941_vm13, %v4932_v10, %v4948_v13  ;;  %v4943_v42 = vsel %vm4939_vm8, %v4923_v39, %v4926_v61 }
 0x468   : > { %v4950_v63 = vsel %vm4940_vm14, %v4947_v2, %v4949_v47  ;;  %v4953_v4 = vsel %vm4941_vm13, %v4935_v1, %v4952_v7  ;;  %v7766_v18 = vadd.s32 4294967169, %v5119_v33  ;;  %v4678_v17 = vmul.f32 %v4677_v34, %v4675_v5 }
 0x469   : > { %v4871_v31 = vclz %v7755_v28  ;;  %v4945_v37 = vsel %vm4941_vm13, %v4929_v11, %v4944_v56  ;;  %v4954_v16 = vsel %vm4940_vm14, %v4951_v3, %v4953_v4  ;;  %8208 = vsinq.f32 %v12418_v45 }
 0x46a   : > { %v12487_v23 = vmul.u32.u64.low %v12443_v12, %v4954_v16  ;;  %v12488_v14 = vmul.u32.u64.high %v12443_v12, %v4954_v16, %v12487_v23  ;;  %v12491_v61 = vmul.u32.u64.low %v12443_v12, %v4950_v63  ;;  %v12492_v10 = vmul.u32.u64.high %v12443_v12, %v4950_v63, %v12491_v61 }
 0x46b   : > { %vm13764_vm8 = vcmp.lt.s32.totalorder %v12191_v6, 0  ;;  %v7756_v33 = vadd.s32 4294967294, %v4871_v31  ;;  %v5125_v1 = vadd.s32 1, %v7766_v18  ;;  %v14124_v11 = vsel %vm12370_vm6, 0, %v12291_v25 }
 0x46c   : > { %v12501_v39 = vadd.s32 3, %v14124_v11  ;;  %v4788_v5 = vsel %vm12385_vm12, 0, %v12423_v15  ;;  %8210 = vcosq.f32 %v12438_v59  ;;  %v4859_v36 = vadd.s32 %v12394_v55, %v12407_v43 }
 0x46d   : > { %vm7757_vm13 = vcmp.lt.s32.totalorder %v7756_v33, 0  ;;  %v4946_v45 = vsel %vm4940_vm14, %v4943_v42, %v4945_v37  ;;  %v14126_v2 = vand.u32 2147483647, %v12401_v30  ;;  %vm5126_vm11 = vcmp.gt.s32.totalorder %v5125_v1, 0 }
 0x46e   : > { %14125 = vst [vmem:[#allocation160_spill] sm:$0xff] %v12501_v39  ;;  %v4679_v25 = vxor.u32 2147483648, %v4678_v17  ;;  %v4874_v56 = vsel %vm7757_vm13, 0, %v7756_v33  ;;  %vm4964_vm6 = vc.u32 %v12488_v14, %v12491_v61  ;;  %v13760_v27 = vand.u32 2147483647, %v12465_v19 }
 0x46f   : > { %v5122_v44 = vand.u32 8388607, %v14126_v2  ;;  %v4875_v15 = vsub.s32 32, %v4874_v56  ;;  %v4879_v13 = vsub.s32 4294967266, %v4874_v56  ;;  %v4965_v3 = vadd.s32 1, %v12492_v10 }
 0x470   : > { %v5014_v55 = vand.u32 2139095040, %v12465_v19  ;;  %8212 = vsinq.f32 %v12438_v59  ;;  %v12519_v43 = vadd.s32 3, %v4788_v5  ;;  %v4962_v32 = vmul.u32 %v12443_v12, %v4946_v45 }
 0x471   : > { %v5127_v7 = vsel %vm5126_vm11, %v5125_v1, 0  ;;  %v14128_v34 = vand.u32 2147483647, %v12191_v6  ;;  %v14129_v28 = vmov 0  ;;  %v4876_v47 = vshll.u32 %v12461_v26, %v4874_v56 }
 0x472   : > { %14127 = vst [vmem:[#allocation161_spill] sm:$0xff] %v12519_v43  ;;  %v4877_v42 = vshrl.u32 %v4859_v36, %v4875_v15  ;;  %v4880_v63 = vadd.s32 127, %v4879_v13  ;;  %v4966_v4 = vsel %vm4964_vm6, %v4965_v3, %v12492_v10  ;;  %v4680_v59 = vsel %vm13764_vm8, %v4679_v25, %v4678_v17 }
 0x473   : > { %vm12524_vm12 = vcmp.le.f32.partialorder %v14128_v34, 0.7853982  ;;  %v4967_v18 = vadd.s32 %v4966_v4, %v4962_v32  ;;  %v5123_v31 = vor.u32 8388608, %v5122_v44  ;;  %v5129_v37 = vand.u32 31, %v5127_v7  ;;  %v12540_v5 = vpop.eup %8208 }
 0x474   : > { %v14130_v28 = vsel %vm12524_vm12, 4294967295, %v14129_v28  ;;  %v4878_v12 = vor.u32 %v4877_v42, %v4876_v47  ;;  %v4881_v16 = vshll.u32 %v4880_v63, 23  ;;  %vm13767_vm14 = vcmp.lt.s32.totalorder %v12281_v46, 0  ;;  %14131 = vst [vmem:[#allocation162_spill] sm:$0xff] %v12540_v5 }
 0x475   : > { %v5015_v23 = vshrl.u32 %v5014_v55, 23  ;;  %v12535_v33 = vand.u32 8388607, %v13760_v27  ;;  %v4968_v26 = vadd.s32 536870912, %v4967_v18  ;;  %v12537_v1 = vshrl.u32 %v5127_v7, 5 }
 0x476   : > { %v5130_v11 = vsub.s32 32, %v5129_v37  ;;  %v5132_v10 = vshll.u32 %v13786_v60, %v5129_v37  ;;  %v4882_v17 = vor.u32 4788187, %v4881_v16  ;;  %v4885_v36 = vcvt.s32.f32 %v4878_v12  ;;  %v12544_v44 = vpop.eup %8210 }
 0x477   : > { %v5135_v45 = vshll.u32 %v13789_v22, %v5129_v37  ;;  %v5138_v2 = vshll.u32 %v13791_v29, %v5129_v37  ;;  %14132 = vst [vmem:[#allocation163_spill] sm:$0xff] %v12544_v44  ;;  %v14133_v25 = vand.u32 2147483647, %v12281_v46  ;;  %v4969_v15 = vshrl.u32 %v4968_v26, 30 }
 0x478   : > { %v5133_v13 = vshrl.u32 %v13789_v22, %v5130_v11  ;;  %v5136_v3 = vshrl.u32 %v13791_v29, %v5130_v11  ;;  %v5141_v55 = vshll.u32 %v13790_v57, %v5129_v37  ;;  %v4883_v32 = vand.u32 2147483647, %v4882_v17 }
 0x479   : > { %vm12548_vm13 = vcmp.le.f32.partialorder %v14133_v25, 0.7853982  ;;  %v5139_v7 = vshrl.u32 %v13790_v57, %v5130_v11  ;;  %v5142_v34 = vshrl.u32 %v13821_v51, %v5130_v11  ;;  %v5144_v47 = vshll.u32 %v13821_v51, %v5129_v37 }
 0x47a   : > { %v4970_v42 = vshll.u32 %v4969_v15, 30  ;;  %v4993_v63 = vsub.s32 4, %v4969_v15  ;;  %v5134_v4 = vor.u32 %v5133_v13, %v5132_v10  ;;  %v5137_v12 = vor.u32 %v5136_v3, %v5135_v45  ;;  %v12560_v44 = vpop.eup %8212 }
 0x47b   : > { %v4886_v16 = vmul.f32 %v4885_v36, %v4883_v32  ;;  %v5140_v26 = vor.u32 %v5139_v7, %v5138_v2  ;;  %v5143_v25 = vor.u32 %v5142_v34, %v5141_v55  ;;  %v5145_v27 = vshrl.u32 %v13792_v54, %v5130_v11  ;;  %14136 = vst [vmem:[#allocation164_spill] sm:$0xff] %v12560_v44 }
 0x47c   : > { %v4683_v17 = vsel %vm12524_vm12, %v12191_v6, %v4680_v59  ;;  %v12565_v43 = vsub.s32 %v4967_v18, %v4970_v42  ;;  %v5163_v37 = vshll.u32 %v5123_v31, 8  ;;  %v7762_v50 = vadd.s32 4294967169, %v5015_v23 }
 0x47d   : > { %v5131_v5 = vshrl.u32 %v13786_v60, %v5130_v11  ;;  %v5146_v39 = vor.u32 %v5145_v27, %v5144_v47  ;;  %vm5147_vm6 = vcmp.lt.s32.totalorder %v12537_v1, 1  ;;  %v5019_v10 = vor.u32 8388608, %v12535_v33 }
 0x47e   : > { %v14137_v36 = vand.u32 2147483647, %v12258_v49  ;;  %v4973_v2 = vsub.s32 0, %v12565_v43  ;;  %v4994_v59 = vsel %vm13767_vm14, %v4993_v63, %v4969_v15  ;;  %vm5150_vm11 = vcmp.lt.s32.totalorder %v12537_v1, 4 }
 0x47f   : > { %v5155_v27 = vsel %vm5147_vm6, %v5134_v4, %v5137_v12  ;;  %v4887_v18 = vxor.u32 2147483648, %v4886_v16  ;;  %vm5149_vm12 = vcmp.lt.s32.totalorder %v12537_v1, 3  ;;  %v5152_v31 = vsel %vm5150_vm11, %v5140_v26, 2102212464 }
 0x480   : > { %vm12572_vm8 = vcmp.le.f32.partialorder %v14137_v36, 0.7853982  ;;  %v5156_v23 = vsel %vm5150_vm11, %v5143_v25, 920167782  ;;  %v7759_v33 = vmin.u32 %v4973_v2, %v12565_v43  ;;  %vm5148_vm4 = vcmp.lt.s32.totalorder %v12537_v1, 2 }
 0x481   : > { %v5157_v11 = vsel %vm5149_vm12, %v5140_v26, %v5156_v23  ;;  %v5159_v13 = vsel %vm5147_vm6, %v5137_v12, %v5140_v26  ;;  %v4996_v15 = vsel %vm12548_vm13, 0, %v4994_v59  ;;  %v5151_v3 = vsel %vm5147_vm6, %v5131_v5, %v5134_v4 }
 0x482   : > { %v5158_v55 = vsel %vm5148_vm4, %v5155_v27, %v5157_v11  ;;  %v5160_v32 = vsel %vm5150_vm11, %v5146_v39, 1326507024  ;;  %v4975_v7 = vclz %v7759_v33  ;;  %v5153_v34 = vsel %vm5149_vm12, %v5137_v12, %v5152_v31 }
 0x483   : > { %v5161_v47 = vsel %vm5149_vm12, %v5143_v25, %v5160_v32  ;;  %v5021_v42 = vadd.s32 1, %v7762_v50  ;;  %vm14140_vm14 = vcmp.lt.s32.totalorder %v12258_v49, 0  ;;  %8214 = vcosq.f32 %v4683_v17 }
 0x484   : > { %v4888_v63 = vsel %vm14140_vm14, %v4887_v18, %v4886_v16  ;;  %v5162_v26 = vsel %vm5148_vm4, %v5159_v13, %v5161_v47  ;;  %v12597_v36 = vmul.u32.u64.low %v5163_v37, %v5158_v55  ;;  %v12598_v2 = vmul.u32.u64.high %v5163_v37, %v5158_v55, %v12597_v36 }
 0x485   : > { %v7760_v59 = vadd.s32 4294967294, %v4975_v7  ;;  %v12601_v5 = vmul.u32.u64.low %v5163_v37, %v5162_v26  ;;  %v12602_v4 = vmul.u32.u64.high %v5163_v37, %v5162_v26, %v12601_v5  ;;  %vm5022_vm6 = vcmp.gt.s32.totalorder %v5021_v42, 0 }
 0x486   : > { %v5154_v39 = vsel %vm5148_vm4, %v5151_v3, %v5153_v34  ;;  %v5023_v50 = vsel %vm5022_vm6, %v5021_v42, 0  ;;  %v12608_v12 = vadd.f32 %v12275_v21, %v12046_v48  ;;  %8216 = vsinq.f32 %v4683_v17 }
 0x487   : > { %v4963_v16 = vadd.s32 %v12491_v61, %v12488_v14  ;;  %vm7761_vm12 = vcmp.lt.s32.totalorder %v7760_v59, 0  ;;  %v5025_v25 = vand.u32 31, %v5023_v50  ;;  %v12615_v27 = vsel %vm12572_vm8, %v12258_v49, %v4888_v63 }
 0x488   : > { %v4978_v18 = vsel %vm7761_vm12, 0, %v7760_v59  ;;  %v12617_v31 = vadd.s32 3, %v4996_v15  ;;  %v5173_v1 = vadd.s32 1, %v12598_v2  ;;  %v5170_v48 = vmul.u32 %v5163_v37, %v5154_v39 }
 0x489   : > { %v4979_v23 = vsub.s32 32, %v4978_v18  ;;  %v4983_v33 = vsub.s32 4294967266, %v4978_v18  ;;  %v12620_v21 = vshll.u32 %v5019_v10, 8  ;;  %v4980_v17 = vshll.u32 %v12565_v43, %v4978_v18 }
 0x48a   : > { %14141 = vst [vmem:[#allocation165_spill] sm:$0xff] %v12617_v31  ;;  %vm5172_vm4 = vc.u32 %v12602_v4, %v12597_v36  ;;  %v5026_v14 = vsub.s32 32, %v5025_v25  ;;  %v5028_v3 = vshll.u32 %v13786_v60, %v5025_v25  ;;  %v5031_v37 = vshll.u32 %v13789_v22, %v5025_v25 }
 0x48b   : > { %v4981_v11 = vshrl.u32 %v4963_v16, %v4979_v23  ;;  %v4984_v13 = vadd.s32 127, %v4983_v33  ;;  %v5174_v15 = vsel %vm5172_vm4, %v5173_v1, %v12598_v2  ;;  %v5034_v34 = vshll.u32 %v13791_v29, %v5025_v25 }
 0x48c   : > { %v5175_v55 = vadd.s32 %v5174_v15, %v5170_v48  ;;  %v5029_v32 = vshrl.u32 %v13789_v22, %v5026_v14  ;;  %v5032_v10 = vshrl.u32 %v13791_v29, %v5026_v14  ;;  %v5035_v47 = vshrl.u32 %v13790_v57, %v5026_v14 }
 0x48d   : > { %v4982_v43 = vor.u32 %v4981_v11, %v4980_v17  ;;  %v4985_v7 = vshll.u32 %v4984_v13, 23  ;;  %v5024_v63 = vshrl.u32 %v5023_v50, 5  ;;  %v5037_v26 = vshll.u32 %v13790_v57, %v5025_v25  ;;  %v12636_v18 = vpop.eup %8214 }
 0x48e   : > { %v5176_v42 = vadd.s32 536870912, %v5175_v55  ;;  %v5038_v2 = vshrl.u32 %v13821_v51, %v5026_v14  ;;  %v5030_v5 = vor.u32 %v5029_v32, %v5028_v3  ;;  %v5033_v39 = vor.u32 %v5032_v10, %v5031_v37  ;;  %v14184_v37 = vld [vmem:[#allocation42_spill] sm:$0xff] }
 0x48f   : > { %v4986_v59 = vor.u32 4788187, %v4985_v7  ;;  %v5036_v16 = vor.u32 %v5035_v47, %v5034_v34  ;;  %v5040_v33 = vshll.u32 %v13821_v51, %v5025_v25  ;;  %v5041_v48 = vshrl.u32 %v13792_v54, %v5026_v14 }
 0x490   : > { %v5177_v1 = vshrl.u32 %v5176_v42, 30  ;;  %v5039_v23 = vor.u32 %v5038_v2, %v5037_v26  ;;  %v12640_v17 = vpop.eup %8216  ;;  %v4989_v11 = vcvt.s32.f32 %v4982_v43  ;;  %v5027_v13 = vshrl.u32 %v13786_v60, %v5026_v14 }
 0x491   : > { %v4987_v50 = vand.u32 2147483647, %v4986_v59  ;;  %v5222_v15 = vand.u32 2139095040, %v12608_v12  ;;  %v5042_v3 = vor.u32 %v5041_v48, %v5040_v33  ;;  %vm5043_vm11 = vcmp.lt.s32.totalorder %v5024_v63, 1  ;;  %v14145_v59 = vld [vmem:[#allocation11_spill] sm:$0xff] }
 0x492   : > { %v5178_v7 = vshll.u32 %v5177_v1, 30  ;;  %vm5046_vm6 = vcmp.lt.s32.totalorder %v5024_v63, 4  ;;  %v14142_v32 = vand.u32 2147483647, %v12401_v30  ;;  %vm13769_vm4 = vcmp.lt.s32.totalorder %v5024_v63, 2 }
 0x493   : > { %vm5045_vm14 = vcmp.lt.s32.totalorder %v5024_v63, 3  ;;  %v5051_v25 = vsel %vm5043_vm11, %v5030_v5, %v5033_v39  ;;  %v5052_v10 = vsel %vm5046_vm6, %v5039_v23, 920167782  ;;  %v5201_v14 = vsub.s32 4, %v5177_v1 }
 0x494   : > { %vm12646_vm12 = vcmp.le.f32.partialorder %v14142_v32, 0.7853982  ;;  %v12652_v43 = vsub.s32 %v5175_v55, %v5178_v7  ;;  %v5048_v34 = vsel %vm5046_vm6, %v5036_v16, 2102212464  ;;  %v5053_v47 = vsel %vm5045_vm14, %v5036_v16, %v5052_v10 }
 0x495   : > { %v4990_v42 = vmul.f32 %v4989_v11, %v4987_v50  ;;  %v5054_v26 = vsel %vm13769_vm4, %v5051_v25, %v5053_v47  ;;  %v5223_v2 = vshrl.u32 %v5222_v15, 23  ;;  %v937_v33 = vsub.s32 4, %v14145_v59 }
 0x496   : > { %v5181_v48 = vsub.s32 0, %v12652_v43  ;;  %v5047_v32 = vsel %vm5043_vm11, %v5027_v13, %v5030_v5  ;;  %v5055_v61 = vsel %vm5043_vm11, %v5033_v39, %v5036_v16  ;;  %v5056_v55 = vsel %vm5046_vm6, %v5042_v3, 1326507024 }
 0x497   : > { %v5049_v7 = vsel %vm5045_vm14, %v5033_v39, %v5048_v34  ;;  %v5057_v44 = vsel %vm5045_vm14, %v5039_v23, %v5056_v55  ;;  %v12665_v10 = vmul.u32.u64.low %v12620_v21, %v5054_v26  ;;  %v12666_v50 = vmul.u32.u64.high %v12620_v21, %v5054_v26, %v12665_v10  ;;  %v14150_v26 = vld [vmem:[#allocation8_spill] sm:$0xff] }
 0x498   : > { %8218 = vcosq.f32 %v12615_v27  ;;  %v7767_v11 = vmin.u32 %v5181_v48, %v12652_v43  ;;  %vm14146_vm4 = vcmp.lt.s32.totalorder %v12401_v30, 0  ;;  %vm14147_vm11 = vcmp.lt.s32.totalorder %v5024_v63, 2 }
 0x499   : > { %v12673_v5 = vsel %vm14146_vm4, %v5201_v14, %v5177_v1  ;;  %v5058_v16 = vsel %vm14147_vm11, %v5055_v61, %v5057_v44  ;;  %v4991_v13 = vxor.u32 2147483648, %v4990_v42  ;;  %v7770_v23 = vadd.s32 4294967169, %v5223_v2  ;;  %vm14148_vm14 = vmmov %vm14147_vm11 }
 0x49a   : > { %v12677_v39 = vmul.u32.u64.low %v12620_v21, %v5058_v16  ;;  %v12678_v15 = vmul.u32.u64.high %v12620_v21, %v5058_v16, %v12677_v39  ;;  %v5183_v3 = vclz %v7767_v11  ;;  %v5050_v25 = vsel %vm14148_vm14, %v5047_v32, %v5049_v7 }
 0x49b   : > { %v14149_v34 = vand.u32 2147483647, %v12608_v12  ;;  %vm14151_vm6 = vcmp.lt.s32.totalorder %v14150_v26, 0  ;;  %8220 = vsinq.f32 %v12615_v27  ;;  %v5069_v44 = vadd.s32 1, %v12666_v50 }
 0x49c   : > { %v938_v48 = vsel %vm14151_vm6, %v937_v33, %v14145_v59  ;;  %v5229_v61 = vadd.s32 1, %v7770_v23  ;;  %v5171_v2 = vadd.s32 %v12597_v36, %v12602_v4  ;;  %v7768_v63 = vadd.s32 4294967294, %v5183_v3 }
 0x49d   : > { %v5226_v47 = vand.u32 8388607, %v14149_v34  ;;  %v940_v14 = vsel %vm9364_vm9, 0, %v938_v48  ;;  %v5066_v7 = vmul.u32 %v12620_v21, %v5050_v25  ;;  %vm5068_vm4 = vc.u32 %v12678_v15, %v12665_v10 }
 0x49e   : > { %vm5230_vm11 = vcmp.gt.s32.totalorder %v5229_v61, 0  ;;  %v944_v27 = vadd.s32 3, %v940_v14  ;;  %vm14153_vm14 = vcmp.lt.s32.totalorder %v12281_v46, 0  ;;  %vm7769_vm9 = vcmp.lt.s32.totalorder %v7768_v63, 0 }
 0x49f   : > { %v5227_v55 = vor.u32 8388608, %v5226_v47  ;;  %v12700_v59 = vsel %vm14153_vm14, %v4991_v13, %v4990_v42  ;;  %v5070_v36 = vsel %vm5068_vm4, %v5069_v44, %v12666_v50  ;;  %v5231_v4 = vsel %vm5230_vm11, %v5229_v61, 0 }
 0x4a0   : > { %v5186_v33 = vsel %vm7769_vm9, 0, %v7768_v63  ;;  %v5071_v11 = vadd.s32 %v5070_v36, %v5066_v7  ;;  %v5233_v16 = vand.u32 31, %v5231_v4  ;;  %v5232_v25 = vshrl.u32 %v5231_v4, 5 }
 0x4a1   : > { %v12703_v39 = vshll.u32 %v5227_v55, 8  ;;  %v5187_v23 = vsub.s32 32, %v5186_v33  ;;  %v5188_v21 = vshll.u32 %v12652_v43, %v5186_v33  ;;  %v5191_v3 = vsub.s32 4294967266, %v5186_v33 }
 0x4a2   : > { %v5072_v34 = vadd.s32 536870912, %v5071_v11  ;;  %v5234_v47 = vsub.s32 32, %v5233_v16  ;;  %v5236_v48 = vshll.u32 %v13786_v60, %v5233_v16  ;;  %v12707_v42 = vand.u32 3, %v944_v27  ;;  %v12709_v13 = vpop.eup %8218 }
 0x4a3   : > { %14154 = vst [vmem:[#allocation11_spill] sm:$0xff] %v12709_v13  ;;  %v5189_v50 = vshrl.u32 %v5171_v2, %v5187_v23  ;;  %v5192_v44 = vadd.s32 127, %v5191_v3  ;;  %v5239_v61 = vshll.u32 %v13789_v22, %v5233_v16  ;;  %v5242_v1 = vshll.u32 %v13791_v29, %v5233_v16 }
 0x4a4   : > { %v12713_v14 = vshrl.u32 %v5072_v34, 30  ;;  %v5237_v43 = vshrl.u32 %v13789_v22, %v5234_v47  ;;  %v5240_v63 = vshrl.u32 %v13791_v29, %v5234_v47  ;;  %v5245_v55 = vshll.u32 %v13790_v57, %v5233_v16 }
 0x4a5   : > { %v5190_v7 = vor.u32 %v5189_v50, %v5188_v21  ;;  %v5193_v36 = vshll.u32 %v5192_v44, 23  ;;  %v5243_v27 = vshrl.u32 %v13790_v57, %v5234_v47  ;;  %v5246_v4 = vshrl.u32 %v13821_v51, %v5234_v47  ;;  %v12720_v2 = vpop.eup %8220 }
 0x4a6   : > { %v5074_v33 = vshll.u32 %v12713_v14, 30  ;;  %v5235_v23 = vshrl.u32 %v13786_v60, %v5234_v47  ;;  %v5238_v3 = vor.u32 %v5237_v43, %v5236_v48  ;;  %v5241_v34 = vor.u32 %v5240_v63, %v5239_v61 }
 0x4a7   : > { %v5194_v32 = vor.u32 4788187, %v5193_v36  ;;  %v5244_v22 = vor.u32 %v5243_v27, %v5242_v1  ;;  %v5247_v31 = vor.u32 %v5246_v4, %v5245_v55  ;;  %v5248_v29 = vshll.u32 %v13821_v51, %v5233_v16  ;;  %v14156_v27 = vld [vmem:[#allocation31_spill] sm:$0xff] }
 0x4a8   : > { %v5197_v13 = vcvt.s32.f32 %v5190_v7  ;;  %v12725_v21 = vsub.s32 %v5071_v11, %v5074_v33  ;;  %v5249_v57 = vshrl.u32 %v13792_v54, %v5234_v47  ;;  %vm5251_vm6 = vcmp.lt.s32.totalorder %v5232_v25, 1  ;;  %v14155_v47 = vld [vmem:[#allocation35_spill] sm:$0xff] }
 0x4a9   : > { %v5195_v50 = vand.u32 2147483647, %v5194_v32  ;;  %vm5252_vm4 = vcmp.lt.s32.totalorder %v5232_v25, 2  ;;  %vm5253_vm11 = vcmp.lt.s32.totalorder %v5232_v25, 3  ;;  %vm5254_vm14 = vcmp.lt.s32.totalorder %v5232_v25, 4 }
 0x4aa   : > { %v5077_v44 = vsub.s32 0, %v12725_v21  ;;  %v5250_v60 = vor.u32 %v5249_v57, %v5248_v29  ;;  %v5256_v48 = vsel %vm5254_vm14, %v5244_v22, 2102212464  ;;  %v5259_v61 = vsel %vm5251_vm6, %v5238_v3, %v5241_v34 }
 0x4ab   : > { %v5198_v43 = vmul.f32 %v5197_v13, %v5195_v50  ;;  %v5255_v1 = vsel %vm5251_vm6, %v5235_v23, %v5238_v3  ;;  %v5260_v63 = vsel %vm5254_vm14, %v5247_v31, 920167782  ;;  %v5263_v55 = vsel %vm5251_vm6, %v5241_v34, %v5244_v22 }
 0x4ac   : > { %v7763_v51 = vmin.u32 %v5077_v44, %v12725_v21  ;;  %v5257_v11 = vsel %vm5253_vm11, %v5241_v34, %v5256_v48  ;;  %v5261_v16 = vsel %vm5253_vm11, %v5244_v22, %v5260_v63  ;;  %v5264_v7 = vsel %vm5254_vm14, %v5250_v60, 1326507024 }
 0x4ad   : > { %v5262_v54 = vsel %vm5252_vm4, %v5259_v61, %v5261_v16  ;;  %v5265_v32 = vsel %vm5253_vm11, %v5247_v31, %v5264_v7  ;;  %v948_v36 = vxor.u32 2147483648, %v14155_v47  ;;  %v951_v4 = vxor.u32 2147483648, %v14156_v27 }
 0x4ae   : > { %v5079_v33 = vclz %v7763_v51  ;;  %v5266_v29 = vsel %vm5252_vm4, %v5263_v55, %v5265_v32  ;;  %v12735_v13 = vmul.u32.u64.low %v12703_v39, %v5262_v54  ;;  %v12736_v23 = vmul.u32.u64.high %v12703_v39, %v5262_v54, %v12735_v13  ;;  %v14160_v32 = vld [vmem:[#allocation9_spill] sm:$0xff] }
 0x4af   : > { %v12743_v3 = vsel %vm12548_vm13, %v12281_v46, %v12700_v59  ;;  %v5258_v31 = vsel %vm5252_vm4, %v5255_v1, %v5257_v11  ;;  %v12747_v34 = vmul.u32.u64.low %v12703_v39, %v5266_v29  ;;  %v12748_v22 = vmul.u32.u64.high %v12703_v39, %v5266_v29, %v12747_v34  ;;  %v14157_v59 = vld [vmem:[#allocation14_spill] sm:$0xff]  ;;  %v14163_v29 = vld [vmem:[#allocation37_spill] sm:$0xff] }
 0x4b0   : > { %v5199_v57 = vxor.u32 2147483648, %v5198_v43  ;;  %v7764_v50 = vadd.s32 4294967294, %v5079_v33  ;;  %vm947_vm9 = vcmp.eq.s32.totalorder %v12707_v42, 0  ;;  %vm950_vm6 = vcmp.eq.s32.totalorder %v12707_v42, 2 }
 0x4b1   : > { %vm946_vm11 = vcmp.lt.s32.totalorder %v12707_v42, 2  ;;  %v949_v44 = vsel %vm947_vm9, %v14156_v27, %v948_v36  ;;  %v952_v56 = vsel %vm950_vm6, %v951_v4, %v14155_v47  ;;  %v1145_v60 = vsub.s32 4, %v14157_v59 }
 0x4b2   : > { %vm7765_vm13 = vcmp.lt.s32.totalorder %v7764_v50, 0  ;;  %v5277_v25 = vadd.s32 1, %v12736_v23  ;;  %vm943_vm4 = vweird.f32 %v14150_v26  ;;  %v953_v48 = vsel %vm946_vm11, %v949_v44, %v952_v56  ;;  %v14159_v26 = vld [vmem:[#allocation4_spill] sm:$0xff]  ;;  %v14166_v56 = vld [vmem:[#allocation27_spill] sm:$0xff] }
 0x4b3   : > { %v5082_v61 = vsel %vm7765_vm13, 0, %v7764_v50  ;;  %v5274_v1 = vmul.u32 %v12703_v39, %v5258_v31  ;;  %vm5276_vm14 = vc.u32 %v12748_v22, %v12735_v13  ;;  %v954_v63 = vsel %vm943_vm4, nan, %v953_v48  ;;  %v14165_v50 = vld [vmem:[#allocation25_spill] sm:$0xff] }
 0x4b4   : > { %v5067_v42 = vadd.s32 %v12665_v10, %v12678_v15  ;;  %v5083_v55 = vsub.s32 32, %v5082_v61  ;;  %v5087_v51 = vsub.s32 4294967266, %v5082_v61  ;;  %v5278_v11 = vsel %vm5276_vm14, %v5277_v25, %v12736_v23  ;;  %v14167_v25 = vld [vmem:[#allocation21_spill] sm:$0xff] }
 0x4b5   : > { %vm14158_vm9 = vcmp.lt.s32.totalorder %v12401_v30, 0  ;;  %v5279_v7 = vadd.s32 %v5278_v11, %v5274_v1  ;;  %v5324_v54 = vpack.c.bf16 %v954_v63, %v14159_v26  ;;  %vm14161_vm6 = vcmp.lt.s32.totalorder %v14160_v32, 0 }
 0x4b6   : > { %v5200_v16 = vsel %vm14158_vm9, %v5199_v57, %v5198_v43  ;;  %v1146_v39 = vsel %vm14161_vm6, %v1145_v60, %v14157_v59  ;;  %v5084_v47 = vshll.u32 %v12725_v21, %v5082_v61  ;;  %v5085_v36 = vshrl.u32 %v5067_v42, %v5083_v55  ;;  %v14164_v43 = vld [vmem:[#allocation36_spill] sm:$0xff] }
 0x4b7   : > { %v5088_v27 = vadd.s32 127, %v5087_v51  ;;  %v1148_v10 = vsel %vm9485_vm2, 0, %v1146_v39  ;;  %v5280_v15 = vadd.s32 536870912, %v5279_v7  ;;  %5537 = vmatprep.subr.bf16.mxu0 %v5324_v54  ;;  %v1156_v23 = vxor.u32 2147483648, %v14163_v29  ;;  %v14168_v39 = vld [vmem:[#allocation26_spill] sm:$0xff] }
 0x4b8   : > { %v1152_v33 = vadd.s32 3, %v1148_v10  ;;  %v1159_v31 = vxor.u32 2147483648, %v14164_v43  ;;  %v5086_v34 = vor.u32 %v5085_v36, %v5084_v47  ;;  %v841_v44 = vand.u32 3, %v14165_v50  ;;  %v14170_v10 = vld [vmem:[#allocation29_spill] sm:$0xff] }
 0x4b9   : > { %v5089_v57 = vshll.u32 %v5088_v27, 23  ;;  %v844_v59 = vxor.u32 2147483648, %v14166_v56  ;;  %v12777_v60 = vshrl.u32 %v5280_v15, 30  ;;  %v847_v48 = vxor.u32 2147483648, %v14167_v25 }
 0x4ba   : > { %v1153_v21 = vand.u32 3, %v1152_v33  ;;  %v5093_v1 = vcvt.s32.f32 %v5086_v34  ;;  %vm843_vm13 = vcmp.eq.s32.totalorder %v841_v44, 0  ;;  %vm5013_vm6 = vcmp.lt.s32.totalorder %v12465_v19, 0 }
 0x4bb   : > { %v5090_v61 = vor.u32 4788187, %v5089_v57  ;;  %v5282_v63 = vshll.u32 %v12777_v60, 30  ;;  %v845_v11 = vsel %vm843_vm13, %v14167_v25, %v844_v59  ;;  %vm846_vm11 = vcmp.eq.s32.totalorder %v841_v44, 2 }
 0x4bc   : > { %vm1154_vm4 = vcmp.lt.s32.totalorder %v1153_v21, 2  ;;  %vm1155_vm14 = vcmp.eq.s32.totalorder %v1153_v21, 0  ;;  %vm1158_vm9 = vcmp.eq.s32.totalorder %v1153_v21, 2  ;;  %v1049_v47 = vand.u32 3, %v14168_v39  ;;  %v14179_v21 = vld [vmem:[#allocation28_spill] sm:$0xff] }
 0x4bd   : > { %v5091_v42 = vand.u32 2147483647, %v5090_v61  ;;  %v1157_v55 = vsel %vm1155_vm14, %v14164_v43, %v1156_v23  ;;  %v1160_v51 = vsel %vm1158_vm9, %v1159_v31, %v14163_v29  ;;  %v12786_v26 = vsub.s32 %v5279_v7, %v5282_v63  ;;  %v14171_v29 = vld [vmem:[#allocation5_spill] sm:$0xff]  ;;  %v14172_v43 = vld [vmem:[#allocation6_spill] sm:$0xff] }
 0x4be   : > { %v1161_v54 = vsel %vm1154_vm4, %v1157_v55, %v1160_v51  ;;  %vm14169_vm2 = vweird.f32 %v14160_v32  ;;  %v848_v4 = vsel %vm846_vm11, %v847_v48, %v14166_v56  ;;  %v1052_v15 = vxor.u32 2147483648, %v14170_v10  ;;  %v14181_v51 = vld [vmem:[#allocation7_spill] sm:$0xff] }
 0x4bf   : > { %v5094_v36 = vmul.f32 %v5093_v1, %v5091_v42  ;;  %v1162_v27 = vsel %vm14169_vm2, nan, %v1161_v54  ;;  %v5285_v33 = vsub.s32 0, %v12786_v26  ;;  %vm839_vm13 = vweird.f32 %v14172_v43  ;;  %v14180_v1 = vld [vmem:[#allocation24_spill] sm:$0xff]  ;;  %v14182_v54 = vld [vmem:[#allocation15_spill] sm:$0xff] }
 0x4c0   : > { %v5326_v23 = vpack.c.bf16 %v1162_v27, %v14171_v29  ;;  %vm14173_vm14 = vcmp.lt.s32.totalorder %v841_v44, 2  ;;  %8222 = vcosq.f32 %v12743_v3  ;;  %v14174_v31 = vsel %vm12646_vm12, 0, %v12673_v5  ;;  %v14178_v44 = vld [vmem:[#allocation2_spill] sm:$0xff] }
 0x4c1   : > { %v849_v7 = vsel %vm14173_vm14, %v845_v11, %v848_v4  ;;  %v12802_v32 = vadd.s32 3, %v14174_v31  ;;  %v14175_v34 = vand.u32 2147483647, %v12465_v19  ;;  %vm1051_vm2 = vcmp.eq.s32.totalorder %v1049_v47, 0 }
 0x4c2   : > { %v850_v50 = vsel %vm839_vm13, nan, %v849_v7  ;;  %v7771_v56 = vmin.u32 %v5285_v33, %v12786_v26  ;;  %5658 = vmatprep.subr.bf16.mxu1 %v5326_v23  ;;  %v1053_v25 = vsel %vm1051_vm2, %v14179_v21, %v1052_v15  ;;  %v1055_v48 = vxor.u32 2147483648, %v14179_v21  ;;  %v14186_v33 = vld [vmem:[#allocation3_spill] sm:$0xff]  ;;  %v14187_v23 = vld [vmem:[#allocation33_spill] sm:$0xff] }
 0x4c3   : > { %vm12806_vm11 = vcmp.le.f32.partialorder %v14175_v34, 0.7853982  ;;  %v5323_v59 = vpack.c.bf16 %v850_v50, %v14178_v44  ;;  %v5203_v5 = vsel %vm12646_vm12, %v12401_v30, %v5200_v16  ;;  %v5095_v61 = vxor.u32 2147483648, %v5094_v36  ;;  %v14189_v7 = vld [vmem:[#allocation19_spill] sm:$0xff]  ;;  %v14190_v34 = vld [vmem:[#allocation49_spill] sm:$0xff] }
 0x4c4   : > { %vm1054_vm4 = vcmp.eq.s32.totalorder %v1049_v47, 2  ;;  %v1353_v63 = vsub.s32 4, %v14180_v1  ;;  %8224 = vsinq.f32 %v12743_v3  ;;  %v5287_v42 = vclz %v7771_v56 }
 0x4c5   : > { %5538 = vmatpush1.bf16.msra.mxu0 %v5323_v59  ;;  %vm1050_vm9 = vcmp.lt.s32.totalorder %v1049_v47, 2  ;;  %v1056_v55 = vsel %vm1054_vm4, %v1055_v48, %v14170_v10  ;;  %vm1047_vm13 = vweird.f32 %v14181_v51  ;;  %vm14183_vm14 = vcmp.lt.s32.totalorder %v14182_v54, 0 }
 0x4c6   : > { %v1057_v11 = vsel %vm1050_vm9, %v1053_v25, %v1056_v55  ;;  %v1354_v39 = vsel %vm14183_vm14, %v1353_v63, %v14180_v1  ;;  %v1769_v16 = vsub.s32 4, %v14184_v37  ;;  %8226 = vcosq.f32 %v5203_v5  ;;  %v14193_v63 = vld [vmem:[#allocation65_spill] sm:$0xff] }
 0x4c7   : > { %v7772_v27 = vadd.s32 4294967294, %v5287_v42  ;;  %v1058_v4 = vsel %vm1047_vm13, nan, %v1057_v11  ;;  %v1356_v3 = vsel %vm9787_vm1, 0, %v1354_v39  ;;  %v5096_v47 = vsel %vm5013_vm6, %v5095_v61, %v5094_v36  ;;  %v14192_v61 = vld [vmem:[#allocation67_spill] sm:$0xff] }
 0x4c8   : > { %v5325_v10 = vpack.c.bf16 %v1058_v4, %v14186_v33  ;;  %v1360_v29 = vadd.s32 3, %v1356_v3  ;;  %vm14188_vm12 = vcmp.lt.s32.totalorder %v14187_v23, 0  ;;  %v1364_v31 = vxor.u32 2147483648, %v14189_v7 }
 0x4c9   : > { %v1770_v43 = vsel %vm14188_vm12, %v1769_v16, %v14184_v37  ;;  %vm7773_vm2 = vcmp.lt.s32.totalorder %v7772_v27, 0  ;;  %v1367_v50 = vxor.u32 2147483648, %v14190_v34  ;;  %8228 = vsinq.f32 %v5203_v5  ;;  %v14194_v5 = vld [vmem:[#allocation32_spill] sm:$0xff] }
 0x4ca   : > { %v1772_v44 = vsel %vm10169_vm7, 0, %v1770_v43  ;;  %v5290_v59 = vsel %vm7773_vm2, 0, %v7772_v27  ;;  %5659 = vmatpush1.bf16.msra.mxu1 %v5325_v10  ;;  %v1361_v21 = vand.u32 3, %v1360_v29  ;;  %v12840_v25 = vsel %vm12806_vm11, %v12465_v19, %v5096_v47  ;;  %v12844_v55 = vpop.eup %8222  ;;  %v14195_v10 = vld [vmem:[#allocation18_spill] sm:$0xff] }
 0x4cb   : > { %v1776_v36 = vadd.s32 3, %v1772_v44  ;;  %v5295_v48 = vsub.s32 4294967266, %v5290_v59  ;;  %v1780_v1 = vxor.u32 2147483648, %v14192_v61  ;;  %v1783_v42 = vxor.u32 2147483648, %v14193_v63  ;;  %v14198_v44 = vld [vmem:[#allocation47_spill] sm:$0xff] }
 0x4cc   : > { %vm1363_vm1 = vcmp.eq.s32.totalorder %v1361_v21, 0  ;;  %vm1366_vm4 = vcmp.eq.s32.totalorder %v1361_v21, 2  ;;  %v1561_v11 = vsub.s32 4, %v14194_v5  ;;  %v5291_v39 = vsub.s32 32, %v5290_v59 }
 0x4cd   : > { %v1777_v51 = vand.u32 3, %v1776_v36  ;;  %v5296_v37 = vadd.s32 127, %v5295_v48  ;;  %v1365_v16 = vsel %vm1363_vm1, %v14190_v34, %v1364_v31  ;;  %v1368_v27 = vsel %vm1366_vm4, %v1367_v50, %v14189_v7 }
 0x4ce   : > { %v5275_v4 = vadd.s32 %v12735_v13, %v12748_v22  ;;  %vm1359_vm7 = vweird.f32 %v14182_v54  ;;  %vm1362_vm9 = vcmp.lt.s32.totalorder %v1361_v21, 2  ;;  %v12852_v15 = vpop.eup %8224  ;;  %8230 = vcosq.f32 %v12840_v25 }
 0x4cf   : > { %vm1779_vm13 = vcmp.eq.s32.totalorder %v1777_v51, 0  ;;  %v1369_v3 = vsel %vm1362_vm9, %v1365_v16, %v1368_v27  ;;  %vm1782_vm14 = vcmp.eq.s32.totalorder %v1777_v51, 2  ;;  %vm1775_vm12 = vweird.f32 %v14187_v23  ;;  %v14210_v27 = vld [vmem:[#allocation52_spill] sm:$0xff] }
 0x4d0   : > { %v1781_v47 = vsel %vm1779_vm13, %v14193_v63, %v1780_v1  ;;  %vm1778_vm2 = vcmp.lt.s32.totalorder %v1777_v51, 2  ;;  %v1784_v33 = vsel %vm1782_vm14, %v1783_v42, %v14192_v61  ;;  %vm14196_vm1 = vcmp.lt.s32.totalorder %v14195_v10, 0  ;;  %v12861_v22 = vpop.eup %8226  ;;  %v14199_v61 = vld [vmem:[#allocation55_spill] sm:$0xff] }
 0x4d1   : > { %v1562_v13 = vsel %vm14196_vm1, %v1561_v11, %v14194_v5  ;;  %v5293_v29 = vshrl.u32 %v5275_v4, %v5291_v39  ;;  %v5297_v43 = vshll.u32 %v5296_v37, 23  ;;  %v1785_v7 = vsel %vm1778_vm2, %v1781_v47, %v1784_v33  ;;  %v14200_v63 = vld [vmem:[#allocation51_spill] sm:$0xff]  ;;  %v14201_v11 = vld [vmem:[#allocation12_spill] sm:$0xff]  ;;  %v14203_v39 = vld [vmem:[#allocation38_spill] sm:$0xff] }
 0x4d2   : > { %v1564_v34 = vsel %vm9881_vm5, 0, %v1562_v13  ;;  %v1370_v50 = vsel %vm1359_vm7, nan, %v1369_v3  ;;  %v1786_v56 = vsel %vm1775_vm12, nan, %v1785_v7  ;;  %v1977_v21 = vsub.s32 4, %v14198_v44  ;;  %v14206_v3 = vld [vmem:[#allocation40_spill] sm:$0xff] }
 0x4d3   : > { %v1568_v23 = vadd.s32 3, %v1564_v34  ;;  %v5292_v36 = vshll.u32 %v12786_v26, %v5290_v59  ;;  %v5328_v48 = vpack.c.bf16 %v1786_v56, %v1370_v50  ;;  %v1572_v1 = vxor.u32 2147483648, %v14199_v61  ;;  %v12871_v51 = vpop.eup %8228  ;;  %v14205_v59 = vld [vmem:[#allocation43_spill] sm:$0xff]  ;;  %v14207_v34 = vld [vmem:[#allocation70_spill] sm:$0xff]  ;;  %v14208_v56 = vld [vmem:[#allocation68_spill] sm:$0xff] }
 0x4d4   : > { %v1575_v42 = vxor.u32 2147483648, %v14200_v63  ;;  %vm1567_vm4 = vweird.f32 %v14195_v10  ;;  %vm14202_vm5 = vcmp.lt.s32.totalorder %v14201_v11, 0  ;;  %v1257_v37 = vand.u32 3, %v14203_v39 }
 0x4d5   : > { %v1569_v5 = vand.u32 3, %v1568_v23  ;;  %v1978_v54 = vsel %vm14202_vm5, %v1977_v21, %v14198_v44  ;;  %v5294_v16 = vor.u32 %v5293_v29, %v5292_v36  ;;  %5539 = vmatprep.subr.bf16.mxu0 %v5328_v48  ;;  %v1260_v4 = vxor.u32 2147483648, %v14205_v59 }
 0x4d6   : > { %v1980_v26 = vsel %vm10269_vm0, 0, %v1978_v54  ;;  %v1263_v47 = vxor.u32 2147483648, %v14206_v3  ;;  %v5298_v33 = vor.u32 4788187, %v5297_v43  ;;  %v1988_v50 = vxor.u32 2147483648, %v14207_v34 }
 0x4d7   : > { %vm1571_vm7 = vcmp.eq.s32.totalorder %v1569_v5, 0  ;;  %vm1574_vm9 = vcmp.eq.s32.totalorder %v1569_v5, 2  ;;  %v1984_v13 = vadd.s32 3, %v1980_v26  ;;  %v1991_v29 = vxor.u32 2147483648, %v14208_v56 }
 0x4d8   : > { %v1573_v7 = vsel %vm1571_vm7, %v14200_v63, %v1572_v1  ;;  %v1576_v31 = vsel %vm1574_vm9, %v1575_v42, %v14199_v61  ;;  %vm1570_vm13 = vcmp.lt.s32.totalorder %v1569_v5, 2  ;;  %vm1259_vm14 = vcmp.eq.s32.totalorder %v1257_v37, 0  ;;  %v12886_v44 = vpop.eup %8230  ;;  %v14209_v5 = vld [vmem:[#allocation10_spill] sm:$0xff] }
 0x4d9   : > { %v1985_v23 = vand.u32 3, %v1984_v13  ;;  %vm1262_vm0 = vcmp.eq.s32.totalorder %v1257_v37, 2  ;;  %v5301_v21 = vcvt.s32.f32 %v5294_v16  ;;  %v1577_v36 = vsel %vm1570_vm13, %v1573_v7, %v1576_v31  ;;  %v14213_v13 = vld [vmem:[#allocation39_spill] sm:$0xff] }
 0x4da   : > { %v1261_v43 = vsel %vm1259_vm14, %v14206_v3, %v1260_v4  ;;  %v1264_v48 = vsel %vm1262_vm0, %v1263_v47, %v14205_v59  ;;  %v5299_v54 = vand.u32 2147483647, %v5298_v33  ;;  %vm1983_vm12 = vweird.f32 %v14201_v11  ;;  %v14211_v59 = vld [vmem:[#allocation60_spill] sm:$0xff] }
 0x4db   : > { %vm1987_vm2 = vcmp.eq.s32.totalorder %v1985_v23, 0  ;;  %vm1990_vm1 = vcmp.eq.s32.totalorder %v1985_v23, 2  ;;  %vm1986_vm5 = vcmp.lt.s32.totalorder %v1985_v23, 2  ;;  %vm1258_vm7 = vcmp.lt.s32.totalorder %v1257_v37, 2  ;;  %v14212_v4 = vld [vmem:[#allocation56_spill] sm:$0xff] }
 0x4dc   : > { %v1989_v61 = vsel %vm1987_vm2, %v14208_v56, %v1988_v50  ;;  %v1992_v1 = vsel %vm1990_vm1, %v1991_v29, %v14207_v34  ;;  %v1578_v63 = vsel %vm1567_vm4, nan, %v1577_v36  ;;  %vm1255_vm9 = vweird.f32 %v14209_v5  ;;  %v14214_v37 = vld [vmem:[#allocation48_spill] sm:$0xff]  ;;  %v14219_v5 = vld [vmem:[#allocation61_spill] sm:$0xff] }
 0x4dd   : > { %v1993_v42 = vsel %vm1986_vm5, %v1989_v61, %v1992_v1  ;;  %v1265_v39 = vsel %vm1258_vm7, %v1261_v43, %v1264_v48  ;;  %v1673_v26 = vand.u32 3, %v14210_v27  ;;  %v1676_v11 = vxor.u32 2147483648, %v14211_v59  ;;  %v14215_v34 = vld [vmem:[#allocation44_spill] sm:$0xff]  ;;  %v14218_v1 = vld [vmem:[#allocation63_spill] sm:$0xff] }
 0x4de   : > { %v1994_v16 = vsel %vm1983_vm12, nan, %v1993_v42  ;;  %v1679_v3 = vxor.u32 2147483648, %v14212_v4  ;;  %v12899_v47 = vmul.f32 %v5301_v21, %v5299_v54  ;;  %v1465_v7 = vand.u32 3, %v14213_v13  ;;  %v14216_v23 = vld [vmem:[#allocation20_spill] sm:$0xff]  ;;  %v14217_v54 = vld [vmem:[#allocation54_spill] sm:$0xff]  ;;  %v14223_v13 = vld [vmem:[#allocation23_spill] sm:$0xff] }
 0x4df   : > { %v5330_v33 = vpack.c.bf16 %v1994_v16, %v1578_v63  ;;  %v1468_v31 = vxor.u32 2147483648, %v14214_v37  ;;  %v1266_v10 = vsel %vm1255_vm9, nan, %v1265_v39  ;;  %vm1675_vm4 = vcmp.eq.s32.totalorder %v1673_v26, 0  ;;  %v14220_v16 = vld [vmem:[#allocation59_spill] sm:$0xff] }
 0x4e0   : > { %vm1678_vm13 = vcmp.eq.s32.totalorder %v1673_v26, 2  ;;  %v1471_v50 = vxor.u32 2147483648, %v14215_v34  ;;  %vm1674_vm14 = vcmp.lt.s32.totalorder %v1673_v26, 2  ;;  %v1677_v56 = vsel %vm1675_vm4, %v14212_v4, %v1676_v11 }
 0x4e1   : > { %5660 = vmatprep.subr.bf16.mxu1 %v5330_v33  ;;  %v1680_v29 = vsel %vm1678_vm13, %v1679_v3, %v14211_v59  ;;  %vm1467_vm0 = vcmp.eq.s32.totalorder %v1465_v7, 0  ;;  %vm1671_vm12 = vweird.f32 %v14216_v23  ;;  %vm1470_vm2 = vcmp.eq.s32.totalorder %v1465_v7, 2  ;;  %v14222_v33 = vld [vmem:[#allocation13_spill] sm:$0xff] }
 0x4e2   : > { %v1681_v21 = vsel %vm1674_vm14, %v1677_v56, %v1680_v29  ;;  %v1469_v36 = vsel %vm1467_vm0, %v14215_v34, %v1468_v31  ;;  %v1472_v48 = vsel %vm1470_vm2, %v1471_v50, %v14214_v37  ;;  %v1881_v61 = vand.u32 3, %v14217_v54  ;;  %v14225_v56 = vld [vmem:[#allocation72_spill] sm:$0xff] }
 0x4e3   : > { %v1682_v43 = vsel %vm1671_vm12, nan, %v1681_v21  ;;  %v1884_v63 = vxor.u32 2147483648, %v14218_v1  ;;  %vm1466_vm1 = vcmp.lt.s32.totalorder %v1465_v7, 2  ;;  %v1887_v39 = vxor.u32 2147483648, %v14219_v5  ;;  %v14226_v21 = vld [vmem:[#allocation81_spill] sm:$0xff]  ;;  %v14228_v54 = vld [vmem:[#allocation64_spill] sm:$0xff] }
 0x4e4   : > { %v5327_v42 = vpack.c.bf16 %v1682_v43, %v1266_v10  ;;  %v2185_v27 = vsub.s32 4, %v14220_v16  ;;  %v5303_v26 = vxor.u32 2147483648, %v12899_v47  ;;  %v1473_v59 = vsel %vm1466_vm1, %v1469_v36, %v1472_v48  ;;  %v14227_v43 = vld [vmem:[#allocation80_spill] sm:$0xff] }
 0x4e5   : > { %vm1883_vm5 = vcmp.eq.s32.totalorder %v1881_v61, 0  ;;  %vm1886_vm7 = vcmp.eq.s32.totalorder %v1881_v61, 2  ;;  %vm1882_vm9 = vcmp.lt.s32.totalorder %v1881_v61, 2  ;;  %vm14221_vm4 = vcmp.lt.s32.totalorder %v9979_v40, 0 }
 0x4e6   : > { %5540 = vmatpush1.bf16.msra.mxu0 %v5327_v42  ;;  %v1885_v11 = vsel %vm1883_vm5, %v14219_v5, %v1884_v63  ;;  %v1888_v4 = vsel %vm1886_vm7, %v1887_v39, %v14218_v1  ;;  %v2186_v3 = vsel %vm14221_vm4, %v2185_v27, %v14220_v16  ;;  %vm1463_vm13 = vweird.f32 %v14222_v33  ;;  %v14231_v16 = vld [vmem:[#allocation99_spill] sm:$0xff]  ;;  %v14241_v5 = vld [vmem:[#allocation85_spill] sm:$0xff] }
 0x4e7   : > { %vm1879_vm14 = vweird.f32 %v14223_v13  ;;  %v1889_v7 = vsel %vm1882_vm9, %v1885_v11, %v1888_v4  ;;  %v2188_v31 = vsel %vm10536_vm10, 0, %v2186_v3  ;;  %v1474_v10 = vsel %vm1463_vm13, nan, %v1473_v59  ;;  %v14232_v59 = vld [vmem:[#allocation53_spill] sm:$0xff]  ;;  %v14235_v13 = vld [vmem:[#allocation86_spill] sm:$0xff] }
 0x4e8   : > { %v1890_v34 = vsel %vm1879_vm14, nan, %v1889_v7  ;;  %v2192_v50 = vadd.s32 3, %v2188_v31  ;;  %v2601_v29 = vsub.s32 4, %v14225_v56  ;;  %vm2191_vm0 = vweird.f32 %v9979_v40  ;;  %v14234_v4 = vld [vmem:[#allocation77_spill] sm:$0xff] }
 0x4e9   : > { %v5329_v23 = vpack.c.bf16 %v1890_v34, %v1474_v10  ;;  %v2196_v36 = vxor.u32 2147483648, %v14226_v21  ;;  %v2199_v48 = vxor.u32 2147483648, %v14227_v43  ;;  %v2393_v61 = vsub.s32 4, %v14228_v54 }
 0x4ea   : > { %v2193_v1 = vand.u32 3, %v2192_v50  ;;  %vm14229_vm12 = vcmp.lt.s32.totalorder %v10328_v8, 0  ;;  %vm2607_vm10 = vweird.f32 %v10328_v8  ;;  %v2612_v42 = vxor.u32 2147483648, %v11017_v9  ;;  %v14237_v50 = vld [vmem:[#allocation45_spill] sm:$0xff] }
 0x4eb   : > { %v2602_v63 = vsel %vm14229_vm12, %v2601_v29, %v14225_v56  ;;  %5661 = vmatpush1.bf16.msra.mxu1 %v5329_v23  ;;  %v2615_v27 = vxor.u32 2147483648, %v14231_v16  ;;  %vm14233_vm2 = vcmp.lt.s32.totalorder %v14232_v59, 0  ;;  %v2809_v3 = vsub.s32 4, %v14234_v4 }
 0x4ec   : > { %v2604_v39 = vsel %vm10878_vm3, 0, %v2602_v63  ;;  %v2394_v11 = vsel %vm14233_vm2, %v2393_v61, %v14228_v54  ;;  %vm2195_vm1 = vcmp.eq.s32.totalorder %v2193_v1, 0  ;;  %vm2198_vm5 = vcmp.eq.s32.totalorder %v2193_v1, 2  ;;  %v14239_v54 = vld [vmem:[#allocation94_spill] sm:$0xff] }
 0x4ed   : > { %v2608_v33 = vadd.s32 3, %v2604_v39  ;;  %v2404_v7 = vxor.u32 2147483648, %v14235_v13  ;;  %v2197_v37 = vsel %vm2195_vm1, %v14227_v43, %v2196_v36  ;;  %v2200_v31 = vsel %vm2198_vm5, %v2199_v48, %v14226_v21  ;;  %v14242_v21 = vld [vmem:[#allocation103_spill] sm:$0xff] }
 0x4ee   : > { %v2396_v34 = vsel %vm10621_vm15, 0, %v2394_v11  ;;  %vm14238_vm3 = vcmp.lt.s32.totalorder %v14237_v50, 0  ;;  %vm2194_vm7 = vcmp.lt.s32.totalorder %v2193_v1, 2  ;;  %vm2399_vm9 = vweird.f32 %v14232_v59 }
 0x4ef   : > { %v2810_v56 = vsel %vm14238_vm3, %v2809_v3, %v14234_v4  ;;  %v2609_v29 = vand.u32 3, %v2608_v33  ;;  %v2400_v23 = vadd.s32 3, %v2396_v34  ;;  %vm14240_vm4 = vnez %v14239_v54  ;;  %v14243_v3 = vld [vmem:[#allocation100_spill] sm:$0xff] }
 0x4f0   : > { %v2812_v61 = vsel %vm14240_vm4, 0, %v2810_v56  ;;  %v2201_v63 = vsel %vm2194_vm7, %v2197_v37, %v2200_v31  ;;  %v2407_v36 = vxor.u32 2147483648, %v14241_v5  ;;  %v2820_v48 = vxor.u32 2147483648, %v14242_v21 }
 0x4f1   : > { %v2816_v43 = vadd.s32 3, %v2812_v61  ;;  %vm5221_vm15 = vcmp.lt.s32.totalorder %v12608_v12, 0  ;;  %vm2610_vm13 = vcmp.lt.s32.totalorder %v2609_v29, 2  ;;  %vm2611_vm14 = vcmp.eq.s32.totalorder %v2609_v29, 0  ;;  %v14249_v61 = vld [vmem:[#allocation71_spill] sm:$0xff] }
 0x4f2   : > { %vm2614_vm12 = vcmp.eq.s32.totalorder %v2609_v29, 2  ;;  %v2401_v39 = vand.u32 3, %v2400_v23  ;;  %v2613_v1 = vsel %vm2611_vm14, %v14231_v16, %v2612_v42  ;;  %v2823_v33 = vxor.u32 2147483648, %v14243_v3  ;;  %v14248_v23 = vld [vmem:[#allocation73_spill] sm:$0xff] }
 0x4f3   : > { %v2616_v11 = vsel %vm2614_vm12, %v2615_v27, %v11017_v9  ;;  %v2817_v4 = vand.u32 3, %v2816_v43  ;;  %v2202_v37 = vsel %vm2191_vm0, nan, %v2201_v63  ;;  %vm2815_vm4 = vweird.f32 %v14237_v50 }
 0x4f4   : > { %v2617_v31 = vsel %vm2610_vm13, %v2613_v1, %v2616_v11  ;;  %vm2403_vm2 = vcmp.eq.s32.totalorder %v2401_v39, 0  ;;  %vm2406_vm1 = vcmp.eq.s32.totalorder %v2401_v39, 2  ;;  %vm2402_vm5 = vcmp.lt.s32.totalorder %v2401_v39, 2 }
 0x4f5   : > { %v2618_v10 = vsel %vm2607_vm10, nan, %v2617_v31  ;;  %v2405_v34 = vsel %vm2403_vm2, %v14241_v5, %v2404_v7  ;;  %v2408_v56 = vsel %vm2406_vm1, %v2407_v36, %v14235_v13  ;;  %vm2819_vm3 = vcmp.eq.s32.totalorder %v2817_v4, 0  ;;  %v14247_v13 = vld [vmem:[#allocation66_spill] sm:$0xff]  ;;  %v14250_v36 = vld [vmem:[#allocation83_spill] sm:$0xff]  ;;  %v14254_v31 = vld [vmem:[#allocation69_spill] sm:$0xff] }
 0x4f6   : > { %v5332_v42 = vpack.c.bf16 %v2618_v10, %v2202_v37  ;;  %v2409_v16 = vsel %vm2402_vm5, %v2405_v34, %v2408_v56  ;;  %vm2822_vm7 = vcmp.eq.s32.totalorder %v2817_v4, 2  ;;  %vm2818_vm14 = vcmp.lt.s32.totalorder %v2817_v4, 2  ;;  %v14252_v4 = vld [vmem:[#allocation16_spill] sm:$0xff] }
 0x4f7   : > { %v2821_v40 = vsel %vm2819_vm3, %v14243_v3, %v2820_v48  ;;  %v2824_v9 = vsel %vm2822_vm7, %v2823_v33, %v14242_v21  ;;  %v14244_v27 = vand.u32 2147483647, %v12608_v12  ;;  %v2089_v29 = vand.u32 3, %v14247_v13  ;;  %v14251_v21 = vld [vmem:[#allocation92_spill] sm:$0xff] }
 0x4f8   : > { %5541 = vmatprep.subr.bf16.mxu0 %v5332_v42  ;;  %v2825_v7 = vsel %vm2818_vm14, %v2821_v40, %v2824_v9  ;;  %v2092_v54 = vxor.u32 2147483648, %v14248_v23  ;;  %v2095_v63 = vxor.u32 2147483648, %v14249_v61  ;;  %v2410_v50 = vsel %vm2399_vm9, nan, %v2409_v16  ;;  %v14253_v3 = vld [vmem:[#allocation88_spill] sm:$0xff]  ;;  %v14258_v9 = vld [vmem:[#allocation57_spill] sm:$0xff] }
 0x4f9   : > { %vm12968_vm0 = vcmp.le.f32.partialorder %v14244_v27, 0.7853982  ;;  %v2826_v5 = vsel %vm2815_vm4, nan, %v2825_v7  ;;  %v2505_v43 = vand.u32 3, %v14250_v36  ;;  %v2508_v48 = vxor.u32 2147483648, %v14251_v21  ;;  %v14255_v34 = vld [vmem:[#allocation76_spill] sm:$0xff] }
 0x4fa   : > { %8232 = vsinq.f32 %v12840_v25  ;;  %v5334_v39 = vpack.c.bf16 %v2826_v5, %v2410_v50  ;;  %vm2091_vm10 = vcmp.eq.s32.totalorder %v2089_v29, 0  ;;  %vm2094_vm13 = vcmp.eq.s32.totalorder %v2089_v29, 2  ;;  %v14257_v16 = vld [vmem:[#allocation84_spill] sm:$0xff]  ;;  %v14260_v36 = vld [vmem:[#allocation93_spill] sm:$0xff] }
 0x4fb   : > { %v5304_v1 = vsel %vm5221_vm15, %v5303_v26, %v12899_v47  ;;  %v2093_v11 = vsel %vm2091_vm10, %v14249_v61, %v2092_v54  ;;  %v2096_v59 = vsel %vm2094_vm13, %v2095_v63, %v14248_v23  ;;  %vm2507_vm9 = vcmp.eq.s32.totalorder %v2505_v43, 0  ;;  %v14256_v26 = vld [vmem:[#allocation74_spill] sm:$0xff]  ;;  %v14259_v63 = vld [vmem:[#allocation97_spill] sm:$0xff] }
 0x4fc   : > { %5662 = vmatprep.subr.bf16.mxu1 %v5334_v39  ;;  %vm2087_vm12 = vweird.f32 %v14252_v4  ;;  %vm2090_vm2 = vcmp.lt.s32.totalorder %v2089_v29, 2  ;;  %v2509_v25 = vsel %vm2507_vm9, %v14253_v3, %v2508_v48  ;;  %v2511_v33 = vxor.u32 2147483648, %v14253_v3  ;;  %v14262_v39 = vld [vmem:[#allocation17_spill] sm:$0xff]  ;;  %v14264_v3 = vld [vmem:[#allocation82_spill] sm:$0xff] }
 0x4fd   : > { %v2097_v37 = vsel %vm2090_vm2, %v2093_v11, %v2096_v59  ;;  %vm2510_vm1 = vcmp.eq.s32.totalorder %v2505_v43, 2  ;;  %v2297_v10 = vand.u32 3, %v14254_v31  ;;  %v2300_v56 = vxor.u32 2147483648, %v14255_v34  ;;  %v14263_v11 = vld [vmem:[#allocation34_spill] sm:$0xff] }
 0x4fe   : > { %vm2506_vm5 = vcmp.lt.s32.totalorder %v2505_v43, 2  ;;  %v2512_v47 = vsel %vm2510_vm1, %v2511_v33, %v14251_v21  ;;  %v2303_v42 = vxor.u32 2147483648, %v14256_v26  ;;  %v2713_v40 = vand.u32 3, %v14257_v16  ;;  %v14261_v21 = vld [vmem:[#allocation90_spill] sm:$0xff]  ;;  %v14266_v33 = vld [vmem:[#allocation111_spill] sm:$0xff] }
 0x4ff   : > { %vm2503_vm3 = vweird.f32 %v14258_v9  ;;  %v2513_v27 = vsel %vm2506_vm5, %v2509_v25, %v2512_v47  ;;  %vm2299_vm7 = vcmp.eq.s32.totalorder %v2297_v10, 0  ;;  %vm2302_vm4 = vcmp.eq.s32.totalorder %v2297_v10, 2  ;;  %v14269_v47 = vld [vmem:[#allocation117_spill] sm:$0xff] }
 0x500   : > { %v2098_v7 = vsel %vm2087_vm12, nan, %v2097_v37  ;;  %v2514_v13 = vsel %vm2503_vm3, nan, %v2513_v27  ;;  %v2301_v29 = vsel %vm2299_vm7, %v14256_v26, %v2300_v56  ;;  %v2304_v23 = vsel %vm2302_vm4, %v2303_v42, %v14255_v34  ;;  %v14267_v34 = vld [vmem:[#allocation110_spill] sm:$0xff] }
 0x501   : > { %v13003_v54 = vsel %vm12968_vm0, %v12608_v12, %v5304_v1  ;;  %v5331_v61 = vpack.c.bf16 %v2514_v13, %v2098_v7  ;;  %vm2298_vm14 = vcmp.lt.s32.totalorder %v2297_v10, 2  ;;  %v2716_v50 = vxor.u32 2147483648, %v14259_v63  ;;  %v14272_v27 = vld [vmem:[#allocation98_spill] sm:$0xff] }
 0x502   : > { %v2305_v5 = vsel %vm2298_vm14, %v2301_v29, %v2304_v23  ;;  %vm2715_vm10 = vcmp.eq.s32.totalorder %v2713_v40, 0  ;;  %v2719_v43 = vxor.u32 2147483648, %v14260_v36  ;;  %v3017_v48 = vsub.s32 4, %v14261_v21  ;;  %v14273_v29 = vld [vmem:[#allocation116_spill] sm:$0xff] }
 0x503   : > { %5542 = vmatpush1.bf16.msra.mxu0 %v5331_v61  ;;  %vm2295_vm13 = vweird.f32 %v14262_v39  ;;  %vm2711_vm9 = vweird.f32 %v14263_v11  ;;  %v2717_v59 = vsel %vm2715_vm10, %v14260_v36, %v2716_v50  ;;  %vm2718_vm12 = vcmp.eq.s32.totalorder %v2713_v40, 2  ;;  %v14274_v61 = vld [vmem:[#allocation125_spill] sm:$0xff]  ;;  %v14276_v36 = vld [vmem:[#allocation131_spill] sm:$0xff]  ;;  %v14279_v39 = vld [vmem:[#allocation130_spill] sm:$0xff] }
 0x504   : > { %v13011_v1 = vpop.eup %8232  ;;  %vm2714_vm2 = vcmp.lt.s32.totalorder %v2713_v40, 2  ;;  %v2720_v4 = vsel %vm2718_vm12, %v2719_v43, %v14259_v63  ;;  %vm14265_vm1 = vcmp.lt.s32.totalorder %v14264_v3, 0  ;;  %v3433_v37 = vsub.s32 4, %v14266_v33  ;;  %v14270_v40 = vld [vmem:[#allocation101_spill] sm:$0xff] }
 0x505   : > { %v3018_v25 = vsel %vm14265_vm1, %v3017_v48, %v14261_v21  ;;  %v2306_v31 = vsel %vm2295_vm13, nan, %v2305_v5  ;;  %v2721_v10 = vsel %vm2714_vm2, %v2717_v59, %v2720_v4  ;;  %vm14268_vm5 = vnez %v14267_v34  ;;  %v14277_v21 = vld [vmem:[#allocation87_spill] sm:$0xff]  ;;  %v14280_v59 = vld [vmem:[#allocation114_spill] sm:$0xff] }
 0x506   : > { %v3020_v56 = vsel %vm14268_vm5, 0, %v3018_v25  ;;  %v3028_v26 = vxor.u32 2147483648, %v14269_v47  ;;  %v2722_v42 = vsel %vm2711_vm9, nan, %v2721_v10  ;;  %vm3023_vm3 = vweird.f32 %v14264_v3  ;;  %v14282_v25 = vld [vmem:[#allocation120_spill] sm:$0xff] }
 0x507   : > { %v3024_v16 = vadd.s32 3, %v3020_v56  ;;  %vm14271_vm7 = vcmp.lt.s32.totalorder %v14270_v40, 0  ;;  %v3225_v7 = vsub.s32 4, %v14272_v27  ;;  %v5333_v13 = vpack.c.bf16 %v2722_v42, %v2306_v31 }
 0x508   : > { %v3434_v9 = vsel %vm14271_vm7, %v3433_v37, %v14266_v33  ;;  %v3031_v23 = vxor.u32 2147483648, %v14273_v29  ;;  %vm14275_vm4 = vnez %v14274_v61  ;;  %vm3439_vm14 = vweird.f32 %v14270_v40  ;;  %v14283_v37 = vld [vmem:[#allocation113_spill] sm:$0xff] }
 0x509   : > { %v3436_v63 = vsel %vm14275_vm4, 0, %v3434_v9  ;;  %v3025_v50 = vand.u32 3, %v3024_v16  ;;  %v3444_v43 = vxor.u32 2147483648, %v14276_v36  ;;  %vm14278_vm10 = vcmp.lt.s32.totalorder %v14277_v21, 0  ;;  %5663 = vmatpush1.bf16.msra.mxu1 %v5333_v13  ;;  %v14284_v16 = vld [vmem:[#allocation102_spill] sm:$0xff] }
 0x50a   : > { %v3440_v5 = vadd.s32 3, %v3436_v63  ;;  %v3226_v48 = vsel %vm14278_vm10, %v3225_v7, %v14272_v27  ;;  %v3447_v11 = vxor.u32 2147483648, %v14279_v39  ;;  %vm14281_vm13 = vnez %v14280_v59  ;;  %v14286_v7 = vld [vmem:[#allocation119_spill] sm:$0xff] }
 0x50b   : > { %v3228_v4 = vsel %vm14281_vm13, 0, %v3226_v48  ;;  %v3236_v33 = vxor.u32 2147483648, %v14282_v25  ;;  %v3641_v31 = vsub.s32 4, %v14283_v37  ;;  %vm3026_vm9 = vcmp.lt.s32.totalorder %v3025_v50, 2 }
 0x50c   : > { %vm3027_vm12 = vcmp.eq.s32.totalorder %v3025_v50, 0  ;;  %vm3030_vm2 = vcmp.eq.s32.totalorder %v3025_v50, 2  ;;  %v3441_v10 = vand.u32 3, %v3440_v5  ;;  %v3232_v42 = vadd.s32 3, %v3228_v4  ;;  %v14289_v4 = vld [vmem:[#allocation96_spill] sm:$0xff] }
 0x50d   : > { %v3029_v34 = vsel %vm3027_vm12, %v14273_v29, %v3028_v26  ;;  %v3032_v56 = vsel %vm3030_vm2, %v3031_v23, %v14269_v47  ;;  %vm14285_vm1 = vcmp.lt.s32.totalorder %v14284_v16, 0  ;;  %v3239_v13 = vxor.u32 2147483648, %v14286_v7  ;;  %v14287_v47 = vld [vmem:[#allocation132_spill] sm:$0xff] }
 0x50e   : > { %v3642_v9 = vsel %vm14285_vm1, %v3641_v31, %v14283_v37  ;;  %v3033_v27 = vsel %vm3026_vm9, %v3029_v34, %v3032_v56  ;;  %vm3443_vm5 = vcmp.eq.s32.totalorder %v3441_v10, 0  ;;  %vm3446_vm7 = vcmp.eq.s32.totalorder %v3441_v10, 2  ;;  %v14290_v31 = vld [vmem:[#allocation107_spill] sm:$0xff]  ;;  %v14291_v34 = vld [vmem:[#allocation104_spill] sm:$0xff] }
 0x50f   : > { %vm3442_vm4 = vcmp.lt.s32.totalorder %v3441_v10, 2  ;;  %v3445_v61 = vsel %vm3443_vm5, %v14279_v39, %v3444_v43  ;;  %v3448_v63 = vsel %vm3446_vm7, %v3447_v11, %v14276_v36  ;;  %v3233_v50 = vand.u32 3, %v3232_v42  ;;  %v14292_v56 = vld [vmem:[#allocation115_spill] sm:$0xff] }
 0x510   : > { %v3449_v5 = vsel %vm3442_vm4, %v3445_v61, %v3448_v63  ;;  %vm3231_vm10 = vweird.f32 %v14277_v21  ;;  %vm14288_vm13 = vnez %v14287_v47  ;;  %v3652_v29 = vxor.u32 2147483648, %v11824_v0 }
 0x511   : > { %v3644_v26 = vsel %vm14288_vm13, 0, %v3642_v9  ;;  %v3034_v23 = vsel %vm3023_vm3, nan, %v3033_v27  ;;  %v3450_v48 = vsel %vm3439_vm14, nan, %v3449_v5  ;;  %vm3235_vm9 = vcmp.eq.s32.totalorder %v3233_v50, 0 }
 0x512   : > { %vm3238_vm12 = vcmp.eq.s32.totalorder %v3233_v50, 2  ;;  %v5336_v43 = vpack.c.bf16 %v3450_v48, %v3034_v23  ;;  %v3237_v36 = vsel %vm3235_vm9, %v14286_v7, %v3236_v33  ;;  %v3648_v11 = vadd.s32 3, %v3644_v26  ;;  %v14293_v33 = vld [vmem:[#allocation50_spill] sm:$0xff]  ;;  %v14295_v23 = vld [vmem:[#allocation121_spill] sm:$0xff] }
 0x513   : > { %v3240_v39 = vsel %vm3238_vm12, %v3239_v13, %v14282_v25  ;;  %v3655_v59 = vxor.u32 2147483648, %v11821_v52  ;;  %v2921_v37 = vand.u32 3, %v14289_v4  ;;  %v2924_v10 = vxor.u32 2147483648, %v14290_v31  ;;  %v14294_v25 = vld [vmem:[#allocation123_spill] sm:$0xff]  ;;  %v14299_v4 = vld [vmem:[#allocation122_spill] sm:$0xff] }
 0x514   : > { %v2927_v3 = vxor.u32 2147483648, %v14291_v34  ;;  %5543 = vmatprep.subr.bf16.mxu0 %v5336_v43  ;;  %vm3234_vm3 = vcmp.lt.s32.totalorder %v3233_v50, 2  ;;  %vm3647_vm14 = vweird.f32 %v14284_v16  ;;  %v3649_v40 = vand.u32 3, %v3648_v11  ;;  %v14298_v11 = vld [vmem:[#allocation108_spill] sm:$0xff]  ;;  %v14300_v16 = vld [vmem:[#allocation89_spill] sm:$0xff] }
 0x515   : > { %v3337_v42 = vand.u32 3, %v14292_v56  ;;  %v3241_v9 = vsel %vm3234_vm3, %v3237_v36, %v3240_v39  ;;  %vm2919_vm2 = vweird.f32 %v14293_v33  ;;  %vm2923_vm1 = vcmp.eq.s32.totalorder %v2921_v37, 0  ;;  %v14304_v33 = vld [vmem:[#allocation78_spill] sm:$0xff] }
 0x516   : > { %v3340_v27 = vxor.u32 2147483648, %v14294_v25  ;;  %vm3651_vm5 = vcmp.eq.s32.totalorder %v3649_v40, 0  ;;  %vm3654_vm7 = vcmp.eq.s32.totalorder %v3649_v40, 2  ;;  %v2925_v7 = vsel %vm2923_vm1, %v14291_v34, %v2924_v10 }
 0x517   : > { %vm2926_vm4 = vcmp.eq.s32.totalorder %v2921_v37, 2  ;;  %vm3650_vm13 = vcmp.lt.s32.totalorder %v3649_v40, 2  ;;  %v3653_v13 = vsel %vm3651_vm5, %v11821_v52, %v3652_v29  ;;  %v3656_v61 = vsel %vm3654_vm7, %v3655_v59, %v11824_v0  ;;  %v14296_v52 = vld [vmem:[#allocation105_spill] sm:$0xff] }
 0x518   : > { %v2928_v63 = vsel %vm2926_vm4, %v2927_v3, %v14290_v31  ;;  %v3242_v50 = vsel %vm3231_vm10, nan, %v3241_v9  ;;  %v3657_v5 = vsel %vm3650_vm13, %v3653_v13, %v3656_v61  ;;  %vm2922_vm9 = vcmp.lt.s32.totalorder %v2921_v37, 2  ;;  %v14297_v29 = vld [vmem:[#allocation109_spill] sm:$0xff] }
 0x519   : > { %vm3339_vm12 = vcmp.eq.s32.totalorder %v3337_v42, 0  ;;  %v3658_v47 = vsel %vm3647_vm14, nan, %v3657_v5  ;;  %v2929_v26 = vsel %vm2922_vm9, %v2925_v7, %v2928_v63  ;;  %v3343_v43 = vxor.u32 2147483648, %v14295_v23  ;;  %v14303_v13 = vld [vmem:[#allocation129_spill] sm:$0xff]  ;;  %v14305_v63 = vld [vmem:[#allocation95_spill] sm:$0xff] }
 0x51a   : > { %v3341_v48 = vsel %vm3339_vm12, %v14295_v23, %v3340_v27  ;;  %v5338_v36 = vpack.c.bf16 %v3658_v47, %v3242_v50  ;;  %vm3342_vm3 = vcmp.eq.s32.totalorder %v3337_v42, 2  ;;  %v3129_v0 = vand.u32 3, %v14296_v52  ;;  %v14302_v27 = vld [vmem:[#allocation124_spill] sm:$0xff] }
 0x51b   : > { %v3132_v39 = vxor.u32 2147483648, %v14297_v29  ;;  %vm3338_vm1 = vcmp.lt.s32.totalorder %v3337_v42, 2  ;;  %v3344_v21 = vsel %vm3342_vm3, %v3343_v43, %v14294_v25  ;;  %v3135_v59 = vxor.u32 2147483648, %v14298_v11  ;;  %v14301_v42 = vld [vmem:[#allocation128_spill] sm:$0xff] }
 0x51c   : > { %v3545_v37 = vand.u32 3, %v14299_v4  ;;  %5664 = vmatprep.subr.bf16.mxu1 %v5338_v36  ;;  %vm3335_vm10 = vweird.f32 %v14300_v16  ;;  %v3345_v31 = vsel %vm3338_vm1, %v3341_v48, %v3344_v21  ;;  %vm3131_vm14 = vcmp.eq.s32.totalorder %v3129_v0, 0  ;;  %v14308_v36 = vld [vmem:[#allocation145_spill] sm:$0xff]  ;;  %v14311_v4 = vld [vmem:[#allocation142_spill] sm:$0xff] }
 0x51d   : > { %vm3134_vm5 = vcmp.eq.s32.totalorder %v3129_v0, 2  ;;  %v2930_v10 = vsel %vm2919_vm2, nan, %v2929_v26  ;;  %v3346_v34 = vsel %vm3335_vm10, nan, %v3345_v31  ;;  %v3133_v3 = vsel %vm3131_vm14, %v14298_v11, %v3132_v39  ;;  %v14310_v21 = vld [vmem:[#allocation133_spill] sm:$0xff] }
 0x51e   : > { %v3136_v40 = vsel %vm3134_vm5, %v3135_v59, %v14297_v29  ;;  %8234 = vcosq.f32 %v13003_v54  ;;  %v5335_v56 = vpack.c.bf16 %v3346_v34, %v2930_v10  ;;  %vm3130_vm7 = vcmp.lt.s32.totalorder %v3129_v0, 2  ;;  %v14313_v34 = vld [vmem:[#allocation118_spill] sm:$0xff] }
 0x51f   : > { %v3548_v9 = vxor.u32 2147483648, %v14301_v42  ;;  %v3137_v25 = vsel %vm3130_vm7, %v3133_v3, %v3136_v40  ;;  %vm3547_vm4 = vcmp.eq.s32.totalorder %v3545_v37, 0  ;;  %v3551_v7 = vxor.u32 2147483648, %v14302_v27  ;;  %v14315_v40 = vld [vmem:[#allocation139_spill] sm:$0xff] }
 0x520   : > { %v3849_v61 = vsub.s32 4, %v14303_v13  ;;  %5544 = vmatpush1.bf16.msra.mxu0 %v5335_v56  ;;  %vm3127_vm2 = vweird.f32 %v14304_v33  ;;  %vm3543_vm13 = vweird.f32 %v14305_v63  ;;  %vm3550_vm9 = vcmp.eq.s32.totalorder %v3545_v37, 2  ;;  %v14319_v63 = vld [vmem:[#allocation137_spill] sm:$0xff] }
 0x521   : > { %v3549_v50 = vsel %vm3547_vm4, %v14302_v27, %v3548_v9  ;;  %vm3546_vm12 = vcmp.lt.s32.totalorder %v3545_v37, 2  ;;  %v3552_v5 = vsel %vm3550_vm9, %v3551_v7, %v14301_v42  ;;  %vm14306_vm3 = vcmp.lt.s32.totalorder %v11395_v24, 0  ;;  %v14317_v42 = vld [vmem:[#allocation147_spill] sm:$0xff] }
 0x522   : > { %v3850_v47 = vsel %vm14306_vm3, %v3849_v61, %v14303_v13  ;;  %v4265_v26 = vsub.s32 4, %v12017_v62  ;;  %v3138_v23 = vsel %vm3127_vm2, nan, %v3137_v25  ;;  %v3553_v48 = vsel %vm3546_vm12, %v3549_v50, %v3552_v5 }
 0x523   : > { %vm14307_vm1 = vnez %v14064_v20  ;;  %v3860_v52 = vxor.u32 2147483648, %v14308_v36  ;;  %v3554_v0 = vsel %vm3543_vm13, nan, %v3553_v48  ;;  %vm3855_vm10 = vweird.f32 %v11395_v24 }
 0x524   : > { %v3852_v43 = vsel %vm14307_vm1, 0, %v3850_v47  ;;  %vm14309_vm14 = vcmp.lt.s32.totalorder %v11788_v53, 0  ;;  %v4057_v11 = vsub.s32 4, %v14310_v21  ;;  %v5337_v59 = vpack.c.bf16 %v3554_v0, %v3138_v23  ;;  %v14321_v47 = vld [vmem:[#allocation146_spill] sm:$0xff] }
 0x525   : > { %v3856_v29 = vadd.s32 3, %v3852_v43  ;;  %v4266_v39 = vsel %vm14309_vm14, %v4265_v26, %v12017_v62  ;;  %v3863_v37 = vxor.u32 2147483648, %v14311_v4  ;;  %vm14312_vm5 = vnez %v14102_v41  ;;  %v14318_v41 = vld [vmem:[#allocation148_spill] sm:$0xff] }
 0x526   : > { %v4268_v16 = vsel %vm14312_vm5, 0, %v4266_v39  ;;  %vm4271_vm7 = vweird.f32 %v11788_v53  ;;  %v4276_v10 = vxor.u32 2147483648, %v12305_v58  ;;  %vm14314_vm4 = vcmp.lt.s32.totalorder %v14313_v34, 0  ;;  %5665 = vmatpush1.bf16.msra.mxu1 %v5337_v59 }
 0x527   : > { %v3857_v20 = vand.u32 3, %v3856_v29  ;;  %v4272_v31 = vadd.s32 3, %v4268_v16  ;;  %v4058_v3 = vsel %vm14314_vm4, %v4057_v11, %v14310_v21  ;;  %v4279_v62 = vxor.u32 2147483648, %v12296_v35  ;;  %v14324_v29 = vld [vmem:[#allocation158_spill] sm:$0xff] }
 0x528   : > { %vm14316_vm2 = vnez %v14315_v40  ;;  %v4068_v9 = vxor.u32 2147483648, %v14317_v42  ;;  %v4473_v25 = vsub.s32 4, %v14318_v41  ;;  %v13118_v7 = vpop.eup %8234  ;;  %vm14320_vm3 = vcmp.lt.s32.totalorder %v14319_v63, 0  ;;  %v14329_v40 = vld [vmem:[#allocation149_spill] sm:$0xff] }
 0x529   : > { %v4060_v56 = vsel %vm14316_vm2, 0, %v4058_v3  ;;  %vm3858_vm13 = vcmp.lt.s32.totalorder %v3857_v20, 2  ;;  %vm3859_vm9 = vcmp.eq.s32.totalorder %v3857_v20, 0  ;;  %vm3862_vm12 = vcmp.eq.s32.totalorder %v3857_v20, 2  ;;  %v14326_v20 = vld [vmem:[#allocation134_spill] sm:$0xff] }
 0x52a   : > { %v4273_v27 = vand.u32 3, %v4272_v31  ;;  %v3861_v13 = vsel %vm3859_vm9, %v14311_v4, %v3860_v52  ;;  %v3864_v61 = vsel %vm3862_vm12, %v3863_v37, %v14308_v36  ;;  %v4064_v33 = vadd.s32 3, %v4060_v56  ;;  %v14322_v36 = vld [vmem:[#allocation154_spill] sm:$0xff]  ;;  %v14325_v37 = vld [vmem:[#allocation156_spill] sm:$0xff] }
 0x52b   : > { %v4474_v50 = vsel %vm14320_vm3, %v4473_v25, %v14318_v41  ;;  %v3865_v5 = vsel %vm3858_vm13, %v3861_v13, %v3864_v61  ;;  %v4071_v26 = vxor.u32 2147483648, %v14321_v47  ;;  %vm4063_vm4 = vweird.f32 %v14313_v34 }
 0x52c   : > { %vm4275_vm1 = vcmp.eq.s32.totalorder %v4273_v27, 0  ;;  %vm4278_vm14 = vcmp.eq.s32.totalorder %v4273_v27, 2  ;;  %vm4274_vm5 = vcmp.lt.s32.totalorder %v4273_v27, 2  ;;  %v4065_v43 = vand.u32 3, %v4064_v33 }
 0x52d   : > { %v4277_v23 = vsel %vm4275_vm1, %v12296_v35, %v4276_v10  ;;  %v4280_v48 = vsel %vm4278_vm14, %v4279_v62, %v12305_v58  ;;  %vm14323_vm2 = vnez %v14322_v36  ;;  %v4484_v39 = vxor.u32 2147483648, %v14324_v29  ;;  %v14327_v10 = vld [vmem:[#allocation138_spill] sm:$0xff]  ;;  %v14328_v62 = vld [vmem:[#allocation136_spill] sm:$0xff]  ;;  %v14333_v36 = vld [vmem:[#allocation135_spill] sm:$0xff] }
 0x52e   : > { %v4281_v0 = vsel %vm4274_vm5, %v4277_v23, %v4280_v48  ;;  %v4476_v52 = vsel %vm14323_vm2, 0, %v4474_v50  ;;  %v3866_v21 = vsel %vm3855_vm10, nan, %v3865_v5  ;;  %vm4067_vm13 = vcmp.eq.s32.totalorder %v4065_v43, 0  ;;  %v14332_v23 = vld [vmem:[#allocation151_spill] sm:$0xff] }
 0x52f   : > { %v4282_v11 = vsel %vm4271_vm7, nan, %v4281_v0  ;;  %vm4070_vm9 = vcmp.eq.s32.totalorder %v4065_v43, 2  ;;  %v4069_v58 = vsel %vm4067_vm13, %v14321_v47, %v4068_v9  ;;  %v4480_v4 = vadd.s32 3, %v4476_v52  ;;  %v14330_v9 = vld [vmem:[#allocation106_spill] sm:$0xff] }
 0x530   : > { %v5340_v35 = vpack.c.bf16 %v4282_v11, %v3866_v21  ;;  %v4072_v59 = vsel %vm4070_vm9, %v4071_v26, %v14317_v42  ;;  %v4487_v16 = vxor.u32 2147483648, %v14325_v37  ;;  %v3753_v31 = vand.u32 3, %v14326_v20  ;;  %v14331_v42 = vld [vmem:[#allocation152_spill] sm:$0xff] }
 0x531   : > { %v3756_v3 = vxor.u32 2147483648, %v14327_v10  ;;  %v3759_v24 = vxor.u32 2147483648, %v14328_v62  ;;  %vm4066_vm10 = vcmp.lt.s32.totalorder %v4065_v43, 2  ;;  %vm4479_vm7 = vweird.f32 %v14319_v63  ;;  %v14335_v21 = vld [vmem:[#allocation140_spill] sm:$0xff]  ;;  %v14337_v63 = vld [vmem:[#allocation126_spill] sm:$0xff] }
 0x532   : > { %5545 = vmatprep.subr.bf16.mxu0 %v5340_v35  ;;  %v4481_v53 = vand.u32 3, %v4480_v4  ;;  %v4169_v56 = vand.u32 3, %v14329_v40  ;;  %v4073_v41 = vsel %vm4066_vm10, %v4069_v58, %v4072_v59  ;;  %vm3751_vm12 = vweird.f32 %v14330_v9  ;;  %v14336_v35 = vld [vmem:[#allocation150_spill] sm:$0xff]  ;;  %v14340_v40 = vld [vmem:[#allocation157_spill] sm:$0xff]  ;;  %v14342_v9 = vld [vmem:[#allocation127_spill] sm:$0xff] }
 0x533   : > { %vm3755_vm3 = vcmp.eq.s32.totalorder %v3753_v31, 0  ;;  %v4172_v25 = vxor.u32 2147483648, %v14331_v42  ;;  %vm3758_vm5 = vcmp.eq.s32.totalorder %v3753_v31, 2  ;;  %v4074_v50 = vsel %vm4063_vm4, nan, %v4073_v41  ;;  %v14341_v41 = vld [vmem:[#allocation112_spill] sm:$0xff] }
 0x534   : > { %vm4483_vm1 = vcmp.eq.s32.totalorder %v4481_v53, 0  ;;  %vm4486_vm14 = vcmp.eq.s32.totalorder %v4481_v53, 2  ;;  %v3757_v27 = vsel %vm3755_vm3, %v14328_v62, %v3756_v3  ;;  %vm4482_vm2 = vcmp.lt.s32.totalorder %v4481_v53, 2 }
 0x535   : > { %v4485_v13 = vsel %vm4483_vm1, %v14325_v37, %v4484_v39  ;;  %v4488_v61 = vsel %vm4486_vm14, %v4487_v16, %v14324_v29  ;;  %v3760_v33 = vsel %vm3758_vm5, %v3759_v24, %v14327_v10  ;;  %vm3754_vm13 = vcmp.lt.s32.totalorder %v3753_v31, 2  ;;  %v14334_v29 = vld [vmem:[#allocation141_spill] sm:$0xff]  ;;  %v14338_v10 = vld [vmem:[#allocation155_spill] sm:$0xff] }
 0x536   : > { %v4489_v5 = vsel %vm4482_vm2, %v4485_v13, %v4488_v61  ;;  %vm4171_vm9 = vcmp.eq.s32.totalorder %v4169_v56, 0  ;;  %v3761_v26 = vsel %vm3754_vm13, %v3757_v27, %v3760_v33  ;;  %v4175_v43 = vxor.u32 2147483648, %v14332_v23  ;;  %v14339_v24 = vld [vmem:[#allocation153_spill] sm:$0xff] }
 0x537   : > { %v4490_v47 = vsel %vm4479_vm7, nan, %v4489_v5  ;;  %v4173_v48 = vsel %vm4171_vm9, %v14332_v23, %v4172_v25  ;;  %vm4174_vm10 = vcmp.eq.s32.totalorder %v4169_v56, 2  ;;  %v3961_v52 = vand.u32 3, %v14333_v36 }
 0x538   : > { %v5342_v0 = vpack.c.bf16 %v4490_v47, %v4074_v50  ;;  %v3964_v39 = vxor.u32 2147483648, %v14334_v29  ;;  %vm4170_vm3 = vcmp.lt.s32.totalorder %v4169_v56, 2  ;;  %v4176_v34 = vsel %vm4174_vm10, %v4175_v43, %v14331_v42 }
 0x539   : > { %v3967_v11 = vxor.u32 2147483648, %v14335_v21  ;;  %v4377_v58 = vand.u32 3, %v14336_v35  ;;  %vm4167_vm4 = vweird.f32 %v14337_v63  ;;  %v4177_v59 = vsel %vm4170_vm3, %v4173_v48, %v4176_v34 }
 0x53a   : > { %5666 = vmatprep.subr.bf16.mxu1 %v5342_v0  ;;  %vm3963_vm7 = vcmp.eq.s32.totalorder %v3961_v52, 0  ;;  %vm3966_vm1 = vcmp.eq.s32.totalorder %v3961_v52, 2  ;;  %v3762_v4 = vsel %vm3751_vm12, nan, %v3761_v26  ;;  %v4178_v37 = vsel %vm4167_vm4, nan, %v4177_v59  ;;  %v14346_v59 = vld [vmem:[#allocation11_spill] sm:$0xff] }
 0x53b   : > { %v3965_v16 = vsel %vm3963_vm7, %v14335_v21, %v3964_v39  ;;  %v3968_v20 = vsel %vm3966_vm1, %v3967_v11, %v14334_v29  ;;  %8236 = vsinq.f32 %v13003_v54  ;;  %v5339_v31 = vpack.c.bf16 %v4178_v37, %v3762_v4 }
 0x53c   : > { %vm3962_vm14 = vcmp.lt.s32.totalorder %v3961_v52, 2  ;;  %v4380_v3 = vxor.u32 2147483648, %v14338_v10  ;;  %vm4379_vm5 = vcmp.eq.s32.totalorder %v4377_v58, 0  ;;  %v4383_v53 = vxor.u32 2147483648, %v14339_v24 }
 0x53d   : > { %v3969_v62 = vsel %vm3962_vm14, %v3965_v16, %v3968_v20  ;;  %v4681_v56 = vsub.s32 4, %v14340_v40  ;;  %5546 = vmatpush1.bf16.msra.mxu0 %v5339_v31  ;;  %vm3959_vm12 = vweird.f32 %v14341_v41  ;;  %vm4375_vm2 = vweird.f32 %v14342_v9  ;;  %v14349_v41 = vld [vmem:[#allocation159_spill] sm:$0xff]  ;;  %v14350_v9 = vld [vmem:[#allocation165_spill] sm:$0xff] }
 0x53e   : > { %v4381_v42 = vsel %vm4379_vm5, %v14339_v24, %v4380_v3  ;;  %vm4382_vm13 = vcmp.eq.s32.totalorder %v4377_v58, 2  ;;  %vm4378_vm9 = vcmp.lt.s32.totalorder %v4377_v58, 2  ;;  %vm14343_vm10 = vcmp.lt.s32.totalorder %v12191_v6, 0 }
 0x53f   : > { %v4384_v54 = vsel %vm4382_vm13, %v4383_v53, %v14338_v10  ;;  %v4682_v25 = vsel %vm14343_vm10, %v4681_v56, %v14340_v40  ;;  %v5097_v27 = vsub.s32 4, %v12713_v14  ;;  %v3970_v13 = vsel %vm3959_vm12, nan, %v3969_v62  ;;  %v14347_v53 = vld [vmem:[#allocation160_spill] sm:$0xff]  ;;  %v14348_v40 = vld [vmem:[#allocation162_spill] sm:$0xff] }
 0x540   : > { %v4385_v61 = vsel %vm4378_vm9, %v4381_v42, %v4384_v54  ;;  %vm14344_vm3 = vnez %v14130_v28  ;;  %v4692_v50 = vxor.u32 2147483648, %v12640_v17  ;;  %vm4687_vm4 = vweird.f32 %v12191_v6 }
 0x541   : > { %v4684_v33 = vsel %vm14344_vm3, 0, %v4682_v25  ;;  %v4386_v5 = vsel %vm4375_vm2, nan, %v4385_v61  ;;  %v5098_v26 = vsel %vm5013_vm6, %v5097_v27, %v12713_v14  ;;  %v4889_v23 = vsub.s32 4, %v12449_v38  ;;  %v14351_v25 = vld [vmem:[#allocation143_spill] sm:$0xff] }
 0x542   : > { %v4688_v47 = vadd.s32 3, %v4684_v33  ;;  %v5341_v48 = vpack.c.bf16 %v4386_v5, %v3970_v13  ;;  %v4695_v43 = vxor.u32 2147483648, %v12636_v18  ;;  %v5100_v0 = vsel %vm12806_vm11, 0, %v5098_v26 }
 0x543   : > { %vm5103_vm7 = vweird.f32 %v12465_v19  ;;  %v5104_v36 = vadd.s32 3, %v5100_v0  ;;  %v5108_v52 = vxor.u32 2147483648, %v13011_v1  ;;  %vm14345_vm1 = vcmp.lt.s32.totalorder %v12258_v49, 0 }
 0x544   : > { %v4689_v28 = vand.u32 3, %v4688_v47  ;;  %v4890_v29 = vsel %vm14345_vm1, %v4889_v23, %v12449_v38  ;;  %5667 = vmatpush1.bf16.msra.mxu1 %v5341_v48  ;;  %v5111_v14 = vxor.u32 2147483648, %v12886_v44  ;;  %v4900_v34 = vxor.u32 2147483648, %v12720_v2 }
 0x545   : > { %v4892_v39 = vsel %vm12572_vm8, 0, %v4890_v29  ;;  %v5305_v57 = vsub.s32 4, %v12777_v60  ;;  %v5105_v21 = vand.u32 3, %v5104_v36  ;;  %v8237_v11 = vpop.eup %8236  ;;  %v4903_v4 = vxor.u32 2147483648, %v14346_v59 }
 0x546   : > { %vm4690_vm6 = vcmp.lt.s32.totalorder %v4689_v28, 2  ;;  %vm4691_vm11 = vcmp.eq.s32.totalorder %v4689_v28, 0  ;;  %vm4694_vm14 = vcmp.eq.s32.totalorder %v4689_v28, 2  ;;  %v4896_v38 = vadd.s32 3, %v4892_v39  ;;  %v14353_v28 = vld [vmem:[#allocation164_spill] sm:$0xff] }
 0x547   : > { %v4693_v35 = vsel %vm4691_vm11, %v12636_v18, %v4692_v50  ;;  %v4696_v58 = vsel %vm4694_vm14, %v4695_v43, %v12640_v17  ;;  %v5306_v63 = vsel %vm5221_vm15, %v5305_v57, %v12777_v60  ;;  %vm5107_vm8 = vcmp.eq.s32.totalorder %v5105_v21, 0 }
 0x548   : > { %v4697_v45 = vsel %vm4690_vm6, %v4693_v35, %v4696_v58  ;;  %vm5110_vm5 = vcmp.eq.s32.totalorder %v5105_v21, 2  ;;  %vm5106_vm12 = vcmp.lt.s32.totalorder %v5105_v21, 2  ;;  %v5109_v37 = vsel %vm5107_vm8, %v12886_v44, %v5108_v52  ;;  %v14354_v52 = vld [vmem:[#allocation163_spill] sm:$0xff] }
 0x549   : > { %v5112_v16 = vsel %vm5110_vm5, %v5111_v14, %v13011_v1  ;;  %v4897_v20 = vand.u32 3, %v4896_v38  ;;  %vm4895_vm2 = vweird.f32 %v12258_v49  ;;  %v5308_v18 = vsel %vm12968_vm0, 0, %v5306_v63  ;;  %v14355_v38 = vld [vmem:[#allocation144_spill] sm:$0xff] }
 0x54a   : > { %v5113_v31 = vsel %vm5106_vm12, %v5109_v37, %v5112_v16  ;;  %v5316_v17 = vxor.u32 2147483648, %v8237_v11  ;;  %v4698_v60 = vsel %vm4687_vm4, nan, %v4697_v45  ;;  %v5312_v62 = vadd.s32 3, %v5308_v18  ;;  %v8032_v16 = vld [vmem:[%s13512_s3 + $0x20] sm:$0xff]   ;;  %v8035_v18 = vld [vmem:[%s13512_s3 + $0x38] sm:$0xff]  }
 0x54b   : > { %v5114_v10 = vsel %vm5103_vm7, nan, %v5113_v31  ;;  %vm4899_vm15 = vcmp.eq.s32.totalorder %v4897_v20, 0  ;;  %vm4902_vm13 = vcmp.eq.s32.totalorder %v4897_v20, 2  ;;  %v5319_v24 = vxor.u32 2147483648, %v13118_v7  ;;  %v8034_v31 = vld [vmem:[%s13512_s3 + $0x30] sm:$0xff]  }
 0x54c   : > { %v5344_v3 = vpack.c.bf16 %v5114_v10, %v4698_v60  ;;  %v4901_v44 = vsel %vm4899_vm15, %v14346_v59, %v4900_v34  ;;  %v4904_v1 = vsel %vm4902_vm13, %v4903_v4, %v12720_v2  ;;  %v4585_v8 = vand.u32 3, %v14347_v53  ;;  %v5384_v60 = vpop.permute.xlu1 %5383 }
 0x54d   : > { %v4588_v56 = vxor.u32 2147483648, %v14348_v40  ;;  %v4591_v6 = vxor.u32 2147483648, %v14349_v41  ;;  %vm4898_vm0 = vcmp.lt.s32.totalorder %v4897_v20, 2  ;;  %vm5311_vm9 = vweird.f32 %v12608_v12  ;;  %v8033_v20 = vld [vmem:[%s13512_s3 + $0x28] sm:$0xff]  }
 0x54e   : > { %5547 = vmatprep.subr.bf16.mxu0 %v5344_v3  ;;  %v5313_v19 = vand.u32 3, %v5312_v62  ;;  %v5001_v42 = vand.u32 3, %v14350_v9  ;;  %v4905_v54 = vsel %vm4898_vm0, %v4901_v44, %v4904_v1  ;;  %vm4583_vm10 = vweird.f32 %v14351_v25  ;;  %v5389_v1 = vpop.permute.xlu0 %5388 }
 0x54f   : > { %vm4587_vm3 = vcmp.eq.s32.totalorder %v4585_v8, 0  ;;  %v5004_v2 = vxor.u32 2147483648, %v12852_v15  ;;  %vm4590_vm1 = vcmp.eq.s32.totalorder %v4585_v8, 2  ;;  %v4906_v50 = vsel %vm4895_vm2, nan, %v4905_v54 }
 0x550   : > { %vm5315_vm4 = vcmp.eq.s32.totalorder %v5313_v19, 0  ;;  %vm5318_vm7 = vcmp.eq.s32.totalorder %v5313_v19, 2  ;;  %v4589_v27 = vsel %vm4587_vm3, %v14349_v41, %v4588_v56  ;;  %vm5314_vm6 = vcmp.lt.s32.totalorder %v5313_v19, 2 }
 0x551   : > { %v5317_v13 = vsel %vm5315_vm4, %v13118_v7, %v5316_v17  ;;  %v5320_v61 = vsel %vm5318_vm7, %v5319_v24, %v8237_v11  ;;  %v4592_v33 = vsel %vm4590_vm1, %v4591_v6, %v14348_v40  ;;  %vm4586_vm11 = vcmp.lt.s32.totalorder %v4585_v8, 2  ;;  %v14352_v7 = vld [vmem:[#allocation161_spill] sm:$0xff]  ;;  %v8036_v17 = vld [vmem:[%s13512_s3 + $0x40] ss:$0 sps:$4 sm:$0xff]  }
 0x552   : > { %v5321_v5 = vsel %vm5314_vm6, %v5317_v13, %v5320_v61  ;;  %vm5003_vm14 = vcmp.eq.s32.totalorder %v5001_v42, 0  ;;  %v4593_v26 = vsel %vm4586_vm11, %v4589_v27, %v4592_v33  ;;  %v5007_v48 = vxor.u32 2147483648, %v12844_v55 }
 0x553   : > { %v5322_v47 = vsel %vm5311_vm9, nan, %v5321_v5  ;;  %v5005_v23 = vsel %vm5003_vm14, %v12844_v55, %v5004_v2  ;;  %vm5006_vm8 = vcmp.eq.s32.totalorder %v5001_v42, 2  ;;  %v4793_v0 = vand.u32 3, %v14352_v7 }
 0x554   : > { %v5346_v43 = vpack.c.bf16 %v5322_v47, %v4906_v50  ;;  %v4796_v36 = vxor.u32 2147483648, %v14353_v28  ;;  %vm5002_vm5 = vcmp.lt.s32.totalorder %v5001_v42, 2  ;;  %v5008_v49 = vsel %vm5006_vm8, %v5007_v48, %v12852_v15  ;;  %v5394_v42 = vpop.permute.xlu1 %5393 }
 0x555   : > { %v4799_v29 = vxor.u32 2147483648, %v14354_v52  ;;  %v5209_v14 = vand.u32 3, %v12802_v32  ;;  %vm4999_vm12 = vweird.f32 %v12281_v46  ;;  %v5009_v12 = vsel %vm5002_vm5, %v5005_v23, %v5008_v49  ;;  %v8028_v46 = vld [vmem:[%s13512_s3] sm:$0xff]   ;;  %v5399_v23 = vpop.permute.xlu0 %5398 }
 0x556   : > { %5668 = vmatprep.subr.bf16.mxu1 %v5346_v43  ;;  %vm4795_vm2 = vcmp.eq.s32.totalorder %v4793_v0, 0  ;;  %vm4798_vm15 = vcmp.eq.s32.totalorder %v4793_v0, 2  ;;  %v4594_v55 = vsel %vm4583_vm10, nan, %v4593_v26  ;;  %v5010_v39 = vsel %vm4999_vm12, nan, %v5009_v12 }
 0x557   : > { %v4797_v34 = vsel %vm4795_vm2, %v14354_v52, %v4796_v36  ;;  %v4800_v57 = vsel %vm4798_vm15, %v4799_v29, %v14353_v28  ;;  %v5343_v21 = vpack.c.bf16 %v5010_v39, %v4594_v55  ;;  %v5212_v15 = vxor.u32 2147483648, %v12871_v51 }
 0x558   : > { %vm4794_vm13 = vcmp.lt.s32.totalorder %v4793_v0, 2  ;;  %vm5211_vm0 = vcmp.eq.s32.totalorder %v5209_v14, 0  ;;  %v5215_v32 = vxor.u32 2147483648, %v12861_v22  ;;  %vm5214_vm9 = vcmp.eq.s32.totalorder %v5209_v14, 2 }
 0x559   : > { %5548 = vmatpush1.bf16.msra.mxu0 %v5343_v21  ;;  %v4801_v11 = vsel %vm4794_vm13, %v4797_v34, %v4800_v57  ;;  %v5213_v35 = vsel %vm5211_vm0, %v12861_v22, %v5212_v15  ;;  %vm5509_vm10 = vcmask 785408   ;;  %vm5210_vm3 = vcmp.lt.s32.totalorder %v5209_v14, 2  ;;  %v8029_v22 = vld [vmem:[%s13512_s3 + $0x8] sm:$0xff]  }
 0x55a   : > { %v5216_v58 = vsel %vm5214_vm9, %v5215_v32, %v12871_v51  ;;  %vm4791_vm4 = vweird.f32 %v14355_v38  ;;  %vm5207_vm7 = vweird.f32 %v12401_v30  ;;  %v14356_v37 = vmov 0   ;;  %v8030_v30 = vld [vmem:[%s13512_s3 + $0x10] sm:$0xff]   ;;  %v8031_v51 = vld [vmem:[%s13512_s3 + $0x18] sm:$0xff]   ;;  %v5404_v32 = vpop.permute.xlu1 %5403 }
 0x55b   : > { %v5217_v63 = vsel %vm5210_vm3, %v5213_v35, %v5216_v58  ;;  %v4802_v45 = vsel %vm4791_vm4, nan, %v4801_v11 }
 0x55c   : > { %v5218_v59 = vsel %vm5207_vm7, nan, %v5217_v63  ;;  %7783 = vmatmul.mubr.msk.bf16.vlgmr.msra.gmra.mrb[24].mxu0 %vm5509_vm10, %v8028_v46 }
 0x55d   : > { %v5345_v4 = vpack.c.bf16 %v5218_v59, %v4802_v45  ;;  %5579 = vmatprep.mubr.bf16.mxu0 %v14356_v37 }
 0x55f   : > { %5669 = vmatpush1.bf16.msra.mxu1 %v5345_v4 }
 0x562   : > { %7792 = vmatmul.mubr.msk.bf16.vlgmr.msra.gmra.mrb[24].mxu1 %vm5509_vm10, %v8028_v46 }
 0x563   : > { %5700 = vmatprep.mubr.bf16.mxu1 %v14356_v37 }
 0x564   : > { %7784 = vmatmul.mubr.msk.bf16.gmra.mrb[28].mxu0 %vm5509_vm10, %v8029_v22 }
 0x565   : > { %5589 = vmatprep.mubr.bf16.mxu0 %v14356_v37 }
 0x56a   : > { %7793 = vmatmul.mubr.msk.bf16.gmra.mrb[28].mxu1 %vm5509_vm10, %v8029_v22 }
 0x56b   : > { %5710 = vmatprep.mubr.bf16.mxu1 %v14356_v37 }
 0x56c   : > { %7785 = vmatmul.mubr.msk.bf16.gmra.mrb[32].mxu0 %vm5509_vm10, %v8030_v30 }
 0x56d   : > { %5599 = vmatprep.mubr.bf16.mxu0 %v14356_v37 }
 0x572   : > { %7794 = vmatmul.mubr.msk.bf16.gmra.mrb[32].mxu1 %vm5509_vm10, %v8030_v30 }
 0x573   : > { %5720 = vmatprep.mubr.bf16.mxu1 %v14356_v37 }
 0x574   : > { %7786 = vmatmul.mubr.msk.bf16.gmra.mrb[36].mxu0 %vm5509_vm10, %v8031_v51 }
 0x575   : > { %5609 = vmatprep.mubr.bf16.mxu0 %v14356_v37 }
 0x57a   : > { %7795 = vmatmul.mubr.msk.bf16.gmra.mrb[36].mxu1 %vm5509_vm10, %v8031_v51  ;;  %v5409_v51 = vpop.permute.xlu0 %5408 }
 0x57b   : > { %5730 = vmatprep.mubr.bf16.mxu1 %v14356_v37 }
 0x57c   : > { %7787 = vmatmul.mubr.msk.bf16.gmra.mrb[40].mxu0 %vm5509_vm10, %v8032_v16 }
 0x57d   : > { %5619 = vmatprep.mubr.bf16.mxu0 %v14356_v37 }
 0x582   : > { %7796 = vmatmul.mubr.msk.bf16.gmra.mrb[40].mxu1 %vm5509_vm10, %v8032_v16 }
 0x583   : > { %5740 = vmatprep.mubr.bf16.mxu1 %v14356_v37 }
 0x584   : > { %7788 = vmatmul.mubr.msk.bf16.gmra.mrb[44].mxu0 %vm5509_vm10, %v8033_v20 }
 0x585   : > { %5629 = vmatprep.mubr.bf16.mxu0 %v14356_v37 }
 0x58a   : > { %7797 = vmatmul.mubr.msk.bf16.gmra.mrb[44].mxu1 %vm5509_vm10, %v8033_v20 }
 0x58b   : > { %5750 = vmatprep.mubr.bf16.mxu1 %v14356_v37 }
 0x58c   : > { %7789 = vmatmul.mubr.msk.bf16.gmra.mrb[48].mxu0 %vm5509_vm10, %v8034_v31 }
 0x58d   : > { %5639 = vmatprep.mubr.bf16.mxu0 %v14356_v37 }
 0x592   : > { %7798 = vmatmul.mubr.msk.bf16.gmra.mrb[48].mxu1 %vm5509_vm10, %v8034_v31 }
 0x593   : > { %5760 = vmatprep.mubr.bf16.mxu1 %v14356_v37 }
 0x594   : > { %7790 = vmatmul.mubr.msk.bf16.gmra.mrb[52].mxu0 %vm5509_vm10, %v8035_v18 }
 0x595   : > { %5649 = vmatprep.mubr.bf16.mxu0 %v14356_v37 }
 0x59a   : > { %7799 = vmatmul.mubr.msk.bf16.gmra.mrb[52].mxu1 %vm5509_vm10, %v8035_v18 }
 0x59b   : > { %5770 = vmatprep.mubr.bf16.mxu1 %v14356_v37 }
 0x59c   : > { %7791 = vmatmul.mubr.msk.bf16.gmra.mrb[56].mxu0 %vm5509_vm10, %v8036_v17 }
 0x59d   : > { %6067 = vmatprep.mubr.bf16.mxu0 %v14356_v37 }
 0x5a2   : > { %7800 = vmatmul.mubr.msk.bf16.gmra.mrb[56].mxu1 %vm5509_vm10, %v8036_v17 }
 0x5a3   : > { %6180 = vmatprep.mubr.bf16.mxu1 %v14356_v37 }
 0x62f   : > { %v5571_v10 = vpop.f32.mrb[24].mxu0 }
 0x630   : > { %v5572_v3 = vadd.f32 %v5571_v10, %v5384_v60  ;;  %v5573_v44 = vpop.f32.mrb[25].mxu0 }
 0x631   : > { %v5574_v62 = vadd.f32 %v5573_v44, %v5384_v60  ;;  %v5575_v24 = vpop.f32.mrb[26].mxu0 }
 0x632   : > { %v5576_v53 = vadd.f32 %v5575_v24, %v5389_v1  ;;  %v5577_v8 = vpop.f32.mrb[27].mxu0  ;;  %v5779_v56 = vmax.f32 %v5572_v3, 0.0 }
 0x633   : > { %v5578_v40 = vadd.f32 %v5577_v8, %v5389_v1  ;;  %v5780_v19 = vmax.f32 %v5574_v62, 0.0 }
 0x634   : > { %v5783_v41 = vmax.f32 %v5576_v53, 0.0 }
 0x635   : > { %v5692_v6 = vpop.f32.mrb[24].mxu1  ;;  %v5784_v9 = vmax.f32 %v5578_v40, 0.0 }
 0x636   : > { %v5693_v54 = vadd.f32 %v5692_v6, %v5384_v60  ;;  %v5694_v25 = vpop.f32.mrb[25].mxu1  ;;  %v5843_v2 = vpack.c.bf16 %v5783_v41, %v5779_v56  ;;  %v5414_v6 = vpop.permute.xlu1 %5413 }
 0x637   : > { %v5695_v27 = vadd.f32 %v5694_v25, %v5384_v60  ;;  %v5696_v13 = vpop.f32.mrb[26].mxu1  ;;  %v5844_v61 = vpack.c.bf16 %v5784_v9, %v5780_v19  ;;  %v5581_v33 = vpop.f32.mrb[28].mxu0 }
 0x638   : > { %v5697_v50 = vadd.f32 %v5696_v13, %v5389_v1  ;;  %v5698_v5 = vpop.f32.mrb[27].mxu1  ;;  %v5582_v47 = vadd.f32 %v5581_v33, %v5394_v42  ;;  %v5583_v26 = vpop.f32.mrb[29].mxu0  ;;  %v5781_v0 = vmax.f32 %v5693_v54, 0.0 }
 0x639   : > { %v5699_v48 = vadd.f32 %v5698_v5, %v5389_v1  ;;  %v5584_v43 = vadd.f32 %v5583_v26, %v5394_v42  ;;  %v5585_v7 = vpop.f32.mrb[30].mxu0  ;;  %6035 = vmatprep.subr.bf16.mxu0 %v5844_v61  ;;  %v5782_v52 = vmax.f32 %v5695_v27, 0.0  ;;  %v5419_v5 = vpop.permute.xlu0 %5418 }
 0x63a   : > { %v5785_v28 = vmax.f32 %v5697_v50, 0.0  ;;  %v5586_v36 = vadd.f32 %v5585_v7, %v5399_v23  ;;  %v5587_v49 = vpop.f32.mrb[31].mxu0  ;;  %6036 = vmatpush1.bf16.msra.mxu0 %v5843_v2  ;;  %v5787_v55 = vmax.f32 %v5582_v47, 0.0 }
 0x63b   : > { %v5786_v29 = vmax.f32 %v5699_v48, 0.0  ;;  %v5588_v14 = vadd.f32 %v5587_v49, %v5399_v23  ;;  %v5788_v21 = vmax.f32 %v5584_v43, 0.0 }
 0x63c   : > { %v5845_v12 = vpack.c.bf16 %v5785_v28, %v5781_v0  ;;  %v5791_v39 = vmax.f32 %v5586_v36, 0.0 }
 0x63d   : > { %v5846_v34 = vpack.c.bf16 %v5786_v29, %v5782_v52  ;;  %v5702_v57 = vpop.f32.mrb[28].mxu1  ;;  %v5792_v15 = vmax.f32 %v5588_v14, 0.0 }
 0x63e   : > { %v5703_v46 = vadd.f32 %v5702_v57, %v5394_v42  ;;  %v5704_v11 = vpop.f32.mrb[29].mxu1  ;;  %v5847_v35 = vpack.c.bf16 %v5791_v39, %v5787_v55  ;;  %v5424_v57 = vpop.permute.xlu1 %5423 }
 0x63f   : > { %v5705_v58 = vadd.f32 %v5704_v11, %v5394_v42  ;;  %v5706_v38 = vpop.f32.mrb[30].mxu1  ;;  %6148 = vmatprep.subr.bf16.mxu1 %v5846_v34  ;;  %v5848_v63 = vpack.c.bf16 %v5792_v15, %v5788_v21  ;;  %v5591_v45 = vpop.f32.mrb[32].mxu0 }
 0x640   : > { %v5707_v59 = vadd.f32 %v5706_v38, %v5399_v23  ;;  %v5708_v4 = vpop.f32.mrb[31].mxu1  ;;  %6149 = vmatpush1.bf16.msra.mxu1 %v5845_v12  ;;  %v5592_v22 = vadd.f32 %v5591_v45, %v5404_v32  ;;  %v5593_v30 = vpop.f32.mrb[33].mxu0  ;;  %v5789_v18 = vmax.f32 %v5703_v46, 0.0 }
 0x641   : > { %v5709_v16 = vadd.f32 %v5708_v4, %v5399_v23  ;;  %v5594_v20 = vadd.f32 %v5593_v30, %v5404_v32  ;;  %v5595_v31 = vpop.f32.mrb[34].mxu0  ;;  %6037 = vmatprep.subr.bf16.mxu0 %v5848_v63  ;;  %v5790_v3 = vmax.f32 %v5705_v58, 0.0  ;;  %v5429_v4 = vpop.permute.xlu0 %5428 }
 0x642   : > { %v5793_v17 = vmax.f32 %v5707_v59, 0.0  ;;  %v5596_v60 = vadd.f32 %v5595_v31, %v5409_v51  ;;  %v5597_v10 = vpop.f32.mrb[35].mxu0  ;;  %6038 = vmatpush1.bf16.msra.mxu0 %v5847_v35  ;;  %v5795_v24 = vmax.f32 %v5592_v22, 0.0 }
 0x643   : > { %v5794_v44 = vmax.f32 %v5709_v16, 0.0  ;;  %v5598_v1 = vadd.f32 %v5597_v10, %v5409_v51  ;;  %v5796_v56 = vmax.f32 %v5594_v20, 0.0 }
 0x644   : > { %v5849_v62 = vpack.c.bf16 %v5793_v17, %v5789_v18  ;;  %v5799_v53 = vmax.f32 %v5596_v60, 0.0 }
 0x645   : > { %v5850_v8 = vpack.c.bf16 %v5794_v44, %v5790_v3  ;;  %v5712_v40 = vpop.f32.mrb[32].mxu1  ;;  %v5800_v41 = vmax.f32 %v5598_v1, 0.0 }
 0x646   : > { %v5713_v19 = vadd.f32 %v5712_v40, %v5404_v32  ;;  %v5714_v9 = vpop.f32.mrb[33].mxu1  ;;  %v5851_v42 = vpack.c.bf16 %v5799_v53, %v5795_v24  ;;  %v5434_v40 = vpop.permute.xlu1 %5433 }
 0x647   : > { %v5715_v54 = vadd.f32 %v5714_v9, %v5404_v32  ;;  %v5716_v25 = vpop.f32.mrb[34].mxu1  ;;  %6150 = vmatprep.subr.bf16.mxu1 %v5850_v8  ;;  %v5852_v2 = vpack.c.bf16 %v5800_v41, %v5796_v56  ;;  %v5601_v27 = vpop.f32.mrb[36].mxu0 }
 0x648   : > { %v5717_v13 = vadd.f32 %v5716_v25, %v5409_v51  ;;  %v5718_v61 = vpop.f32.mrb[35].mxu1  ;;  %6151 = vmatpush1.bf16.msra.mxu1 %v5849_v62  ;;  %v5602_v33 = vadd.f32 %v5601_v27, %v5414_v6  ;;  %v5603_v50 = vpop.f32.mrb[37].mxu0  ;;  %v5797_v48 = vmax.f32 %v5713_v19, 0.0 }
 0x649   : > { %v5719_v47 = vadd.f32 %v5718_v61, %v5409_v51  ;;  %v5604_v26 = vadd.f32 %v5603_v50, %v5414_v6  ;;  %v5605_v23 = vpop.f32.mrb[38].mxu0  ;;  %6039 = vmatprep.subr.bf16.mxu0 %v5852_v2  ;;  %v5798_v28 = vmax.f32 %v5715_v54, 0.0  ;;  %v5439_v61 = vpop.permute.xlu0 %5438 }
 0x64a   : > { %v5801_v43 = vmax.f32 %v5717_v13, 0.0  ;;  %v5606_v7 = vadd.f32 %v5605_v23, %v5419_v5  ;;  %v5607_v0 = vpop.f32.mrb[39].mxu0  ;;  %6040 = vmatpush1.bf16.msra.mxu0 %v5851_v42  ;;  %v5803_v29 = vmax.f32 %v5602_v33, 0.0 }
 0x64b   : > { %v5802_v36 = vmax.f32 %v5719_v47, 0.0  ;;  %v5608_v49 = vadd.f32 %v5607_v0, %v5419_v5  ;;  %v5804_v39 = vmax.f32 %v5604_v26, 0.0 }
 0x64c   : > { %v5853_v52 = vpack.c.bf16 %v5801_v43, %v5797_v48  ;;  %v5807_v14 = vmax.f32 %v5606_v7, 0.0 }
 0x64d   : > { %v5854_v12 = vpack.c.bf16 %v5802_v36, %v5798_v28  ;;  %v5722_v55 = vpop.f32.mrb[36].mxu1  ;;  %v5808_v34 = vmax.f32 %v5608_v49, 0.0 }
 0x64e   : > { %v5723_v21 = vadd.f32 %v5722_v55, %v5414_v6  ;;  %v5724_v15 = vpop.f32.mrb[37].mxu1  ;;  %v5855_v32 = vpack.c.bf16 %v5807_v14, %v5803_v29  ;;  %v5444_v55 = vpop.permute.xlu1 %5443 }
 0x64f   : > { %v5725_v46 = vadd.f32 %v5724_v15, %v5414_v6  ;;  %v5726_v11 = vpop.f32.mrb[38].mxu1  ;;  %6152 = vmatprep.subr.bf16.mxu1 %v5854_v12  ;;  %v5856_v35 = vpack.c.bf16 %v5808_v34, %v5804_v39  ;;  %v5611_v58 = vpop.f32.mrb[40].mxu0 }
 0x650   : > { %v5727_v38 = vadd.f32 %v5726_v11, %v5419_v5  ;;  %v5728_v63 = vpop.f32.mrb[39].mxu1  ;;  %6153 = vmatpush1.bf16.msra.mxu1 %v5853_v52  ;;  %v5612_v45 = vadd.f32 %v5611_v58, %v5424_v57  ;;  %v5613_v59 = vpop.f32.mrb[41].mxu0  ;;  %v5805_v16 = vmax.f32 %v5723_v21, 0.0 }
 0x651   : > { %v5729_v22 = vadd.f32 %v5728_v63, %v5419_v5  ;;  %v5614_v30 = vadd.f32 %v5613_v59, %v5424_v57  ;;  %v5615_v51 = vpop.f32.mrb[42].mxu0  ;;  %6041 = vmatprep.subr.bf16.mxu0 %v5856_v35  ;;  %v5806_v17 = vmax.f32 %v5725_v46, 0.0  ;;  %v5449_v63 = vpop.permute.xlu0 %5448 }
 0x652   : > { %v5809_v20 = vmax.f32 %v5727_v38, 0.0  ;;  %v5616_v31 = vadd.f32 %v5615_v51, %v5429_v4  ;;  %v5617_v18 = vpop.f32.mrb[43].mxu0  ;;  %6042 = vmatpush1.bf16.msra.mxu0 %v5855_v32  ;;  %v5811_v44 = vmax.f32 %v5612_v45, 0.0 }
 0x653   : > { %v5810_v60 = vmax.f32 %v5729_v22, 0.0  ;;  %v5618_v10 = vadd.f32 %v5617_v18, %v5429_v4  ;;  %v5812_v53 = vmax.f32 %v5614_v30, 0.0 }
 0x654   : > { %v5857_v3 = vpack.c.bf16 %v5809_v20, %v5805_v16  ;;  %v5815_v1 = vmax.f32 %v5616_v31, 0.0 }
 0x655   : > { %v5858_v62 = vpack.c.bf16 %v5810_v60, %v5806_v17  ;;  %v5732_v24 = vpop.f32.mrb[40].mxu1  ;;  %v5816_v8 = vmax.f32 %v5618_v10, 0.0 }
 0x656   : > { %v5733_v56 = vadd.f32 %v5732_v24, %v5424_v57  ;;  %v5734_v41 = vpop.f32.mrb[41].mxu1  ;;  %v5859_v6 = vpack.c.bf16 %v5815_v1, %v5811_v44  ;;  %v5454_v24 = vpop.permute.xlu1 %5453 }
 0x657   : > { %v5735_v19 = vadd.f32 %v5734_v41, %v5424_v57  ;;  %v5736_v9 = vpop.f32.mrb[42].mxu1  ;;  %6154 = vmatprep.subr.bf16.mxu1 %v5858_v62  ;;  %v5860_v42 = vpack.c.bf16 %v5816_v8, %v5812_v53  ;;  %v5621_v54 = vpop.f32.mrb[44].mxu0 }
 0x658   : > { %v5737_v25 = vadd.f32 %v5736_v9, %v5429_v4  ;;  %v5738_v2 = vpop.f32.mrb[43].mxu1  ;;  %6155 = vmatpush1.bf16.msra.mxu1 %v5857_v3  ;;  %v5622_v27 = vadd.f32 %v5621_v54, %v5434_v40  ;;  %v5623_v13 = vpop.f32.mrb[45].mxu0  ;;  %v5813_v47 = vmax.f32 %v5733_v56, 0.0 }
 0x659   : > { %v5739_v33 = vadd.f32 %v5738_v2, %v5429_v4  ;;  %v5624_v50 = vadd.f32 %v5623_v13, %v5434_v40  ;;  %v5625_v5 = vpop.f32.mrb[46].mxu0  ;;  %6043 = vmatprep.subr.bf16.mxu0 %v5860_v42  ;;  %v5814_v43 = vmax.f32 %v5735_v19, 0.0  ;;  %v5459_v2 = vpop.permute.xlu0 %5458 }
 0x65a   : > { %v5817_v26 = vmax.f32 %v5737_v25, 0.0  ;;  %v5626_v23 = vadd.f32 %v5625_v5, %v5439_v61  ;;  %v5627_v48 = vpop.f32.mrb[47].mxu0  ;;  %6044 = vmatpush1.bf16.msra.mxu0 %v5859_v6  ;;  %v5819_v36 = vmax.f32 %v5622_v27, 0.0 }
 0x65b   : > { %v5818_v7 = vmax.f32 %v5739_v33, 0.0  ;;  %v5628_v0 = vadd.f32 %v5627_v48, %v5439_v61  ;;  %v5820_v14 = vmax.f32 %v5624_v50, 0.0 }
 0x65c   : > { %v5861_v28 = vpack.c.bf16 %v5817_v26, %v5813_v47  ;;  %v5823_v49 = vmax.f32 %v5626_v23, 0.0 }
 0x65d   : > { %v5862_v52 = vpack.c.bf16 %v5818_v7, %v5814_v43  ;;  %v5742_v29 = vpop.f32.mrb[44].mxu1  ;;  %v5824_v12 = vmax.f32 %v5628_v0, 0.0 }
 0x65e   : > { %v5743_v39 = vadd.f32 %v5742_v29, %v5434_v40  ;;  %v5744_v34 = vpop.f32.mrb[45].mxu1  ;;  %v5863_v57 = vpack.c.bf16 %v5823_v49, %v5819_v36 }
 0x65f   : > { %v5745_v21 = vadd.f32 %v5744_v34, %v5434_v40  ;;  %v5746_v15 = vpop.f32.mrb[46].mxu1  ;;  %6156 = vmatprep.subr.bf16.mxu1 %v5862_v52  ;;  %v5864_v32 = vpack.c.bf16 %v5824_v12, %v5820_v14  ;;  %v5631_v46 = vpop.f32.mrb[48].mxu0 }
 0x660   : > { %v5747_v11 = vadd.f32 %v5746_v15, %v5439_v61  ;;  %v5748_v35 = vpop.f32.mrb[47].mxu1  ;;  %6157 = vmatpush1.bf16.msra.mxu1 %v5861_v28  ;;  %v5632_v58 = vadd.f32 %v5631_v46, %v5444_v55  ;;  %v5633_v38 = vpop.f32.mrb[49].mxu0  ;;  %v5821_v22 = vmax.f32 %v5743_v39, 0.0 }
 0x661   : > { %v5749_v45 = vadd.f32 %v5748_v35, %v5439_v61  ;;  %v5634_v59 = vadd.f32 %v5633_v38, %v5444_v55  ;;  %v5635_v4 = vpop.f32.mrb[50].mxu0  ;;  %6045 = vmatprep.subr.bf16.mxu0 %v5864_v32  ;;  %v5822_v20 = vmax.f32 %v5745_v21, 0.0 }
 0x662   : > { %v5825_v30 = vmax.f32 %v5747_v11, 0.0  ;;  %v5636_v51 = vadd.f32 %v5635_v4, %v5449_v63  ;;  %v5637_v16 = vpop.f32.mrb[51].mxu0  ;;  %6046 = vmatpush1.bf16.msra.mxu0 %v5863_v57  ;;  %v5827_v60 = vmax.f32 %v5632_v58, 0.0  ;;  %v8037_v11 = vld [vmem:[%s13513_s4] sm:$0xff]  }
 0x663   : > { %v5826_v31 = vmax.f32 %v5749_v45, 0.0  ;;  %v5638_v18 = vadd.f32 %v5637_v16, %v5449_v63  ;;  %v5828_v1 = vmax.f32 %v5634_v59, 0.0 }
 0x664   : > { %v5865_v17 = vpack.c.bf16 %v5825_v30, %v5821_v22  ;;  %v5831_v10 = vmax.f32 %v5636_v51, 0.0 }
 0x665   : > { %v5866_v3 = vpack.c.bf16 %v5826_v31, %v5822_v20  ;;  %v5752_v44 = vpop.f32.mrb[48].mxu1  ;;  %v5832_v62 = vmax.f32 %v5638_v18, 0.0  ;;  %v8038_v31 = vld [vmem:[%s13513_s4 + $0x8] sm:$0xff]   ;;  %v8039_v18 = vld [vmem:[%s13513_s4 + $0x10] sm:$0xff]  }
 0x666   : > { %v5753_v53 = vadd.f32 %v5752_v44, %v5444_v55  ;;  %v5754_v8 = vpop.f32.mrb[49].mxu1  ;;  %v5867_v40 = vpack.c.bf16 %v5831_v10, %v5827_v60  ;;  %v8041_v60 = vld [vmem:[%s13513_s4 + $0x20] sm:$0xff]   ;;  %v8042_v10 = vld [vmem:[%s13513_s4 + $0x28] sm:$0xff]   ;;  %v8044_v44 = vld [vmem:[%s13513_s4 + $0x38] sm:$0xff]  }
 0x667   : > { %v5755_v56 = vadd.f32 %v5754_v8, %v5444_v55  ;;  %v5756_v41 = vpop.f32.mrb[50].mxu1  ;;  %6158 = vmatprep.subr.bf16.mxu1 %v5866_v3  ;;  %v5868_v6 = vpack.c.bf16 %v5832_v62, %v5828_v1  ;;  %v5641_v19 = vpop.f32.mrb[52].mxu0  ;;  %v8043_v3 = vld [vmem:[%s13513_s4 + $0x30] sm:$0xff]  }
 0x668   : > { %v5757_v9 = vadd.f32 %v5756_v41, %v5449_v63  ;;  %v5758_v42 = vpop.f32.mrb[51].mxu1  ;;  %6159 = vmatpush1.bf16.msra.mxu1 %v5865_v17  ;;  %v5642_v54 = vadd.f32 %v5641_v19, %v5454_v24  ;;  %v5643_v25 = vpop.f32.mrb[53].mxu0  ;;  %v5829_v33 = vmax.f32 %v5753_v53, 0.0  ;;  %v8040_v17 = vld [vmem:[%s13513_s4 + $0x18] sm:$0xff]  }
 0x669   : > { %v5759_v27 = vadd.f32 %v5758_v42, %v5449_v63  ;;  %v5644_v13 = vadd.f32 %v5643_v25, %v5454_v24  ;;  %v5645_v61 = vpop.f32.mrb[54].mxu0  ;;  %6047 = vmatprep.subr.bf16.mxu0 %v5868_v6  ;;  %v5830_v26 = vmax.f32 %v5755_v56, 0.0  ;;  %v5910_v1 = vpop.permute.xlu1 %5909 }
 0x66a   : > { %v5833_v50 = vmax.f32 %v5757_v9, 0.0  ;;  %v5646_v5 = vadd.f32 %v5645_v61, %v5459_v2  ;;  %v5647_v47 = vpop.f32.mrb[55].mxu0  ;;  %6048 = vmatpush1.bf16.msra.mxu0 %v5867_v40  ;;  %v5835_v7 = vmax.f32 %v5642_v54, 0.0  ;;  %v5915_v8 = vpop.permute.xlu0 %5914 }
 0x66b   : > { %v5834_v23 = vmax.f32 %v5759_v27, 0.0  ;;  %v5648_v48 = vadd.f32 %v5647_v47, %v5459_v2  ;;  %v5836_v49 = vmax.f32 %v5644_v13, 0.0 }
 0x66c   : > { %v5869_v43 = vpack.c.bf16 %v5833_v50, %v5829_v33  ;;  %v5839_v0 = vmax.f32 %v5646_v5, 0.0 }
 0x66d   : > { %v5870_v28 = vpack.c.bf16 %v5834_v23, %v5830_v26  ;;  %v5762_v36 = vpop.f32.mrb[52].mxu1  ;;  %v5840_v52 = vmax.f32 %v5648_v48, 0.0  ;;  %v5920_v27 = vpop.permute.xlu1 %5919 }
 0x66e   : > { %v5763_v29 = vadd.f32 %v5762_v36, %v5454_v24  ;;  %v5764_v14 = vpop.f32.mrb[53].mxu1  ;;  %v5871_v12 = vpack.c.bf16 %v5839_v0, %v5835_v7  ;;  %v5925_v0 = vpop.permute.xlu0 %5924 }
 0x66f   : > { %v5765_v55 = vadd.f32 %v5764_v14, %v5454_v24  ;;  %v5766_v39 = vpop.f32.mrb[54].mxu1  ;;  %6160 = vmatprep.subr.bf16.mxu1 %v5870_v28  ;;  %v5872_v34 = vpack.c.bf16 %v5840_v52, %v5836_v49  ;;  %v13312_v57 = vpop.f32.mrb[56].mxu0 }
 0x670   : > { %v5767_v21 = vadd.f32 %v5766_v39, %v5459_v2  ;;  %v5768_v15 = vpop.f32.mrb[55].mxu1  ;;  %6161 = vmatpush1.bf16.msra.mxu1 %v5869_v43  ;;  %v13314_v32 = vpop.f32.mrb[57].mxu0  ;;  %v5837_v58 = vmax.f32 %v5763_v29, 0.0 }
 0x671   : > { %v5769_v46 = vadd.f32 %v5768_v15, %v5459_v2  ;;  %6049 = vmatprep.subr.bf16.mxu0 %v5872_v34  ;;  %v5655_v35 = vpop.f32.mrb[58].mxu0  ;;  %v5838_v45 = vmax.f32 %v5765_v55, 0.0 }
 0x672   : > { %v5841_v38 = vmax.f32 %v5767_v21, 0.0  ;;  %6050 = vmatpush1.bf16.msra.mxu0 %v5871_v12  ;;  %v5656_v63 = vpop.f32.mrb[59].mxu0 }
 0x673   : > { %v5842_v59 = vmax.f32 %v5769_v46, 0.0  ;;  %v5930_v63 = vpop.permute.xlu1 %5929 }
 0x674   : > { %v5873_v4 = vpack.c.bf16 %v5841_v38, %v5837_v58 }
 0x675   : > { %v5874_v22 = vpack.c.bf16 %v5842_v59, %v5838_v45  ;;  %v13319_v30 = vpop.f32.mrb[56].mxu1  ;;  %6068 = vmatmul.mubr.bf16.vlgmr.msra.gmra.mrb[60].mxu0 %v8037_v11 }
 0x676   : > { %v13321_v51 = vpop.f32.mrb[57].mxu1  ;;  %6077 = vmatprep.mubr.bf16.mxu0 %v14356_v37 }
 0x677   : > { %6162 = vmatprep.subr.bf16.mxu1 %v5874_v22  ;;  %v5776_v16 = vpop.f32.mrb[58].mxu1 }
 0x678   : > { %6163 = vmatpush1.bf16.msra.mxu1 %v5873_v4  ;;  %v5777_v20 = vpop.f32.mrb[59].mxu1 }
 0x67b   : > { %6181 = vmatmul.mubr.bf16.vlgmr.msra.gmra.mrb[60].mxu1 %v8037_v11 }
 0x67c   : > { %6190 = vmatprep.mubr.bf16.mxu1 %v14356_v37 }
 0x67d   : > { %6078 = vmatmul.mubr.bf16.gmra.mrb[64].mxu0 %v8038_v31 }
 0x67e   : > { %6087 = vmatprep.mubr.bf16.mxu0 %v14356_v37 }
 0x683   : > { %6191 = vmatmul.mubr.bf16.gmra.mrb[64].mxu1 %v8038_v31 }
 0x684   : > { %6200 = vmatprep.mubr.bf16.mxu1 %v14356_v37 }
 0x685   : > { %6088 = vmatmul.mubr.bf16.gmra.mrb[68].mxu0 %v8039_v18 }
 0x686   : > { %6097 = vmatprep.mubr.bf16.mxu0 %v14356_v37 }
 0x68b   : > { %6201 = vmatmul.mubr.bf16.gmra.mrb[68].mxu1 %v8039_v18 }
 0x68c   : > { %6210 = vmatprep.mubr.bf16.mxu1 %v14356_v37 }
 0x68d   : > { %6098 = vmatmul.mubr.bf16.gmra.mrb[72].mxu0 %v8040_v17 }
 0x68e   : > { %6107 = vmatprep.mubr.bf16.mxu0 %v14356_v37 }
 0x693   : > { %6211 = vmatmul.mubr.bf16.gmra.mrb[72].mxu1 %v8040_v17 }
 0x694   : > { %6220 = vmatprep.mubr.bf16.mxu1 %v14356_v37 }
 0x695   : > { %6108 = vmatmul.mubr.bf16.gmra.mrb[76].mxu0 %v8041_v60 }
 0x696   : > { %6117 = vmatprep.mubr.bf16.mxu0 %v14356_v37 }
 0x69b   : > { %6221 = vmatmul.mubr.bf16.gmra.mrb[76].mxu1 %v8041_v60 }
 0x69c   : > { %6230 = vmatprep.mubr.bf16.mxu1 %v14356_v37 }
 0x69d   : > { %6118 = vmatmul.mubr.bf16.gmra.mrb[80].mxu0 %v8042_v10 }
 0x69e   : > { %6127 = vmatprep.mubr.bf16.mxu0 %v14356_v37 }
 0x6a3   : > { %6231 = vmatmul.mubr.bf16.gmra.mrb[80].mxu1 %v8042_v10 }
 0x6a4   : > { %6240 = vmatprep.mubr.bf16.mxu1 %v14356_v37 }
 0x6a5   : > { %6128 = vmatmul.mubr.bf16.gmra.mrb[84].mxu0 %v8043_v3 }
 0x6a6   : > { %6137 = vmatprep.mubr.bf16.mxu0 %v14356_v37 }
 0x6ab   : > { %6241 = vmatmul.mubr.bf16.gmra.mrb[84].mxu1 %v8043_v3  ;;  %v5935_v3 = vpop.permute.xlu0 %5934 }
 0x6ac   : > { %6250 = vmatprep.mubr.bf16.mxu1 %v14356_v37 }
 0x6ad   : > { %6138 = vmatmul.mubr.bf16.gmra.mrb[88].mxu0 %v8044_v44 }
 0x6ae   : > { %6549 = vmatprep.mubr.bf16.mxu0 %v14356_v37 }
 0x6b3   : > { %6251 = vmatmul.mubr.bf16.gmra.mrb[88].mxu1 %v8044_v44 }
 0x6b4   : > { %6662 = vmatprep.mubr.bf16.mxu1 %v14356_v37 }
 0x748   : > { %v6069_v62 = vpop.f32.mrb[60].mxu0 }
 0x749   : > { %v6070_v24 = vadd.f32 %v6069_v62, %v5910_v1  ;;  %v6071_v53 = vpop.f32.mrb[61].mxu0 }
 0x74a   : > { %v6072_v40 = vadd.f32 %v6071_v53, %v5910_v1  ;;  %v6073_v56 = vpop.f32.mrb[62].mxu0 }
 0x74b   : > { %v6074_v41 = vadd.f32 %v6073_v56, %v5915_v8  ;;  %v6075_v6 = vpop.f32.mrb[63].mxu0  ;;  %v6261_v9 = vmax.f32 %v6070_v24, 0.0 }
 0x74c   : > { %v6076_v19 = vadd.f32 %v6075_v6, %v5915_v8  ;;  %v6262_v25 = vmax.f32 %v6072_v40, 0.0 }
 0x74d   : > { %v6265_v42 = vmax.f32 %v6074_v41, 0.0 }
 0x74e   : > { %v6182_v54 = vpop.f32.mrb[60].mxu1  ;;  %v6266_v2 = vmax.f32 %v6076_v19, 0.0 }
 0x74f   : > { %v6183_v13 = vadd.f32 %v6182_v54, %v5910_v1  ;;  %v6184_v61 = vpop.f32.mrb[61].mxu1  ;;  %v6325_v33 = vpack.c.bf16 %v6265_v42, %v6261_v9 }
 0x750   : > { %v6185_v50 = vadd.f32 %v6184_v61, %v5910_v1  ;;  %v6186_v5 = vpop.f32.mrb[62].mxu1  ;;  %v6326_v47 = vpack.c.bf16 %v6266_v2, %v6262_v25  ;;  %v6079_v26 = vpop.f32.mrb[64].mxu0 }
 0x751   : > { %v6187_v23 = vadd.f32 %v6186_v5, %v5915_v8  ;;  %v6188_v48 = vpop.f32.mrb[63].mxu1  ;;  %v6080_v43 = vadd.f32 %v6079_v26, %v5920_v27  ;;  %v6081_v7 = vpop.f32.mrb[65].mxu0  ;;  %v6263_v52 = vmax.f32 %v6183_v13, 0.0 }
 0x752   : > { %v6189_v28 = vadd.f32 %v6188_v48, %v5915_v8  ;;  %v6082_v36 = vadd.f32 %v6081_v7, %v5920_v27  ;;  %v6083_v49 = vpop.f32.mrb[66].mxu0  ;;  %6517 = vmatprep.subr.bf16.mxu0 %v6326_v47  ;;  %v6264_v55 = vmax.f32 %v6185_v50, 0.0  ;;  %v5940_v13 = vpop.permute.xlu1 %5939 }
 0x753   : > { %v6267_v29 = vmax.f32 %v6187_v23, 0.0  ;;  %v6084_v14 = vadd.f32 %v6083_v49, %v5925_v0  ;;  %v6085_v12 = vpop.f32.mrb[67].mxu0  ;;  %6518 = vmatpush1.bf16.msra.mxu0 %v6325_v33  ;;  %v6269_v15 = vmax.f32 %v6080_v43, 0.0 }
 0x754   : > { %v6268_v39 = vmax.f32 %v6189_v28, 0.0  ;;  %v6086_v34 = vadd.f32 %v6085_v12, %v5925_v0  ;;  %v6270_v58 = vmax.f32 %v6082_v36, 0.0  ;;  %v5945_v28 = vpop.permute.xlu0 %5944 }
 0x755   : > { %v6327_v21 = vpack.c.bf16 %v6267_v29, %v6263_v52  ;;  %v6273_v46 = vmax.f32 %v6084_v14, 0.0 }
 0x756   : > { %v6328_v11 = vpack.c.bf16 %v6268_v39, %v6264_v55  ;;  %v6192_v35 = vpop.f32.mrb[64].mxu1  ;;  %v6274_v38 = vmax.f32 %v6086_v34, 0.0 }
 0x757   : > { %v6193_v45 = vadd.f32 %v6192_v35, %v5920_v27  ;;  %v6194_v59 = vpop.f32.mrb[65].mxu1  ;;  %v6329_v4 = vpack.c.bf16 %v6273_v46, %v6269_v15 }
 0x758   : > { %v6195_v22 = vadd.f32 %v6194_v59, %v5920_v27  ;;  %v6196_v16 = vpop.f32.mrb[66].mxu1  ;;  %6630 = vmatprep.subr.bf16.mxu1 %v6328_v11  ;;  %v6330_v20 = vpack.c.bf16 %v6274_v38, %v6270_v58  ;;  %v6089_v31 = vpop.f32.mrb[68].mxu0 }
 0x759   : > { %v6197_v18 = vadd.f32 %v6196_v16, %v5925_v0  ;;  %v6198_v17 = vpop.f32.mrb[67].mxu1  ;;  %6631 = vmatpush1.bf16.msra.mxu1 %v6327_v21  ;;  %v6090_v60 = vadd.f32 %v6089_v31, %v5930_v63  ;;  %v6091_v10 = vpop.f32.mrb[69].mxu0  ;;  %v6271_v24 = vmax.f32 %v6193_v45, 0.0 }
 0x75a   : > { %v6199_v44 = vadd.f32 %v6198_v17, %v5925_v0  ;;  %v6092_v1 = vadd.f32 %v6091_v10, %v5930_v63  ;;  %v6093_v62 = vpop.f32.mrb[70].mxu0  ;;  %6519 = vmatprep.subr.bf16.mxu0 %v6330_v20  ;;  %v6272_v56 = vmax.f32 %v6195_v22, 0.0  ;;  %v5950_v45 = vpop.permute.xlu1 %5949 }
 0x75b   : > { %v6275_v53 = vmax.f32 %v6197_v18, 0.0  ;;  %v6094_v8 = vadd.f32 %v6093_v62, %v5935_v3  ;;  %v6095_v40 = vpop.f32.mrb[71].mxu0  ;;  %6520 = vmatpush1.bf16.msra.mxu0 %v6329_v4  ;;  %v6277_v9 = vmax.f32 %v6090_v60, 0.0 }
 0x75c   : > { %v6276_v41 = vmax.f32 %v6199_v44, 0.0  ;;  %v6096_v6 = vadd.f32 %v6095_v40, %v5935_v3  ;;  %v6278_v2 = vmax.f32 %v6092_v1, 0.0  ;;  %v5955_v44 = vpop.permute.xlu0 %5954 }
 0x75d   : > { %v6331_v19 = vpack.c.bf16 %v6275_v53, %v6271_v24  ;;  %v6281_v42 = vmax.f32 %v6094_v8, 0.0 }
 0x75e   : > { %v6332_v54 = vpack.c.bf16 %v6276_v41, %v6272_v56  ;;  %v6202_v25 = vpop.f32.mrb[68].mxu1  ;;  %v6282_v27 = vmax.f32 %v6096_v6, 0.0 }
 0x75f   : > { %v6203_v61 = vadd.f32 %v6202_v25, %v5930_v63  ;;  %v6204_v33 = vpop.f32.mrb[69].mxu1  ;;  %v6333_v50 = vpack.c.bf16 %v6281_v42, %v6277_v9 }
 0x760   : > { %v6205_v5 = vadd.f32 %v6204_v33, %v5930_v63  ;;  %v6206_v47 = vpop.f32.mrb[70].mxu1  ;;  %6632 = vmatprep.subr.bf16.mxu1 %v6332_v54  ;;  %v6334_v26 = vpack.c.bf16 %v6282_v27, %v6278_v2  ;;  %v6099_v23 = vpop.f32.mrb[72].mxu0 }
 0x761   : > { %v6207_v48 = vadd.f32 %v6206_v47, %v5935_v3  ;;  %v6208_v43 = vpop.f32.mrb[71].mxu1  ;;  %6633 = vmatpush1.bf16.msra.mxu1 %v6331_v19  ;;  %v6100_v7 = vadd.f32 %v6099_v23, %v5940_v13  ;;  %v6101_v0 = vpop.f32.mrb[73].mxu0  ;;  %v6279_v29 = vmax.f32 %v6203_v61, 0.0 }
 0x762   : > { %v6209_v36 = vadd.f32 %v6208_v43, %v5935_v3  ;;  %v6102_v49 = vadd.f32 %v6101_v0, %v5940_v13  ;;  %v6103_v52 = vpop.f32.mrb[74].mxu0  ;;  %6521 = vmatprep.subr.bf16.mxu0 %v6334_v26  ;;  %v6280_v39 = vmax.f32 %v6205_v5, 0.0  ;;  %v5960_v61 = vpop.permute.xlu1 %5959 }
 0x763   : > { %v6283_v14 = vmax.f32 %v6207_v48, 0.0  ;;  %v6104_v12 = vadd.f32 %v6103_v52, %v5945_v28  ;;  %v6105_v55 = vpop.f32.mrb[75].mxu0  ;;  %6522 = vmatpush1.bf16.msra.mxu0 %v6333_v50  ;;  %v6285_v46 = vmax.f32 %v6100_v7, 0.0 }
 0x764   : > { %v6284_v34 = vmax.f32 %v6209_v36, 0.0  ;;  %v6106_v21 = vadd.f32 %v6105_v55, %v5945_v28  ;;  %v6286_v38 = vmax.f32 %v6102_v49, 0.0  ;;  %v5965_v36 = vpop.permute.xlu0 %5964 }
 0x765   : > { %v6335_v15 = vpack.c.bf16 %v6283_v14, %v6279_v29  ;;  %v6289_v11 = vmax.f32 %v6104_v12, 0.0 }
 0x766   : > { %v6336_v35 = vpack.c.bf16 %v6284_v34, %v6280_v39  ;;  %v6212_v58 = vpop.f32.mrb[72].mxu1  ;;  %v6290_v63 = vmax.f32 %v6106_v21, 0.0 }
 0x767   : > { %v6213_v59 = vadd.f32 %v6212_v58, %v5940_v13  ;;  %v6214_v4 = vpop.f32.mrb[73].mxu1  ;;  %v6337_v22 = vpack.c.bf16 %v6289_v11, %v6285_v46 }
 0x768   : > { %v6215_v16 = vadd.f32 %v6214_v4, %v5940_v13  ;;  %v6216_v20 = vpop.f32.mrb[74].mxu1  ;;  %6634 = vmatprep.subr.bf16.mxu1 %v6336_v35  ;;  %v6338_v31 = vpack.c.bf16 %v6290_v63, %v6286_v38  ;;  %v6109_v18 = vpop.f32.mrb[76].mxu0 }
 0x769   : > { %v6217_v17 = vadd.f32 %v6216_v20, %v5945_v28  ;;  %v6218_v60 = vpop.f32.mrb[75].mxu1  ;;  %6635 = vmatpush1.bf16.msra.mxu1 %v6335_v15  ;;  %v6110_v10 = vadd.f32 %v6109_v18, %v5950_v45  ;;  %v6111_v3 = vpop.f32.mrb[77].mxu0  ;;  %v6287_v53 = vmax.f32 %v6213_v59, 0.0 }
 0x76a   : > { %v6219_v1 = vadd.f32 %v6218_v60, %v5945_v28  ;;  %v6112_v62 = vadd.f32 %v6111_v3, %v5950_v45  ;;  %v6113_v24 = vpop.f32.mrb[78].mxu0  ;;  %6523 = vmatprep.subr.bf16.mxu0 %v6338_v31  ;;  %v6288_v41 = vmax.f32 %v6215_v16, 0.0  ;;  %v5970_v59 = vpop.permute.xlu1 %5969 }
 0x76b   : > { %v6291_v8 = vmax.f32 %v6217_v17, 0.0  ;;  %v6114_v40 = vadd.f32 %v6113_v24, %v5955_v44  ;;  %v6115_v56 = vpop.f32.mrb[79].mxu0  ;;  %6524 = vmatpush1.bf16.msra.mxu0 %v6337_v22  ;;  %v6293_v42 = vmax.f32 %v6110_v10, 0.0 }
 0x76c   : > { %v6292_v6 = vmax.f32 %v6219_v1, 0.0  ;;  %v6116_v19 = vadd.f32 %v6115_v56, %v5955_v44  ;;  %v6294_v27 = vmax.f32 %v6112_v62, 0.0  ;;  %v5975_v1 = vpop.permute.xlu0 %5974 }
 0x76d   : > { %v6339_v9 = vpack.c.bf16 %v6291_v8, %v6287_v53  ;;  %v6297_v54 = vmax.f32 %v6114_v40, 0.0 }
 0x76e   : > { %v6340_v25 = vpack.c.bf16 %v6292_v6, %v6288_v41  ;;  %v6222_v2 = vpop.f32.mrb[76].mxu1  ;;  %v6298_v13 = vmax.f32 %v6116_v19, 0.0 }
 0x76f   : > { %v6223_v33 = vadd.f32 %v6222_v2, %v5950_v45  ;;  %v6224_v50 = vpop.f32.mrb[77].mxu1  ;;  %v6341_v5 = vpack.c.bf16 %v6297_v54, %v6293_v42 }
 0x770   : > { %v6225_v47 = vadd.f32 %v6224_v50, %v5950_v45  ;;  %v6226_v26 = vpop.f32.mrb[78].mxu1  ;;  %6636 = vmatprep.subr.bf16.mxu1 %v6340_v25  ;;  %v6342_v23 = vpack.c.bf16 %v6298_v13, %v6294_v27  ;;  %v6119_v48 = vpop.f32.mrb[80].mxu0 }
 0x771   : > { %v6227_v43 = vadd.f32 %v6226_v26, %v5955_v44  ;;  %v6228_v7 = vpop.f32.mrb[79].mxu1  ;;  %6637 = vmatpush1.bf16.msra.mxu1 %v6339_v9  ;;  %v6120_v0 = vadd.f32 %v6119_v48, %v5960_v61  ;;  %v6121_v28 = vpop.f32.mrb[81].mxu0  ;;  %v6295_v14 = vmax.f32 %v6223_v33, 0.0 }
 0x772   : > { %v6229_v49 = vadd.f32 %v6228_v7, %v5955_v44  ;;  %v6122_v52 = vadd.f32 %v6121_v28, %v5960_v61  ;;  %v6123_v29 = vpop.f32.mrb[82].mxu0  ;;  %6525 = vmatprep.subr.bf16.mxu0 %v6342_v23  ;;  %v6296_v34 = vmax.f32 %v6225_v47, 0.0  ;;  %v5980_v33 = vpop.permute.xlu1 %5979 }
 0x773   : > { %v6299_v12 = vmax.f32 %v6227_v43, 0.0  ;;  %v6124_v55 = vadd.f32 %v6123_v29, %v5965_v36  ;;  %v6125_v39 = vpop.f32.mrb[83].mxu0  ;;  %6526 = vmatpush1.bf16.msra.mxu0 %v6341_v5  ;;  %v6301_v11 = vmax.f32 %v6120_v0, 0.0 }
 0x774   : > { %v6300_v21 = vmax.f32 %v6229_v49, 0.0  ;;  %v6126_v15 = vadd.f32 %v6125_v39, %v5965_v36  ;;  %v6302_v63 = vmax.f32 %v6122_v52, 0.0  ;;  %v5985_v49 = vpop.permute.xlu0 %5984 }
 0x775   : > { %v6343_v46 = vpack.c.bf16 %v6299_v12, %v6295_v14  ;;  %v6305_v35 = vmax.f32 %v6124_v55, 0.0 }
 0x776   : > { %v6344_v58 = vpack.c.bf16 %v6300_v21, %v6296_v34  ;;  %v6232_v38 = vpop.f32.mrb[80].mxu1  ;;  %v6306_v45 = vmax.f32 %v6126_v15, 0.0 }
 0x777   : > { %v6233_v4 = vadd.f32 %v6232_v38, %v5960_v61  ;;  %v6234_v22 = vpop.f32.mrb[81].mxu1  ;;  %v6345_v16 = vpack.c.bf16 %v6305_v35, %v6301_v11 }
 0x778   : > { %v6235_v20 = vadd.f32 %v6234_v22, %v5960_v61  ;;  %v6236_v31 = vpop.f32.mrb[82].mxu1  ;;  %6638 = vmatprep.subr.bf16.mxu1 %v6344_v58  ;;  %v6346_v18 = vpack.c.bf16 %v6306_v45, %v6302_v63  ;;  %v6129_v17 = vpop.f32.mrb[84].mxu0 }
 0x779   : > { %v6237_v60 = vadd.f32 %v6236_v31, %v5965_v36  ;;  %v6238_v10 = vpop.f32.mrb[83].mxu1  ;;  %6639 = vmatpush1.bf16.msra.mxu1 %v6343_v46  ;;  %v6130_v3 = vadd.f32 %v6129_v17, %v5970_v59  ;;  %v6131_v44 = vpop.f32.mrb[85].mxu0  ;;  %v6303_v8 = vmax.f32 %v6233_v4, 0.0 }
 0x77a   : > { %v6239_v62 = vadd.f32 %v6238_v10, %v5965_v36  ;;  %v6132_v24 = vadd.f32 %v6131_v44, %v5970_v59  ;;  %v6133_v53 = vpop.f32.mrb[86].mxu0  ;;  %6527 = vmatprep.subr.bf16.mxu0 %v6346_v18  ;;  %v6304_v6 = vmax.f32 %v6235_v20, 0.0 }
 0x77b   : > { %v6307_v40 = vmax.f32 %v6237_v60, 0.0  ;;  %v6134_v56 = vadd.f32 %v6133_v53, %v5975_v1  ;;  %v6135_v41 = vpop.f32.mrb[87].mxu0  ;;  %6528 = vmatpush1.bf16.msra.mxu0 %v6345_v16  ;;  %v6309_v54 = vmax.f32 %v6130_v3, 0.0  ;;  %v8045_v3 = vld [vmem:[%s13514_s5] sm:$0xff]  }
 0x77c   : > { %v6308_v19 = vmax.f32 %v6239_v62, 0.0  ;;  %v6136_v9 = vadd.f32 %v6135_v41, %v5975_v1  ;;  %v6310_v13 = vmax.f32 %v6132_v24, 0.0  ;;  %v8048_v41 = vld [vmem:[%s13514_s5 + $0x18] sm:$0xff]  }
 0x77d   : > { %v6347_v42 = vpack.c.bf16 %v6307_v40, %v6303_v8  ;;  %v6313_v25 = vmax.f32 %v6134_v56, 0.0  ;;  %v8046_v40 = vld [vmem:[%s13514_s5 + $0x8] sm:$0xff]   ;;  %v8047_v56 = vld [vmem:[%s13514_s5 + $0x10] sm:$0xff]  }
 0x77e   : > { %v6348_v2 = vpack.c.bf16 %v6308_v19, %v6304_v6  ;;  %v6242_v27 = vpop.f32.mrb[84].mxu1  ;;  %v6314_v61 = vmax.f32 %v6136_v9, 0.0  ;;  %v8049_v6 = vld [vmem:[%s13514_s5 + $0x20] sm:$0xff]   ;;  %v8050_v19 = vld [vmem:[%s13514_s5 + $0x28] sm:$0xff]   ;;  %v8051_v9 = vld [vmem:[%s13514_s5 + $0x30] sm:$0xff]  }
 0x77f   : > { %v6243_v50 = vadd.f32 %v6242_v27, %v5970_v59  ;;  %v6244_v5 = vpop.f32.mrb[85].mxu1  ;;  %v6349_v47 = vpack.c.bf16 %v6313_v25, %v6309_v54  ;;  %v6392_v54 = vpop.permute.xlu1 %6391 }
 0x780   : > { %v6245_v26 = vadd.f32 %v6244_v5, %v5970_v59  ;;  %v6246_v23 = vpop.f32.mrb[86].mxu1  ;;  %6640 = vmatprep.subr.bf16.mxu1 %v6348_v2  ;;  %v6350_v48 = vpack.c.bf16 %v6314_v61, %v6310_v13  ;;  %v6139_v43 = vpop.f32.mrb[88].mxu0 }
 0x781   : > { %v6247_v7 = vadd.f32 %v6246_v23, %v5975_v1  ;;  %v6248_v0 = vpop.f32.mrb[87].mxu1  ;;  %6641 = vmatpush1.bf16.msra.mxu1 %v6347_v42  ;;  %v6140_v28 = vadd.f32 %v6139_v43, %v5980_v33  ;;  %v6141_v36 = vpop.f32.mrb[89].mxu0  ;;  %v6311_v12 = vmax.f32 %v6243_v50, 0.0  ;;  %v8052_v42 = vld [vmem:[%s13514_s5 + $0x38] sm:$0xff]  }
 0x782   : > { %v6249_v52 = vadd.f32 %v6248_v0, %v5975_v1  ;;  %v6142_v29 = vadd.f32 %v6141_v36, %v5980_v33  ;;  %v6143_v14 = vpop.f32.mrb[90].mxu0  ;;  %6529 = vmatprep.subr.bf16.mxu0 %v6350_v48  ;;  %v6312_v21 = vmax.f32 %v6245_v26, 0.0  ;;  %v6397_v13 = vpop.permute.xlu0 %6396 }
 0x783   : > { %v6315_v55 = vmax.f32 %v6247_v7, 0.0  ;;  %v6144_v39 = vadd.f32 %v6143_v14, %v5985_v49  ;;  %v6145_v34 = vpop.f32.mrb[91].mxu0  ;;  %6530 = vmatpush1.bf16.msra.mxu0 %v6349_v47  ;;  %v6317_v35 = vmax.f32 %v6140_v28, 0.0  ;;  %v6402_v0 = vpop.permute.xlu1 %6401 }
 0x784   : > { %v6316_v15 = vmax.f32 %v6249_v52, 0.0  ;;  %v6146_v46 = vadd.f32 %v6145_v34, %v5985_v49  ;;  %v6318_v45 = vmax.f32 %v6142_v29, 0.0 }
 0x785   : > { %v6351_v11 = vpack.c.bf16 %v6315_v55, %v6311_v12  ;;  %v6321_v58 = vmax.f32 %v6144_v39, 0.0 }
 0x786   : > { %v6352_v38 = vpack.c.bf16 %v6316_v15, %v6312_v21  ;;  %v6252_v63 = vpop.f32.mrb[88].mxu1  ;;  %v6322_v59 = vmax.f32 %v6146_v46, 0.0  ;;  %v6407_v15 = vpop.permute.xlu0 %6406 }
 0x787   : > { %v6253_v4 = vadd.f32 %v6252_v63, %v5980_v33  ;;  %v6254_v22 = vpop.f32.mrb[89].mxu1  ;;  %v6353_v16 = vpack.c.bf16 %v6321_v58, %v6317_v35 }
 0x788   : > { %v6255_v20 = vadd.f32 %v6254_v22, %v5980_v33  ;;  %v6256_v31 = vpop.f32.mrb[90].mxu1  ;;  %6642 = vmatprep.subr.bf16.mxu1 %v6352_v38  ;;  %v6354_v18 = vpack.c.bf16 %v6322_v59, %v6318_v45 }
 0x789   : > { %v6257_v17 = vadd.f32 %v6256_v31, %v5985_v49  ;;  %v6258_v60 = vpop.f32.mrb[91].mxu1  ;;  %6643 = vmatpush1.bf16.msra.mxu1 %v6351_v11  ;;  %v6319_v44 = vmax.f32 %v6253_v4, 0.0 }
 0x78a   : > { %v6259_v10 = vadd.f32 %v6258_v60, %v5985_v49  ;;  %6531 = vmatprep.subr.bf16.mxu0 %v6354_v18  ;;  %v6320_v62 = vmax.f32 %v6255_v20, 0.0 }
 0x78b   : > { %v6323_v1 = vmax.f32 %v6257_v17, 0.0  ;;  %6532 = vmatpush1.bf16.msra.mxu0 %v6353_v16 }
 0x78c   : > { %v6324_v24 = vmax.f32 %v6259_v10, 0.0 }
 0x78d   : > { %v6355_v53 = vpack.c.bf16 %v6323_v1, %v6319_v44 }
 0x78e   : > { %v6356_v8 = vpack.c.bf16 %v6324_v24, %v6320_v62  ;;  %6550 = vmatmul.mubr.bf16.vlgmr.msra.gmra.mrb[92].mxu0 %v8045_v3 }
 0x78f   : > { %6559 = vmatprep.mubr.bf16.mxu0 %v14356_v37 }
 0x790   : > { %6644 = vmatprep.subr.bf16.mxu1 %v6356_v8 }
 0x791   : > { %6645 = vmatpush1.bf16.msra.mxu1 %v6355_v53 }
 0x794   : > { %6663 = vmatmul.mubr.bf16.vlgmr.msra.gmra.mrb[92].mxu1 %v8045_v3  ;;  %v6412_v3 = vpop.permute.xlu1 %6411 }
 0x795   : > { %6672 = vmatprep.mubr.bf16.mxu1 %v14356_v37 }
 0x796   : > { %6560 = vmatmul.mubr.bf16.gmra.mrb[96].mxu0 %v8046_v40 }
 0x797   : > { %6569 = vmatprep.mubr.bf16.mxu0 %v14356_v37 }
 0x79c   : > { %6673 = vmatmul.mubr.bf16.gmra.mrb[96].mxu1 %v8046_v40 }
 0x79d   : > { %6682 = vmatprep.mubr.bf16.mxu1 %v14356_v37 }
 0x79e   : > { %6570 = vmatmul.mubr.bf16.gmra.mrb[100].mxu0 %v8047_v56 }
 0x79f   : > { %6579 = vmatprep.mubr.bf16.mxu0 %v14356_v37 }
 0x7a4   : > { %6683 = vmatmul.mubr.bf16.gmra.mrb[100].mxu1 %v8047_v56 }
 0x7a5   : > { %6692 = vmatprep.mubr.bf16.mxu1 %v14356_v37 }
 0x7a6   : > { %6580 = vmatmul.mubr.bf16.gmra.mrb[104].mxu0 %v8048_v41 }
 0x7a7   : > { %6589 = vmatprep.mubr.bf16.mxu0 %v14356_v37 }
 0x7ac   : > { %6693 = vmatmul.mubr.bf16.gmra.mrb[104].mxu1 %v8048_v41 }
 0x7ad   : > { %6702 = vmatprep.mubr.bf16.mxu1 %v14356_v37 }
 0x7ae   : > { %6590 = vmatmul.mubr.bf16.gmra.mrb[108].mxu0 %v8049_v6 }
 0x7af   : > { %6599 = vmatprep.mubr.bf16.mxu0 %v14356_v37 }
 0x7b4   : > { %6703 = vmatmul.mubr.bf16.gmra.mrb[108].mxu1 %v8049_v6 }
 0x7b5   : > { %6712 = vmatprep.mubr.bf16.mxu1 %v14356_v37 }
 0x7b6   : > { %6600 = vmatmul.mubr.bf16.gmra.mrb[112].mxu0 %v8050_v19 }
 0x7b7   : > { %6609 = vmatprep.mubr.bf16.mxu0 %v14356_v37 }
 0x7bc   : > { %6713 = vmatmul.mubr.bf16.gmra.mrb[112].mxu1 %v8050_v19 }
 0x7bd   : > { %6722 = vmatprep.mubr.bf16.mxu1 %v14356_v37 }
 0x7be   : > { %6610 = vmatmul.mubr.bf16.gmra.mrb[116].mxu0 %v8051_v9 }
 0x7bf   : > { %6619 = vmatprep.mubr.bf16.mxu0 %v14356_v37 }
 0x7c4   : > { %6723 = vmatmul.mubr.bf16.gmra.mrb[116].mxu1 %v8051_v9  ;;  %v6417_v9 = vpop.permute.xlu0 %6416 }
 0x7c5   : > { %6732 = vmatprep.mubr.bf16.mxu1 %v14356_v37 }
 0x7c6   : > { %6620 = vmatmul.mubr.bf16.gmra.mrb[120].mxu0 %v8052_v42 }
 0x7c7   : > { %7042 = vmatprep.mubr.bf16.mxu0 %v14356_v37 }
 0x7cc   : > { %6733 = vmatmul.mubr.bf16.gmra.mrb[120].mxu1 %v8052_v42 }
 0x7cd   : > { %7163 = vmatprep.mubr.bf16.mxu1 %v14356_v37 }
 0x861   : > { %v6551_v25 = vpop.f32.mrb[92].mxu0 }
 0x862   : > { %v6552_v2 = vadd.f32 %v6551_v25, %v6392_v54  ;;  %v6553_v27 = vpop.f32.mrb[93].mxu0 }
 0x863   : > { %v6554_v61 = vadd.f32 %v6553_v27, %v6392_v54  ;;  %v6555_v33 = vpop.f32.mrb[94].mxu0 }
 0x864   : > { %v6556_v50 = vadd.f32 %v6555_v33, %v6397_v13  ;;  %v6557_v5 = vpop.f32.mrb[95].mxu0  ;;  %v6743_v26 = vmax.f32 %v6552_v2, 0.0 }
 0x865   : > { %v6558_v47 = vadd.f32 %v6557_v5, %v6397_v13  ;;  %v6744_v43 = vmax.f32 %v6554_v61, 0.0 }
 0x866   : > { %v6747_v23 = vmax.f32 %v6556_v50, 0.0 }
 0x867   : > { %v6664_v48 = vpop.f32.mrb[92].mxu1  ;;  %v6748_v7 = vmax.f32 %v6558_v47, 0.0 }
 0x868   : > { %v6665_v28 = vadd.f32 %v6664_v48, %v6392_v54  ;;  %v6666_v36 = vpop.f32.mrb[93].mxu1  ;;  %v6807_v49 = vpack.c.bf16 %v6747_v23, %v6743_v26 }
 0x869   : > { %v6667_v52 = vadd.f32 %v6666_v36, %v6392_v54  ;;  %v6668_v29 = vpop.f32.mrb[94].mxu1  ;;  %v6808_v14 = vpack.c.bf16 %v6748_v7, %v6744_v43  ;;  %v6561_v12 = vpop.f32.mrb[96].mxu0 }
 0x86a   : > { %v6669_v55 = vadd.f32 %v6668_v29, %v6397_v13  ;;  %v6670_v39 = vpop.f32.mrb[95].mxu1  ;;  %v6562_v34 = vadd.f32 %v6561_v12, %v6402_v0  ;;  %v6563_v21 = vpop.f32.mrb[97].mxu0  ;;  %v6745_v58 = vmax.f32 %v6665_v28, 0.0 }
 0x86b   : > { %v6671_v46 = vadd.f32 %v6670_v39, %v6397_v13  ;;  %v6564_v11 = vadd.f32 %v6563_v21, %v6402_v0  ;;  %v6565_v35 = vpop.f32.mrb[98].mxu0  ;;  %7010 = vmatprep.subr.bf16.mxu0 %v6808_v14  ;;  %v6746_v59 = vmax.f32 %v6667_v52, 0.0  ;;  %v6422_v28 = vpop.permute.xlu1 %6421 }
 0x86c   : > { %v6749_v38 = vmax.f32 %v6669_v55, 0.0  ;;  %v6566_v63 = vadd.f32 %v6565_v35, %v6407_v15  ;;  %v6567_v45 = vpop.f32.mrb[99].mxu0  ;;  %7011 = vmatpush1.bf16.msra.mxu0 %v6807_v49  ;;  %v6751_v20 = vmax.f32 %v6562_v34, 0.0 }
 0x86d   : > { %v6750_v4 = vmax.f32 %v6671_v46, 0.0  ;;  %v6568_v22 = vadd.f32 %v6567_v45, %v6407_v15  ;;  %v6752_v60 = vmax.f32 %v6564_v11, 0.0  ;;  %v6427_v46 = vpop.permute.xlu0 %6426 }
 0x86e   : > { %v6809_v16 = vpack.c.bf16 %v6749_v38, %v6745_v58  ;;  %v6755_v31 = vmax.f32 %v6566_v63, 0.0 }
 0x86f   : > { %v6810_v18 = vpack.c.bf16 %v6750_v4, %v6746_v59  ;;  %v6674_v17 = vpop.f32.mrb[96].mxu1  ;;  %v6756_v10 = vmax.f32 %v6568_v22, 0.0 }
 0x870   : > { %v6675_v44 = vadd.f32 %v6674_v17, %v6402_v0  ;;  %v6676_v1 = vpop.f32.mrb[97].mxu1  ;;  %v6811_v62 = vpack.c.bf16 %v6755_v31, %v6751_v20 }
 0x871   : > { %v6677_v24 = vadd.f32 %v6676_v1, %v6402_v0  ;;  %v6678_v53 = vpop.f32.mrb[98].mxu1  ;;  %7131 = vmatprep.subr.bf16.mxu1 %v6810_v18  ;;  %v6812_v8 = vpack.c.bf16 %v6756_v10, %v6752_v60  ;;  %v6571_v40 = vpop.f32.mrb[100].mxu0 }
 0x872   : > { %v6679_v56 = vadd.f32 %v6678_v53, %v6407_v15  ;;  %v6680_v41 = vpop.f32.mrb[99].mxu1  ;;  %7132 = vmatpush1.bf16.msra.mxu1 %v6809_v16  ;;  %v6572_v6 = vadd.f32 %v6571_v40, %v6412_v3  ;;  %v6573_v19 = vpop.f32.mrb[101].mxu0  ;;  %v6753_v2 = vmax.f32 %v6675_v44, 0.0 }
 0x873   : > { %v6681_v42 = vadd.f32 %v6680_v41, %v6407_v15  ;;  %v6574_v54 = vadd.f32 %v6573_v19, %v6412_v3  ;;  %v6575_v25 = vpop.f32.mrb[102].mxu0  ;;  %7012 = vmatprep.subr.bf16.mxu0 %v6812_v8  ;;  %v6754_v33 = vmax.f32 %v6677_v24, 0.0  ;;  %v6432_v44 = vpop.permute.xlu1 %6431 }
 0x874   : > { %v6757_v27 = vmax.f32 %v6679_v56, 0.0  ;;  %v6576_v13 = vadd.f32 %v6575_v25, %v6417_v9  ;;  %v6577_v61 = vpop.f32.mrb[103].mxu0  ;;  %7013 = vmatpush1.bf16.msra.mxu0 %v6811_v62  ;;  %v6759_v26 = vmax.f32 %v6572_v6, 0.0 }
 0x875   : > { %v6758_v50 = vmax.f32 %v6681_v42, 0.0  ;;  %v6578_v5 = vadd.f32 %v6577_v61, %v6417_v9  ;;  %v6760_v7 = vmax.f32 %v6574_v54, 0.0  ;;  %v6437_v42 = vpop.permute.xlu0 %6436 }
 0x876   : > { %v6813_v47 = vpack.c.bf16 %v6757_v27, %v6753_v2  ;;  %v6763_v23 = vmax.f32 %v6576_v13, 0.0 }
 0x877   : > { %v6814_v48 = vpack.c.bf16 %v6758_v50, %v6754_v33  ;;  %v6684_v43 = vpop.f32.mrb[100].mxu1  ;;  %v6764_v0 = vmax.f32 %v6578_v5, 0.0 }
 0x878   : > { %v6685_v36 = vadd.f32 %v6684_v43, %v6412_v3  ;;  %v6686_v49 = vpop.f32.mrb[101].mxu1  ;;  %v6815_v52 = vpack.c.bf16 %v6763_v23, %v6759_v26 }
 0x879   : > { %v6687_v29 = vadd.f32 %v6686_v49, %v6412_v3  ;;  %v6688_v14 = vpop.f32.mrb[102].mxu1  ;;  %7133 = vmatprep.subr.bf16.mxu1 %v6814_v48  ;;  %v6816_v12 = vpack.c.bf16 %v6764_v0, %v6760_v7  ;;  %v6581_v55 = vpop.f32.mrb[104].mxu0 }
 0x87a   : > { %v6689_v39 = vadd.f32 %v6688_v14, %v6417_v9  ;;  %v6690_v34 = vpop.f32.mrb[103].mxu1  ;;  %7134 = vmatpush1.bf16.msra.mxu1 %v6813_v47  ;;  %v6582_v21 = vadd.f32 %v6581_v55, %v6422_v28  ;;  %v6583_v15 = vpop.f32.mrb[105].mxu0  ;;  %v6761_v38 = vmax.f32 %v6685_v36, 0.0 }
 0x87b   : > { %v6691_v11 = vadd.f32 %v6690_v34, %v6417_v9  ;;  %v6584_v35 = vadd.f32 %v6583_v15, %v6422_v28  ;;  %v6585_v58 = vpop.f32.mrb[106].mxu0  ;;  %7014 = vmatprep.subr.bf16.mxu0 %v6816_v12  ;;  %v6762_v4 = vmax.f32 %v6687_v29, 0.0  ;;  %v6442_v36 = vpop.permute.xlu1 %6441 }
 0x87c   : > { %v6765_v63 = vmax.f32 %v6689_v39, 0.0  ;;  %v6586_v45 = vadd.f32 %v6585_v58, %v6427_v46  ;;  %v6587_v59 = vpop.f32.mrb[107].mxu0  ;;  %7015 = vmatpush1.bf16.msra.mxu0 %v6815_v52  ;;  %v6767_v31 = vmax.f32 %v6582_v21, 0.0 }
 0x87d   : > { %v6766_v22 = vmax.f32 %v6691_v11, 0.0  ;;  %v6588_v16 = vadd.f32 %v6587_v59, %v6427_v46  ;;  %v6768_v10 = vmax.f32 %v6584_v35, 0.0  ;;  %v6447_v11 = vpop.permute.xlu0 %6446 }
 0x87e   : > { %v6817_v20 = vpack.c.bf16 %v6765_v63, %v6761_v38  ;;  %v6771_v18 = vmax.f32 %v6586_v45, 0.0 }
 0x87f   : > { %v6818_v17 = vpack.c.bf16 %v6766_v22, %v6762_v4  ;;  %v6694_v60 = vpop.f32.mrb[104].mxu1  ;;  %v6772_v3 = vmax.f32 %v6588_v16, 0.0 }
 0x880   : > { %v6695_v1 = vadd.f32 %v6694_v60, %v6422_v28  ;;  %v6696_v62 = vpop.f32.mrb[105].mxu1  ;;  %v6819_v24 = vpack.c.bf16 %v6771_v18, %v6767_v31 }
 0x881   : > { %v6697_v53 = vadd.f32 %v6696_v62, %v6422_v28  ;;  %v6698_v8 = vpop.f32.mrb[106].mxu1  ;;  %7135 = vmatprep.subr.bf16.mxu1 %v6818_v17  ;;  %v6820_v40 = vpack.c.bf16 %v6772_v3, %v6768_v10  ;;  %v6591_v56 = vpop.f32.mrb[108].mxu0 }
 0x882   : > { %v6699_v41 = vadd.f32 %v6698_v8, %v6427_v46  ;;  %v6700_v6 = vpop.f32.mrb[107].mxu1  ;;  %7136 = vmatpush1.bf16.msra.mxu1 %v6817_v20  ;;  %v6592_v19 = vadd.f32 %v6591_v56, %v6432_v44  ;;  %v6593_v9 = vpop.f32.mrb[109].mxu0  ;;  %v6769_v27 = vmax.f32 %v6695_v1, 0.0 }
 0x883   : > { %v6701_v54 = vadd.f32 %v6700_v6, %v6427_v46  ;;  %v6594_v25 = vadd.f32 %v6593_v9, %v6432_v44  ;;  %v6595_v2 = vpop.f32.mrb[110].mxu0  ;;  %7016 = vmatprep.subr.bf16.mxu0 %v6820_v40  ;;  %v6770_v50 = vmax.f32 %v6697_v53, 0.0  ;;  %v6452_v1 = vpop.permute.xlu1 %6451 }
 0x884   : > { %v6773_v13 = vmax.f32 %v6699_v41, 0.0  ;;  %v6596_v61 = vadd.f32 %v6595_v2, %v6437_v42  ;;  %v6597_v33 = vpop.f32.mrb[111].mxu0  ;;  %7017 = vmatpush1.bf16.msra.mxu0 %v6819_v24  ;;  %v6775_v23 = vmax.f32 %v6592_v19, 0.0 }
 0x885   : > { %v6774_v5 = vmax.f32 %v6701_v54, 0.0  ;;  %v6598_v47 = vadd.f32 %v6597_v33, %v6437_v42  ;;  %v6776_v0 = vmax.f32 %v6594_v25, 0.0  ;;  %v6457_v54 = vpop.permute.xlu0 %6456 }
 0x886   : > { %v6821_v26 = vpack.c.bf16 %v6773_v13, %v6769_v27  ;;  %v6779_v48 = vmax.f32 %v6596_v61, 0.0 }
 0x887   : > { %v6822_v43 = vpack.c.bf16 %v6774_v5, %v6770_v50  ;;  %v6704_v7 = vpop.f32.mrb[108].mxu1  ;;  %v6780_v28 = vmax.f32 %v6598_v47, 0.0 }
 0x888   : > { %v6705_v49 = vadd.f32 %v6704_v7, %v6432_v44  ;;  %v6706_v52 = vpop.f32.mrb[109].mxu1  ;;  %v6823_v29 = vpack.c.bf16 %v6779_v48, %v6775_v23 }
 0x889   : > { %v6707_v14 = vadd.f32 %v6706_v52, %v6432_v44  ;;  %v6708_v12 = vpop.f32.mrb[110].mxu1  ;;  %7137 = vmatprep.subr.bf16.mxu1 %v6822_v43  ;;  %v6824_v55 = vpack.c.bf16 %v6780_v28, %v6776_v0  ;;  %v6601_v39 = vpop.f32.mrb[112].mxu0 }
 0x88a   : > { %v6709_v34 = vadd.f32 %v6708_v12, %v6437_v42  ;;  %v6710_v21 = vpop.f32.mrb[111].mxu1  ;;  %7138 = vmatpush1.bf16.msra.mxu1 %v6821_v26  ;;  %v6602_v15 = vadd.f32 %v6601_v39, %v6442_v36  ;;  %v6603_v46 = vpop.f32.mrb[113].mxu0  ;;  %v6777_v63 = vmax.f32 %v6705_v49, 0.0 }
 0x88b   : > { %v6711_v35 = vadd.f32 %v6710_v21, %v6437_v42  ;;  %v6604_v58 = vadd.f32 %v6603_v46, %v6442_v36  ;;  %v6605_v38 = vpop.f32.mrb[114].mxu0  ;;  %7018 = vmatprep.subr.bf16.mxu0 %v6824_v55  ;;  %v6778_v22 = vmax.f32 %v6707_v14, 0.0  ;;  %v6462_v49 = vpop.permute.xlu1 %6461 }
 0x88c   : > { %v6781_v45 = vmax.f32 %v6709_v34, 0.0  ;;  %v6606_v59 = vadd.f32 %v6605_v38, %v6447_v11  ;;  %v6607_v4 = vpop.f32.mrb[115].mxu0  ;;  %7019 = vmatpush1.bf16.msra.mxu0 %v6823_v29  ;;  %v6783_v18 = vmax.f32 %v6602_v15, 0.0 }
 0x88d   : > { %v6782_v16 = vmax.f32 %v6711_v35, 0.0  ;;  %v6608_v20 = vadd.f32 %v6607_v4, %v6447_v11  ;;  %v6784_v3 = vmax.f32 %v6604_v58, 0.0  ;;  %v6467_v35 = vpop.permute.xlu0 %6466 }
 0x88e   : > { %v6825_v31 = vpack.c.bf16 %v6781_v45, %v6777_v63  ;;  %v6787_v17 = vmax.f32 %v6606_v59, 0.0 }
 0x88f   : > { %v6826_v60 = vpack.c.bf16 %v6782_v16, %v6778_v22  ;;  %v6714_v10 = vpop.f32.mrb[112].mxu1  ;;  %v6788_v44 = vmax.f32 %v6608_v20, 0.0 }
 0x890   : > { %v6715_v62 = vadd.f32 %v6714_v10, %v6442_v36  ;;  %v6716_v24 = vpop.f32.mrb[113].mxu1  ;;  %v6827_v53 = vpack.c.bf16 %v6787_v17, %v6783_v18 }
 0x891   : > { %v6717_v8 = vadd.f32 %v6716_v24, %v6442_v36  ;;  %v6718_v40 = vpop.f32.mrb[114].mxu1  ;;  %7139 = vmatprep.subr.bf16.mxu1 %v6826_v60  ;;  %v6828_v56 = vpack.c.bf16 %v6788_v44, %v6784_v3  ;;  %v6611_v41 = vpop.f32.mrb[116].mxu0 }
 0x892   : > { %v6719_v6 = vadd.f32 %v6718_v40, %v6447_v11  ;;  %v6720_v19 = vpop.f32.mrb[115].mxu1  ;;  %7140 = vmatpush1.bf16.msra.mxu1 %v6825_v31  ;;  %v6612_v9 = vadd.f32 %v6611_v41, %v6452_v1  ;;  %v6613_v42 = vpop.f32.mrb[117].mxu0  ;;  %v6785_v13 = vmax.f32 %v6715_v62, 0.0 }
 0x893   : > { %v6721_v25 = vadd.f32 %v6720_v19, %v6447_v11  ;;  %v6614_v2 = vadd.f32 %v6613_v42, %v6452_v1  ;;  %v6615_v27 = vpop.f32.mrb[118].mxu0  ;;  %7020 = vmatprep.subr.bf16.mxu0 %v6828_v56  ;;  %v6786_v5 = vmax.f32 %v6717_v8, 0.0 }
 0x894   : > { %v6789_v61 = vmax.f32 %v6719_v6, 0.0  ;;  %v6616_v33 = vadd.f32 %v6615_v27, %v6457_v54  ;;  %v6617_v50 = vpop.f32.mrb[119].mxu0  ;;  %7021 = vmatpush1.bf16.msra.mxu0 %v6827_v53  ;;  %v6791_v48 = vmax.f32 %v6612_v9, 0.0  ;;  %v8053_v9 = vld [vmem:[%s13515_s6] sm:$0xff]  }
 0x895   : > { %v6790_v47 = vmax.f32 %v6721_v25, 0.0  ;;  %v6618_v26 = vadd.f32 %v6617_v50, %v6457_v54  ;;  %v6792_v28 = vmax.f32 %v6614_v2, 0.0  ;;  %v8056_v50 = vld [vmem:[%s13515_s6 + $0x18] sm:$0xff]  }
 0x896   : > { %v6829_v23 = vpack.c.bf16 %v6789_v61, %v6785_v13  ;;  %v6795_v43 = vmax.f32 %v6616_v33, 0.0  ;;  %v8054_v61 = vld [vmem:[%s13515_s6 + $0x8] sm:$0xff]   ;;  %v8055_v33 = vld [vmem:[%s13515_s6 + $0x10] sm:$0xff]  }
 0x897   : > { %v6830_v7 = vpack.c.bf16 %v6790_v47, %v6786_v5  ;;  %v6724_v0 = vpop.f32.mrb[116].mxu1  ;;  %v6796_v36 = vmax.f32 %v6618_v26, 0.0  ;;  %v8057_v5 = vld [vmem:[%s13515_s6 + $0x20] sm:$0xff]   ;;  %v8058_v47 = vld [vmem:[%s13515_s6 + $0x28] sm:$0xff]   ;;  %v8059_v26 = vld [vmem:[%s13515_s6 + $0x30] sm:$0xff]  }
 0x898   : > { %v6725_v52 = vadd.f32 %v6724_v0, %v6452_v1  ;;  %v6726_v29 = vpop.f32.mrb[117].mxu1  ;;  %v6831_v14 = vpack.c.bf16 %v6795_v43, %v6791_v48  ;;  %v8061_v48 = vld [vmem:[%s13515_s6 + $0x40] ss:$0 sps:$4 sm:$0xff]   ;;  %v6876_v43 = vpop.permute.xlu1 %6875 }
 0x899   : > { %v6727_v12 = vadd.f32 %v6726_v29, %v6452_v1  ;;  %v6728_v55 = vpop.f32.mrb[118].mxu1  ;;  %7141 = vmatprep.subr.bf16.mxu1 %v6830_v7  ;;  %v6832_v39 = vpack.c.bf16 %v6796_v36, %v6792_v28  ;;  %v6621_v34 = vpop.f32.mrb[120].mxu0 }
 0x89a   : > { %v6729_v21 = vadd.f32 %v6728_v55, %v6457_v54  ;;  %v6730_v15 = vpop.f32.mrb[119].mxu1  ;;  %7142 = vmatpush1.bf16.msra.mxu1 %v6829_v23  ;;  %v6622_v46 = vadd.f32 %v6621_v34, %v6462_v49  ;;  %v6623_v11 = vpop.f32.mrb[121].mxu0  ;;  %v6793_v45 = vmax.f32 %v6725_v52, 0.0  ;;  %v8060_v23 = vld [vmem:[%s13515_s6 + $0x38] sm:$0xff]  }
 0x89b   : > { %v6731_v58 = vadd.f32 %v6730_v15, %v6457_v54  ;;  %v6624_v38 = vadd.f32 %v6623_v11, %v6462_v49  ;;  %v6625_v63 = vpop.f32.mrb[122].mxu0  ;;  %7022 = vmatprep.subr.bf16.mxu0 %v6832_v39  ;;  %v6794_v16 = vmax.f32 %v6727_v12, 0.0 }
 0x89c   : > { %v6797_v59 = vmax.f32 %v6729_v21, 0.0  ;;  %v6626_v4 = vadd.f32 %v6625_v63, %v6467_v35  ;;  %v6627_v22 = vpop.f32.mrb[123].mxu0  ;;  %7023 = vmatpush1.bf16.msra.mxu0 %v6831_v14  ;;  %v6799_v17 = vmax.f32 %v6622_v46, 0.0  ;;  %v6886_v0 = vpop.permute.xlu1 %6885 }
 0x89d   : > { %v6798_v20 = vmax.f32 %v6731_v58, 0.0  ;;  %v6628_v31 = vadd.f32 %v6627_v22, %v6467_v35  ;;  %v6800_v44 = vmax.f32 %v6624_v38, 0.0 }
 0x89e   : > { %v6833_v18 = vpack.c.bf16 %v6797_v59, %v6793_v45  ;;  %v6803_v60 = vmax.f32 %v6626_v4, 0.0 }
 0x89f   : > { %v6834_v10 = vpack.c.bf16 %v6798_v20, %v6794_v16  ;;  %v6734_v3 = vpop.f32.mrb[120].mxu1  ;;  %v6804_v1 = vmax.f32 %v6628_v31, 0.0 }
 0x8a0   : > { %v6735_v62 = vadd.f32 %v6734_v3, %v6462_v49  ;;  %v6736_v24 = vpop.f32.mrb[121].mxu1  ;;  %v6835_v53 = vpack.c.bf16 %v6803_v60, %v6799_v17  ;;  %v13445_v11 = vpop.permute.xlu1 %6895 }
 0x8a1   : > { %v6737_v8 = vadd.f32 %v6736_v24, %v6462_v49  ;;  %v6738_v40 = vpop.f32.mrb[122].mxu1  ;;  %7143 = vmatprep.subr.bf16.mxu1 %v6834_v10  ;;  %v6836_v56 = vpack.c.bf16 %v6804_v1, %v6800_v44  ;;  %v6881_v49 = vpop.permute.xlu0 %6880 }
 0x8a2   : > { %v6739_v41 = vadd.f32 %v6738_v40, %v6467_v35  ;;  %v6740_v6 = vpop.f32.mrb[123].mxu1  ;;  %7144 = vmatpush1.bf16.msra.mxu1 %v6833_v18  ;;  %v6801_v42 = vmax.f32 %v6735_v62, 0.0 }
 0x8a3   : > { %v6741_v19 = vadd.f32 %v6740_v6, %v6467_v35  ;;  %7024 = vmatprep.subr.bf16.mxu0 %v6836_v56  ;;  %v6802_v25 = vmax.f32 %v6737_v8, 0.0 }
 0x8a4   : > { %v6805_v54 = vmax.f32 %v6739_v41, 0.0  ;;  %7025 = vmatpush1.bf16.msra.mxu0 %v6835_v53 }
 0x8a5   : > { %v6806_v2 = vmax.f32 %v6741_v19, 0.0  ;;  %v6891_v31 = vpop.permute.xlu0 %6890 }
 0x8a6   : > { %v6837_v27 = vpack.c.bf16 %v6805_v54, %v6801_v42  ;;  %v13447_v42 = vpop.permute.xlu1 %6905 }
 0x8a7   : > { %v6838_v13 = vpack.c.bf16 %v6806_v2, %v6802_v25  ;;  %7043 = vmatmul.mubr.bf16.vlgmr.msra.gmra.mrb[124].mxu0 %v8053_v9 }
 0x8a8   : > { %7052 = vmatprep.mubr.bf16.mxu0 %v14356_v37 }
 0x8a9   : > { %7145 = vmatprep.subr.bf16.mxu1 %v6838_v13 }
 0x8aa   : > { %7146 = vmatpush1.bf16.msra.mxu1 %v6837_v27 }
 0x8ad   : > { %7164 = vmatmul.mubr.bf16.vlgmr.msra.gmra.mrb[124].mxu1 %v8053_v9 }
 0x8ae   : > { %7173 = vmatprep.mubr.bf16.mxu1 %v14356_v37 }
 0x8af   : > { %7053 = vmatmul.mubr.bf16.gmra.mrb[128].mxu0 %v8054_v61 }
 0x8b0   : > { %7062 = vmatprep.mubr.bf16.mxu0 %v14356_v37 }
 0x8b5   : > { %7174 = vmatmul.mubr.bf16.gmra.mrb[128].mxu1 %v8054_v61 }
 0x8b6   : > { %7183 = vmatprep.mubr.bf16.mxu1 %v14356_v37 }
 0x8b7   : > { %7063 = vmatmul.mubr.bf16.gmra.mrb[132].mxu0 %v8055_v33 }
 0x8b8   : > { %7072 = vmatprep.mubr.bf16.mxu0 %v14356_v37 }
 0x8bd   : > { %7184 = vmatmul.mubr.bf16.gmra.mrb[132].mxu1 %v8055_v33 }
 0x8be   : > { %7193 = vmatprep.mubr.bf16.mxu1 %v14356_v37 }
 0x8bf   : > { %7073 = vmatmul.mubr.bf16.gmra.mrb[136].mxu0 %v8056_v50 }
 0x8c0   : > { %7082 = vmatprep.mubr.bf16.mxu0 %v14356_v37 }
 0x8c5   : > { %7194 = vmatmul.mubr.bf16.gmra.mrb[136].mxu1 %v8056_v50 }
 0x8c6   : > { %7203 = vmatprep.mubr.bf16.mxu1 %v14356_v37 }
 0x8c7   : > { %7083 = vmatmul.mubr.bf16.gmra.mrb[140].mxu0 %v8057_v5 }
 0x8c8   : > { %7092 = vmatprep.mubr.bf16.mxu0 %v14356_v37 }
 0x8cd   : > { %7204 = vmatmul.mubr.bf16.gmra.mrb[140].mxu1 %v8057_v5 }
 0x8ce   : > { %7213 = vmatprep.mubr.bf16.mxu1 %v14356_v37 }
 0x8cf   : > { %7093 = vmatmul.mubr.bf16.gmra.mrb[144].mxu0 %v8058_v47 }
 0x8d0   : > { %7102 = vmatprep.mubr.bf16.mxu0 %v14356_v37 }
 0x8d5   : > { %7214 = vmatmul.mubr.bf16.gmra.mrb[144].mxu1 %v8058_v47 }
 0x8d6   : > { %7223 = vmatprep.mubr.bf16.mxu1 %v14356_v37 }
 0x8d7   : > { %7103 = vmatmul.mubr.bf16.gmra.mrb[148].mxu0 %v8059_v26 }
 0x8d8   : > { %7112 = vmatprep.mubr.bf16.mxu0 %v14356_v37 }
 0x8dd   : > { %7224 = vmatmul.mubr.bf16.gmra.mrb[148].mxu1 %v8059_v26 }
 0x8de   : > { %7233 = vmatprep.mubr.bf16.mxu1 %v14356_v37 }
 0x8df   : > { %7113 = vmatmul.mubr.bf16.gmra.mrb[152].mxu0 %v8060_v23 }
 0x8e0   : > { %7122 = vmatprep.mubr.bf16.mxu0 %v14356_v37 }
 0x8e5   : > { %7234 = vmatmul.mubr.bf16.gmra.mrb[152].mxu1 %v8060_v23  ;;  %v6901_v23 = vpop.permute.xlu0 %6900 }
 0x8e6   : > { %7243 = vmatprep.mubr.bf16.mxu1 %v14356_v37 }
 0x8e7   : > { %7123 = vmatmul.mubr.bf16.gmra.mrb[156].mxu0 %v8061_v48 }
 0x8e8   : > { %7385 = vmatprep.mubr.bf16.mxu0 %v14356_v37 }
 0x8ed   : > { %7244 = vmatmul.mubr.bf16.gmra.mrb[156].mxu1 %v8061_v48 }
 0x8ee   : > { %7426 = vmatprep.mubr.bf16.mxu1 %v14356_v37 }
 0x97a   : > { %v7044_v7 = vpop.f32.mrb[124].mxu0 }
 0x97b   : > { %v7045_v28 = vadd.f32 %v7044_v7, %v6876_v43  ;;  %v7046_v36 = vpop.f32.mrb[125].mxu0 }
 0x97c   : > { %v7047_v52 = vadd.f32 %v7046_v36, %v6876_v43  ;;  %v7048_v29 = vpop.f32.mrb[126].mxu0 }
 0x97d   : > { %v7049_v14 = vadd.f32 %v7048_v29, %v6881_v49  ;;  %v7050_v12 = vpop.f32.mrb[127].mxu0  ;;  %v7252_v39 = vmax.f32 %v7045_v28, 0.0 }
 0x97e   : > { %v7051_v55 = vadd.f32 %v7050_v12, %v6881_v49  ;;  %v7253_v15 = vmax.f32 %v7047_v52, 0.0 }
 0x97f   : > { %v7256_v34 = vmax.f32 %v7049_v14, 0.0 }
 0x980   : > { %v7165_v21 = vpop.f32.mrb[124].mxu1  ;;  %v7257_v46 = vmax.f32 %v7051_v55, 0.0 }
 0x981   : > { %v7166_v35 = vadd.f32 %v7165_v21, %v6876_v43  ;;  %v7167_v37 = vpop.f32.mrb[125].mxu1  ;;  %v7320_v58 = vpack.c.bf16 %v7256_v34, %v7252_v39 }
 0x982   : > { %v7168_v38 = vadd.f32 %v7167_v37, %v6876_v43  ;;  %v7169_v63 = vpop.f32.mrb[126].mxu1  ;;  %v7321_v45 = vpack.c.bf16 %v7257_v46, %v7253_v15  ;;  %v7054_v59 = vpop.f32.mrb[128].mxu0 }
 0x983   : > { %v7170_v4 = vadd.f32 %v7169_v63, %v6881_v49  ;;  %v7171_v22 = vpop.f32.mrb[127].mxu1  ;;  %v7055_v16 = vadd.f32 %v7054_v59, %v6886_v0  ;;  %v7056_v20 = vpop.f32.mrb[129].mxu0  ;;  %v7254_v10 = vmax.f32 %v7166_v35, 0.0 }
 0x984   : > { %v7172_v18 = vadd.f32 %v7171_v22, %v6881_v49  ;;  %v7057_v17 = vadd.f32 %v7056_v20, %v6886_v0  ;;  %v7058_v60 = vpop.f32.mrb[130].mxu0  ;;  %7353 = vmatprep.subr.bf16.mxu0 %v7321_v45  ;;  %v7255_v62 = vmax.f32 %v7168_v38, 0.0  ;;  %v13451_v35 = vpop.permute.xlu1 %6915 }
 0x985   : > { %v7258_v3 = vmax.f32 %v7170_v4, 0.0  ;;  %v7059_v44 = vadd.f32 %v7058_v60, %v6891_v31  ;;  %v7060_v1 = vpop.f32.mrb[131].mxu0  ;;  %7354 = vmatpush1.bf16.msra.mxu0 %v7320_v58  ;;  %v7260_v40 = vmax.f32 %v7055_v16, 0.0 }
 0x986   : > { %v7259_v24 = vmax.f32 %v7172_v18, 0.0  ;;  %v7061_v53 = vadd.f32 %v7060_v1, %v6891_v31  ;;  %v7261_v19 = vmax.f32 %v7057_v17, 0.0  ;;  %v6911_v18 = vpop.permute.xlu0 %6910 }
 0x987   : > { %v7322_v8 = vpack.c.bf16 %v7258_v3, %v7254_v10  ;;  %v7264_v56 = vmax.f32 %v7059_v44, 0.0 }
 0x988   : > { %v7323_v41 = vpack.c.bf16 %v7259_v24, %v7255_v62  ;;  %v7175_v6 = vpop.f32.mrb[128].mxu1  ;;  %v7265_v9 = vmax.f32 %v7061_v53, 0.0 }
 0x989   : > { %v7176_v54 = vadd.f32 %v7175_v6, %v6886_v0  ;;  %v7177_v25 = vpop.f32.mrb[129].mxu1  ;;  %v7324_v2 = vpack.c.bf16 %v7264_v56, %v7260_v40 }
 0x98a   : > { %v7178_v27 = vadd.f32 %v7177_v25, %v6886_v0  ;;  %v7179_v13 = vpop.f32.mrb[130].mxu1  ;;  %7394 = vmatprep.subr.bf16.mxu1 %v7323_v41  ;;  %v7325_v61 = vpack.c.bf16 %v7265_v9, %v7261_v19  ;;  %v7064_v33 = vpop.f32.mrb[132].mxu0 }
 0x98b   : > { %v7180_v50 = vadd.f32 %v7179_v13, %v6891_v31  ;;  %v7181_v5 = vpop.f32.mrb[131].mxu1  ;;  %7395 = vmatpush1.bf16.msra.mxu1 %v7322_v8  ;;  %v7065_v47 = vadd.f32 %v7064_v33, %v13445_v11  ;;  %v7066_v26 = vpop.f32.mrb[133].mxu0  ;;  %v7262_v28 = vmax.f32 %v7176_v54, 0.0 }
 0x98c   : > { %v7182_v48 = vadd.f32 %v7181_v5, %v6891_v31  ;;  %v7067_v43 = vadd.f32 %v7066_v26, %v13445_v11  ;;  %v7068_v7 = vpop.f32.mrb[134].mxu0  ;;  %7355 = vmatprep.subr.bf16.mxu0 %v7325_v61  ;;  %v7263_v52 = vmax.f32 %v7178_v27, 0.0  ;;  %v13457_v54 = vpop.permute.xlu1 %6925 }
 0x98d   : > { %v7266_v36 = vmax.f32 %v7180_v50, 0.0  ;;  %v7069_v49 = vadd.f32 %v7068_v7, %v6901_v23  ;;  %v7070_v0 = vpop.f32.mrb[135].mxu0  ;;  %7356 = vmatpush1.bf16.msra.mxu0 %v7324_v2  ;;  %v7268_v55 = vmax.f32 %v7065_v47, 0.0 }
 0x98e   : > { %v7267_v29 = vmax.f32 %v7182_v48, 0.0  ;;  %v7071_v14 = vadd.f32 %v7070_v0, %v6901_v23  ;;  %v7269_v15 = vmax.f32 %v7067_v43, 0.0  ;;  %v6921_v48 = vpop.permute.xlu0 %6920 }
 0x98f   : > { %v7326_v12 = vpack.c.bf16 %v7266_v36, %v7262_v28  ;;  %v7272_v39 = vmax.f32 %v7069_v49, 0.0 }
 0x990   : > { %v7327_v34 = vpack.c.bf16 %v7267_v29, %v7263_v52  ;;  %v7185_v21 = vpop.f32.mrb[132].mxu1  ;;  %v7273_v46 = vmax.f32 %v7071_v14, 0.0 }
 0x991   : > { %v7186_v37 = vadd.f32 %v7185_v21, %v13445_v11  ;;  %v7187_v58 = vpop.f32.mrb[133].mxu1  ;;  %v7328_v38 = vpack.c.bf16 %v7272_v39, %v7268_v55 }
 0x992   : > { %v7188_v63 = vadd.f32 %v7187_v58, %v13445_v11  ;;  %v7189_v45 = vpop.f32.mrb[134].mxu1  ;;  %7396 = vmatprep.subr.bf16.mxu1 %v7327_v34  ;;  %v7329_v59 = vpack.c.bf16 %v7273_v46, %v7269_v15  ;;  %v7074_v4 = vpop.f32.mrb[136].mxu0 }
 0x993   : > { %v7190_v22 = vadd.f32 %v7189_v45, %v6901_v23  ;;  %v7191_v16 = vpop.f32.mrb[135].mxu1  ;;  %7397 = vmatpush1.bf16.msra.mxu1 %v7326_v12  ;;  %v7075_v20 = vadd.f32 %v7074_v4, %v13447_v42  ;;  %v7076_v31 = vpop.f32.mrb[137].mxu0  ;;  %v7270_v3 = vmax.f32 %v7186_v37, 0.0 }
 0x994   : > { %v7192_v17 = vadd.f32 %v7191_v16, %v6901_v23  ;;  %v7077_v60 = vadd.f32 %v7076_v31, %v13447_v42  ;;  %v7078_v10 = vpop.f32.mrb[138].mxu0  ;;  %7357 = vmatprep.subr.bf16.mxu0 %v7329_v59  ;;  %v7271_v62 = vmax.f32 %v7188_v63, 0.0  ;;  %v13463_v37 = vpop.permute.xlu1 %6935 }
 0x995   : > { %v7274_v44 = vmax.f32 %v7190_v22, 0.0  ;;  %v7079_v1 = vadd.f32 %v7078_v10, %v6911_v18  ;;  %v7080_v11 = vpop.f32.mrb[139].mxu0  ;;  %7358 = vmatpush1.bf16.msra.mxu0 %v7328_v38  ;;  %v7276_v40 = vmax.f32 %v7075_v20, 0.0 }
 0x996   : > { %v7275_v24 = vmax.f32 %v7192_v17, 0.0  ;;  %v7081_v53 = vadd.f32 %v7080_v11, %v6911_v18  ;;  %v7277_v19 = vmax.f32 %v7077_v60, 0.0  ;;  %v6931_v17 = vpop.permute.xlu0 %6930 }
 0x997   : > { %v7330_v8 = vpack.c.bf16 %v7274_v44, %v7270_v3  ;;  %v7280_v56 = vmax.f32 %v7079_v1, 0.0 }
 0x998   : > { %v7331_v41 = vpack.c.bf16 %v7275_v24, %v7271_v62  ;;  %v7195_v6 = vpop.f32.mrb[136].mxu1  ;;  %v7281_v9 = vmax.f32 %v7081_v53, 0.0 }
 0x999   : > { %v7196_v25 = vadd.f32 %v7195_v6, %v13447_v42  ;;  %v7197_v2 = vpop.f32.mrb[137].mxu1  ;;  %v7332_v27 = vpack.c.bf16 %v7280_v56, %v7276_v40 }
 0x99a   : > { %v7198_v13 = vadd.f32 %v7197_v2, %v13447_v42  ;;  %v7199_v61 = vpop.f32.mrb[138].mxu1  ;;  %7398 = vmatprep.subr.bf16.mxu1 %v7331_v41  ;;  %v7333_v33 = vpack.c.bf16 %v7281_v9, %v7277_v19  ;;  %v7084_v50 = vpop.f32.mrb[140].mxu0 }
 0x99b   : > { %v7200_v5 = vadd.f32 %v7199_v61, %v6911_v18  ;;  %v7201_v47 = vpop.f32.mrb[139].mxu1  ;;  %7399 = vmatpush1.bf16.msra.mxu1 %v7330_v8  ;;  %v7085_v26 = vadd.f32 %v7084_v50, %v13451_v35  ;;  %v7086_v23 = vpop.f32.mrb[141].mxu0  ;;  %v7278_v36 = vmax.f32 %v7196_v25, 0.0 }
 0x99c   : > { %v7202_v43 = vadd.f32 %v7201_v47, %v6911_v18  ;;  %v7087_v7 = vadd.f32 %v7086_v23, %v13451_v35  ;;  %v7088_v28 = vpop.f32.mrb[142].mxu0  ;;  %7359 = vmatprep.subr.bf16.mxu0 %v7333_v33  ;;  %v7279_v52 = vmax.f32 %v7198_v13, 0.0  ;;  %v13469_v25 = vpop.permute.xlu1 %6945 }
 0x99d   : > { %v7282_v49 = vmax.f32 %v7200_v5, 0.0  ;;  %v7089_v0 = vadd.f32 %v7088_v28, %v6921_v48  ;;  %v7090_v42 = vpop.f32.mrb[143].mxu0  ;;  %7360 = vmatpush1.bf16.msra.mxu0 %v7332_v27  ;;  %v7284_v55 = vmax.f32 %v7085_v26, 0.0 }
 0x99e   : > { %v7283_v29 = vmax.f32 %v7202_v43, 0.0  ;;  %v7091_v14 = vadd.f32 %v7090_v42, %v6921_v48  ;;  %v7285_v15 = vmax.f32 %v7087_v7, 0.0  ;;  %v6941_v43 = vpop.permute.xlu0 %6940 }
 0x99f   : > { %v7334_v12 = vpack.c.bf16 %v7282_v49, %v7278_v36  ;;  %v7288_v39 = vmax.f32 %v7089_v0, 0.0 }
 0x9a0   : > { %v7335_v34 = vpack.c.bf16 %v7283_v29, %v7279_v52  ;;  %v7205_v21 = vpop.f32.mrb[140].mxu1  ;;  %v7289_v46 = vmax.f32 %v7091_v14, 0.0 }
 0x9a1   : > { %v7206_v58 = vadd.f32 %v7205_v21, %v13451_v35  ;;  %v7207_v38 = vpop.f32.mrb[141].mxu1  ;;  %v7336_v63 = vpack.c.bf16 %v7288_v39, %v7284_v55 }
 0x9a2   : > { %v7208_v45 = vadd.f32 %v7207_v38, %v13451_v35  ;;  %v7209_v59 = vpop.f32.mrb[142].mxu1  ;;  %7400 = vmatprep.subr.bf16.mxu1 %v7335_v34  ;;  %v7337_v4 = vpack.c.bf16 %v7289_v46, %v7285_v15  ;;  %v7094_v22 = vpop.f32.mrb[144].mxu0 }
 0x9a3   : > { %v7210_v16 = vadd.f32 %v7209_v59, %v6921_v48  ;;  %v7211_v20 = vpop.f32.mrb[143].mxu1  ;;  %7401 = vmatpush1.bf16.msra.mxu1 %v7334_v12  ;;  %v7095_v31 = vadd.f32 %v7094_v22, %v13457_v54  ;;  %v7096_v18 = vpop.f32.mrb[145].mxu0  ;;  %v7286_v44 = vmax.f32 %v7206_v58, 0.0 }
 0x9a4   : > { %v7212_v60 = vadd.f32 %v7211_v20, %v6921_v48  ;;  %v7097_v10 = vadd.f32 %v7096_v18, %v13457_v54  ;;  %v7098_v3 = vpop.f32.mrb[146].mxu0  ;;  %7361 = vmatprep.subr.bf16.mxu0 %v7337_v4  ;;  %v7287_v62 = vmax.f32 %v7208_v45, 0.0  ;;  %v13475_v58 = vpop.permute.xlu1 %5463 }
 0x9a5   : > { %v7290_v1 = vmax.f32 %v7210_v16, 0.0  ;;  %v7099_v11 = vadd.f32 %v7098_v3, %v6931_v17  ;;  %v7100_v35 = vpop.f32.mrb[147].mxu0  ;;  %7362 = vmatpush1.bf16.msra.mxu0 %v7336_v63  ;;  %v7292_v40 = vmax.f32 %v7095_v31, 0.0 }
 0x9a6   : > { %v7291_v24 = vmax.f32 %v7212_v60, 0.0  ;;  %v7101_v53 = vadd.f32 %v7100_v35, %v6931_v17  ;;  %v7293_v19 = vmax.f32 %v7097_v10, 0.0  ;;  %v6951_v60 = vpop.permute.xlu0 %6950 }
 0x9a7   : > { %v7338_v8 = vpack.c.bf16 %v7290_v1, %v7286_v44  ;;  %v7296_v56 = vmax.f32 %v7099_v11, 0.0 }
 0x9a8   : > { %v7339_v41 = vpack.c.bf16 %v7291_v24, %v7287_v62  ;;  %v7215_v6 = vpop.f32.mrb[144].mxu1  ;;  %v7297_v9 = vmax.f32 %v7101_v53, 0.0 }
 0x9a9   : > { %v7216_v2 = vadd.f32 %v7215_v6, %v13457_v54  ;;  %v7217_v27 = vpop.f32.mrb[145].mxu1  ;;  %v7340_v13 = vpack.c.bf16 %v7296_v56, %v7292_v40 }
 0x9aa   : > { %v7218_v61 = vadd.f32 %v7217_v27, %v13457_v54  ;;  %v7219_v33 = vpop.f32.mrb[146].mxu1  ;;  %7402 = vmatprep.subr.bf16.mxu1 %v7339_v41  ;;  %v7341_v50 = vpack.c.bf16 %v7297_v9, %v7293_v19  ;;  %v7104_v5 = vpop.f32.mrb[148].mxu0 }
 0x9ab   : > { %v7220_v47 = vadd.f32 %v7219_v33, %v6931_v17  ;;  %v7221_v26 = vpop.f32.mrb[147].mxu1  ;;  %7403 = vmatpush1.bf16.msra.mxu1 %v7338_v8  ;;  %v7105_v23 = vadd.f32 %v7104_v5, %v13463_v37  ;;  %v7106_v48 = vpop.f32.mrb[149].mxu0  ;;  %v7294_v49 = vmax.f32 %v7216_v2, 0.0  ;;  %v7482_v2 = vlaneseq }
 0x9ac   : > { %v7222_v7 = vadd.f32 %v7221_v26, %v6931_v17  ;;  %v7107_v28 = vadd.f32 %v7106_v48, %v13463_v37  ;;  %v7108_v36 = vpop.f32.mrb[150].mxu0  ;;  %7363 = vmatprep.subr.bf16.mxu0 %v7341_v50  ;;  %v7295_v52 = vmax.f32 %v7218_v61, 0.0  ;;  %v6956_v27 = vpop.permute.xlu1 %6955 }
 0x9ad   : > { %v7298_v0 = vmax.f32 %v7220_v47, 0.0  ;;  %v7109_v42 = vadd.f32 %v7108_v36, %v6941_v43  ;;  %v7110_v54 = vpop.f32.mrb[151].mxu0  ;;  %7364 = vmatpush1.bf16.msra.mxu0 %v7340_v13  ;;  %v7300_v55 = vmax.f32 %v7105_v23, 0.0  ;;  %v8270_v23 = vmov 1966171168  }
 0x9ae   : > { %v7299_v29 = vmax.f32 %v7222_v7, 0.0  ;;  %v7111_v14 = vadd.f32 %v7110_v54, %v6941_v43  ;;  %v7301_v15 = vmax.f32 %v7107_v28, 0.0  ;;  %v7480_v48 = vunpack.c.l.s4 %v8270_v23 }
 0x9af   : > { %v7342_v12 = vpack.c.bf16 %v7298_v0, %v7294_v49  ;;  %v7304_v39 = vmax.f32 %v7109_v42, 0.0  ;;  %v7483_v42 = vshrl.u32 %v7482_v2, 7  ;;  %vm7504_vm1 = vcmp.lt.s32.totalorder %v7482_v2, 512 }
 0x9b0   : > { %v7343_v34 = vpack.c.bf16 %v7299_v29, %v7295_v52  ;;  %v7225_v21 = vpop.f32.mrb[148].mxu1  ;;  %v7305_v46 = vmax.f32 %v7111_v14, 0.0  ;;  %v7352_v14 = vld [vmem:[%s13516_s7] sm:$0xf] }
 0x9b1   : > { %v7226_v38 = vadd.f32 %v7225_v21, %v13463_v37  ;;  %v7227_v63 = vpop.f32.mrb[149].mxu1  ;;  %v7344_v45 = vpack.c.bf16 %v7304_v39, %v7300_v55  ;;  %v7481_v21 = vunpack.c.0.s8 %v7480_v48 }
 0x9b2   : > { %v7228_v59 = vadd.f32 %v7227_v63, %v13463_v37  ;;  %v7229_v4 = vpop.f32.mrb[150].mxu1  ;;  %7404 = vmatprep.subr.bf16.mxu1 %v7343_v34  ;;  %v7345_v22 = vpack.c.bf16 %v7305_v46, %v7301_v15  ;;  %v7114_v16 = vpop.f32.mrb[152].mxu0 }
 0x9b3   : > { %v7230_v20 = vadd.f32 %v7229_v4, %v6941_v43  ;;  %v7231_v31 = vpop.f32.mrb[151].mxu1  ;;  %7405 = vmatpush1.bf16.msra.mxu1 %v7342_v12  ;;  %v7115_v18 = vadd.f32 %v7114_v16, %v13469_v25  ;;  %v7116_v17 = vpop.f32.mrb[153].mxu0  ;;  %v7302_v1 = vmax.f32 %v7226_v38, 0.0  ;;  %v13487_v4 = vsub.s32 %v7481_v21, %v7483_v42 }
 0x9b4   : > { %v7232_v10 = vadd.f32 %v7231_v31, %v6941_v43  ;;  %v7117_v3 = vadd.f32 %v7116_v17, %v13469_v25  ;;  %v7118_v44 = vpop.f32.mrb[154].mxu0  ;;  %7365 = vmatprep.subr.bf16.mxu0 %v7345_v22  ;;  %v7303_v62 = vmax.f32 %v7228_v59, 0.0 }
 0x9b5   : > { %v7306_v11 = vmax.f32 %v7230_v20, 0.0  ;;  %v7119_v35 = vadd.f32 %v7118_v44, %v6951_v60  ;;  %v7120_v37 = vpop.f32.mrb[155].mxu0  ;;  %7366 = vmatpush1.bf16.msra.mxu0 %v7344_v45  ;;  %v7308_v40 = vmax.f32 %v7115_v18, 0.0  ;;  %v5652_v44 = vadd.f32 %v13312_v57, %v13475_v58 }
 0x9b6   : > { %v7307_v24 = vmax.f32 %v7232_v10, 0.0  ;;  %v7121_v53 = vadd.f32 %v7120_v37, %v6951_v60  ;;  %v7309_v19 = vmax.f32 %v7117_v3, 0.0 }
 0x9b7   : > { %v7346_v8 = vpack.c.bf16 %v7306_v11, %v7302_v1  ;;  %v7312_v56 = vmax.f32 %v7119_v35, 0.0  ;;  %v5654_v1 = vadd.f32 %v13314_v32, %v13475_v58 }
 0x9b8   : > { %v7347_v41 = vpack.c.bf16 %v7307_v24, %v7303_v62  ;;  %v7235_v6 = vpop.f32.mrb[152].mxu1  ;;  %v7313_v9 = vmax.f32 %v7121_v53, 0.0  ;;  %v7439_v62 = vpop.permute.xlu0 %7438 }
 0x9b9   : > { %v7236_v13 = vadd.f32 %v7235_v6, %v13469_v25  ;;  %v7237_v61 = vpop.f32.mrb[153].mxu1  ;;  %v7348_v33 = vpack.c.bf16 %v7312_v56, %v7308_v40 }
 0x9ba   : > { %v7238_v50 = vadd.f32 %v7237_v61, %v13469_v25  ;;  %v7239_v5 = vpop.f32.mrb[154].mxu1  ;;  %7406 = vmatprep.subr.bf16.mxu1 %v7347_v41  ;;  %v7349_v47 = vpack.c.bf16 %v7313_v9, %v7309_v19  ;;  %v7124_v26 = vpop.f32.mrb[156].mxu0  ;;  %v5773_v41 = vadd.f32 %v13319_v30, %v13475_v58  ;;  %v5775_v19 = vadd.f32 %v13321_v51, %v13475_v58 }
 0x9bb   : > { %v7240_v43 = vadd.f32 %v7239_v5, %v6951_v60  ;;  %v7241_v7 = vpop.f32.mrb[155].mxu1  ;;  %7407 = vmatpush1.bf16.msra.mxu1 %v7346_v8  ;;  %v7125_v28 = vadd.f32 %v7124_v26, %v6956_v27  ;;  %v7126_v36 = vpop.f32.mrb[157].mxu0  ;;  %v7310_v52 = vmax.f32 %v7236_v13, 0.0 }
 0x9bc   : > { %v7242_v49 = vadd.f32 %v7241_v7, %v6951_v60  ;;  %v7127_v0 = vadd.f32 %v7126_v36, %v6956_v27  ;;  %7367 = vmatprep.subr.bf16.mxu0 %v7349_v47  ;;  %v7128_v54 = vpop.f32.mrb[158].mxu0  ;;  %v7311_v55 = vmax.f32 %v7238_v50, 0.0 }
 0x9bd   : > { %v7314_v29 = vmax.f32 %v7240_v43, 0.0  ;;  %v7316_v25 = vmax.f32 %v7125_v28, 0.0  ;;  %7368 = vmatpush1.bf16.msra.mxu0 %v7348_v33  ;;  %v7129_v12 = vpop.f32.mrb[159].mxu0 }
 0x9be   : > { %v7315_v39 = vmax.f32 %v7242_v49, 0.0  ;;  %v7317_v34 = vmax.f32 %v7127_v0, 0.0 }
 0x9bf   : > { %v7350_v15 = vpack.c.bf16 %v7314_v29, %v7310_v52 }
 0x9c0   : > { %v7351_v46 = vpack.c.bf16 %v7315_v39, %v7311_v55  ;;  %v7245_v38 = vpop.f32.mrb[156].mxu1  ;;  %v7477_v63 = vcombine.low %v7316_v25, %v7317_v34  ;;  %7386 = vmatmul.mubr.bf16.vlgmr.msra.gmra.mrb[160].mxu0 %v7352_v14 }
 0x9c1   : > { %v7246_v45 = vadd.f32 %v7245_v38, %v6956_v27  ;;  %v7247_v59 = vpop.f32.mrb[157].mxu1 }
 0x9c2   : > { %v7248_v22 = vadd.f32 %v7247_v59, %v6956_v27  ;;  %7408 = vmatprep.subr.bf16.mxu1 %v7351_v46  ;;  %v7249_v16 = vpop.f32.mrb[158].mxu1  ;;  %v7485_v17 = vrot.slane %v7477_v63, %v13487_v4 }
 0x9c3   : > { %v7318_v20 = vmax.f32 %v7246_v45, 0.0  ;;  %7409 = vmatpush1.bf16.msra.mxu1 %v7350_v15  ;;  %v7250_v31 = vpop.f32.mrb[159].mxu1 }
 0x9c4   : > { %v7319_v18 = vmax.f32 %v7248_v22, 0.0 }
 0x9c6   : > { %v7478_v60 = vcombine.low %v7318_v20, %v7319_v18  ;;  %7427 = vmatmul.mubr.bf16.vlgmr.msra.gmra.mrb[160].mxu1 %v7352_v14 }
 0x9c8   : > { %v7492_v10 = vrot.slane %v7478_v60, %v13487_v4 }
 0x9ca   : > { %v7493_v3 = vcombine.low %v7485_v17, %v7492_v10 }
 0x9cc   : > { %v7500_v54 = vrot.slane %v7493_v3, %v13487_v4 }
 0xa93   : > { %v7387_v11 = vpop.f32.mrb[160].mxu0 }
 0xa94   : > { %v7388_v35 = vadd.f32 %v7387_v11, %v5652_v44  ;;  %v7389_v37 = vpop.f32.mrb[161].mxu0 }
 0xa95   : > { %v7390_v24 = vadd.f32 %v7389_v37, %v5654_v1  ;;  %v7391_v53 = vpop.f32.mrb[162].mxu0 }
 0xa96   : > { %v7441_v8 = vadd.f32 %v7439_v62, %v7388_v35  ;;  %v7392_v40 = vpop.f32.mrb[163].mxu0 }
 0xa97   : > { %v7442_v56 = vadd.f32 %v7439_v62, %v7390_v24 }
 0xa98   : > { %v7826_v6 = vmul.f32 -1.442695, %v7441_v8 }
 0xa99   : > { %v7428_v57 = vpop.f32.mrb[160].mxu1  ;;  %v7827_v9 = vmul.f32 -1.442695, %v7442_v56 }
 0xa9a   : > { %8238 = vpow2.f32 %v7826_v6  ;;  %v7429_v32 = vadd.f32 %v7428_v57, %v5773_v41  ;;  %v7430_v27 = vpop.f32.mrb[161].mxu1 }
 0xa9b   : > { %8240 = vpow2.f32 %v7827_v9  ;;  %v7431_v13 = vadd.f32 %v7430_v27, %v5775_v19  ;;  %v7432_v61 = vpop.f32.mrb[162].mxu1 }
 0xa9c   : > { %v7443_v33 = vadd.f32 %v7439_v62, %v7429_v32  ;;  %v7433_v50 = vpop.f32.mrb[163].mxu1 }
 0xa9d   : > { %v7444_v5 = vadd.f32 %v7439_v62, %v7431_v13 }
 0xa9e   : > { %v7828_v47 = vmul.f32 -1.442695, %v7443_v33 }
 0xa9f   : > { %v7829_v26 = vmul.f32 -1.442695, %v7444_v5 }
 0xaa0   : > { %8242 = vpow2.f32 %v7828_v47 }
 0xaa1   : > { %8244 = vpow2.f32 %v7829_v26 }
 0xaa4   : > { %v8239_v30 = vpop.eup %8238 }
 0xaa5   : > { %v8241_v23 = vpop.eup %8240  ;;  %v7457_v48 = vadd.f32 1.0, %v8239_v30 }
 0xaa6   : > { %v7458_v51 = vadd.f32 1.0, %v8241_v23 }
 0xaa7   : > { %8246 = vrcp.f32 %v7457_v48 }
 0xaa8   : > { %8248 = vrcp.f32 %v7458_v51 }
 0xaaa   : > { %v8243_v58 = vpop.eup %8242 }
 0xaab   : > { %v8245_v43 = vpop.eup %8244  ;;  %v7459_v7 = vadd.f32 1.0, %v8243_v58 }
 0xaac   : > { %v7460_v28 = vadd.f32 1.0, %v8245_v43 }
 0xaad   : > { %8250 = vrcp.f32 %v7459_v7 }
 0xaae   : > { %8252 = vrcp.f32 %v7460_v28 }
 0xab1   : > { %v8247_v36 = vpop.eup %8246 }
 0xab2   : > { %v8249_v49 = vpop.eup %8248  ;;  %7469 = vst [vmem:[%s307_s17] sm:$0xff] %v8247_v36 }
 0xab3   : > { %7470 = vst [vmem:[%s307_s17 + $0x8] sm:$0xff] %v8249_v49 }
 0xab7   : > { %v8251_v0 = vpop.eup %8250 }
 0xab8   : > { %v8253_v42 = vpop.eup %8252  ;;  %7471 = vst [vmem:[%s307_s17 + $0x10] sm:$0xff] %v8251_v0 }
 0xab9   : > { %7472 = vst [vmem:[%s307_s17 + $0x18] sm:$0xff] %v8253_v42 }
 0xaba   : > { %7830 = vst.msk [vmem:[%s307_s17 + $0x3] ss:$8 sm:$0xf] %vm7504_vm1, %v7500_v54 }
 0xabb PF: > { %s18_s27 = sadd.s32 1, %s8260_s27  }
 0xabc   : > { %p15_p4 = scmp.ge.s32.totalorder %s18_s27, 4  }
 0xabe   :  { %17 = sbr.rel (!%p15_p4) target bundleno = 1 (0x1), region = 83 }

</bundles_post_ra>
